<compile_context>
chip_gen: v7x
topology: tpu7x:2x2x1
jax: 0.10.0
libtpu: 0.0.40
codegen_flags: <defaults>
</compile_context>

<pallas_src>
import functools

import jax
import jax.numpy as jnp
import numpy as np
from jax.experimental import pallas as pl
from jax.experimental.pallas import tpu as pltpu


# ---------------------------------------------------------------------------
# Fused kernel: head (7x7 conv + InstanceNorm + ReLU) + n_blocks RDBs, one image
# per grid step.  All activations live in VMEM in the lane-dense (C, H*W) layout.
# Scratch:
#   patch_ref : (9*cin_max, H*W) bf16 im2col buffer (reused by every 3x3 conv)
#   feat_ref  : (n_feats + n_dense*growth, H*W) bf16 dense-concat accumulator
# ---------------------------------------------------------------------------
def _make_edge_kernel(H, W, n_feats, growth, n_dense, n_blocks, k_head, eps=1e-5):
    HW = H * W
    taps3 = [(dy, dx) for dy in range(3) for dx in range(3)]

    def kernel(hp_ref, m_ref, w_ref, b_ref, o_ref, patch_ref, feat_ref):

        def conv_mm(p, widx, k, cout):
            """(cout,k) bf16 @ (k,HW) bf16 -> (cout,HW) f32, plus bias (cout,1)."""
            w = w_ref[widx, :cout, :k]
            b = b_ref[widx, :cout, :]
            return jnp.dot(w, p, preferred_element_type=jnp.float32) + b

        # ---- Head: 7x7 conv (reflect pad + im2col done lane-dense in the wrapper),
        #      InstanceNorm2d (affine=False, biased var, fused one-pass stats), ReLU.
        acc = conv_mm(hp_ref[0], 0, k_head, n_feats)               # (n_feats, HW) f32
        mean = jnp.sum(acc, axis=1, keepdims=True) * (1.0 / HW)
        ex2 = jnp.sum(acc * acc, axis=1, keepdims=True) * (1.0 / HW)
        var = jnp.maximum(ex2 - mean * mean, 0.0)                  # clamp >= 0
        x2d = jnp.maximum((acc - mean) * jax.lax.rsqrt(var + eps), 0.0)

        # ---- Body: n_blocks residual dense blocks; trunk x2d stays f32.
        widx = 1
        for _ in range(n_blocks):
            feat_ref[0:n_feats, :] = x2d.astype(jnp.bfloat16)
            cin = n_feats
            for _ in range(n_dense):
                f = feat_ref[0:cin, :]                             # (cin, HW) bf16
                # Doubled copy once per layer: every tap is then a cheap static
                # lane-slice fd[:, s:s+HW] with exact semantics f[(o + d) % HW].
                fd = jnp.concatenate([f, f], axis=1)               # (cin, 2*HW)
                for t, (dy, dx) in enumerate(taps3):
                    d = (dy - 1) * W + (dx - 1)
                    s = d % HW
                    # zero-padding of the 3x3 conv == boundary mask (precomputed)
                    patch_ref[t * cin:(t + 1) * cin, :] = (
                        fd[:, s:s + HW] * m_ref[t:t + 1, :])
                y = conv_mm(patch_ref[0:9 * cin, :], widx, 9 * cin, growth)
                y = jnp.maximum(y, 0.0)
                feat_ref[cin:cin + growth, :] = y.astype(jnp.bfloat16)
                cin += growth
                widx += 1
            # 1x1 local-feature-fusion conv + residual add (no ReLU).
            x2d = x2d + conv_mm(feat_ref[0:cin, :], widx, cin, n_feats)
            widx += 1

        # Lane-dense (n_feats, H*W) writeback -> already NCHW after a free reshape.
        o_ref[0] = x2d.astype(o_ref.dtype)

    return kernel


# ---------------------------------------------------------------------------
# Wrapper: reflect pad + head im2col (layout plumbing), one pallas_call, free reshape.
# ---------------------------------------------------------------------------
def edge_detect_forward(x_nchw, w_stack, b_stack, *, n_feats, growth, n_dense, n_blocks):
    N, cin_img, H, W = x_nchw.shape
    HW = H * W
    n_convs, cout_max, k_max = w_stack.shape
    KH = 7
    k_head = KH * KH * cin_img
    c_feat = n_feats + n_dense * growth
    k_body_max = 9 * (n_feats + (n_dense - 1) * growth)

    # Head: ReflectionPad2d(3) + im2col to a lane-dense (K_head, H*W) bf16 slab.
    xpad = jnp.pad(x_nchw, ((0, 0), (0, 0), (3, 3), (3, 3)), mode="reflect")
    head_patch = jnp.concatenate(
        [xpad[:, :, dy:dy + H, dx:dx + W].reshape(N, cin_img, HW)
         for dy in range(KH) for dx in range(KH)], axis=1).astype(jnp.bfloat16)

    # Precomputed 3x3 boundary masks (1 inside, 0 where the padded tap would be read).
    o = np.arange(HW)
    row, col = o // W, o % W
    masks = np.stack(
        [((row + dy - 1 >= 0) & (row + dy - 1 < H) &
          (col + dx - 1 >= 0) & (col + dx - 1 < W)).astype(np.float32)
         for dy in range(3) for dx in range(3)])
    tap_masks = jnp.asarray(masks, dtype=jnp.bfloat16)            # (9, HW)

    kernel = _make_edge_kernel(H, W, n_feats, growth, n_dense, n_blocks, k_head)
    out = pl.pallas_call(
        kernel,
        out_shape=jax.ShapeDtypeStruct((N, n_feats, HW), jnp.float32),
        grid=(N,),
        in_specs=[
            pl.BlockSpec((1, k_head, HW), lambda n: (n, 0, 0)),
            pl.BlockSpec((9, HW), lambda n: (0, 0)),
            pl.BlockSpec((n_convs, cout_max, k_max), lambda n: (0, 0, 0)),
            pl.BlockSpec((n_convs, cout_max, 1), lambda n: (0, 0, 0)),
        ],
        out_specs=pl.BlockSpec((1, n_feats, HW), lambda n: (n, 0, 0)),
        scratch_shapes=[
            pltpu.VMEM((k_body_max, HW), jnp.bfloat16),   # im2col patch (bf16)
            pltpu.VMEM((c_feat, HW), jnp.bfloat16),       # dense-concat accumulator
        ],
        compiler_params=pltpu.CompilerParams(dimension_semantics=("parallel",)),
    )(head_patch, tap_masks, w_stack, b_stack)
    return out.reshape(N, n_feats, H, W)                          # metadata-only


# ---------------------------------------------------------------------------
# Parameter construction + packing (deterministic synthetic weights).
# ---------------------------------------------------------------------------
def init_params(key, n_feats=8, growth=8, n_dense=3, n_blocks=3):
    """Convs in call order: head 7x7, then per RDB its n_dense 3x3 convs and the 1x1
    LFF. Each entry: (w (KH,KW,Cin,Cout) HWIO, b (Cout,))."""
    def conv_p(k, kh, kw, cin, cout):
        kw_key, kb_key = jax.random.split(k)
        w = jax.random.normal(kw_key, (kh, kw, cin, cout), jnp.float32) / jnp.sqrt(
            float(kh * kw * cin))
        b = 0.01 * jax.random.normal(kb_key, (cout,), jnp.float32)
        return w, b

    n_keys = 1 + n_blocks * (n_dense + 1)
    keys = list(jax.random.split(key, n_keys))
    convs = [conv_p(keys.pop(0), 7, 7, 3, n_feats)]
    for _ in range(n_blocks):
        cin = n_feats
        for _ in range(n_dense):
            convs.append(conv_p(keys.pop(0), 3, 3, cin, growth))
            cin += growth
        convs.append(conv_p(keys.pop(0), 1, 1, cin, n_feats))
    return convs


def pack_params(convs):
    """Flatten each weight to (KH*KW*Cin, Cout) in (dy, dx, cin) order (matching the
    kernel/wrapper im2col order), transpose to the lane-dense (Cout, K) orientation,
    zero-pad to a common (Cout_max, K_max), stack, cast the weight stack to bf16."""
    k_max = max(w.shape[0] * w.shape[1] * w.shape[2] for w, _ in convs)
    cout_max = max(w.shape[3] for w, _ in convs)
    w_stack = jnp.zeros((len(convs), cout_max, k_max), jnp.float32)
    b_stack = jnp.zeros((len(convs), cout_max, 1), jnp.float32)
    for i, (w, b) in enumerate(convs):
        K, cout = w.shape[0] * w.shape[1] * w.shape[2], w.shape[3]
        w_stack = w_stack.at[i, :cout, :K].set(w.reshape(K, cout).T)
        b_stack = b_stack.at[i, :cout, 0].set(b)
    return w_stack.astype(jnp.bfloat16), b_stack


if __name__ == "__main__":
    # n_feats defaults to 64 in the module; use 8 here for a small, fast smoke test.
    N_FEATS, GROWTH, N_DENSE, N_BLOCKS = 8, 8, 3, 3
    key = jax.random.PRNGKey(0)
    k_x, k_p = jax.random.split(key)

    x = jax.random.normal(k_x, (2, 3, 16, 16), jnp.float32)       # NCHW RGB input
    convs = init_params(k_p, n_feats=N_FEATS, growth=GROWTH,
                        n_dense=N_DENSE, n_blocks=N_BLOCKS)
    w_stack, b_stack = pack_params(convs)

    fwd = jax.jit(functools.partial(edge_detect_forward, n_feats=N_FEATS, growth=GROWTH,
                                    n_dense=N_DENSE, n_blocks=N_BLOCKS))
    out = fwd(x, w_stack, b_stack)
    jax.block_until_ready(out)

    assert out.shape == (2, N_FEATS, 16, 16), out.shape
    assert bool(jnp.all(jnp.isfinite(out)))
    print("KERNEL_OK")
</pallas_src>

<mosaic_0001>
module attributes {stable_mosaic.version = 11 : i64} {
  func.func @kernel(%arg0: i32, %arg1: memref<1x147x256xbf16, #tpu.memory_space<vmem>>, %arg2: memref<9x256xbf16, #tpu.memory_space<vmem>>, %arg3: memref<13x8x216xbf16, #tpu.memory_space<vmem>>, %arg4: memref<13x8x1xf32, #tpu.memory_space<vmem>>, %arg5: memref<1x8x256xf32, #tpu.memory_space<vmem>>, %arg6: memref<216x256xbf16, #tpu.memory_space<vmem>>, %arg7: memref<32x256xbf16, #tpu.memory_space<vmem>>) attributes {dimension_semantics = [#tpu.dimension_semantics<parallel>], iteration_bounds = array<i64: 2>, scalar_prefetch = 0 : i64, scratch_operands = 2 : i64, tpu.core_type = #tpu.core_type<tc>, window_params = [{transform_indices = @transform_0, window_bounds = array<i64: 1, 147, 256>}, {pipeline_mode = #tpu.pipeline_mode<synchronous>, transform_indices = @transform_1, window_bounds = array<i64: 9, 256>}, {pipeline_mode = #tpu.pipeline_mode<synchronous>, transform_indices = @transform_2, window_bounds = array<i64: 13, 8, 216>}, {pipeline_mode = #tpu.pipeline_mode<synchronous>, transform_indices = @transform_3, window_bounds = array<i64: 13, 8, 1>}, {transform_indices = @transform_4, window_bounds = array<i64: 1, 8, 256>}]} {
    %c0 = arith.constant 0 : index
    %c0_0 = arith.constant 0 : index
    %c0_1 = arith.constant 0 : index
    %0 = vector.load %arg1[%c0, %c0_0, %c0_1] : memref<1x147x256xbf16, #tpu.memory_space<vmem>>, vector<1x147x256xbf16>
    %1 = vector.shape_cast %0 : vector<1x147x256xbf16> to vector<147x256xbf16>
    %c0_2 = arith.constant 0 : index
    %c0_3 = arith.constant 0 : index
    %c0_4 = arith.constant 0 : index
    %2 = vector.load %arg3[%c0_2, %c0_3, %c0_4] : memref<13x8x216xbf16, #tpu.memory_space<vmem>>, vector<1x8x147xbf16>
    %3 = vector.shape_cast %2 : vector<1x8x147xbf16> to vector<8x147xbf16>
    %c0_5 = arith.constant 0 : index
    %c0_6 = arith.constant 0 : index
    %c0_7 = arith.constant 0 : index
    %4 = vector.load %arg4[%c0_5, %c0_6, %c0_7] : memref<13x8x1xf32, #tpu.memory_space<vmem>>, vector<1x8x1xf32>
    %5 = vector.shape_cast %4 : vector<1x8x1xf32> to vector<8x1xf32>
    %cst = arith.constant dense<0.000000e+00> : vector<8x256xf32>
    %6 = tpu.matmul %3, %1, %cst {dimension_numbers = #tpu.dot_dimension_numbers<[1], [0], [0], [1], [0, 0, 1, 1], [], []>} : vector<8x147xbf16>, vector<147x256xbf16>, vector<8x256xf32> -> vector<8x256xf32>
    %7 = vector.broadcast %5 : vector<8x1xf32> to vector<8x256xf32>
    %8 = arith.addf %6, %7 : vector<8x256xf32>
    %cst_8 = arith.constant dense<0.000000e+00> : vector<8xf32>
    %9 = vector.multi_reduction <add>, %8, %cst_8 [1] : vector<8x256xf32> to vector<8xf32>
    %10 = vector.shape_cast %9 : vector<8xf32> to vector<8x1xf32>
    %cst_9 = arith.constant 3.906250e-03 : f32
    %11 = vector.broadcast %cst_9 : f32 to vector<8x1xf32>
    %12 = arith.mulf %10, %11 : vector<8x1xf32>
    %13 = arith.mulf %8, %8 : vector<8x256xf32>
    %cst_10 = arith.constant dense<0.000000e+00> : vector<8xf32>
    %14 = vector.multi_reduction <add>, %13, %cst_10 [1] : vector<8x256xf32> to vector<8xf32>
    %15 = vector.shape_cast %14 : vector<8xf32> to vector<8x1xf32>
    %cst_11 = arith.constant 3.906250e-03 : f32
    %16 = vector.broadcast %cst_11 : f32 to vector<8x1xf32>
    %17 = arith.mulf %15, %16 : vector<8x1xf32>
    %18 = arith.mulf %12, %12 : vector<8x1xf32>
    %19 = arith.subf %17, %18 : vector<8x1xf32>
    %cst_12 = arith.constant 0.000000e+00 : f32
    %20 = vector.broadcast %cst_12 : f32 to vector<8x1xf32>
    %21 = arith.maximumf %19, %20 : vector<8x1xf32>
    %22 = vector.broadcast %12 : vector<8x1xf32> to vector<8x256xf32>
    %23 = arith.subf %8, %22 : vector<8x256xf32>
    %cst_13 = arith.constant 9.99999974E-6 : f32
    %24 = vector.broadcast %cst_13 : f32 to vector<8x1xf32>
    %25 = arith.addf %21, %24 : vector<8x1xf32>
    %26 = math.rsqrt %25 : vector<8x1xf32>
    %27 = vector.broadcast %26 : vector<8x1xf32> to vector<8x256xf32>
    %28 = arith.mulf %23, %27 : vector<8x256xf32>
    %cst_14 = arith.constant 0.000000e+00 : f32
    %29 = vector.broadcast %cst_14 : f32 to vector<8x256xf32>
    %30 = arith.maximumf %28, %29 : vector<8x256xf32>
    %31 = arith.truncf %30 : vector<8x256xf32> to vector<8x256xbf16>
    %c0_15 = arith.constant 0 : index
    %c0_16 = arith.constant 0 : index
    %32 = vector.load %arg7[%c0_15, %c0_16] : memref<32x256xbf16, #tpu.memory_space<vmem>>, vector<8x256xbf16>
    tpu.vector_store %arg7[%c0_15, %c0_16], %31 {strides = array<i32>} : memref<32x256xbf16, #tpu.memory_space<vmem>>, vector<8x256xbf16>,
    %c0_17 = arith.constant 0 : index
    %c0_18 = arith.constant 0 : index
    %33 = vector.load %arg7[%c0_17, %c0_18] : memref<32x256xbf16, #tpu.memory_space<vmem>>, vector<8x256xbf16>
    %34 = tpu.concatenate %33, %33 in 1 : vector<8x256xbf16>, vector<8x256xbf16> -> vector<8x512xbf16>
    %35 = vector.extract_strided_slice %34 {offsets = [0, 239], sizes = [8, 256], strides = [1, 1]} : vector<8x512xbf16> to vector<8x256xbf16>
    %c0_19 = arith.constant 0 : index
    %c0_20 = arith.constant 0 : index
    %36 = vector.load %arg2[%c0_19, %c0_20] : memref<9x256xbf16, #tpu.memory_space<vmem>>, vector<1x256xbf16>
    %37 = vector.broadcast %36 : vector<1x256xbf16> to vector<8x256xbf16>
    %38 = arith.mulf %35, %37 : vector<8x256xbf16>
    %c0_21 = arith.constant 0 : index
    %c0_22 = arith.constant 0 : index
    %39 = vector.load %arg6[%c0_21, %c0_22] : memref<216x256xbf16, #tpu.memory_space<vmem>>, vector<8x256xbf16>
    tpu.vector_store %arg6[%c0_21, %c0_22], %38 {strides = array<i32>} : memref<216x256xbf16, #tpu.memory_space<vmem>>, vector<8x256xbf16>,
    %40 = vector.extract_strided_slice %34 {offsets = [0, 240], sizes = [8, 256], strides = [1, 1]} : vector<8x512xbf16> to vector<8x256xbf16>
    %c1 = arith.constant 1 : index
    %c0_23 = arith.constant 0 : index
    %41 = vector.load %arg2[%c1, %c0_23] : memref<9x256xbf16, #tpu.memory_space<vmem>>, vector<1x256xbf16>
    %42 = vector.broadcast %41 : vector<1x256xbf16> to vector<8x256xbf16>
    %43 = arith.mulf %40, %42 : vector<8x256xbf16>
    %c8 = arith.constant 8 : index
    %c0_24 = arith.constant 0 : index
    %44 = vector.load %arg6[%c8, %c0_24] : memref<216x256xbf16, #tpu.memory_space<vmem>>, vector<8x256xbf16>
    tpu.vector_store %arg6[%c8, %c0_24], %43 {strides = array<i32>} : memref<216x256xbf16, #tpu.memory_space<vmem>>, vector<8x256xbf16>,
    %45 = vector.extract_strided_slice %34 {offsets = [0, 241], sizes = [8, 256], strides = [1, 1]} : vector<8x512xbf16> to vector<8x256xbf16>
    %c2 = arith.constant 2 : index
    %c0_25 = arith.constant 0 : index
    %46 = vector.load %arg2[%c2, %c0_25] : memref<9x256xbf16, #tpu.memory_space<vmem>>, vector<1x256xbf16>
    %47 = vector.broadcast %46 : vector<1x256xbf16> to vector<8x256xbf16>
    %48 = arith.mulf %45, %47 : vector<8x256xbf16>
    %c16 = arith.constant 16 : index
    %c0_26 = arith.constant 0 : index
    %49 = vector.load %arg6[%c16, %c0_26] : memref<216x256xbf16, #tpu.memory_space<vmem>>, vector<8x256xbf16>
    tpu.vector_store %arg6[%c16, %c0_26], %48 {strides = array<i32>} : memref<216x256xbf16, #tpu.memory_space<vmem>>, vector<8x256xbf16>,
    %50 = vector.extract_strided_slice %34 {offsets = [0, 255], sizes = [8, 256], strides = [1, 1]} : vector<8x512xbf16> to vector<8x256xbf16>
    %c3 = arith.constant 3 : index
    %c0_27 = arith.constant 0 : index
    %51 = vector.load %arg2[%c3, %c0_27] : memref<9x256xbf16, #tpu.memory_space<vmem>>, vector<1x256xbf16>
    %52 = vector.broadcast %51 : vector<1x256xbf16> to vector<8x256xbf16>
    %53 = arith.mulf %50, %52 : vector<8x256xbf16>
    %c24 = arith.constant 24 : index
    %c0_28 = arith.constant 0 : index
    %54 = vector.load %arg6[%c24, %c0_28] : memref<216x256xbf16, #tpu.memory_space<vmem>>, vector<8x256xbf16>
    tpu.vector_store %arg6[%c24, %c0_28], %53 {strides = array<i32>} : memref<216x256xbf16, #tpu.memory_space<vmem>>, vector<8x256xbf16>,
    %55 = vector.extract_strided_slice %34 {offsets = [0, 0], sizes = [8, 256], strides = [1, 1]} : vector<8x512xbf16> to vector<8x256xbf16>
    %c4 = arith.constant 4 : index
    %c0_29 = arith.constant 0 : index
    %56 = vector.load %arg2[%c4, %c0_29] : memref<9x256xbf16, #tpu.memory_space<vmem>>, vector<1x256xbf16>
    %57 = vector.broadcast %56 : vector<1x256xbf16> to vector<8x256xbf16>
    %58 = arith.mulf %55, %57 : vector<8x256xbf16>
    %c32 = arith.constant 32 : index
    %c0_30 = arith.constant 0 : index
    %59 = vector.load %arg6[%c32, %c0_30] : memref<216x256xbf16, #tpu.memory_space<vmem>>, vector<8x256xbf16>
    tpu.vector_store %arg6[%c32, %c0_30], %58 {strides = array<i32>} : memref<216x256xbf16, #tpu.memory_space<vmem>>, vector<8x256xbf16>,
    %60 = vector.extract_strided_slice %34 {offsets = [0, 1], sizes = [8, 256], strides = [1, 1]} : vector<8x512xbf16> to vector<8x256xbf16>
    %c5 = arith.constant 5 : index
    %c0_31 = arith.constant 0 : index
    %61 = vector.load %arg2[%c5, %c0_31] : memref<9x256xbf16, #tpu.memory_space<vmem>>, vector<1x256xbf16>
    %62 = vector.broadcast %61 : vector<1x256xbf16> to vector<8x256xbf16>
    %63 = arith.mulf %60, %62 : vector<8x256xbf16>
    %c40 = arith.constant 40 : index
    %c0_32 = arith.constant 0 : index
    %64 = vector.load %arg6[%c40, %c0_32] : memref<216x256xbf16, #tpu.memory_space<vmem>>, vector<8x256xbf16>
    tpu.vector_store %arg6[%c40, %c0_32], %63 {strides = array<i32>} : memref<216x256xbf16, #tpu.memory_space<vmem>>, vector<8x256xbf16>,
    %65 = vector.extract_strided_slice %34 {offsets = [0, 15], sizes = [8, 256], strides = [1, 1]} : vector<8x512xbf16> to vector<8x256xbf16>
    %c6 = arith.constant 6 : index
    %c0_33 = arith.constant 0 : index
    %66 = vector.load %arg2[%c6, %c0_33] : memref<9x256xbf16, #tpu.memory_space<vmem>>, vector<1x256xbf16>
    %67 = vector.broadcast %66 : vector<1x256xbf16> to vector<8x256xbf16>
    %68 = arith.mulf %65, %67 : vector<8x256xbf16>
    %c48 = arith.constant 48 : index
    %c0_34 = arith.constant 0 : index
    %69 = vector.load %arg6[%c48, %c0_34] : memref<216x256xbf16, #tpu.memory_space<vmem>>, vector<8x256xbf16>
    tpu.vector_store %arg6[%c48, %c0_34], %68 {strides = array<i32>} : memref<216x256xbf16, #tpu.memory_space<vmem>>, vector<8x256xbf16>,
    %70 = vector.extract_strided_slice %34 {offsets = [0, 16], sizes = [8, 256], strides = [1, 1]} : vector<8x512xbf16> to vector<8x256xbf16>
    %c7 = arith.constant 7 : index
    %c0_35 = arith.constant 0 : index
    %71 = vector.load %arg2[%c7, %c0_35] : memref<9x256xbf16, #tpu.memory_space<vmem>>, vector<1x256xbf16>
    %72 = vector.broadcast %71 : vector<1x256xbf16> to vector<8x256xbf16>
    %73 = arith.mulf %70, %72 : vector<8x256xbf16>
    %c56 = arith.constant 56 : index
    %c0_36 = arith.constant 0 : index
    %74 = vector.load %arg6[%c56, %c0_36] : memref<216x256xbf16, #tpu.memory_space<vmem>>, vector<8x256xbf16>
    tpu.vector_store %arg6[%c56, %c0_36], %73 {strides = array<i32>} : memref<216x256xbf16, #tpu.memory_space<vmem>>, vector<8x256xbf16>,
    %75 = vector.extract_strided_slice %34 {offsets = [0, 17], sizes = [8, 256], strides = [1, 1]} : vector<8x512xbf16> to vector<8x256xbf16>
    %c8_37 = arith.constant 8 : index
    %c0_38 = arith.constant 0 : index
    %76 = vector.load %arg2[%c8_37, %c0_38] : memref<9x256xbf16, #tpu.memory_space<vmem>>, vector<1x256xbf16>
    %77 = vector.broadcast %76 : vector<1x256xbf16> to vector<8x256xbf16>
    %78 = arith.mulf %75, %77 : vector<8x256xbf16>
    %c64 = arith.constant 64 : index
    %c0_39 = arith.constant 0 : index
    %79 = vector.load %arg6[%c64, %c0_39] : memref<216x256xbf16, #tpu.memory_space<vmem>>, vector<8x256xbf16>
    tpu.vector_store %arg6[%c64, %c0_39], %78 {strides = array<i32>} : memref<216x256xbf16, #tpu.memory_space<vmem>>, vector<8x256xbf16>,
    %c0_40 = arith.constant 0 : index
    %c0_41 = arith.constant 0 : index
    %80 = vector.load %arg6[%c0_40, %c0_41] : memref<216x256xbf16, #tpu.memory_space<vmem>>, vector<72x256xbf16>
    %c1_42 = arith.constant 1 : index
    %c0_43 = arith.constant 0 : index
    %c0_44 = arith.constant 0 : index
    %81 = vector.load %arg3[%c1_42, %c0_43, %c0_44] : memref<13x8x216xbf16, #tpu.memory_space<vmem>>, vector<1x8x72xbf16>
    %82 = vector.shape_cast %81 : vector<1x8x72xbf16> to vector<8x72xbf16>
    %c1_45 = arith.constant 1 : index
    %c0_46 = arith.constant 0 : index
    %c0_47 = arith.constant 0 : index
    %83 = vector.load %arg4[%c1_45, %c0_46, %c0_47] : memref<13x8x1xf32, #tpu.memory_space<vmem>>, vector<1x8x1xf32>
    %84 = vector.shape_cast %83 : vector<1x8x1xf32> to vector<8x1xf32>
    %cst_48 = arith.constant dense<0.000000e+00> : vector<8x256xf32>
    %85 = tpu.matmul %82, %80, %cst_48 {dimension_numbers = #tpu.dot_dimension_numbers<[1], [0], [0], [1], [0, 0, 1, 1], [], []>} : vector<8x72xbf16>, vector<72x256xbf16>, vector<8x256xf32> -> vector<8x256xf32>
    %86 = vector.broadcast %84 : vector<8x1xf32> to vector<8x256xf32>
    %87 = arith.addf %85, %86 : vector<8x256xf32>
    %cst_49 = arith.constant 0.000000e+00 : f32
    %88 = vector.broadcast %cst_49 : f32 to vector<8x256xf32>
    %89 = arith.maximumf %87, %88 : vector<8x256xf32>
    %90 = arith.truncf %89 : vector<8x256xf32> to vector<8x256xbf16>
    %c8_50 = arith.constant 8 : index
    %c0_51 = arith.constant 0 : index
    %91 = vector.load %arg7[%c8_50, %c0_51] : memref<32x256xbf16, #tpu.memory_space<vmem>>, vector<8x256xbf16>
    tpu.vector_store %arg7[%c8_50, %c0_51], %90 {strides = array<i32>} : memref<32x256xbf16, #tpu.memory_space<vmem>>, vector<8x256xbf16>,
    %c0_52 = arith.constant 0 : index
    %c0_53 = arith.constant 0 : index
    %92 = vector.load %arg7[%c0_52, %c0_53] : memref<32x256xbf16, #tpu.memory_space<vmem>>, vector<16x256xbf16>
    %93 = tpu.concatenate %92, %92 in 1 : vector<16x256xbf16>, vector<16x256xbf16> -> vector<16x512xbf16>
    %94 = vector.extract_strided_slice %93 {offsets = [0, 239], sizes = [16, 256], strides = [1, 1]} : vector<16x512xbf16> to vector<16x256xbf16>
    %c0_54 = arith.constant 0 : index
    %c0_55 = arith.constant 0 : index
    %95 = vector.load %arg2[%c0_54, %c0_55] : memref<9x256xbf16, #tpu.memory_space<vmem>>, vector<1x256xbf16>
    %96 = vector.broadcast %95 : vector<1x256xbf16> to vector<16x256xbf16>
    %97 = arith.mulf %94, %96 : vector<16x256xbf16>
    %c0_56 = arith.constant 0 : index
    %c0_57 = arith.constant 0 : index
    %98 = vector.load %arg6[%c0_56, %c0_57] : memref<216x256xbf16, #tpu.memory_space<vmem>>, vector<16x256xbf16>
    tpu.vector_store %arg6[%c0_56, %c0_57], %97 {strides = array<i32>} : memref<216x256xbf16, #tpu.memory_space<vmem>>, vector<16x256xbf16>,
    %99 = vector.extract_strided_slice %93 {offsets = [0, 240], sizes = [16, 256], strides = [1, 1]} : vector<16x512xbf16> to vector<16x256xbf16>
    %c1_58 = arith.constant 1 : index
    %c0_59 = arith.constant 0 : index
    %100 = vector.load %arg2[%c1_58, %c0_59] : memref<9x256xbf16, #tpu.memory_space<vmem>>, vector<1x256xbf16>
    %101 = vector.broadcast %100 : vector<1x256xbf16> to vector<16x256xbf16>
    %102 = arith.mulf %99, %101 : vector<16x256xbf16>
    %c16_60 = arith.constant 16 : index
    %c0_61 = arith.constant 0 : index
    %103 = vector.load %arg6[%c16_60, %c0_61] : memref<216x256xbf16, #tpu.memory_space<vmem>>, vector<16x256xbf16>
    tpu.vector_store %arg6[%c16_60, %c0_61], %102 {strides = array<i32>} : memref<216x256xbf16, #tpu.memory_space<vmem>>, vector<16x256xbf16>,
    %104 = vector.extract_strided_slice %93 {offsets = [0, 241], sizes = [16, 256], strides = [1, 1]} : vector<16x512xbf16> to vector<16x256xbf16>
    %c2_62 = arith.constant 2 : index
    %c0_63 = arith.constant 0 : index
    %105 = vector.load %arg2[%c2_62, %c0_63] : memref<9x256xbf16, #tpu.memory_space<vmem>>, vector<1x256xbf16>
    %106 = vector.broadcast %105 : vector<1x256xbf16> to vector<16x256xbf16>
    %107 = arith.mulf %104, %106 : vector<16x256xbf16>
    %c32_64 = arith.constant 32 : index
    %c0_65 = arith.constant 0 : index
    %108 = vector.load %arg6[%c32_64, %c0_65] : memref<216x256xbf16, #tpu.memory_space<vmem>>, vector<16x256xbf16>
    tpu.vector_store %arg6[%c32_64, %c0_65], %107 {strides = array<i32>} : memref<216x256xbf16, #tpu.memory_space<vmem>>, vector<16x256xbf16>,
    %109 = vector.extract_strided_slice %93 {offsets = [0, 255], sizes = [16, 256], strides = [1, 1]} : vector<16x512xbf16> to vector<16x256xbf16>
    %c3_66 = arith.constant 3 : index
    %c0_67 = arith.constant 0 : index
    %110 = vector.load %arg2[%c3_66, %c0_67] : memref<9x256xbf16, #tpu.memory_space<vmem>>, vector<1x256xbf16>
    %111 = vector.broadcast %110 : vector<1x256xbf16> to vector<16x256xbf16>
    %112 = arith.mulf %109, %111 : vector<16x256xbf16>
    %c48_68 = arith.constant 48 : index
    %c0_69 = arith.constant 0 : index
    %113 = vector.load %arg6[%c48_68, %c0_69] : memref<216x256xbf16, #tpu.memory_space<vmem>>, vector<16x256xbf16>
    tpu.vector_store %arg6[%c48_68, %c0_69], %112 {strides = array<i32>} : memref<216x256xbf16, #tpu.memory_space<vmem>>, vector<16x256xbf16>,
    %114 = vector.extract_strided_slice %93 {offsets = [0, 0], sizes = [16, 256], strides = [1, 1]} : vector<16x512xbf16> to vector<16x256xbf16>
    %c4_70 = arith.constant 4 : index
    %c0_71 = arith.constant 0 : index
    %115 = vector.load %arg2[%c4_70, %c0_71] : memref<9x256xbf16, #tpu.memory_space<vmem>>, vector<1x256xbf16>
    %116 = vector.broadcast %115 : vector<1x256xbf16> to vector<16x256xbf16>
    %117 = arith.mulf %114, %116 : vector<16x256xbf16>
    %c64_72 = arith.constant 64 : index
    %c0_73 = arith.constant 0 : index
    %118 = vector.load %arg6[%c64_72, %c0_73] : memref<216x256xbf16, #tpu.memory_space<vmem>>, vector<16x256xbf16>
    tpu.vector_store %arg6[%c64_72, %c0_73], %117 {strides = array<i32>} : memref<216x256xbf16, #tpu.memory_space<vmem>>, vector<16x256xbf16>,
    %119 = vector.extract_strided_slice %93 {offsets = [0, 1], sizes = [16, 256], strides = [1, 1]} : vector<16x512xbf16> to vector<16x256xbf16>
    %c5_74 = arith.constant 5 : index
    %c0_75 = arith.constant 0 : index
    %120 = vector.load %arg2[%c5_74, %c0_75] : memref<9x256xbf16, #tpu.memory_space<vmem>>, vector<1x256xbf16>
    %121 = vector.broadcast %120 : vector<1x256xbf16> to vector<16x256xbf16>
    %122 = arith.mulf %119, %121 : vector<16x256xbf16>
    %c80 = arith.constant 80 : index
    %c0_76 = arith.constant 0 : index
    %123 = vector.load %arg6[%c80, %c0_76] : memref<216x256xbf16, #tpu.memory_space<vmem>>, vector<16x256xbf16>
    tpu.vector_store %arg6[%c80, %c0_76], %122 {strides = array<i32>} : memref<216x256xbf16, #tpu.memory_space<vmem>>, vector<16x256xbf16>,
    %124 = vector.extract_strided_slice %93 {offsets = [0, 15], sizes = [16, 256], strides = [1, 1]} : vector<16x512xbf16> to vector<16x256xbf16>
    %c6_77 = arith.constant 6 : index
    %c0_78 = arith.constant 0 : index
    %125 = vector.load %arg2[%c6_77, %c0_78] : memref<9x256xbf16, #tpu.memory_space<vmem>>, vector<1x256xbf16>
    %126 = vector.broadcast %125 : vector<1x256xbf16> to vector<16x256xbf16>
    %127 = arith.mulf %124, %126 : vector<16x256xbf16>
    %c96 = arith.constant 96 : index
    %c0_79 = arith.constant 0 : index
    %128 = vector.load %arg6[%c96, %c0_79] : memref<216x256xbf16, #tpu.memory_space<vmem>>, vector<16x256xbf16>
    tpu.vector_store %arg6[%c96, %c0_79], %127 {strides = array<i32>} : memref<216x256xbf16, #tpu.memory_space<vmem>>, vector<16x256xbf16>,
    %129 = vector.extract_strided_slice %93 {offsets = [0, 16], sizes = [16, 256], strides = [1, 1]} : vector<16x512xbf16> to vector<16x256xbf16>
    %c7_80 = arith.constant 7 : index
    %c0_81 = arith.constant 0 : index
    %130 = vector.load %arg2[%c7_80, %c0_81] : memref<9x256xbf16, #tpu.memory_space<vmem>>, vector<1x256xbf16>
    %131 = vector.broadcast %130 : vector<1x256xbf16> to vector<16x256xbf16>
    %132 = arith.mulf %129, %131 : vector<16x256xbf16>
    %c112 = arith.constant 112 : index
    %c0_82 = arith.constant 0 : index
    %133 = vector.load %arg6[%c112, %c0_82] : memref<216x256xbf16, #tpu.memory_space<vmem>>, vector<16x256xbf16>
    tpu.vector_store %arg6[%c112, %c0_82], %132 {strides = array<i32>} : memref<216x256xbf16, #tpu.memory_space<vmem>>, vector<16x256xbf16>,
    %134 = vector.extract_strided_slice %93 {offsets = [0, 17], sizes = [16, 256], strides = [1, 1]} : vector<16x512xbf16> to vector<16x256xbf16>
    %c8_83 = arith.constant 8 : index
    %c0_84 = arith.constant 0 : index
    %135 = vector.load %arg2[%c8_83, %c0_84] : memref<9x256xbf16, #tpu.memory_space<vmem>>, vector<1x256xbf16>
    %136 = vector.broadcast %135 : vector<1x256xbf16> to vector<16x256xbf16>
    %137 = arith.mulf %134, %136 : vector<16x256xbf16>
    %c128 = arith.constant 128 : index
    %c0_85 = arith.constant 0 : index
    %138 = vector.load %arg6[%c128, %c0_85] : memref<216x256xbf16, #tpu.memory_space<vmem>>, vector<16x256xbf16>
    tpu.vector_store %arg6[%c128, %c0_85], %137 {strides = array<i32>} : memref<216x256xbf16, #tpu.memory_space<vmem>>, vector<16x256xbf16>,
    %c0_86 = arith.constant 0 : index
    %c0_87 = arith.constant 0 : index
    %139 = vector.load %arg6[%c0_86, %c0_87] : memref<216x256xbf16, #tpu.memory_space<vmem>>, vector<144x256xbf16>
    %c2_88 = arith.constant 2 : index
    %c0_89 = arith.constant 0 : index
    %c0_90 = arith.constant 0 : index
    %140 = vector.load %arg3[%c2_88, %c0_89, %c0_90] : memref<13x8x216xbf16, #tpu.memory_space<vmem>>, vector<1x8x144xbf16>
    %141 = vector.shape_cast %140 : vector<1x8x144xbf16> to vector<8x144xbf16>
    %c2_91 = arith.constant 2 : index
    %c0_92 = arith.constant 0 : index
    %c0_93 = arith.constant 0 : index
    %142 = vector.load %arg4[%c2_91, %c0_92, %c0_93] : memref<13x8x1xf32, #tpu.memory_space<vmem>>, vector<1x8x1xf32>
    %143 = vector.shape_cast %142 : vector<1x8x1xf32> to vector<8x1xf32>
    %cst_94 = arith.constant dense<0.000000e+00> : vector<8x256xf32>
    %144 = tpu.matmul %141, %139, %cst_94 {dimension_numbers = #tpu.dot_dimension_numbers<[1], [0], [0], [1], [0, 0, 1, 1], [], []>} : vector<8x144xbf16>, vector<144x256xbf16>, vector<8x256xf32> -> vector<8x256xf32>
    %145 = vector.broadcast %143 : vector<8x1xf32> to vector<8x256xf32>
    %146 = arith.addf %144, %145 : vector<8x256xf32>
    %cst_95 = arith.constant 0.000000e+00 : f32
    %147 = vector.broadcast %cst_95 : f32 to vector<8x256xf32>
    %148 = arith.maximumf %146, %147 : vector<8x256xf32>
    %149 = arith.truncf %148 : vector<8x256xf32> to vector<8x256xbf16>
    %c16_96 = arith.constant 16 : index
    %c0_97 = arith.constant 0 : index
    %150 = vector.load %arg7[%c16_96, %c0_97] : memref<32x256xbf16, #tpu.memory_space<vmem>>, vector<8x256xbf16>
    tpu.vector_store %arg7[%c16_96, %c0_97], %149 {strides = array<i32>} : memref<32x256xbf16, #tpu.memory_space<vmem>>, vector<8x256xbf16>,
    %c0_98 = arith.constant 0 : index
    %c0_99 = arith.constant 0 : index
    %151 = vector.load %arg7[%c0_98, %c0_99] : memref<32x256xbf16, #tpu.memory_space<vmem>>, vector<24x256xbf16>
    %152 = tpu.concatenate %151, %151 in 1 : vector<24x256xbf16>, vector<24x256xbf16> -> vector<24x512xbf16>
    %153 = vector.extract_strided_slice %152 {offsets = [0, 239], sizes = [24, 256], strides = [1, 1]} : vector<24x512xbf16> to vector<24x256xbf16>
    %c0_100 = arith.constant 0 : index
    %c0_101 = arith.constant 0 : index
    %154 = vector.load %arg2[%c0_100, %c0_101] : memref<9x256xbf16, #tpu.memory_space<vmem>>, vector<1x256xbf16>
    %155 = vector.broadcast %154 : vector<1x256xbf16> to vector<24x256xbf16>
    %156 = arith.mulf %153, %155 : vector<24x256xbf16>
    %c0_102 = arith.constant 0 : index
    %c0_103 = arith.constant 0 : index
    %157 = vector.load %arg6[%c0_102, %c0_103] : memref<216x256xbf16, #tpu.memory_space<vmem>>, vector<24x256xbf16>
    tpu.vector_store %arg6[%c0_102, %c0_103], %156 {strides = array<i32>} : memref<216x256xbf16, #tpu.memory_space<vmem>>, vector<24x256xbf16>,
    %158 = vector.extract_strided_slice %152 {offsets = [0, 240], sizes = [24, 256], strides = [1, 1]} : vector<24x512xbf16> to vector<24x256xbf16>
    %c1_104 = arith.constant 1 : index
    %c0_105 = arith.constant 0 : index
    %159 = vector.load %arg2[%c1_104, %c0_105] : memref<9x256xbf16, #tpu.memory_space<vmem>>, vector<1x256xbf16>
    %160 = vector.broadcast %159 : vector<1x256xbf16> to vector<24x256xbf16>
    %161 = arith.mulf %158, %160 : vector<24x256xbf16>
    %c24_106 = arith.constant 24 : index
    %c0_107 = arith.constant 0 : index
    %162 = vector.load %arg6[%c24_106, %c0_107] : memref<216x256xbf16, #tpu.memory_space<vmem>>, vector<24x256xbf16>
    tpu.vector_store %arg6[%c24_106, %c0_107], %161 {strides = array<i32>} : memref<216x256xbf16, #tpu.memory_space<vmem>>, vector<24x256xbf16>,
    %163 = vector.extract_strided_slice %152 {offsets = [0, 241], sizes = [24, 256], strides = [1, 1]} : vector<24x512xbf16> to vector<24x256xbf16>
    %c2_108 = arith.constant 2 : index
    %c0_109 = arith.constant 0 : index
    %164 = vector.load %arg2[%c2_108, %c0_109] : memref<9x256xbf16, #tpu.memory_space<vmem>>, vector<1x256xbf16>
    %165 = vector.broadcast %164 : vector<1x256xbf16> to vector<24x256xbf16>
    %166 = arith.mulf %163, %165 : vector<24x256xbf16>
    %c48_110 = arith.constant 48 : index
    %c0_111 = arith.constant 0 : index
    %167 = vector.load %arg6[%c48_110, %c0_111] : memref<216x256xbf16, #tpu.memory_space<vmem>>, vector<24x256xbf16>
    tpu.vector_store %arg6[%c48_110, %c0_111], %166 {strides = array<i32>} : memref<216x256xbf16, #tpu.memory_space<vmem>>, vector<24x256xbf16>,
    %168 = vector.extract_strided_slice %152 {offsets = [0, 255], sizes = [24, 256], strides = [1, 1]} : vector<24x512xbf16> to vector<24x256xbf16>
    %c3_112 = arith.constant 3 : index
    %c0_113 = arith.constant 0 : index
    %169 = vector.load %arg2[%c3_112, %c0_113] : memref<9x256xbf16, #tpu.memory_space<vmem>>, vector<1x256xbf16>
    %170 = vector.broadcast %169 : vector<1x256xbf16> to vector<24x256xbf16>
    %171 = arith.mulf %168, %170 : vector<24x256xbf16>
    %c72 = arith.constant 72 : index
    %c0_114 = arith.constant 0 : index
    %172 = vector.load %arg6[%c72, %c0_114] : memref<216x256xbf16, #tpu.memory_space<vmem>>, vector<24x256xbf16>
    tpu.vector_store %arg6[%c72, %c0_114], %171 {strides = array<i32>} : memref<216x256xbf16, #tpu.memory_space<vmem>>, vector<24x256xbf16>,
    %173 = vector.extract_strided_slice %152 {offsets = [0, 0], sizes = [24, 256], strides = [1, 1]} : vector<24x512xbf16> to vector<24x256xbf16>
    %c4_115 = arith.constant 4 : index
    %c0_116 = arith.constant 0 : index
    %174 = vector.load %arg2[%c4_115, %c0_116] : memref<9x256xbf16, #tpu.memory_space<vmem>>, vector<1x256xbf16>
    %175 = vector.broadcast %174 : vector<1x256xbf16> to vector<24x256xbf16>
    %176 = arith.mulf %173, %175 : vector<24x256xbf16>
    %c96_117 = arith.constant 96 : index
    %c0_118 = arith.constant 0 : index
    %177 = vector.load %arg6[%c96_117, %c0_118] : memref<216x256xbf16, #tpu.memory_space<vmem>>, vector<24x256xbf16>
    tpu.vector_store %arg6[%c96_117, %c0_118], %176 {strides = array<i32>} : memref<216x256xbf16, #tpu.memory_space<vmem>>, vector<24x256xbf16>,
    %178 = vector.extract_strided_slice %152 {offsets = [0, 1], sizes = [24, 256], strides = [1, 1]} : vector<24x512xbf16> to vector<24x256xbf16>
    %c5_119 = arith.constant 5 : index
    %c0_120 = arith.constant 0 : index
    %179 = vector.load %arg2[%c5_119, %c0_120] : memref<9x256xbf16, #tpu.memory_space<vmem>>, vector<1x256xbf16>
    %180 = vector.broadcast %179 : vector<1x256xbf16> to vector<24x256xbf16>
    %181 = arith.mulf %178, %180 : vector<24x256xbf16>
    %c120 = arith.constant 120 : index
    %c0_121 = arith.constant 0 : index
    %182 = vector.load %arg6[%c120, %c0_121] : memref<216x256xbf16, #tpu.memory_space<vmem>>, vector<24x256xbf16>
    tpu.vector_store %arg6[%c120, %c0_121], %181 {strides = array<i32>} : memref<216x256xbf16, #tpu.memory_space<vmem>>, vector<24x256xbf16>,
    %183 = vector.extract_strided_slice %152 {offsets = [0, 15], sizes = [24, 256], strides = [1, 1]} : vector<24x512xbf16> to vector<24x256xbf16>
    %c6_122 = arith.constant 6 : index
    %c0_123 = arith.constant 0 : index
    %184 = vector.load %arg2[%c6_122, %c0_123] : memref<9x256xbf16, #tpu.memory_space<vmem>>, vector<1x256xbf16>
    %185 = vector.broadcast %184 : vector<1x256xbf16> to vector<24x256xbf16>
    %186 = arith.mulf %183, %185 : vector<24x256xbf16>
    %c144 = arith.constant 144 : index
    %c0_124 = arith.constant 0 : index
    %187 = vector.load %arg6[%c144, %c0_124] : memref<216x256xbf16, #tpu.memory_space<vmem>>, vector<24x256xbf16>
    tpu.vector_store %arg6[%c144, %c0_124], %186 {strides = array<i32>} : memref<216x256xbf16, #tpu.memory_space<vmem>>, vector<24x256xbf16>,
    %188 = vector.extract_strided_slice %152 {offsets = [0, 16], sizes = [24, 256], strides = [1, 1]} : vector<24x512xbf16> to vector<24x256xbf16>
    %c7_125 = arith.constant 7 : index
    %c0_126 = arith.constant 0 : index
    %189 = vector.load %arg2[%c7_125, %c0_126] : memref<9x256xbf16, #tpu.memory_space<vmem>>, vector<1x256xbf16>
    %190 = vector.broadcast %189 : vector<1x256xbf16> to vector<24x256xbf16>
    %191 = arith.mulf %188, %190 : vector<24x256xbf16>
    %c168 = arith.constant 168 : index
    %c0_127 = arith.constant 0 : index
    %192 = vector.load %arg6[%c168, %c0_127] : memref<216x256xbf16, #tpu.memory_space<vmem>>, vector<24x256xbf16>
    tpu.vector_store %arg6[%c168, %c0_127], %191 {strides = array<i32>} : memref<216x256xbf16, #tpu.memory_space<vmem>>, vector<24x256xbf16>,
    %193 = vector.extract_strided_slice %152 {offsets = [0, 17], sizes = [24, 256], strides = [1, 1]} : vector<24x512xbf16> to vector<24x256xbf16>
    %c8_128 = arith.constant 8 : index
    %c0_129 = arith.constant 0 : index
    %194 = vector.load %arg2[%c8_128, %c0_129] : memref<9x256xbf16, #tpu.memory_space<vmem>>, vector<1x256xbf16>
    %195 = vector.broadcast %194 : vector<1x256xbf16> to vector<24x256xbf16>
    %196 = arith.mulf %193, %195 : vector<24x256xbf16>
    %c192 = arith.constant 192 : index
    %c0_130 = arith.constant 0 : index
    %197 = vector.load %arg6[%c192, %c0_130] : memref<216x256xbf16, #tpu.memory_space<vmem>>, vector<24x256xbf16>
    tpu.vector_store %arg6[%c192, %c0_130], %196 {strides = array<i32>} : memref<216x256xbf16, #tpu.memory_space<vmem>>, vector<24x256xbf16>,
    %c0_131 = arith.constant 0 : index
    %c0_132 = arith.constant 0 : index
    %198 = vector.load %arg6[%c0_131, %c0_132] : memref<216x256xbf16, #tpu.memory_space<vmem>>, vector<216x256xbf16>
    %c3_133 = arith.constant 3 : index
    %c0_134 = arith.constant 0 : index
    %c0_135 = arith.constant 0 : index
    %199 = vector.load %arg3[%c3_133, %c0_134, %c0_135] : memref<13x8x216xbf16, #tpu.memory_space<vmem>>, vector<1x8x216xbf16>
    %200 = vector.shape_cast %199 : vector<1x8x216xbf16> to vector<8x216xbf16>
    %c3_136 = arith.constant 3 : index
    %c0_137 = arith.constant 0 : index
    %c0_138 = arith.constant 0 : index
    %201 = vector.load %arg4[%c3_136, %c0_137, %c0_138] : memref<13x8x1xf32, #tpu.memory_space<vmem>>, vector<1x8x1xf32>
    %202 = vector.shape_cast %201 : vector<1x8x1xf32> to vector<8x1xf32>
    %cst_139 = arith.constant dense<0.000000e+00> : vector<8x256xf32>
    %203 = tpu.matmul %200, %198, %cst_139 {dimension_numbers = #tpu.dot_dimension_numbers<[1], [0], [0], [1], [0, 0, 1, 1], [], []>} : vector<8x216xbf16>, vector<216x256xbf16>, vector<8x256xf32> -> vector<8x256xf32>
    %204 = vector.broadcast %202 : vector<8x1xf32> to vector<8x256xf32>
    %205 = arith.addf %203, %204 : vector<8x256xf32>
    %cst_140 = arith.constant 0.000000e+00 : f32
    %206 = vector.broadcast %cst_140 : f32 to vector<8x256xf32>
    %207 = arith.maximumf %205, %206 : vector<8x256xf32>
    %208 = arith.truncf %207 : vector<8x256xf32> to vector<8x256xbf16>
    %c24_141 = arith.constant 24 : index
    %c0_142 = arith.constant 0 : index
    %209 = vector.load %arg7[%c24_141, %c0_142] : memref<32x256xbf16, #tpu.memory_space<vmem>>, vector<8x256xbf16>
    tpu.vector_store %arg7[%c24_141, %c0_142], %208 {strides = array<i32>} : memref<32x256xbf16, #tpu.memory_space<vmem>>, vector<8x256xbf16>,
    %c0_143 = arith.constant 0 : index
    %c0_144 = arith.constant 0 : index
    %210 = vector.load %arg7[%c0_143, %c0_144] : memref<32x256xbf16, #tpu.memory_space<vmem>>, vector<32x256xbf16>
    %c4_145 = arith.constant 4 : index
    %c0_146 = arith.constant 0 : index
    %c0_147 = arith.constant 0 : index
    %211 = vector.load %arg3[%c4_145, %c0_146, %c0_147] : memref<13x8x216xbf16, #tpu.memory_space<vmem>>, vector<1x8x32xbf16>
    %212 = vector.shape_cast %211 : vector<1x8x32xbf16> to vector<8x32xbf16>
    %c4_148 = arith.constant 4 : index
    %c0_149 = arith.constant 0 : index
    %c0_150 = arith.constant 0 : index
    %213 = vector.load %arg4[%c4_148, %c0_149, %c0_150] : memref<13x8x1xf32, #tpu.memory_space<vmem>>, vector<1x8x1xf32>
    %214 = vector.shape_cast %213 : vector<1x8x1xf32> to vector<8x1xf32>
    %cst_151 = arith.constant dense<0.000000e+00> : vector<8x256xf32>
    %215 = tpu.matmul %212, %210, %cst_151 {dimension_numbers = #tpu.dot_dimension_numbers<[1], [0], [0], [1], [0, 0, 1, 1], [], []>} : vector<8x32xbf16>, vector<32x256xbf16>, vector<8x256xf32> -> vector<8x256xf32>
    %216 = vector.broadcast %214 : vector<8x1xf32> to vector<8x256xf32>
    %217 = arith.addf %215, %216 : vector<8x256xf32>
    %218 = arith.addf %30, %217 : vector<8x256xf32>
    %219 = arith.truncf %218 : vector<8x256xf32> to vector<8x256xbf16>
    %c0_152 = arith.constant 0 : index
    %c0_153 = arith.constant 0 : index
    %220 = vector.load %arg7[%c0_152, %c0_153] : memref<32x256xbf16, #tpu.memory_space<vmem>>, vector<8x256xbf16>
    tpu.vector_store %arg7[%c0_152, %c0_153], %219 {strides = array<i32>} : memref<32x256xbf16, #tpu.memory_space<vmem>>, vector<8x256xbf16>,
    %c0_154 = arith.constant 0 : index
    %c0_155 = arith.constant 0 : index
    %221 = vector.load %arg7[%c0_154, %c0_155] : memref<32x256xbf16, #tpu.memory_space<vmem>>, vector<8x256xbf16>
    %222 = tpu.concatenate %221, %221 in 1 : vector<8x256xbf16>, vector<8x256xbf16> -> vector<8x512xbf16>
    %223 = vector.extract_strided_slice %222 {offsets = [0, 239], sizes = [8, 256], strides = [1, 1]} : vector<8x512xbf16> to vector<8x256xbf16>
    %c0_156 = arith.constant 0 : index
    %c0_157 = arith.constant 0 : index
    %224 = vector.load %arg2[%c0_156, %c0_157] : memref<9x256xbf16, #tpu.memory_space<vmem>>, vector<1x256xbf16>
    %225 = vector.broadcast %224 : vector<1x256xbf16> to vector<8x256xbf16>
    %226 = arith.mulf %223, %225 : vector<8x256xbf16>
    %c0_158 = arith.constant 0 : index
    %c0_159 = arith.constant 0 : index
    %227 = vector.load %arg6[%c0_158, %c0_159] : memref<216x256xbf16, #tpu.memory_space<vmem>>, vector<8x256xbf16>
    tpu.vector_store %arg6[%c0_158, %c0_159], %226 {strides = array<i32>} : memref<216x256xbf16, #tpu.memory_space<vmem>>, vector<8x256xbf16>,
    %228 = vector.extract_strided_slice %222 {offsets = [0, 240], sizes = [8, 256], strides = [1, 1]} : vector<8x512xbf16> to vector<8x256xbf16>
    %c1_160 = arith.constant 1 : index
    %c0_161 = arith.constant 0 : index
    %229 = vector.load %arg2[%c1_160, %c0_161] : memref<9x256xbf16, #tpu.memory_space<vmem>>, vector<1x256xbf16>
    %230 = vector.broadcast %229 : vector<1x256xbf16> to vector<8x256xbf16>
    %231 = arith.mulf %228, %230 : vector<8x256xbf16>
    %c8_162 = arith.constant 8 : index
    %c0_163 = arith.constant 0 : index
    %232 = vector.load %arg6[%c8_162, %c0_163] : memref<216x256xbf16, #tpu.memory_space<vmem>>, vector<8x256xbf16>
    tpu.vector_store %arg6[%c8_162, %c0_163], %231 {strides = array<i32>} : memref<216x256xbf16, #tpu.memory_space<vmem>>, vector<8x256xbf16>,
    %233 = vector.extract_strided_slice %222 {offsets = [0, 241], sizes = [8, 256], strides = [1, 1]} : vector<8x512xbf16> to vector<8x256xbf16>
    %c2_164 = arith.constant 2 : index
    %c0_165 = arith.constant 0 : index
    %234 = vector.load %arg2[%c2_164, %c0_165] : memref<9x256xbf16, #tpu.memory_space<vmem>>, vector<1x256xbf16>
    %235 = vector.broadcast %234 : vector<1x256xbf16> to vector<8x256xbf16>
    %236 = arith.mulf %233, %235 : vector<8x256xbf16>
    %c16_166 = arith.constant 16 : index
    %c0_167 = arith.constant 0 : index
    %237 = vector.load %arg6[%c16_166, %c0_167] : memref<216x256xbf16, #tpu.memory_space<vmem>>, vector<8x256xbf16>
    tpu.vector_store %arg6[%c16_166, %c0_167], %236 {strides = array<i32>} : memref<216x256xbf16, #tpu.memory_space<vmem>>, vector<8x256xbf16>,
    %238 = vector.extract_strided_slice %222 {offsets = [0, 255], sizes = [8, 256], strides = [1, 1]} : vector<8x512xbf16> to vector<8x256xbf16>
    %c3_168 = arith.constant 3 : index
    %c0_169 = arith.constant 0 : index
    %239 = vector.load %arg2[%c3_168, %c0_169] : memref<9x256xbf16, #tpu.memory_space<vmem>>, vector<1x256xbf16>
    %240 = vector.broadcast %239 : vector<1x256xbf16> to vector<8x256xbf16>
    %241 = arith.mulf %238, %240 : vector<8x256xbf16>
    %c24_170 = arith.constant 24 : index
    %c0_171 = arith.constant 0 : index
    %242 = vector.load %arg6[%c24_170, %c0_171] : memref<216x256xbf16, #tpu.memory_space<vmem>>, vector<8x256xbf16>
    tpu.vector_store %arg6[%c24_170, %c0_171], %241 {strides = array<i32>} : memref<216x256xbf16, #tpu.memory_space<vmem>>, vector<8x256xbf16>,
    %243 = vector.extract_strided_slice %222 {offsets = [0, 0], sizes = [8, 256], strides = [1, 1]} : vector<8x512xbf16> to vector<8x256xbf16>
    %c4_172 = arith.constant 4 : index
    %c0_173 = arith.constant 0 : index
    %244 = vector.load %arg2[%c4_172, %c0_173] : memref<9x256xbf16, #tpu.memory_space<vmem>>, vector<1x256xbf16>
    %245 = vector.broadcast %244 : vector<1x256xbf16> to vector<8x256xbf16>
    %246 = arith.mulf %243, %245 : vector<8x256xbf16>
    %c32_174 = arith.constant 32 : index
    %c0_175 = arith.constant 0 : index
    %247 = vector.load %arg6[%c32_174, %c0_175] : memref<216x256xbf16, #tpu.memory_space<vmem>>, vector<8x256xbf16>
    tpu.vector_store %arg6[%c32_174, %c0_175], %246 {strides = array<i32>} : memref<216x256xbf16, #tpu.memory_space<vmem>>, vector<8x256xbf16>,
    %248 = vector.extract_strided_slice %222 {offsets = [0, 1], sizes = [8, 256], strides = [1, 1]} : vector<8x512xbf16> to vector<8x256xbf16>
    %c5_176 = arith.constant 5 : index
    %c0_177 = arith.constant 0 : index
    %249 = vector.load %arg2[%c5_176, %c0_177] : memref<9x256xbf16, #tpu.memory_space<vmem>>, vector<1x256xbf16>
    %250 = vector.broadcast %249 : vector<1x256xbf16> to vector<8x256xbf16>
    %251 = arith.mulf %248, %250 : vector<8x256xbf16>
    %c40_178 = arith.constant 40 : index
    %c0_179 = arith.constant 0 : index
    %252 = vector.load %arg6[%c40_178, %c0_179] : memref<216x256xbf16, #tpu.memory_space<vmem>>, vector<8x256xbf16>
    tpu.vector_store %arg6[%c40_178, %c0_179], %251 {strides = array<i32>} : memref<216x256xbf16, #tpu.memory_space<vmem>>, vector<8x256xbf16>,
    %253 = vector.extract_strided_slice %222 {offsets = [0, 15], sizes = [8, 256], strides = [1, 1]} : vector<8x512xbf16> to vector<8x256xbf16>
    %c6_180 = arith.constant 6 : index
    %c0_181 = arith.constant 0 : index
    %254 = vector.load %arg2[%c6_180, %c0_181] : memref<9x256xbf16, #tpu.memory_space<vmem>>, vector<1x256xbf16>
    %255 = vector.broadcast %254 : vector<1x256xbf16> to vector<8x256xbf16>
    %256 = arith.mulf %253, %255 : vector<8x256xbf16>
    %c48_182 = arith.constant 48 : index
    %c0_183 = arith.constant 0 : index
    %257 = vector.load %arg6[%c48_182, %c0_183] : memref<216x256xbf16, #tpu.memory_space<vmem>>, vector<8x256xbf16>
    tpu.vector_store %arg6[%c48_182, %c0_183], %256 {strides = array<i32>} : memref<216x256xbf16, #tpu.memory_space<vmem>>, vector<8x256xbf16>,
    %258 = vector.extract_strided_slice %222 {offsets = [0, 16], sizes = [8, 256], strides = [1, 1]} : vector<8x512xbf16> to vector<8x256xbf16>
    %c7_184 = arith.constant 7 : index
    %c0_185 = arith.constant 0 : index
    %259 = vector.load %arg2[%c7_184, %c0_185] : memref<9x256xbf16, #tpu.memory_space<vmem>>, vector<1x256xbf16>
    %260 = vector.broadcast %259 : vector<1x256xbf16> to vector<8x256xbf16>
    %261 = arith.mulf %258, %260 : vector<8x256xbf16>
    %c56_186 = arith.constant 56 : index
    %c0_187 = arith.constant 0 : index
    %262 = vector.load %arg6[%c56_186, %c0_187] : memref<216x256xbf16, #tpu.memory_space<vmem>>, vector<8x256xbf16>
    tpu.vector_store %arg6[%c56_186, %c0_187], %261 {strides = array<i32>} : memref<216x256xbf16, #tpu.memory_space<vmem>>, vector<8x256xbf16>,
    %263 = vector.extract_strided_slice %222 {offsets = [0, 17], sizes = [8, 256], strides = [1, 1]} : vector<8x512xbf16> to vector<8x256xbf16>
    %c8_188 = arith.constant 8 : index
    %c0_189 = arith.constant 0 : index
    %264 = vector.load %arg2[%c8_188, %c0_189] : memref<9x256xbf16, #tpu.memory_space<vmem>>, vector<1x256xbf16>
    %265 = vector.broadcast %264 : vector<1x256xbf16> to vector<8x256xbf16>
    %266 = arith.mulf %263, %265 : vector<8x256xbf16>
    %c64_190 = arith.constant 64 : index
    %c0_191 = arith.constant 0 : index
    %267 = vector.load %arg6[%c64_190, %c0_191] : memref<216x256xbf16, #tpu.memory_space<vmem>>, vector<8x256xbf16>
    tpu.vector_store %arg6[%c64_190, %c0_191], %266 {strides = array<i32>} : memref<216x256xbf16, #tpu.memory_space<vmem>>, vector<8x256xbf16>,
    %c0_192 = arith.constant 0 : index
    %c0_193 = arith.constant 0 : index
    %268 = vector.load %arg6[%c0_192, %c0_193] : memref<216x256xbf16, #tpu.memory_space<vmem>>, vector<72x256xbf16>
    %c5_194 = arith.constant 5 : index
    %c0_195 = arith.constant 0 : index
    %c0_196 = arith.constant 0 : index
    %269 = vector.load %arg3[%c5_194, %c0_195, %c0_196] : memref<13x8x216xbf16, #tpu.memory_space<vmem>>, vector<1x8x72xbf16>
    %270 = vector.shape_cast %269 : vector<1x8x72xbf16> to vector<8x72xbf16>
    %c5_197 = arith.constant 5 : index
    %c0_198 = arith.constant 0 : index
    %c0_199 = arith.constant 0 : index
    %271 = vector.load %arg4[%c5_197, %c0_198, %c0_199] : memref<13x8x1xf32, #tpu.memory_space<vmem>>, vector<1x8x1xf32>
    %272 = vector.shape_cast %271 : vector<1x8x1xf32> to vector<8x1xf32>
    %cst_200 = arith.constant dense<0.000000e+00> : vector<8x256xf32>
    %273 = tpu.matmul %270, %268, %cst_200 {dimension_numbers = #tpu.dot_dimension_numbers<[1], [0], [0], [1], [0, 0, 1, 1], [], []>} : vector<8x72xbf16>, vector<72x256xbf16>, vector<8x256xf32> -> vector<8x256xf32>
    %274 = vector.broadcast %272 : vector<8x1xf32> to vector<8x256xf32>
    %275 = arith.addf %273, %274 : vector<8x256xf32>
    %cst_201 = arith.constant 0.000000e+00 : f32
    %276 = vector.broadcast %cst_201 : f32 to vector<8x256xf32>
    %277 = arith.maximumf %275, %276 : vector<8x256xf32>
    %278 = arith.truncf %277 : vector<8x256xf32> to vector<8x256xbf16>
    %c8_202 = arith.constant 8 : index
    %c0_203 = arith.constant 0 : index
    %279 = vector.load %arg7[%c8_202, %c0_203] : memref<32x256xbf16, #tpu.memory_space<vmem>>, vector<8x256xbf16>
    tpu.vector_store %arg7[%c8_202, %c0_203], %278 {strides = array<i32>} : memref<32x256xbf16, #tpu.memory_space<vmem>>, vector<8x256xbf16>,
    %c0_204 = arith.constant 0 : index
    %c0_205 = arith.constant 0 : index
    %280 = vector.load %arg7[%c0_204, %c0_205] : memref<32x256xbf16, #tpu.memory_space<vmem>>, vector<16x256xbf16>
    %281 = tpu.concatenate %280, %280 in 1 : vector<16x256xbf16>, vector<16x256xbf16> -> vector<16x512xbf16>
    %282 = vector.extract_strided_slice %281 {offsets = [0, 239], sizes = [16, 256], strides = [1, 1]} : vector<16x512xbf16> to vector<16x256xbf16>
    %c0_206 = arith.constant 0 : index
    %c0_207 = arith.constant 0 : index
    %283 = vector.load %arg2[%c0_206, %c0_207] : memref<9x256xbf16, #tpu.memory_space<vmem>>, vector<1x256xbf16>
    %284 = vector.broadcast %283 : vector<1x256xbf16> to vector<16x256xbf16>
    %285 = arith.mulf %282, %284 : vector<16x256xbf16>
    %c0_208 = arith.constant 0 : index
    %c0_209 = arith.constant 0 : index
    %286 = vector.load %arg6[%c0_208, %c0_209] : memref<216x256xbf16, #tpu.memory_space<vmem>>, vector<16x256xbf16>
    tpu.vector_store %arg6[%c0_208, %c0_209], %285 {strides = array<i32>} : memref<216x256xbf16, #tpu.memory_space<vmem>>, vector<16x256xbf16>,
    %287 = vector.extract_strided_slice %281 {offsets = [0, 240], sizes = [16, 256], strides = [1, 1]} : vector<16x512xbf16> to vector<16x256xbf16>
    %c1_210 = arith.constant 1 : index
    %c0_211 = arith.constant 0 : index
    %288 = vector.load %arg2[%c1_210, %c0_211] : memref<9x256xbf16, #tpu.memory_space<vmem>>, vector<1x256xbf16>
    %289 = vector.broadcast %288 : vector<1x256xbf16> to vector<16x256xbf16>
    %290 = arith.mulf %287, %289 : vector<16x256xbf16>
    %c16_212 = arith.constant 16 : index
    %c0_213 = arith.constant 0 : index
    %291 = vector.load %arg6[%c16_212, %c0_213] : memref<216x256xbf16, #tpu.memory_space<vmem>>, vector<16x256xbf16>
    tpu.vector_store %arg6[%c16_212, %c0_213], %290 {strides = array<i32>} : memref<216x256xbf16, #tpu.memory_space<vmem>>, vector<16x256xbf16>,
    %292 = vector.extract_strided_slice %281 {offsets = [0, 241], sizes = [16, 256], strides = [1, 1]} : vector<16x512xbf16> to vector<16x256xbf16>
    %c2_214 = arith.constant 2 : index
    %c0_215 = arith.constant 0 : index
    %293 = vector.load %arg2[%c2_214, %c0_215] : memref<9x256xbf16, #tpu.memory_space<vmem>>, vector<1x256xbf16>
    %294 = vector.broadcast %293 : vector<1x256xbf16> to vector<16x256xbf16>
    %295 = arith.mulf %292, %294 : vector<16x256xbf16>
    %c32_216 = arith.constant 32 : index
    %c0_217 = arith.constant 0 : index
    %296 = vector.load %arg6[%c32_216, %c0_217] : memref<216x256xbf16, #tpu.memory_space<vmem>>, vector<16x256xbf16>
    tpu.vector_store %arg6[%c32_216, %c0_217], %295 {strides = array<i32>} : memref<216x256xbf16, #tpu.memory_space<vmem>>, vector<16x256xbf16>,
    %297 = vector.extract_strided_slice %281 {offsets = [0, 255], sizes = [16, 256], strides = [1, 1]} : vector<16x512xbf16> to vector<16x256xbf16>
    %c3_218 = arith.constant 3 : index
    %c0_219 = arith.constant 0 : index
    %298 = vector.load %arg2[%c3_218, %c0_219] : memref<9x256xbf16, #tpu.memory_space<vmem>>, vector<1x256xbf16>
    %299 = vector.broadcast %298 : vector<1x256xbf16> to vector<16x256xbf16>
    %300 = arith.mulf %297, %299 : vector<16x256xbf16>
    %c48_220 = arith.constant 48 : index
    %c0_221 = arith.constant 0 : index
    %301 = vector.load %arg6[%c48_220, %c0_221] : memref<216x256xbf16, #tpu.memory_space<vmem>>, vector<16x256xbf16>
    tpu.vector_store %arg6[%c48_220, %c0_221], %300 {strides = array<i32>} : memref<216x256xbf16, #tpu.memory_space<vmem>>, vector<16x256xbf16>,
    %302 = vector.extract_strided_slice %281 {offsets = [0, 0], sizes = [16, 256], strides = [1, 1]} : vector<16x512xbf16> to vector<16x256xbf16>
    %c4_222 = arith.constant 4 : index
    %c0_223 = arith.constant 0 : index
    %303 = vector.load %arg2[%c4_222, %c0_223] : memref<9x256xbf16, #tpu.memory_space<vmem>>, vector<1x256xbf16>
    %304 = vector.broadcast %303 : vector<1x256xbf16> to vector<16x256xbf16>
    %305 = arith.mulf %302, %304 : vector<16x256xbf16>
    %c64_224 = arith.constant 64 : index
    %c0_225 = arith.constant 0 : index
    %306 = vector.load %arg6[%c64_224, %c0_225] : memref<216x256xbf16, #tpu.memory_space<vmem>>, vector<16x256xbf16>
    tpu.vector_store %arg6[%c64_224, %c0_225], %305 {strides = array<i32>} : memref<216x256xbf16, #tpu.memory_space<vmem>>, vector<16x256xbf16>,
    %307 = vector.extract_strided_slice %281 {offsets = [0, 1], sizes = [16, 256], strides = [1, 1]} : vector<16x512xbf16> to vector<16x256xbf16>
    %c5_226 = arith.constant 5 : index
    %c0_227 = arith.constant 0 : index
    %308 = vector.load %arg2[%c5_226, %c0_227] : memref<9x256xbf16, #tpu.memory_space<vmem>>, vector<1x256xbf16>
    %309 = vector.broadcast %308 : vector<1x256xbf16> to vector<16x256xbf16>
    %310 = arith.mulf %307, %309 : vector<16x256xbf16>
    %c80_228 = arith.constant 80 : index
    %c0_229 = arith.constant 0 : index
    %311 = vector.load %arg6[%c80_228, %c0_229] : memref<216x256xbf16, #tpu.memory_space<vmem>>, vector<16x256xbf16>
    tpu.vector_store %arg6[%c80_228, %c0_229], %310 {strides = array<i32>} : memref<216x256xbf16, #tpu.memory_space<vmem>>, vector<16x256xbf16>,
    %312 = vector.extract_strided_slice %281 {offsets = [0, 15], sizes = [16, 256], strides = [1, 1]} : vector<16x512xbf16> to vector<16x256xbf16>
    %c6_230 = arith.constant 6 : index
    %c0_231 = arith.constant 0 : index
    %313 = vector.load %arg2[%c6_230, %c0_231] : memref<9x256xbf16, #tpu.memory_space<vmem>>, vector<1x256xbf16>
    %314 = vector.broadcast %313 : vector<1x256xbf16> to vector<16x256xbf16>
    %315 = arith.mulf %312, %314 : vector<16x256xbf16>
    %c96_232 = arith.constant 96 : index
    %c0_233 = arith.constant 0 : index
    %316 = vector.load %arg6[%c96_232, %c0_233] : memref<216x256xbf16, #tpu.memory_space<vmem>>, vector<16x256xbf16>
    tpu.vector_store %arg6[%c96_232, %c0_233], %315 {strides = array<i32>} : memref<216x256xbf16, #tpu.memory_space<vmem>>, vector<16x256xbf16>,
    %317 = vector.extract_strided_slice %281 {offsets = [0, 16], sizes = [16, 256], strides = [1, 1]} : vector<16x512xbf16> to vector<16x256xbf16>
    %c7_234 = arith.constant 7 : index
    %c0_235 = arith.constant 0 : index
    %318 = vector.load %arg2[%c7_234, %c0_235] : memref<9x256xbf16, #tpu.memory_space<vmem>>, vector<1x256xbf16>
    %319 = vector.broadcast %318 : vector<1x256xbf16> to vector<16x256xbf16>
    %320 = arith.mulf %317, %319 : vector<16x256xbf16>
    %c112_236 = arith.constant 112 : index
    %c0_237 = arith.constant 0 : index
    %321 = vector.load %arg6[%c112_236, %c0_237] : memref<216x256xbf16, #tpu.memory_space<vmem>>, vector<16x256xbf16>
    tpu.vector_store %arg6[%c112_236, %c0_237], %320 {strides = array<i32>} : memref<216x256xbf16, #tpu.memory_space<vmem>>, vector<16x256xbf16>,
    %322 = vector.extract_strided_slice %281 {offsets = [0, 17], sizes = [16, 256], strides = [1, 1]} : vector<16x512xbf16> to vector<16x256xbf16>
    %c8_238 = arith.constant 8 : index
    %c0_239 = arith.constant 0 : index
    %323 = vector.load %arg2[%c8_238, %c0_239] : memref<9x256xbf16, #tpu.memory_space<vmem>>, vector<1x256xbf16>
    %324 = vector.broadcast %323 : vector<1x256xbf16> to vector<16x256xbf16>
    %325 = arith.mulf %322, %324 : vector<16x256xbf16>
    %c128_240 = arith.constant 128 : index
    %c0_241 = arith.constant 0 : index
    %326 = vector.load %arg6[%c128_240, %c0_241] : memref<216x256xbf16, #tpu.memory_space<vmem>>, vector<16x256xbf16>
    tpu.vector_store %arg6[%c128_240, %c0_241], %325 {strides = array<i32>} : memref<216x256xbf16, #tpu.memory_space<vmem>>, vector<16x256xbf16>,
    %c0_242 = arith.constant 0 : index
    %c0_243 = arith.constant 0 : index
    %327 = vector.load %arg6[%c0_242, %c0_243] : memref<216x256xbf16, #tpu.memory_space<vmem>>, vector<144x256xbf16>
    %c6_244 = arith.constant 6 : index
    %c0_245 = arith.constant 0 : index
    %c0_246 = arith.constant 0 : index
    %328 = vector.load %arg3[%c6_244, %c0_245, %c0_246] : memref<13x8x216xbf16, #tpu.memory_space<vmem>>, vector<1x8x144xbf16>
    %329 = vector.shape_cast %328 : vector<1x8x144xbf16> to vector<8x144xbf16>
    %c6_247 = arith.constant 6 : index
    %c0_248 = arith.constant 0 : index
    %c0_249 = arith.constant 0 : index
    %330 = vector.load %arg4[%c6_247, %c0_248, %c0_249] : memref<13x8x1xf32, #tpu.memory_space<vmem>>, vector<1x8x1xf32>
    %331 = vector.shape_cast %330 : vector<1x8x1xf32> to vector<8x1xf32>
    %cst_250 = arith.constant dense<0.000000e+00> : vector<8x256xf32>
    %332 = tpu.matmul %329, %327, %cst_250 {dimension_numbers = #tpu.dot_dimension_numbers<[1], [0], [0], [1], [0, 0, 1, 1], [], []>} : vector<8x144xbf16>, vector<144x256xbf16>, vector<8x256xf32> -> vector<8x256xf32>
    %333 = vector.broadcast %331 : vector<8x1xf32> to vector<8x256xf32>
    %334 = arith.addf %332, %333 : vector<8x256xf32>
    %cst_251 = arith.constant 0.000000e+00 : f32
    %335 = vector.broadcast %cst_251 : f32 to vector<8x256xf32>
    %336 = arith.maximumf %334, %335 : vector<8x256xf32>
    %337 = arith.truncf %336 : vector<8x256xf32> to vector<8x256xbf16>
    %c16_252 = arith.constant 16 : index
    %c0_253 = arith.constant 0 : index
    %338 = vector.load %arg7[%c16_252, %c0_253] : memref<32x256xbf16, #tpu.memory_space<vmem>>, vector<8x256xbf16>
    tpu.vector_store %arg7[%c16_252, %c0_253], %337 {strides = array<i32>} : memref<32x256xbf16, #tpu.memory_space<vmem>>, vector<8x256xbf16>,
    %c0_254 = arith.constant 0 : index
    %c0_255 = arith.constant 0 : index
    %339 = vector.load %arg7[%c0_254, %c0_255] : memref<32x256xbf16, #tpu.memory_space<vmem>>, vector<24x256xbf16>
    %340 = tpu.concatenate %339, %339 in 1 : vector<24x256xbf16>, vector<24x256xbf16> -> vector<24x512xbf16>
    %341 = vector.extract_strided_slice %340 {offsets = [0, 239], sizes = [24, 256], strides = [1, 1]} : vector<24x512xbf16> to vector<24x256xbf16>
    %c0_256 = arith.constant 0 : index
    %c0_257 = arith.constant 0 : index
    %342 = vector.load %arg2[%c0_256, %c0_257] : memref<9x256xbf16, #tpu.memory_space<vmem>>, vector<1x256xbf16>
    %343 = vector.broadcast %342 : vector<1x256xbf16> to vector<24x256xbf16>
    %344 = arith.mulf %341, %343 : vector<24x256xbf16>
    %c0_258 = arith.constant 0 : index
    %c0_259 = arith.constant 0 : index
    %345 = vector.load %arg6[%c0_258, %c0_259] : memref<216x256xbf16, #tpu.memory_space<vmem>>, vector<24x256xbf16>
    tpu.vector_store %arg6[%c0_258, %c0_259], %344 {strides = array<i32>} : memref<216x256xbf16, #tpu.memory_space<vmem>>, vector<24x256xbf16>,
    %346 = vector.extract_strided_slice %340 {offsets = [0, 240], sizes = [24, 256], strides = [1, 1]} : vector<24x512xbf16> to vector<24x256xbf16>
    %c1_260 = arith.constant 1 : index
    %c0_261 = arith.constant 0 : index
    %347 = vector.load %arg2[%c1_260, %c0_261] : memref<9x256xbf16, #tpu.memory_space<vmem>>, vector<1x256xbf16>
    %348 = vector.broadcast %347 : vector<1x256xbf16> to vector<24x256xbf16>
    %349 = arith.mulf %346, %348 : vector<24x256xbf16>
    %c24_262 = arith.constant 24 : index
    %c0_263 = arith.constant 0 : index
    %350 = vector.load %arg6[%c24_262, %c0_263] : memref<216x256xbf16, #tpu.memory_space<vmem>>, vector<24x256xbf16>
    tpu.vector_store %arg6[%c24_262, %c0_263], %349 {strides = array<i32>} : memref<216x256xbf16, #tpu.memory_space<vmem>>, vector<24x256xbf16>,
    %351 = vector.extract_strided_slice %340 {offsets = [0, 241], sizes = [24, 256], strides = [1, 1]} : vector<24x512xbf16> to vector<24x256xbf16>
    %c2_264 = arith.constant 2 : index
    %c0_265 = arith.constant 0 : index
    %352 = vector.load %arg2[%c2_264, %c0_265] : memref<9x256xbf16, #tpu.memory_space<vmem>>, vector<1x256xbf16>
    %353 = vector.broadcast %352 : vector<1x256xbf16> to vector<24x256xbf16>
    %354 = arith.mulf %351, %353 : vector<24x256xbf16>
    %c48_266 = arith.constant 48 : index
    %c0_267 = arith.constant 0 : index
    %355 = vector.load %arg6[%c48_266, %c0_267] : memref<216x256xbf16, #tpu.memory_space<vmem>>, vector<24x256xbf16>
    tpu.vector_store %arg6[%c48_266, %c0_267], %354 {strides = array<i32>} : memref<216x256xbf16, #tpu.memory_space<vmem>>, vector<24x256xbf16>,
    %356 = vector.extract_strided_slice %340 {offsets = [0, 255], sizes = [24, 256], strides = [1, 1]} : vector<24x512xbf16> to vector<24x256xbf16>
    %c3_268 = arith.constant 3 : index
    %c0_269 = arith.constant 0 : index
    %357 = vector.load %arg2[%c3_268, %c0_269] : memref<9x256xbf16, #tpu.memory_space<vmem>>, vector<1x256xbf16>
    %358 = vector.broadcast %357 : vector<1x256xbf16> to vector<24x256xbf16>
    %359 = arith.mulf %356, %358 : vector<24x256xbf16>
    %c72_270 = arith.constant 72 : index
    %c0_271 = arith.constant 0 : index
    %360 = vector.load %arg6[%c72_270, %c0_271] : memref<216x256xbf16, #tpu.memory_space<vmem>>, vector<24x256xbf16>
    tpu.vector_store %arg6[%c72_270, %c0_271], %359 {strides = array<i32>} : memref<216x256xbf16, #tpu.memory_space<vmem>>, vector<24x256xbf16>,
    %361 = vector.extract_strided_slice %340 {offsets = [0, 0], sizes = [24, 256], strides = [1, 1]} : vector<24x512xbf16> to vector<24x256xbf16>
    %c4_272 = arith.constant 4 : index
    %c0_273 = arith.constant 0 : index
    %362 = vector.load %arg2[%c4_272, %c0_273] : memref<9x256xbf16, #tpu.memory_space<vmem>>, vector<1x256xbf16>
    %363 = vector.broadcast %362 : vector<1x256xbf16> to vector<24x256xbf16>
    %364 = arith.mulf %361, %363 : vector<24x256xbf16>
    %c96_274 = arith.constant 96 : index
    %c0_275 = arith.constant 0 : index
    %365 = vector.load %arg6[%c96_274, %c0_275] : memref<216x256xbf16, #tpu.memory_space<vmem>>, vector<24x256xbf16>
    tpu.vector_store %arg6[%c96_274, %c0_275], %364 {strides = array<i32>} : memref<216x256xbf16, #tpu.memory_space<vmem>>, vector<24x256xbf16>,
    %366 = vector.extract_strided_slice %340 {offsets = [0, 1], sizes = [24, 256], strides = [1, 1]} : vector<24x512xbf16> to vector<24x256xbf16>
    %c5_276 = arith.constant 5 : index
    %c0_277 = arith.constant 0 : index
    %367 = vector.load %arg2[%c5_276, %c0_277] : memref<9x256xbf16, #tpu.memory_space<vmem>>, vector<1x256xbf16>
    %368 = vector.broadcast %367 : vector<1x256xbf16> to vector<24x256xbf16>
    %369 = arith.mulf %366, %368 : vector<24x256xbf16>
    %c120_278 = arith.constant 120 : index
    %c0_279 = arith.constant 0 : index
    %370 = vector.load %arg6[%c120_278, %c0_279] : memref<216x256xbf16, #tpu.memory_space<vmem>>, vector<24x256xbf16>
    tpu.vector_store %arg6[%c120_278, %c0_279], %369 {strides = array<i32>} : memref<216x256xbf16, #tpu.memory_space<vmem>>, vector<24x256xbf16>,
    %371 = vector.extract_strided_slice %340 {offsets = [0, 15], sizes = [24, 256], strides = [1, 1]} : vector<24x512xbf16> to vector<24x256xbf16>
    %c6_280 = arith.constant 6 : index
    %c0_281 = arith.constant 0 : index
    %372 = vector.load %arg2[%c6_280, %c0_281] : memref<9x256xbf16, #tpu.memory_space<vmem>>, vector<1x256xbf16>
    %373 = vector.broadcast %372 : vector<1x256xbf16> to vector<24x256xbf16>
    %374 = arith.mulf %371, %373 : vector<24x256xbf16>
    %c144_282 = arith.constant 144 : index
    %c0_283 = arith.constant 0 : index
    %375 = vector.load %arg6[%c144_282, %c0_283] : memref<216x256xbf16, #tpu.memory_space<vmem>>, vector<24x256xbf16>
    tpu.vector_store %arg6[%c144_282, %c0_283], %374 {strides = array<i32>} : memref<216x256xbf16, #tpu.memory_space<vmem>>, vector<24x256xbf16>,
    %376 = vector.extract_strided_slice %340 {offsets = [0, 16], sizes = [24, 256], strides = [1, 1]} : vector<24x512xbf16> to vector<24x256xbf16>
    %c7_284 = arith.constant 7 : index
    %c0_285 = arith.constant 0 : index
    %377 = vector.load %arg2[%c7_284, %c0_285] : memref<9x256xbf16, #tpu.memory_space<vmem>>, vector<1x256xbf16>
    %378 = vector.broadcast %377 : vector<1x256xbf16> to vector<24x256xbf16>
    %379 = arith.mulf %376, %378 : vector<24x256xbf16>
    %c168_286 = arith.constant 168 : index
    %c0_287 = arith.constant 0 : index
    %380 = vector.load %arg6[%c168_286, %c0_287] : memref<216x256xbf16, #tpu.memory_space<vmem>>, vector<24x256xbf16>
    tpu.vector_store %arg6[%c168_286, %c0_287], %379 {strides = array<i32>} : memref<216x256xbf16, #tpu.memory_space<vmem>>, vector<24x256xbf16>,
    %381 = vector.extract_strided_slice %340 {offsets = [0, 17], sizes = [24, 256], strides = [1, 1]} : vector<24x512xbf16> to vector<24x256xbf16>
    %c8_288 = arith.constant 8 : index
    %c0_289 = arith.constant 0 : index
    %382 = vector.load %arg2[%c8_288, %c0_289] : memref<9x256xbf16, #tpu.memory_space<vmem>>, vector<1x256xbf16>
    %383 = vector.broadcast %382 : vector<1x256xbf16> to vector<24x256xbf16>
    %384 = arith.mulf %381, %383 : vector<24x256xbf16>
    %c192_290 = arith.constant 192 : index
    %c0_291 = arith.constant 0 : index
    %385 = vector.load %arg6[%c192_290, %c0_291] : memref<216x256xbf16, #tpu.memory_space<vmem>>, vector<24x256xbf16>
    tpu.vector_store %arg6[%c192_290, %c0_291], %384 {strides = array<i32>} : memref<216x256xbf16, #tpu.memory_space<vmem>>, vector<24x256xbf16>,
    %c0_292 = arith.constant 0 : index
    %c0_293 = arith.constant 0 : index
    %386 = vector.load %arg6[%c0_292, %c0_293] : memref<216x256xbf16, #tpu.memory_space<vmem>>, vector<216x256xbf16>
    %c7_294 = arith.constant 7 : index
    %c0_295 = arith.constant 0 : index
    %c0_296 = arith.constant 0 : index
    %387 = vector.load %arg3[%c7_294, %c0_295, %c0_296] : memref<13x8x216xbf16, #tpu.memory_space<vmem>>, vector<1x8x216xbf16>
    %388 = vector.shape_cast %387 : vector<1x8x216xbf16> to vector<8x216xbf16>
    %c7_297 = arith.constant 7 : index
    %c0_298 = arith.constant 0 : index
    %c0_299 = arith.constant 0 : index
    %389 = vector.load %arg4[%c7_297, %c0_298, %c0_299] : memref<13x8x1xf32, #tpu.memory_space<vmem>>, vector<1x8x1xf32>
    %390 = vector.shape_cast %389 : vector<1x8x1xf32> to vector<8x1xf32>
    %cst_300 = arith.constant dense<0.000000e+00> : vector<8x256xf32>
    %391 = tpu.matmul %388, %386, %cst_300 {dimension_numbers = #tpu.dot_dimension_numbers<[1], [0], [0], [1], [0, 0, 1, 1], [], []>} : vector<8x216xbf16>, vector<216x256xbf16>, vector<8x256xf32> -> vector<8x256xf32>
    %392 = vector.broadcast %390 : vector<8x1xf32> to vector<8x256xf32>
    %393 = arith.addf %391, %392 : vector<8x256xf32>
    %cst_301 = arith.constant 0.000000e+00 : f32
    %394 = vector.broadcast %cst_301 : f32 to vector<8x256xf32>
    %395 = arith.maximumf %393, %394 : vector<8x256xf32>
    %396 = arith.truncf %395 : vector<8x256xf32> to vector<8x256xbf16>
    %c24_302 = arith.constant 24 : index
    %c0_303 = arith.constant 0 : index
    %397 = vector.load %arg7[%c24_302, %c0_303] : memref<32x256xbf16, #tpu.memory_space<vmem>>, vector<8x256xbf16>
    tpu.vector_store %arg7[%c24_302, %c0_303], %396 {strides = array<i32>} : memref<32x256xbf16, #tpu.memory_space<vmem>>, vector<8x256xbf16>,
    %c0_304 = arith.constant 0 : index
    %c0_305 = arith.constant 0 : index
    %398 = vector.load %arg7[%c0_304, %c0_305] : memref<32x256xbf16, #tpu.memory_space<vmem>>, vector<32x256xbf16>
    %c8_306 = arith.constant 8 : index
    %c0_307 = arith.constant 0 : index
    %c0_308 = arith.constant 0 : index
    %399 = vector.load %arg3[%c8_306, %c0_307, %c0_308] : memref<13x8x216xbf16, #tpu.memory_space<vmem>>, vector<1x8x32xbf16>
    %400 = vector.shape_cast %399 : vector<1x8x32xbf16> to vector<8x32xbf16>
    %c8_309 = arith.constant 8 : index
    %c0_310 = arith.constant 0 : index
    %c0_311 = arith.constant 0 : index
    %401 = vector.load %arg4[%c8_309, %c0_310, %c0_311] : memref<13x8x1xf32, #tpu.memory_space<vmem>>, vector<1x8x1xf32>
    %402 = vector.shape_cast %401 : vector<1x8x1xf32> to vector<8x1xf32>
    %cst_312 = arith.constant dense<0.000000e+00> : vector<8x256xf32>
    %403 = tpu.matmul %400, %398, %cst_312 {dimension_numbers = #tpu.dot_dimension_numbers<[1], [0], [0], [1], [0, 0, 1, 1], [], []>} : vector<8x32xbf16>, vector<32x256xbf16>, vector<8x256xf32> -> vector<8x256xf32>
    %404 = vector.broadcast %402 : vector<8x1xf32> to vector<8x256xf32>
    %405 = arith.addf %403, %404 : vector<8x256xf32>
    %406 = arith.addf %218, %405 : vector<8x256xf32>
    %407 = arith.truncf %406 : vector<8x256xf32> to vector<8x256xbf16>
    %c0_313 = arith.constant 0 : index
    %c0_314 = arith.constant 0 : index
    %408 = vector.load %arg7[%c0_313, %c0_314] : memref<32x256xbf16, #tpu.memory_space<vmem>>, vector<8x256xbf16>
    tpu.vector_store %arg7[%c0_313, %c0_314], %407 {strides = array<i32>} : memref<32x256xbf16, #tpu.memory_space<vmem>>, vector<8x256xbf16>,
    %c0_315 = arith.constant 0 : index
    %c0_316 = arith.constant 0 : index
    %409 = vector.load %arg7[%c0_315, %c0_316] : memref<32x256xbf16, #tpu.memory_space<vmem>>, vector<8x256xbf16>
    %410 = tpu.concatenate %409, %409 in 1 : vector<8x256xbf16>, vector<8x256xbf16> -> vector<8x512xbf16>
    %411 = vector.extract_strided_slice %410 {offsets = [0, 239], sizes = [8, 256], strides = [1, 1]} : vector<8x512xbf16> to vector<8x256xbf16>
    %c0_317 = arith.constant 0 : index
    %c0_318 = arith.constant 0 : index
    %412 = vector.load %arg2[%c0_317, %c0_318] : memref<9x256xbf16, #tpu.memory_space<vmem>>, vector<1x256xbf16>
    %413 = vector.broadcast %412 : vector<1x256xbf16> to vector<8x256xbf16>
    %414 = arith.mulf %411, %413 : vector<8x256xbf16>
    %c0_319 = arith.constant 0 : index
    %c0_320 = arith.constant 0 : index
    %415 = vector.load %arg6[%c0_319, %c0_320] : memref<216x256xbf16, #tpu.memory_space<vmem>>, vector<8x256xbf16>
    tpu.vector_store %arg6[%c0_319, %c0_320], %414 {strides = array<i32>} : memref<216x256xbf16, #tpu.memory_space<vmem>>, vector<8x256xbf16>,
    %416 = vector.extract_strided_slice %410 {offsets = [0, 240], sizes = [8, 256], strides = [1, 1]} : vector<8x512xbf16> to vector<8x256xbf16>
    %c1_321 = arith.constant 1 : index
    %c0_322 = arith.constant 0 : index
    %417 = vector.load %arg2[%c1_321, %c0_322] : memref<9x256xbf16, #tpu.memory_space<vmem>>, vector<1x256xbf16>
    %418 = vector.broadcast %417 : vector<1x256xbf16> to vector<8x256xbf16>
    %419 = arith.mulf %416, %418 : vector<8x256xbf16>
    %c8_323 = arith.constant 8 : index
    %c0_324 = arith.constant 0 : index
    %420 = vector.load %arg6[%c8_323, %c0_324] : memref<216x256xbf16, #tpu.memory_space<vmem>>, vector<8x256xbf16>
    tpu.vector_store %arg6[%c8_323, %c0_324], %419 {strides = array<i32>} : memref<216x256xbf16, #tpu.memory_space<vmem>>, vector<8x256xbf16>,
    %421 = vector.extract_strided_slice %410 {offsets = [0, 241], sizes = [8, 256], strides = [1, 1]} : vector<8x512xbf16> to vector<8x256xbf16>
    %c2_325 = arith.constant 2 : index
    %c0_326 = arith.constant 0 : index
    %422 = vector.load %arg2[%c2_325, %c0_326] : memref<9x256xbf16, #tpu.memory_space<vmem>>, vector<1x256xbf16>
    %423 = vector.broadcast %422 : vector<1x256xbf16> to vector<8x256xbf16>
    %424 = arith.mulf %421, %423 : vector<8x256xbf16>
    %c16_327 = arith.constant 16 : index
    %c0_328 = arith.constant 0 : index
    %425 = vector.load %arg6[%c16_327, %c0_328] : memref<216x256xbf16, #tpu.memory_space<vmem>>, vector<8x256xbf16>
    tpu.vector_store %arg6[%c16_327, %c0_328], %424 {strides = array<i32>} : memref<216x256xbf16, #tpu.memory_space<vmem>>, vector<8x256xbf16>,
    %426 = vector.extract_strided_slice %410 {offsets = [0, 255], sizes = [8, 256], strides = [1, 1]} : vector<8x512xbf16> to vector<8x256xbf16>
    %c3_329 = arith.constant 3 : index
    %c0_330 = arith.constant 0 : index
    %427 = vector.load %arg2[%c3_329, %c0_330] : memref<9x256xbf16, #tpu.memory_space<vmem>>, vector<1x256xbf16>
    %428 = vector.broadcast %427 : vector<1x256xbf16> to vector<8x256xbf16>
    %429 = arith.mulf %426, %428 : vector<8x256xbf16>
    %c24_331 = arith.constant 24 : index
    %c0_332 = arith.constant 0 : index
    %430 = vector.load %arg6[%c24_331, %c0_332] : memref<216x256xbf16, #tpu.memory_space<vmem>>, vector<8x256xbf16>
    tpu.vector_store %arg6[%c24_331, %c0_332], %429 {strides = array<i32>} : memref<216x256xbf16, #tpu.memory_space<vmem>>, vector<8x256xbf16>,
    %431 = vector.extract_strided_slice %410 {offsets = [0, 0], sizes = [8, 256], strides = [1, 1]} : vector<8x512xbf16> to vector<8x256xbf16>
    %c4_333 = arith.constant 4 : index
    %c0_334 = arith.constant 0 : index
    %432 = vector.load %arg2[%c4_333, %c0_334] : memref<9x256xbf16, #tpu.memory_space<vmem>>, vector<1x256xbf16>
    %433 = vector.broadcast %432 : vector<1x256xbf16> to vector<8x256xbf16>
    %434 = arith.mulf %431, %433 : vector<8x256xbf16>
    %c32_335 = arith.constant 32 : index
    %c0_336 = arith.constant 0 : index
    %435 = vector.load %arg6[%c32_335, %c0_336] : memref<216x256xbf16, #tpu.memory_space<vmem>>, vector<8x256xbf16>
    tpu.vector_store %arg6[%c32_335, %c0_336], %434 {strides = array<i32>} : memref<216x256xbf16, #tpu.memory_space<vmem>>, vector<8x256xbf16>,
    %436 = vector.extract_strided_slice %410 {offsets = [0, 1], sizes = [8, 256], strides = [1, 1]} : vector<8x512xbf16> to vector<8x256xbf16>
    %c5_337 = arith.constant 5 : index
    %c0_338 = arith.constant 0 : index
    %437 = vector.load %arg2[%c5_337, %c0_338] : memref<9x256xbf16, #tpu.memory_space<vmem>>, vector<1x256xbf16>
    %438 = vector.broadcast %437 : vector<1x256xbf16> to vector<8x256xbf16>
    %439 = arith.mulf %436, %438 : vector<8x256xbf16>
    %c40_339 = arith.constant 40 : index
    %c0_340 = arith.constant 0 : index
    %440 = vector.load %arg6[%c40_339, %c0_340] : memref<216x256xbf16, #tpu.memory_space<vmem>>, vector<8x256xbf16>
    tpu.vector_store %arg6[%c40_339, %c0_340], %439 {strides = array<i32>} : memref<216x256xbf16, #tpu.memory_space<vmem>>, vector<8x256xbf16>,
    %441 = vector.extract_strided_slice %410 {offsets = [0, 15], sizes = [8, 256], strides = [1, 1]} : vector<8x512xbf16> to vector<8x256xbf16>
    %c6_341 = arith.constant 6 : index
    %c0_342 = arith.constant 0 : index
    %442 = vector.load %arg2[%c6_341, %c0_342] : memref<9x256xbf16, #tpu.memory_space<vmem>>, vector<1x256xbf16>
    %443 = vector.broadcast %442 : vector<1x256xbf16> to vector<8x256xbf16>
    %444 = arith.mulf %441, %443 : vector<8x256xbf16>
    %c48_343 = arith.constant 48 : index
    %c0_344 = arith.constant 0 : index
    %445 = vector.load %arg6[%c48_343, %c0_344] : memref<216x256xbf16, #tpu.memory_space<vmem>>, vector<8x256xbf16>
    tpu.vector_store %arg6[%c48_343, %c0_344], %444 {strides = array<i32>} : memref<216x256xbf16, #tpu.memory_space<vmem>>, vector<8x256xbf16>,
    %446 = vector.extract_strided_slice %410 {offsets = [0, 16], sizes = [8, 256], strides = [1, 1]} : vector<8x512xbf16> to vector<8x256xbf16>
    %c7_345 = arith.constant 7 : index
    %c0_346 = arith.constant 0 : index
    %447 = vector.load %arg2[%c7_345, %c0_346] : memref<9x256xbf16, #tpu.memory_space<vmem>>, vector<1x256xbf16>
    %448 = vector.broadcast %447 : vector<1x256xbf16> to vector<8x256xbf16>
    %449 = arith.mulf %446, %448 : vector<8x256xbf16>
    %c56_347 = arith.constant 56 : index
    %c0_348 = arith.constant 0 : index
    %450 = vector.load %arg6[%c56_347, %c0_348] : memref<216x256xbf16, #tpu.memory_space<vmem>>, vector<8x256xbf16>
    tpu.vector_store %arg6[%c56_347, %c0_348], %449 {strides = array<i32>} : memref<216x256xbf16, #tpu.memory_space<vmem>>, vector<8x256xbf16>,
    %451 = vector.extract_strided_slice %410 {offsets = [0, 17], sizes = [8, 256], strides = [1, 1]} : vector<8x512xbf16> to vector<8x256xbf16>
    %c8_349 = arith.constant 8 : index
    %c0_350 = arith.constant 0 : index
    %452 = vector.load %arg2[%c8_349, %c0_350] : memref<9x256xbf16, #tpu.memory_space<vmem>>, vector<1x256xbf16>
    %453 = vector.broadcast %452 : vector<1x256xbf16> to vector<8x256xbf16>
    %454 = arith.mulf %451, %453 : vector<8x256xbf16>
    %c64_351 = arith.constant 64 : index
    %c0_352 = arith.constant 0 : index
    %455 = vector.load %arg6[%c64_351, %c0_352] : memref<216x256xbf16, #tpu.memory_space<vmem>>, vector<8x256xbf16>
    tpu.vector_store %arg6[%c64_351, %c0_352], %454 {strides = array<i32>} : memref<216x256xbf16, #tpu.memory_space<vmem>>, vector<8x256xbf16>,
    %c0_353 = arith.constant 0 : index
    %c0_354 = arith.constant 0 : index
    %456 = vector.load %arg6[%c0_353, %c0_354] : memref<216x256xbf16, #tpu.memory_space<vmem>>, vector<72x256xbf16>
    %c9 = arith.constant 9 : index
    %c0_355 = arith.constant 0 : index
    %c0_356 = arith.constant 0 : index
    %457 = vector.load %arg3[%c9, %c0_355, %c0_356] : memref<13x8x216xbf16, #tpu.memory_space<vmem>>, vector<1x8x72xbf16>
    %458 = vector.shape_cast %457 : vector<1x8x72xbf16> to vector<8x72xbf16>
    %c9_357 = arith.constant 9 : index
    %c0_358 = arith.constant 0 : index
    %c0_359 = arith.constant 0 : index
    %459 = vector.load %arg4[%c9_357, %c0_358, %c0_359] : memref<13x8x1xf32, #tpu.memory_space<vmem>>, vector<1x8x1xf32>
    %460 = vector.shape_cast %459 : vector<1x8x1xf32> to vector<8x1xf32>
    %cst_360 = arith.constant dense<0.000000e+00> : vector<8x256xf32>
    %461 = tpu.matmul %458, %456, %cst_360 {dimension_numbers = #tpu.dot_dimension_numbers<[1], [0], [0], [1], [0, 0, 1, 1], [], []>} : vector<8x72xbf16>, vector<72x256xbf16>, vector<8x256xf32> -> vector<8x256xf32>
    %462 = vector.broadcast %460 : vector<8x1xf32> to vector<8x256xf32>
    %463 = arith.addf %461, %462 : vector<8x256xf32>
    %cst_361 = arith.constant 0.000000e+00 : f32
    %464 = vector.broadcast %cst_361 : f32 to vector<8x256xf32>
    %465 = arith.maximumf %463, %464 : vector<8x256xf32>
    %466 = arith.truncf %465 : vector<8x256xf32> to vector<8x256xbf16>
    %c8_362 = arith.constant 8 : index
    %c0_363 = arith.constant 0 : index
    %467 = vector.load %arg7[%c8_362, %c0_363] : memref<32x256xbf16, #tpu.memory_space<vmem>>, vector<8x256xbf16>
    tpu.vector_store %arg7[%c8_362, %c0_363], %466 {strides = array<i32>} : memref<32x256xbf16, #tpu.memory_space<vmem>>, vector<8x256xbf16>,
    %c0_364 = arith.constant 0 : index
    %c0_365 = arith.constant 0 : index
    %468 = vector.load %arg7[%c0_364, %c0_365] : memref<32x256xbf16, #tpu.memory_space<vmem>>, vector<16x256xbf16>
    %469 = tpu.concatenate %468, %468 in 1 : vector<16x256xbf16>, vector<16x256xbf16> -> vector<16x512xbf16>
    %470 = vector.extract_strided_slice %469 {offsets = [0, 239], sizes = [16, 256], strides = [1, 1]} : vector<16x512xbf16> to vector<16x256xbf16>
    %c0_366 = arith.constant 0 : index
    %c0_367 = arith.constant 0 : index
    %471 = vector.load %arg2[%c0_366, %c0_367] : memref<9x256xbf16, #tpu.memory_space<vmem>>, vector<1x256xbf16>
    %472 = vector.broadcast %471 : vector<1x256xbf16> to vector<16x256xbf16>
    %473 = arith.mulf %470, %472 : vector<16x256xbf16>
    %c0_368 = arith.constant 0 : index
    %c0_369 = arith.constant 0 : index
    %474 = vector.load %arg6[%c0_368, %c0_369] : memref<216x256xbf16, #tpu.memory_space<vmem>>, vector<16x256xbf16>
    tpu.vector_store %arg6[%c0_368, %c0_369], %473 {strides = array<i32>} : memref<216x256xbf16, #tpu.memory_space<vmem>>, vector<16x256xbf16>,
    %475 = vector.extract_strided_slice %469 {offsets = [0, 240], sizes = [16, 256], strides = [1, 1]} : vector<16x512xbf16> to vector<16x256xbf16>
    %c1_370 = arith.constant 1 : index
    %c0_371 = arith.constant 0 : index
    %476 = vector.load %arg2[%c1_370, %c0_371] : memref<9x256xbf16, #tpu.memory_space<vmem>>, vector<1x256xbf16>
    %477 = vector.broadcast %476 : vector<1x256xbf16> to vector<16x256xbf16>
    %478 = arith.mulf %475, %477 : vector<16x256xbf16>
    %c16_372 = arith.constant 16 : index
    %c0_373 = arith.constant 0 : index
    %479 = vector.load %arg6[%c16_372, %c0_373] : memref<216x256xbf16, #tpu.memory_space<vmem>>, vector<16x256xbf16>
    tpu.vector_store %arg6[%c16_372, %c0_373], %478 {strides = array<i32>} : memref<216x256xbf16, #tpu.memory_space<vmem>>, vector<16x256xbf16>,
    %480 = vector.extract_strided_slice %469 {offsets = [0, 241], sizes = [16, 256], strides = [1, 1]} : vector<16x512xbf16> to vector<16x256xbf16>
    %c2_374 = arith.constant 2 : index
    %c0_375 = arith.constant 0 : index
    %481 = vector.load %arg2[%c2_374, %c0_375] : memref<9x256xbf16, #tpu.memory_space<vmem>>, vector<1x256xbf16>
    %482 = vector.broadcast %481 : vector<1x256xbf16> to vector<16x256xbf16>
    %483 = arith.mulf %480, %482 : vector<16x256xbf16>
    %c32_376 = arith.constant 32 : index
    %c0_377 = arith.constant 0 : index
    %484 = vector.load %arg6[%c32_376, %c0_377] : memref<216x256xbf16, #tpu.memory_space<vmem>>, vector<16x256xbf16>
    tpu.vector_store %arg6[%c32_376, %c0_377], %483 {strides = array<i32>} : memref<216x256xbf16, #tpu.memory_space<vmem>>, vector<16x256xbf16>,
    %485 = vector.extract_strided_slice %469 {offsets = [0, 255], sizes = [16, 256], strides = [1, 1]} : vector<16x512xbf16> to vector<16x256xbf16>
    %c3_378 = arith.constant 3 : index
    %c0_379 = arith.constant 0 : index
    %486 = vector.load %arg2[%c3_378, %c0_379] : memref<9x256xbf16, #tpu.memory_space<vmem>>, vector<1x256xbf16>
    %487 = vector.broadcast %486 : vector<1x256xbf16> to vector<16x256xbf16>
    %488 = arith.mulf %485, %487 : vector<16x256xbf16>
    %c48_380 = arith.constant 48 : index
    %c0_381 = arith.constant 0 : index
    %489 = vector.load %arg6[%c48_380, %c0_381] : memref<216x256xbf16, #tpu.memory_space<vmem>>, vector<16x256xbf16>
    tpu.vector_store %arg6[%c48_380, %c0_381], %488 {strides = array<i32>} : memref<216x256xbf16, #tpu.memory_space<vmem>>, vector<16x256xbf16>,
    %490 = vector.extract_strided_slice %469 {offsets = [0, 0], sizes = [16, 256], strides = [1, 1]} : vector<16x512xbf16> to vector<16x256xbf16>
    %c4_382 = arith.constant 4 : index
    %c0_383 = arith.constant 0 : index
    %491 = vector.load %arg2[%c4_382, %c0_383] : memref<9x256xbf16, #tpu.memory_space<vmem>>, vector<1x256xbf16>
    %492 = vector.broadcast %491 : vector<1x256xbf16> to vector<16x256xbf16>
    %493 = arith.mulf %490, %492 : vector<16x256xbf16>
    %c64_384 = arith.constant 64 : index
    %c0_385 = arith.constant 0 : index
    %494 = vector.load %arg6[%c64_384, %c0_385] : memref<216x256xbf16, #tpu.memory_space<vmem>>, vector<16x256xbf16>
    tpu.vector_store %arg6[%c64_384, %c0_385], %493 {strides = array<i32>} : memref<216x256xbf16, #tpu.memory_space<vmem>>, vector<16x256xbf16>,
    %495 = vector.extract_strided_slice %469 {offsets = [0, 1], sizes = [16, 256], strides = [1, 1]} : vector<16x512xbf16> to vector<16x256xbf16>
    %c5_386 = arith.constant 5 : index
    %c0_387 = arith.constant 0 : index
    %496 = vector.load %arg2[%c5_386, %c0_387] : memref<9x256xbf16, #tpu.memory_space<vmem>>, vector<1x256xbf16>
    %497 = vector.broadcast %496 : vector<1x256xbf16> to vector<16x256xbf16>
    %498 = arith.mulf %495, %497 : vector<16x256xbf16>
    %c80_388 = arith.constant 80 : index
    %c0_389 = arith.constant 0 : index
    %499 = vector.load %arg6[%c80_388, %c0_389] : memref<216x256xbf16, #tpu.memory_space<vmem>>, vector<16x256xbf16>
    tpu.vector_store %arg6[%c80_388, %c0_389], %498 {strides = array<i32>} : memref<216x256xbf16, #tpu.memory_space<vmem>>, vector<16x256xbf16>,
    %500 = vector.extract_strided_slice %469 {offsets = [0, 15], sizes = [16, 256], strides = [1, 1]} : vector<16x512xbf16> to vector<16x256xbf16>
    %c6_390 = arith.constant 6 : index
    %c0_391 = arith.constant 0 : index
    %501 = vector.load %arg2[%c6_390, %c0_391] : memref<9x256xbf16, #tpu.memory_space<vmem>>, vector<1x256xbf16>
    %502 = vector.broadcast %501 : vector<1x256xbf16> to vector<16x256xbf16>
    %503 = arith.mulf %500, %502 : vector<16x256xbf16>
    %c96_392 = arith.constant 96 : index
    %c0_393 = arith.constant 0 : index
    %504 = vector.load %arg6[%c96_392, %c0_393] : memref<216x256xbf16, #tpu.memory_space<vmem>>, vector<16x256xbf16>
    tpu.vector_store %arg6[%c96_392, %c0_393], %503 {strides = array<i32>} : memref<216x256xbf16, #tpu.memory_space<vmem>>, vector<16x256xbf16>,
    %505 = vector.extract_strided_slice %469 {offsets = [0, 16], sizes = [16, 256], strides = [1, 1]} : vector<16x512xbf16> to vector<16x256xbf16>
    %c7_394 = arith.constant 7 : index
    %c0_395 = arith.constant 0 : index
    %506 = vector.load %arg2[%c7_394, %c0_395] : memref<9x256xbf16, #tpu.memory_space<vmem>>, vector<1x256xbf16>
    %507 = vector.broadcast %506 : vector<1x256xbf16> to vector<16x256xbf16>
    %508 = arith.mulf %505, %507 : vector<16x256xbf16>
    %c112_396 = arith.constant 112 : index
    %c0_397 = arith.constant 0 : index
    %509 = vector.load %arg6[%c112_396, %c0_397] : memref<216x256xbf16, #tpu.memory_space<vmem>>, vector<16x256xbf16>
    tpu.vector_store %arg6[%c112_396, %c0_397], %508 {strides = array<i32>} : memref<216x256xbf16, #tpu.memory_space<vmem>>, vector<16x256xbf16>,
    %510 = vector.extract_strided_slice %469 {offsets = [0, 17], sizes = [16, 256], strides = [1, 1]} : vector<16x512xbf16> to vector<16x256xbf16>
    %c8_398 = arith.constant 8 : index
    %c0_399 = arith.constant 0 : index
    %511 = vector.load %arg2[%c8_398, %c0_399] : memref<9x256xbf16, #tpu.memory_space<vmem>>, vector<1x256xbf16>
    %512 = vector.broadcast %511 : vector<1x256xbf16> to vector<16x256xbf16>
    %513 = arith.mulf %510, %512 : vector<16x256xbf16>
    %c128_400 = arith.constant 128 : index
    %c0_401 = arith.constant 0 : index
    %514 = vector.load %arg6[%c128_400, %c0_401] : memref<216x256xbf16, #tpu.memory_space<vmem>>, vector<16x256xbf16>
    tpu.vector_store %arg6[%c128_400, %c0_401], %513 {strides = array<i32>} : memref<216x256xbf16, #tpu.memory_space<vmem>>, vector<16x256xbf16>,
    %c0_402 = arith.constant 0 : index
    %c0_403 = arith.constant 0 : index
    %515 = vector.load %arg6[%c0_402, %c0_403] : memref<216x256xbf16, #tpu.memory_space<vmem>>, vector<144x256xbf16>
    %c10 = arith.constant 10 : index
    %c0_404 = arith.constant 0 : index
    %c0_405 = arith.constant 0 : index
    %516 = vector.load %arg3[%c10, %c0_404, %c0_405] : memref<13x8x216xbf16, #tpu.memory_space<vmem>>, vector<1x8x144xbf16>
    %517 = vector.shape_cast %516 : vector<1x8x144xbf16> to vector<8x144xbf16>
    %c10_406 = arith.constant 10 : index
    %c0_407 = arith.constant 0 : index
    %c0_408 = arith.constant 0 : index
    %518 = vector.load %arg4[%c10_406, %c0_407, %c0_408] : memref<13x8x1xf32, #tpu.memory_space<vmem>>, vector<1x8x1xf32>
    %519 = vector.shape_cast %518 : vector<1x8x1xf32> to vector<8x1xf32>
    %cst_409 = arith.constant dense<0.000000e+00> : vector<8x256xf32>
    %520 = tpu.matmul %517, %515, %cst_409 {dimension_numbers = #tpu.dot_dimension_numbers<[1], [0], [0], [1], [0, 0, 1, 1], [], []>} : vector<8x144xbf16>, vector<144x256xbf16>, vector<8x256xf32> -> vector<8x256xf32>
    %521 = vector.broadcast %519 : vector<8x1xf32> to vector<8x256xf32>
    %522 = arith.addf %520, %521 : vector<8x256xf32>
    %cst_410 = arith.constant 0.000000e+00 : f32
    %523 = vector.broadcast %cst_410 : f32 to vector<8x256xf32>
    %524 = arith.maximumf %522, %523 : vector<8x256xf32>
    %525 = arith.truncf %524 : vector<8x256xf32> to vector<8x256xbf16>
    %c16_411 = arith.constant 16 : index
    %c0_412 = arith.constant 0 : index
    %526 = vector.load %arg7[%c16_411, %c0_412] : memref<32x256xbf16, #tpu.memory_space<vmem>>, vector<8x256xbf16>
    tpu.vector_store %arg7[%c16_411, %c0_412], %525 {strides = array<i32>} : memref<32x256xbf16, #tpu.memory_space<vmem>>, vector<8x256xbf16>,
    %c0_413 = arith.constant 0 : index
    %c0_414 = arith.constant 0 : index
    %527 = vector.load %arg7[%c0_413, %c0_414] : memref<32x256xbf16, #tpu.memory_space<vmem>>, vector<24x256xbf16>
    %528 = tpu.concatenate %527, %527 in 1 : vector<24x256xbf16>, vector<24x256xbf16> -> vector<24x512xbf16>
    %529 = vector.extract_strided_slice %528 {offsets = [0, 239], sizes = [24, 256], strides = [1, 1]} : vector<24x512xbf16> to vector<24x256xbf16>
    %c0_415 = arith.constant 0 : index
    %c0_416 = arith.constant 0 : index
    %530 = vector.load %arg2[%c0_415, %c0_416] : memref<9x256xbf16, #tpu.memory_space<vmem>>, vector<1x256xbf16>
    %531 = vector.broadcast %530 : vector<1x256xbf16> to vector<24x256xbf16>
    %532 = arith.mulf %529, %531 : vector<24x256xbf16>
    %c0_417 = arith.constant 0 : index
    %c0_418 = arith.constant 0 : index
    %533 = vector.load %arg6[%c0_417, %c0_418] : memref<216x256xbf16, #tpu.memory_space<vmem>>, vector<24x256xbf16>
    tpu.vector_store %arg6[%c0_417, %c0_418], %532 {strides = array<i32>} : memref<216x256xbf16, #tpu.memory_space<vmem>>, vector<24x256xbf16>,
    %534 = vector.extract_strided_slice %528 {offsets = [0, 240], sizes = [24, 256], strides = [1, 1]} : vector<24x512xbf16> to vector<24x256xbf16>
    %c1_419 = arith.constant 1 : index
    %c0_420 = arith.constant 0 : index
    %535 = vector.load %arg2[%c1_419, %c0_420] : memref<9x256xbf16, #tpu.memory_space<vmem>>, vector<1x256xbf16>
    %536 = vector.broadcast %535 : vector<1x256xbf16> to vector<24x256xbf16>
    %537 = arith.mulf %534, %536 : vector<24x256xbf16>
    %c24_421 = arith.constant 24 : index
    %c0_422 = arith.constant 0 : index
    %538 = vector.load %arg6[%c24_421, %c0_422] : memref<216x256xbf16, #tpu.memory_space<vmem>>, vector<24x256xbf16>
    tpu.vector_store %arg6[%c24_421, %c0_422], %537 {strides = array<i32>} : memref<216x256xbf16, #tpu.memory_space<vmem>>, vector<24x256xbf16>,
    %539 = vector.extract_strided_slice %528 {offsets = [0, 241], sizes = [24, 256], strides = [1, 1]} : vector<24x512xbf16> to vector<24x256xbf16>
    %c2_423 = arith.constant 2 : index
    %c0_424 = arith.constant 0 : index
    %540 = vector.load %arg2[%c2_423, %c0_424] : memref<9x256xbf16, #tpu.memory_space<vmem>>, vector<1x256xbf16>
    %541 = vector.broadcast %540 : vector<1x256xbf16> to vector<24x256xbf16>
    %542 = arith.mulf %539, %541 : vector<24x256xbf16>
    %c48_425 = arith.constant 48 : index
    %c0_426 = arith.constant 0 : index
    %543 = vector.load %arg6[%c48_425, %c0_426] : memref<216x256xbf16, #tpu.memory_space<vmem>>, vector<24x256xbf16>
    tpu.vector_store %arg6[%c48_425, %c0_426], %542 {strides = array<i32>} : memref<216x256xbf16, #tpu.memory_space<vmem>>, vector<24x256xbf16>,
    %544 = vector.extract_strided_slice %528 {offsets = [0, 255], sizes = [24, 256], strides = [1, 1]} : vector<24x512xbf16> to vector<24x256xbf16>
    %c3_427 = arith.constant 3 : index
    %c0_428 = arith.constant 0 : index
    %545 = vector.load %arg2[%c3_427, %c0_428] : memref<9x256xbf16, #tpu.memory_space<vmem>>, vector<1x256xbf16>
    %546 = vector.broadcast %545 : vector<1x256xbf16> to vector<24x256xbf16>
    %547 = arith.mulf %544, %546 : vector<24x256xbf16>
    %c72_429 = arith.constant 72 : index
    %c0_430 = arith.constant 0 : index
    %548 = vector.load %arg6[%c72_429, %c0_430] : memref<216x256xbf16, #tpu.memory_space<vmem>>, vector<24x256xbf16>
    tpu.vector_store %arg6[%c72_429, %c0_430], %547 {strides = array<i32>} : memref<216x256xbf16, #tpu.memory_space<vmem>>, vector<24x256xbf16>,
    %549 = vector.extract_strided_slice %528 {offsets = [0, 0], sizes = [24, 256], strides = [1, 1]} : vector<24x512xbf16> to vector<24x256xbf16>
    %c4_431 = arith.constant 4 : index
    %c0_432 = arith.constant 0 : index
    %550 = vector.load %arg2[%c4_431, %c0_432] : memref<9x256xbf16, #tpu.memory_space<vmem>>, vector<1x256xbf16>
    %551 = vector.broadcast %550 : vector<1x256xbf16> to vector<24x256xbf16>
    %552 = arith.mulf %549, %551 : vector<24x256xbf16>
    %c96_433 = arith.constant 96 : index
    %c0_434 = arith.constant 0 : index
    %553 = vector.load %arg6[%c96_433, %c0_434] : memref<216x256xbf16, #tpu.memory_space<vmem>>, vector<24x256xbf16>
    tpu.vector_store %arg6[%c96_433, %c0_434], %552 {strides = array<i32>} : memref<216x256xbf16, #tpu.memory_space<vmem>>, vector<24x256xbf16>,
    %554 = vector.extract_strided_slice %528 {offsets = [0, 1], sizes = [24, 256], strides = [1, 1]} : vector<24x512xbf16> to vector<24x256xbf16>
    %c5_435 = arith.constant 5 : index
    %c0_436 = arith.constant 0 : index
    %555 = vector.load %arg2[%c5_435, %c0_436] : memref<9x256xbf16, #tpu.memory_space<vmem>>, vector<1x256xbf16>
    %556 = vector.broadcast %555 : vector<1x256xbf16> to vector<24x256xbf16>
    %557 = arith.mulf %554, %556 : vector<24x256xbf16>
    %c120_437 = arith.constant 120 : index
    %c0_438 = arith.constant 0 : index
    %558 = vector.load %arg6[%c120_437, %c0_438] : memref<216x256xbf16, #tpu.memory_space<vmem>>, vector<24x256xbf16>
    tpu.vector_store %arg6[%c120_437, %c0_438], %557 {strides = array<i32>} : memref<216x256xbf16, #tpu.memory_space<vmem>>, vector<24x256xbf16>,
    %559 = vector.extract_strided_slice %528 {offsets = [0, 15], sizes = [24, 256], strides = [1, 1]} : vector<24x512xbf16> to vector<24x256xbf16>
    %c6_439 = arith.constant 6 : index
    %c0_440 = arith.constant 0 : index
    %560 = vector.load %arg2[%c6_439, %c0_440] : memref<9x256xbf16, #tpu.memory_space<vmem>>, vector<1x256xbf16>
    %561 = vector.broadcast %560 : vector<1x256xbf16> to vector<24x256xbf16>
    %562 = arith.mulf %559, %561 : vector<24x256xbf16>
    %c144_441 = arith.constant 144 : index
    %c0_442 = arith.constant 0 : index
    %563 = vector.load %arg6[%c144_441, %c0_442] : memref<216x256xbf16, #tpu.memory_space<vmem>>, vector<24x256xbf16>
    tpu.vector_store %arg6[%c144_441, %c0_442], %562 {strides = array<i32>} : memref<216x256xbf16, #tpu.memory_space<vmem>>, vector<24x256xbf16>,
    %564 = vector.extract_strided_slice %528 {offsets = [0, 16], sizes = [24, 256], strides = [1, 1]} : vector<24x512xbf16> to vector<24x256xbf16>
    %c7_443 = arith.constant 7 : index
    %c0_444 = arith.constant 0 : index
    %565 = vector.load %arg2[%c7_443, %c0_444] : memref<9x256xbf16, #tpu.memory_space<vmem>>, vector<1x256xbf16>
    %566 = vector.broadcast %565 : vector<1x256xbf16> to vector<24x256xbf16>
    %567 = arith.mulf %564, %566 : vector<24x256xbf16>
    %c168_445 = arith.constant 168 : index
    %c0_446 = arith.constant 0 : index
    %568 = vector.load %arg6[%c168_445, %c0_446] : memref<216x256xbf16, #tpu.memory_space<vmem>>, vector<24x256xbf16>
    tpu.vector_store %arg6[%c168_445, %c0_446], %567 {strides = array<i32>} : memref<216x256xbf16, #tpu.memory_space<vmem>>, vector<24x256xbf16>,
    %569 = vector.extract_strided_slice %528 {offsets = [0, 17], sizes = [24, 256], strides = [1, 1]} : vector<24x512xbf16> to vector<24x256xbf16>
    %c8_447 = arith.constant 8 : index
    %c0_448 = arith.constant 0 : index
    %570 = vector.load %arg2[%c8_447, %c0_448] : memref<9x256xbf16, #tpu.memory_space<vmem>>, vector<1x256xbf16>
    %571 = vector.broadcast %570 : vector<1x256xbf16> to vector<24x256xbf16>
    %572 = arith.mulf %569, %571 : vector<24x256xbf16>
    %c192_449 = arith.constant 192 : index
    %c0_450 = arith.constant 0 : index
    %573 = vector.load %arg6[%c192_449, %c0_450] : memref<216x256xbf16, #tpu.memory_space<vmem>>, vector<24x256xbf16>
    tpu.vector_store %arg6[%c192_449, %c0_450], %572 {strides = array<i32>} : memref<216x256xbf16, #tpu.memory_space<vmem>>, vector<24x256xbf16>,
    %c0_451 = arith.constant 0 : index
    %c0_452 = arith.constant 0 : index
    %574 = vector.load %arg6[%c0_451, %c0_452] : memref<216x256xbf16, #tpu.memory_space<vmem>>, vector<216x256xbf16>
    %c11 = arith.constant 11 : index
    %c0_453 = arith.constant 0 : index
    %c0_454 = arith.constant 0 : index
    %575 = vector.load %arg3[%c11, %c0_453, %c0_454] : memref<13x8x216xbf16, #tpu.memory_space<vmem>>, vector<1x8x216xbf16>
    %576 = vector.shape_cast %575 : vector<1x8x216xbf16> to vector<8x216xbf16>
    %c11_455 = arith.constant 11 : index
    %c0_456 = arith.constant 0 : index
    %c0_457 = arith.constant 0 : index
    %577 = vector.load %arg4[%c11_455, %c0_456, %c0_457] : memref<13x8x1xf32, #tpu.memory_space<vmem>>, vector<1x8x1xf32>
    %578 = vector.shape_cast %577 : vector<1x8x1xf32> to vector<8x1xf32>
    %cst_458 = arith.constant dense<0.000000e+00> : vector<8x256xf32>
    %579 = tpu.matmul %576, %574, %cst_458 {dimension_numbers = #tpu.dot_dimension_numbers<[1], [0], [0], [1], [0, 0, 1, 1], [], []>} : vector<8x216xbf16>, vector<216x256xbf16>, vector<8x256xf32> -> vector<8x256xf32>
    %580 = vector.broadcast %578 : vector<8x1xf32> to vector<8x256xf32>
    %581 = arith.addf %579, %580 : vector<8x256xf32>
    %cst_459 = arith.constant 0.000000e+00 : f32
    %582 = vector.broadcast %cst_459 : f32 to vector<8x256xf32>
    %583 = arith.maximumf %581, %582 : vector<8x256xf32>
    %584 = arith.truncf %583 : vector<8x256xf32> to vector<8x256xbf16>
    %c24_460 = arith.constant 24 : index
    %c0_461 = arith.constant 0 : index
    %585 = vector.load %arg7[%c24_460, %c0_461] : memref<32x256xbf16, #tpu.memory_space<vmem>>, vector<8x256xbf16>
    tpu.vector_store %arg7[%c24_460, %c0_461], %584 {strides = array<i32>} : memref<32x256xbf16, #tpu.memory_space<vmem>>, vector<8x256xbf16>,
    %c0_462 = arith.constant 0 : index
    %c0_463 = arith.constant 0 : index
    %586 = vector.load %arg7[%c0_462, %c0_463] : memref<32x256xbf16, #tpu.memory_space<vmem>>, vector<32x256xbf16>
    %c12 = arith.constant 12 : index
    %c0_464 = arith.constant 0 : index
    %c0_465 = arith.constant 0 : index
    %587 = vector.load %arg3[%c12, %c0_464, %c0_465] : memref<13x8x216xbf16, #tpu.memory_space<vmem>>, vector<1x8x32xbf16>
    %588 = vector.shape_cast %587 : vector<1x8x32xbf16> to vector<8x32xbf16>
    %c12_466 = arith.constant 12 : index
    %c0_467 = arith.constant 0 : index
    %c0_468 = arith.constant 0 : index
    %589 = vector.load %arg4[%c12_466, %c0_467, %c0_468] : memref<13x8x1xf32, #tpu.memory_space<vmem>>, vector<1x8x1xf32>
    %590 = vector.shape_cast %589 : vector<1x8x1xf32> to vector<8x1xf32>
    %cst_469 = arith.constant dense<0.000000e+00> : vector<8x256xf32>
    %591 = tpu.matmul %588, %586, %cst_469 {dimension_numbers = #tpu.dot_dimension_numbers<[1], [0], [0], [1], [0, 0, 1, 1], [], []>} : vector<8x32xbf16>, vector<32x256xbf16>, vector<8x256xf32> -> vector<8x256xf32>
    %592 = vector.broadcast %590 : vector<8x1xf32> to vector<8x256xf32>
    %593 = arith.addf %591, %592 : vector<8x256xf32>
    %594 = arith.addf %406, %593 : vector<8x256xf32>
    %c0_470 = arith.constant 0 : index
    %c0_471 = arith.constant 0 : index
    %c0_472 = arith.constant 0 : index
    %595 = vector.load %arg5[%c0_470, %c0_471, %c0_472] : memref<1x8x256xf32, #tpu.memory_space<vmem>>, vector<1x8x256xf32>
    %596 = vector.shape_cast %595 : vector<1x8x256xf32> to vector<8x256xf32>
    %597 = vector.shape_cast %594 : vector<8x256xf32> to vector<1x8x256xf32>
    tpu.vector_store %arg5[%c0_470, %c0_471, %c0_472], %597 {strides = array<i32>} : memref<1x8x256xf32, #tpu.memory_space<vmem>>, vector<1x8x256xf32>,
    return
  }
  func.func @transform_0(%arg0: i32) -> (i32, i32, i32) {
    %c0_i32 = arith.constant 0 : i32
    %c0_i32_0 = arith.constant 0 : i32
    %c0_i32_1 = arith.constant 0 : i32
    return %arg0, %c0_i32, %c0_i32_0 : i32, i32, i32
  }
  func.func @transform_1(%arg0: i32) -> (i32, i32) {
    %c0_i32 = arith.constant 0 : i32
    %c0_i32_0 = arith.constant 0 : i32
    %c0_i32_1 = arith.constant 0 : i32
    return %c0_i32, %c0_i32_0 : i32, i32
  }
  func.func @transform_2(%arg0: i32) -> (i32, i32, i32) {
    %c0_i32 = arith.constant 0 : i32
    %c0_i32_0 = arith.constant 0 : i32
    %c0_i32_1 = arith.constant 0 : i32
    %c0_i32_2 = arith.constant 0 : i32
    return %c0_i32, %c0_i32_0, %c0_i32_1 : i32, i32, i32
  }
  func.func @transform_3(%arg0: i32) -> (i32, i32, i32) {
    %c0_i32 = arith.constant 0 : i32
    %c0_i32_0 = arith.constant 0 : i32
    %c0_i32_1 = arith.constant 0 : i32
    %c0_i32_2 = arith.constant 0 : i32
    return %c0_i32, %c0_i32_0, %c0_i32_1 : i32, i32, i32
  }
  func.func @transform_4(%arg0: i32) -> (i32, i32, i32) {
    %c0_i32 = arith.constant 0 : i32
    %c0_i32_0 = arith.constant 0 : i32
    %c0_i32_1 = arith.constant 0 : i32
    return %arg0, %c0_i32, %c0_i32_0 : i32, i32, i32
  }
}

</mosaic_0001>

<bundles_post_ra>
// kernel: edge_detect_forward.1
= control target key start
LH: loop header
LB: loop body
LE: loop exit
PB: predicated region body
PF: predicated region fallthrough
CT: control target
= control target key end

     0   :  { %s8590_s15 = smov 0   ;;  %s10974_s0 = inlined_call_operand.vmem [shape: bf16[2,147,256], index: 0, kind: input, shape index: {}]   ;;  %s10975_s1 = inlined_call_operand.vmem [shape: bf16[9,256], index: 1, kind: input, shape index: {}]   ;;  %s10976_s2 = inlined_call_operand.vmem [shape: bf16[13,8,216], index: 2, kind: input, shape index: {}]   ;;  %s10977_s3 = inlined_call_operand.vmem [shape: f32[13,8,1], index: 3, kind: input, shape index: {}]   ;;  %s10978_s4 = inlined_call_operand.vmem [shape: f32[2,8,256], index: 4, kind: output, shape index: {}]  }
   0x1 LB: > { %s7583_s16 = sadd.s32 4294967295, %s8553_s15   ;;  %p7587_p0 = scmp.ge.s32.totalorder %s8553_s15, 1  ;;  %s8553_s15 = sphi %s8590_s15, %s14_s15  }
   0x2   : > { %p162_p1 = scmp.lt.s32.totalorder %s8553_s15, 3 }
   0x4   : > { %p163_p2 = pnand %p7587_p0, %p162_p1 }
   0x5   : > { %p188_p3 = scmp.lt.s32.totalorder (!%p163_p2), %s7583_s16, 1  ;;  %v8601_v0 = vld [vmem:[%s10976_s2] sm:$0xff] (!%p163_p2)  ;;  %vm326_vm0 = vcmask (!%p163_p2), 154624   ;;  %v8555_v4 = vmov (!%p163_p2), 0   ;;  %v417_v7 = vlaneseq (!%p163_p2)  ;;  %s8556_s29 = smov (!%p163_p2), 111   ;;  %vm330_vm1 = vcmask (!%p163_p2), 1040384  }
   0x6   : > { %166 = sbr.rel (%p163_p2) target bundleno = 4769 (0x12a1), region = 36  ;;  %v7592_v1 = vcombine.high (!%p163_p2), %v8601_v0, %v8601_v0  ;;  %v219_v2 = vld [vmem:[%s10977_s3] sm:$0xff] (!%p163_p2)  ;;  %8332 = vset.pattern.permute.xlu0 (!%p163_p2), %v8555_v4  ;;  %968 = vmatprep.mubr.bf16.mxu1 (!%p163_p2), %v8555_v4  ;;  %s8557_s30 = smov (!%p163_p2), 112   ;;  %vm331_vm2 = vcmask (!%p163_p2), 1041408   ;;  %v8558_v39 = vmov (!%p163_p2), 65535   ;;  %v7591_v49 = vcombine.low (!%p163_p2), %v8601_v0, %v8601_v0 }
   0x7   : > { %v408_v3 = vld [vmem:[%s10975_s1] sm:$0x11] (!%p163_p2)  ;;  %222 = vperm.xlu0 (!%p163_p2), %8332, %v219_v2   ;;  %v8619_v11 = vshrl.u32 (!%p163_p2), %v417_v7, 7  ;;  %8333 = vset.pattern.permute.xlu1 (!%p163_p2), %v8555_v4  ;;  %v332_v40 = vsel (!%p163_p2), %vm330_vm1, 4294967295, %v8558_v39  ;;  %v517_v61 = vld [vmem:[%s10975_s1] sm:$0x22] (!%p163_p2) }
   0x8   : > { %v7614_v5 = vcombine.low (!%p163_p2), %v408_v3, %v408_v3  ;;  %v7615_v6 = vcombine.high (!%p163_p2), %v408_v3, %v408_v3  ;;  %v462_v8 = vld [vmem:[%s10975_s1] sm:$0x11] (!%p163_p2)  ;;  %7613 = vmatprep.mubr.msk.bf16.mxu0 (!%p163_p2), %vm326_vm0, %v7592_v1  ;;  %v333_v44 = vsel (!%p163_p2), %vm331_vm2, %v332_v40, 0  ;;  %v570_v62 = vld [vmem:[%s10975_s1] sm:$0x22] (!%p163_p2)  ;;  %v7622_v63 = vcombine.low (!%p163_p2), %v517_v61, %v517_v61  ;;  %s8559_s17 = smov (!%p163_p2), 113  }
   0x9   : > { %v7618_v9 = vcombine.low (!%p163_p2), %v462_v8, %v462_v8  ;;  %v8628_v12 = vsub.s32 (!%p163_p2), 0, %v8619_v11  ;;  %v7619_v15 = vcombine.high (!%p163_p2), %v462_v8, %v462_v8  ;;  %v7626_v0 = vcombine.low (!%p163_p2), %v570_v62, %v570_v62  ;;  %v707_v7 = vld [vmem:[%s10975_s1] sm:$0x88] (!%p163_p2)  ;;  %s8560_s20 = smov (!%p163_p2), 127   ;;  %s8561_s21 = smov (!%p163_p2), 15  }
   0xa   : > { %v415_v10 = vpack.i.b16 (!%p163_p2), %v7614_v5, %v7614_v5  ;;  %v422_v13 = vpack.i.b16 (!%p163_p2), %v7615_v6, %v7615_v6  ;;  %v7623_v1 = vcombine.high (!%p163_p2), %v517_v61, %v517_v61  ;;  %v524_v2 = vpack.i.b16 (!%p163_p2), %v7622_v63, %v7622_v63  ;;  %v758_v8 = vld [vmem:[%s10975_s1] sm:$0x88] (!%p163_p2)  ;;  %s8562_s22 = smov (!%p163_p2), 16   ;;  %s8563_s23 = smov (!%p163_p2), 1  }
   0xb   : > { %v469_v14 = vshrl.u32 (!%p163_p2), %v7618_v9, 16  ;;  %v477_v23 = vshrl.u32 (!%p163_p2), %v7619_v15, 16  ;;  %v8676_v3 = vsub.s32 (!%p163_p2), 1, %v8619_v11  ;;  %v577_v5 = vshrl.u32 (!%p163_p2), %v7626_v0, 16  ;;  %v654_v9 = vld [vmem:[%s10975_s1] sm:$0x44] (!%p163_p2) }
   0xc   : > { %v420_v18 = vrot.slane (!%p163_p2), %v415_v10, %v8628_v12  ;;  %v427_v21 = vrot.slane (!%p163_p2), %v422_v13, %v8628_v12  ;;  %v7627_v6 = vcombine.high (!%p163_p2), %v570_v62, %v570_v62  ;;  %v531_v10 = vpack.i.b16 (!%p163_p2), %v7623_v1, %v7623_v1  ;;  %s8564_s24 = smov (!%p163_p2), 17  }
   0xd   : > { %s10980_s16 = smov (!%p188_p3, %s7583_s16), 1  ;;  %v470_v22 = vpack.i.b16 %v469_v14, %v469_v14  ;;  %v478_v27 = vpack.i.b16 %v477_v23, %v477_v23  ;;  %v7638_v13 = vcombine.high %v707_v7, %v707_v7  ;;  %v7642_v14 = vcombine.high %v758_v8, %v758_v8 }
   0xe   : > { %s8313_s25 = smul.u32 152, %s10980_s16  ;;  %430 = vrot.lane.b32.xlu1 %v420_v18, %s8556_s29  ;;  %v529_v15 = vrot.slane %v524_v2, %v8676_v3  ;;  %v7633_v18 = vcombine.low %v654_v9, %v654_v9  ;;  %v7637_v39 = vcombine.low %v707_v7, %v707_v7  ;;  %v7641_v40 = vcombine.low %v758_v8, %v758_v8  ;;  %s8306_s11 = sshll.u32 %s10980_s16, 4 }
   0xf   : > { %v475_v26 = vrot.slane %v470_v22, %v8628_v12  ;;  %v483_v30 = vrot.slane %v478_v27, %v8628_v12  ;;  %v773_v22 = vshrl.u32 %v7642_v14, 16  ;;  %v811_v27 = vld [vmem:[%s10975_s1 + $0x8] sm:$0x11]  ;;  %vm434_vm3 = vcmask 908288   ;;  %s197_s14 = scalar_lea.vmem %s10978_s4, %s8306_s11 }
  0x10   : > { %s8625_s28 = scalar_lea.vmem %s10974_s0, %s8313_s25  ;;  %vm490_vm4 = vcmask 916480   ;;  %vm543_vm5 = vcmask 924672   ;;  %vm598_vm6 = vcmask 1039360   ;;  %vm621_vm7 = vcmask 7168  }
  0x11   : > { %v8334_v16 = vld [vmem:[%s8625_s28 + $0x4] ss:$8 sps:$4 sm:$0xff]   ;;  %v8336_v17 = vld [vmem:[%s8625_s28] ss:$8 sps:$4 sm:$0xff]   ;;  %v8337_v19 = vld [vmem:[%s8625_s28 + $0x14] ss:$8 sps:$4 sm:$0xff]  }
  0x12   : > { %340 = vmatprep.subr.bf16.mxu0 %v8334_v16  ;;  %v8339_v20 = vld [vmem:[%s8625_s28 + $0x10] ss:$8 sps:$4 sm:$0xff]   ;;  %v8340_v24 = vld [vmem:[%s8625_s28 + $0x24] ss:$8 sps:$4 sm:$0xff]   ;;  %v8342_v25 = vld [vmem:[%s8625_s28 + $0x20] ss:$8 sps:$4 sm:$0xff]   ;;  %432 = vrot.lane.b32.xlu1 %v427_v21, %s8556_s29  ;;  %v578_v16 = vpack.i.b16 %v577_v5, %v577_v5  ;;  %v721_v21 = vpack.i.b16 %v7638_v13, %v7638_v13 }
  0x13   : > { %341 = vmatpush1.bf16.msra.mxu0 %v8336_v17  ;;  %v8343_v28 = vld [vmem:[%s8625_s28 + $0x34] ss:$8 sps:$4 sm:$0xff]   ;;  %v8345_v29 = vld [vmem:[%s8625_s28 + $0x30] ss:$8 sps:$4 sm:$0xff]   ;;  %v8346_v31 = vld [vmem:[%s8625_s28 + $0x44] ss:$8 sps:$4 sm:$0xff]  }
  0x14   : > { %342 = vmatprep.subr.bf16.mxu0 %v8337_v19  ;;  %v8348_v32 = vld [vmem:[%s8625_s28 + $0x40] ss:$8 sps:$4 sm:$0xff]   ;;  %v8349_v33 = vld [vmem:[%s8625_s28 + $0x54] ss:$8 sps:$4 sm:$0xff]   ;;  %v8351_v34 = vld [vmem:[%s8625_s28 + $0x50] ss:$8 sps:$4 sm:$0xff]   ;;  %v536_v19 = vrot.slane %v531_v10, %v8676_v3  ;;  %v583_v23 = vrot.slane %v578_v16, %v8676_v3 }
  0x15   : > { %v8352_v35 = vld [vmem:[%s8625_s28 + $0x64] ss:$8 sps:$4 sm:$0xff]   ;;  %v8354_v36 = vld [vmem:[%s8625_s28 + $0x60] ss:$8 sps:$4 sm:$0xff]   ;;  %v8355_v37 = vld [vmem:[%s8625_s28 + $0x74] ss:$8 sps:$4 sm:$0xff]  }
  0x16   : > { %486 = vrot.lane.b32.xlu1 %v475_v26, %s8557_s30  ;;  %v217_v38 = vld [vmem:[%s8625_s28 + $0x90] sm:$0x33]  ;;  %v8358_v42 = vld [vmem:[%s8625_s28 + $0x84] ss:$8 sps:$4 sm:$0xff]   ;;  %v8360_v45 = vld [vmem:[%s8625_s28 + $0x80] ss:$8 sps:$4 sm:$0xff]   ;;  %v7634_v26 = vcombine.high %v654_v9, %v654_v9 }
  0x17   : > { %343 = vmatpush1.bf16.msra.mxu0 %v8339_v20  ;;  %v8357_v41 = vld [vmem:[%s8625_s28 + $0x70] ss:$8 sps:$4 sm:$0xff]   ;;  %v7612_v43 = vcombine.high %v217_v38, %v217_v38  ;;  %v7611_v46 = vcombine.low %v217_v38, %v217_v38  ;;  %v585_v17 = vshrl.u32 %v7627_v6, 16  ;;  %v8690_v20 = vsub.s32 3, %v8619_v11 }
  0x18   : > { %344 = vmatprep.subr.bf16.mxu0 %v8340_v24  ;;  %vm566_vm8 = vcmask 121856   ;;  %vm513_vm9 = vcmask 130048   ;;  %vm458_vm10 = vcmask 138240   ;;  %vm456_vm11 = vcmask 1043456  }
  0x19   : > { %v338_v47 = vand.u32 %v7612_v43, %v333_v44  ;;  %v335_v48 = vand.u32 %v7611_v46, %v333_v44  ;;  %v586_v24 = vpack.i.b16 %v585_v17, %v585_v17  ;;  %v765_v43 = vshrl.u32 %v7641_v40, 16 }
  0x1a   : > { %488 = vrot.lane.b32.xlu1 %v483_v30, %s8557_s30  ;;  %v7646_v30 = vcombine.high %v811_v27, %v811_v27  ;;  %v7645_v46 = vcombine.low %v811_v27, %v811_v27  ;;  %vm925_vm12 = vcmask 588800   ;;  %vm2663_vm13 = vcmask 719872  }
  0x1b   : > { %345 = vmatpush1.bf16.msra.mxu0 %v8342_v25  ;;  %v661_v25 = vshrl.u32 %v7633_v18, 16  ;;  %vm2739_vm14 = vcmask 261120  }
  0x1c   : > { %346 = vmatprep.subr.bf16.mxu0 %v8343_v28  ;;  %v726_v28 = vrot.slane %v721_v21, %v8690_v20 }
  0x1f   : > { %347 = vmatpush1.bf16.msra.mxu0 %v8345_v29  ;;  %v774_v29 = vpack.i.b16 %v773_v22, %v773_v22 }
  0x20   : > { %348 = vmatprep.subr.bf16.mxu0 %v8346_v31  ;;  %v591_v31 = vrot.slane %v586_v24, %v8676_v3 }
  0x23   : > { %349 = vmatpush1.bf16.msra.mxu0 %v8348_v32  ;;  %v8702_v32 = vsub.s32 2, %v8619_v11 }
  0x24   : > { %350 = vmatprep.subr.bf16.mxu0 %v8349_v33  ;;  %v662_v33 = vpack.i.b16 %v661_v25, %v661_v25 }
  0x27   : > { %351 = vmatpush1.bf16.msra.mxu0 %v8351_v34  ;;  %v669_v34 = vshrl.u32 %v7634_v26, 16 }
  0x28   : > { %352 = vmatprep.subr.bf16.mxu0 %v8352_v35  ;;  %v779_v35 = vrot.slane %v774_v29, %v8690_v20 }
  0x29   : > { %v670_v38 = vpack.i.b16 %v669_v34, %v669_v34 }
  0x2b   : > { %353 = vmatpush1.bf16.msra.mxu0 %v8354_v36  ;;  %v825_v36 = vpack.i.b16 %v7646_v30, %v7646_v30 }
  0x2c   : > { %354 = vmatprep.subr.bf16.mxu0 %v8355_v37  ;;  %v667_v37 = vrot.slane %v662_v33, %v8702_v32 }
  0x2d   : > { %v830_v11 = vrot.slane %v825_v36, %v8628_v12 }
  0x2f   : > { %355 = vmatpush1.bf16.msra.mxu0 %v8357_v41  ;;  %v675_v41 = vrot.slane %v670_v38, %v8702_v32 }
  0x30   : > { %356 = vmatprep.subr.bf16.mxu0 %v8358_v42  ;;  %v714_v42 = vpack.i.b16 %v7637_v39, %v7637_v39 }
  0x32   : > { %v719_v44 = vrot.slane %v714_v42, %v8690_v20 }
  0x33   : > { %357 = vmatpush1.bf16.msra.mxu0 %v8360_v45  ;;  %v766_v45 = vpack.i.b16 %v765_v43, %v765_v43 }
  0x34   : > { %358 = vmatprep.subr.bf16.mxu0 %v338_v47 }
  0x35   : > { %v771_v47 = vrot.slane %v766_v45, %v8690_v20 }
  0x37   : > { %359 = vmatpush1.bf16.msra.mxu0 %v335_v48  ;;  %v818_v48 = vpack.i.b16 %v7645_v46, %v7645_v46 }
  0x3a   : > { %373 = vmatmul.mubr.bf16.vlgmr.msra.gmra.mrb[0].mxu0 %v7591_v49  ;;  %v823_v49 = vrot.slane %v818_v48, %v8628_v12 }
  0x86   : > { %v223_v50 = vpop.permute.xlu0 %222 }
 0x10d   : > { %v374_v51 = vpop.f32.mrb[0].mxu0 }
 0x10e   : > { %v8659_v52 = vadd.f32 %v374_v51, %v223_v50  ;;  %v376_v53 = vpop.f32.mrb[1].mxu0 }
 0x10f   : > { %v8661_v54 = vadd.f32 %v376_v53, %v223_v50  ;;  %v378_v55 = vpop.f32.mrb[2].mxu0  ;;  %v431_v50 = vpop.permute.xlu1 %430 }
 0x110   : > { %v379_v56 = vpop.f32.mrb[3].mxu0  ;;  %v385_v57 = vmul.f32 %v8659_v52, %v8659_v52 }
 0x111   : > { %v381_v58 = vadd.f32 %v8661_v54, %v8659_v52  ;;  %v386_v59 = vmul.f32 %v8661_v54, %v8661_v54 }
 0x113   : > { %382 = vadd.xlane.f32.xlu0 %v381_v58  ;;  %v387_v60 = vadd.f32 %v386_v59, %v385_v57  ;;  %v433_v51 = vpop.permute.xlu1 %432 }
 0x114   : > { %v435_v17 = vsel %vm434_vm3, %v431_v50, %v433_v51 }
 0x115   : > { %388 = vadd.xlane.f32.xlu1 %v387_v60 }
 0x117   : > { %v487_v53 = vpop.permute.xlu1 %486 }
 0x11b   : > { %v489_v55 = vpop.permute.xlu1 %488 }
 0x11c   : > { %v491_v22 = vsel %vm490_vm4, %v487_v53, %v489_v55 }
 0x126   : > { %539 = vrot.lane.b32.xlu1 %v529_v15, %s8559_s17 }
 0x129   : > { %541 = vrot.lane.b32.xlu0 %v536_v19, %s8559_s17 }
 0x12a   : > { %594 = vrot.lane.b32.xlu1 %v583_v23, %s8560_s20 }
 0x12d   : > { %731 = vrot.lane.b32.xlu0 %v726_v28, %s8561_s21 }
 0x12e   : > { %596 = vrot.lane.b32.xlu1 %v591_v31, %s8560_s20 }
 0x131   : > { %784 = vrot.lane.b32.xlu0 %v779_v35, %s8562_s22 }
 0x132   : > { %678 = vrot.lane.b32.xlu1 %v667_v37, %s8563_s23 }
 0x135   : > { %835 = vrot.lane.b32.xlu0 %v830_v11, %s8564_s24 }
 0x136   : > { %680 = vrot.lane.b32.xlu1 %v675_v41, %s8563_s23 }
 0x13a   : > { %729 = vrot.lane.b32.xlu1 %v719_v44, %s8561_s21 }
 0x13e   : > { %782 = vrot.lane.b32.xlu1 %v771_v47, %s8562_s22 }
 0x142   : > { %833 = vrot.lane.b32.xlu1 %v823_v49, %s8564_s24 }
 0x1a0   : > { %v383_v56 = vpop.xlane.xlu0 %382 }
 0x1a1   : > { %v384_v57 = vmul.f32 0.00390625, %v383_v56 }
 0x1a2   : > { %v389_v58 = vpop.xlane.xlu1 %388 }
 0x1a3   : > { %v390_v59 = vmul.f32 0.00390625, %v389_v58  ;;  %v391_v60 = vmul.f32 %v384_v57, %v384_v57  ;;  %v394_v1 = vsub.f32 %v8659_v52, %v384_v57  ;;  %v395_v2 = vsub.f32 %v8661_v54, %v384_v57 }
 0x1a4   : > { %v542_v24 = vpop.permute.xlu0 %541 }
 0x1a5   : > { %v392_v61 = vsub.f32 %v390_v59, %v391_v60 }
 0x1a6   : > { %v540_v0 = vpop.permute.xlu1 %539 }
 0x1a7   : > { %v393_v62 = vmax.f32 %v392_v61, 0.0  ;;  %v544_v30 = vsel %vm543_vm5, %v540_v0, %v542_v24 }
 0x1a8   : > { %v732_v39 = vpop.permute.xlu0 %731 }
 0x1a9   : > { %v396_v63 = vadd.f32 1e-05, %v393_v62 }
 0x1aa   : > { %v595_v10 = vpop.permute.xlu1 %594 }
 0x1ab   : > { %8539 = vrsqrt.f32 %v396_v63 }
 0x1ac   : > { %v785_v47 = vpop.permute.xlu0 %784 }
 0x1ae   : > { %v597_v15 = vpop.permute.xlu1 %596 }
 0x1af   : > { %v599_v37 = vsel %vm598_vm6, %v595_v10, %v597_v15 }
 0x1b0   : > { %v836_v62 = vpop.permute.xlu0 %835 }
 0x1b2   : > { %v679_v52 = vpop.permute.xlu1 %678 }
 0x1b5   : > { %v8540_v5 = vpop.eup %8539 }
 0x1b6   : > { %v398_v6 = vmul.f32 %v8540_v5, %v394_v1  ;;  %v399_v7 = vmul.f32 %v8540_v5, %v395_v2  ;;  %v681_v23 = vpop.permute.xlu1 %680 }
 0x1b7   : > { %v682_v44 = vsel %vm621_vm7, %v679_v52, %v681_v23 }
 0x1b8   : > { %v8722_v8 = vmax.f32 %v398_v6, 0.0  ;;  %v8724_v9 = vmax.f32 %v399_v7, 0.0 }
 0x1ba   : > { %v402_v13 = vpack.c.bf16 %v8722_v8, %v8722_v8  ;;  %v403_v14 = vpack.c.bf16 %v8724_v9, %v8724_v9  ;;  %v730_v38 = vpop.permute.xlu1 %729 }
 0x1bc   : > { %404 = vst [vmem:[#allocation3] sm:$0xf] %v402_v13  ;;  %405 = vst [vmem:[#allocation3 + $0x8] sm:$0xf] %v403_v14 }
 0x1be   : > { %v783_v46 = vpop.permute.xlu1 %782 }
 0x1bf   : > { %v786_v60 = vsel %vm513_vm9, %v783_v46, %v785_v47 }
 0x1c2   : > { %v834_v61 = vpop.permute.xlu1 %833 }
 0x1c3   : > { %v8730_v54 = vld [vmem:[#allocation3 + $0x8] sm:$0xf]  ;;  %v8732_v16 = vld [vmem:[#allocation3] sm:$0xf]  ;;  %v837_v5 = vsel %vm458_vm10, %v834_v61, %v836_v62 }
 0x1c4   : > { %v441_v18 = vmul.bf16 %v433_v51, %v8730_v54  ;;  %v439_v19 = vmul.bf16 %v431_v50, %v8730_v54  ;;  %v440_v21 = vmul.bf16 %v435_v17, %v8732_v16  ;;  %v497_v26 = vmul.bf16 %v489_v55, %v8730_v54 }
 0x1c5   : > { %v495_v28 = vmul.bf16 %v487_v53, %v8730_v54  ;;  %v496_v29 = vmul.bf16 %v491_v22, %v8732_v16  ;;  %v550_v31 = vmul.bf16 %v542_v24, %v8730_v54  ;;  %v548_v34 = vmul.bf16 %v540_v0, %v8730_v54 }
 0x1c6   : > { %v7617_v25 = vcombine.low %v441_v18, %v441_v18  ;;  %v7616_v27 = vcombine.low %v439_v19, %v440_v21  ;;  %v7621_v33 = vcombine.low %v497_v26, %v497_v26  ;;  %v549_v35 = vmul.bf16 %v544_v30, %v8732_v16  ;;  %v991_v18 = vld [vmem:[%s10975_s1] sm:$0x11]  ;;  %v1191_v26 = vld [vmem:[%s10975_s1] sm:$0x22] }
 0x1c7   : > { %v7620_v36 = vcombine.low %v495_v28, %v496_v29  ;;  %v605_v40 = vmul.bf16 %v597_v15, %v8730_v54  ;;  %v7625_v11 = vcombine.low %v550_v31, %v550_v31  ;;  %v603_v41 = vmul.bf16 %v595_v10, %v8730_v54  ;;  %v1057_v19 = vld [vmem:[%s10975_s1] sm:$0x11] }
 0x1c8   : > { %452 = vrot.lane.b32.xlu0 %v7617_v25, %s8564_s24  ;;  %450 = vrot.lane.b32.xlu1 %v7616_v27, %s8564_s24  ;;  %v604_v42 = vmul.bf16 %v599_v37, %v8732_v16  ;;  %v7624_v43 = vcombine.low %v548_v34, %v549_v35  ;;  %v688_v45 = vmul.bf16 %v681_v23, %v8732_v16  ;;  %v1125_v25 = vld [vmem:[%s10975_s1] sm:$0x22]  ;;  %v7650_v34 = vld [vmem:[%s10977_s3 + $0x8] sm:$0xff] }
 0x1c9   : > { %v7629_v48 = vcombine.low %v605_v40, %v605_v40  ;;  %v686_v49 = vmul.bf16 %v679_v52, %v8732_v16  ;;  %v687_v50 = vmul.bf16 %v682_v44, %v8730_v54  ;;  %v733_v53 = vsel %vm566_vm8, %v730_v38, %v732_v39  ;;  %v1293_v35 = vld [vmem:[%s10975_s1] sm:$0x44] }
 0x1ca   : > { %v7628_v51 = vcombine.low %v603_v41, %v604_v42  ;;  %v739_v55 = vmul.bf16 %v732_v39, %v8732_v16  ;;  %v7636_v56 = vcombine.low %v688_v45, %v688_v45  ;;  %v737_v57 = vmul.bf16 %v730_v38, %v8732_v16 }
 0x1cb   : > { %v738_v58 = vmul.bf16 %v733_v53, %v8730_v54  ;;  %v7635_v59 = vcombine.low %v686_v49, %v687_v50  ;;  %v792_v63 = vmul.bf16 %v785_v47, %v8732_v16  ;;  %v790_v1 = vmul.bf16 %v783_v46, %v8732_v16  ;;  %v1361_v53 = vld [vmem:[%s10975_s1] sm:$0x88] }
 0x1cc   : > { %508 = vrot.lane.b32.xlu0 %v7621_v33, %s8562_s22  ;;  %506 = vrot.lane.b32.xlu1 %v7620_v36, %s8562_s22  ;;  %v7640_v0 = vcombine.low %v739_v55, %v739_v55  ;;  %v791_v2 = vmul.bf16 %v786_v60, %v8730_v54  ;;  %v841_v7 = vmul.bf16 %v834_v61, %v8732_v16  ;;  %v1427_v55 = vld [vmem:[%s10975_s1] sm:$0x88] }
 0x1cd   : > { %v7639_v6 = vcombine.low %v737_v57, %v738_v58  ;;  %v842_v10 = vmul.bf16 %v837_v5, %v8730_v54  ;;  %v843_v13 = vmul.bf16 %v836_v62, %v8732_v16  ;;  %v7644_v14 = vcombine.low %v792_v63, %v792_v63 }
 0x1ce   : > { %v7643_v15 = vcombine.low %v790_v1, %v791_v2  ;;  %v7663_v21 = vcombine.low %v991_v18, %v991_v18  ;;  %v7664_v22 = vcombine.high %v991_v18, %v991_v18  ;;  %v7669_v23 = vcombine.low %v1057_v19, %v1057_v19 }
 0x1cf   : > { %v7648_v52 = vcombine.low %v843_v13, %v843_v13  ;;  %v7647_v17 = vcombine.low %v841_v7, %v842_v10  ;;  %v7670_v24 = vcombine.high %v1057_v19, %v1057_v19  ;;  %v7675_v27 = vcombine.low %v1125_v25, %v1125_v25  ;;  %v1495_v10 = vld [vmem:[%s10975_s1 + $0x8] sm:$0x11] }
 0x1d0   : > { %561 = vrot.lane.b32.xlu0 %v7625_v11, %s8561_s21  ;;  %559 = vrot.lane.b32.xlu1 %v7624_v43, %s8561_s21  ;;  %v7681_v28 = vcombine.low %v1191_v26, %v1191_v26  ;;  %v998_v29 = vpack.i.b16 %v7663_v21, %v7663_v21  ;;  %v1005_v30 = vpack.i.b16 %v7664_v22, %v7664_v22  ;;  %v1064_v31 = vshrl.u32 %v7669_v23, 16 }
 0x1d1   : > { %v1072_v33 = vshrl.u32 %v7670_v24, 16  ;;  %v7676_v38 = vcombine.high %v1125_v25, %v1125_v25  ;;  %v1132_v40 = vpack.i.b16 %v7675_v27, %v7675_v27  ;;  %v7682_v41 = vcombine.high %v1191_v26, %v1191_v26 }
 0x1d2   : > { %v1003_v36 = vrot.slane %v998_v29, %v8628_v12  ;;  %v1065_v37 = vpack.i.b16 %v1064_v31, %v1064_v31  ;;  %v1010_v39 = vrot.slane %v1005_v30, %v8628_v12  ;;  %v1198_v11 = vshrl.u32 %v7681_v28, 16  ;;  %v625_v31 = vld [vmem:[%s10975_s1] sm:$0x44] }
 0x1d3   : > { %v1073_v43 = vpack.i.b16 %v1072_v33, %v1072_v33  ;;  %v7691_v44 = vcombine.low %v1293_v35, %v1293_v35  ;;  %v1139_v45 = vpack.i.b16 %v7676_v38, %v7676_v38  ;;  %v1206_v47 = vshrl.u32 %v7682_v41, 16 }
 0x1d4   : > { %616 = vrot.lane.b32.xlu0 %v7629_v48, %s8563_s23  ;;  %614 = vrot.lane.b32.xlu1 %v7628_v51, %s8563_s23  ;;  %v1070_v42 = vrot.slane %v1065_v37, %v8628_v12  ;;  %v1199_v46 = vpack.i.b16 %v1198_v11, %v1198_v11  ;;  %v1137_v49 = vrot.slane %v1132_v40, %v8676_v3 }
 0x1d5   : > { %v1078_v48 = vrot.slane %v1073_v43, %v8628_v12  ;;  %v1300_v50 = vshrl.u32 %v7691_v44, 16  ;;  %v7692_v51 = vcombine.high %v1293_v35, %v1293_v35  ;;  %v1207_v58 = vpack.i.b16 %v1206_v47, %v1206_v47 }
 0x1d6   : > { %v1204_v57 = vrot.slane %v1199_v46, %v8676_v3  ;;  %v7697_v61 = vcombine.low %v1361_v53, %v1361_v53  ;;  %v7703_v62 = vcombine.low %v1427_v55, %v1427_v55  ;;  %v7704_v1 = vcombine.high %v1427_v55, %v1427_v55 }
 0x1d7   : > { %v1308_v60 = vshrl.u32 %v7692_v51, 16  ;;  %v1212_v63 = vrot.slane %v1207_v58, %v8676_v3  ;;  %v7710_v21 = vcombine.high %v1495_v10, %v1495_v10  ;;  %v7631_v37 = vcombine.high %v625_v31, %v625_v31 }
 0x1d8   : > { %699 = vrot.lane.b32.xlu0 %v7636_v56, %s8560_s20  ;;  %697 = vrot.lane.b32.xlu1 %v7635_v59, %s8560_s20  ;;  %v1144_v56 = vrot.slane %v1139_v45, %v8676_v3  ;;  %v1301_v59 = vpack.i.b16 %v1300_v50, %v1300_v50  ;;  %v1434_v7 = vshrl.u32 %v7703_v62, 16  ;;  %v1442_v18 = vshrl.u32 %v7704_v1, 16 }
 0x1d9   : > { %v1309_v5 = vpack.i.b16 %v1308_v60, %v1308_v60  ;;  %v1509_v27 = vpack.i.b16 %v7710_v21, %v7710_v21  ;;  %v639_v44 = vpack.i.b16 %v7631_v37, %v7631_v37 }
 0x1da   : > { %v1306_v2 = vrot.slane %v1301_v59, %v8702_v32  ;;  %v1443_v24 = vpack.i.b16 %v1442_v18, %v1442_v18 }
 0x1db   : > { %v1514_v28 = vrot.slane %v1509_v27, %v8628_v12 }
 0x1dc   : > { %750 = vrot.lane.b32.xlu0 %v7640_v0, %s8559_s17  ;;  %748 = vrot.lane.b32.xlu1 %v7639_v6, %s8559_s17  ;;  %v7698_v0 = vcombine.high %v1361_v53, %v1361_v53  ;;  %v1368_v6 = vpack.i.b16 %v7697_v61, %v7697_v61  ;;  %v1448_v25 = vrot.slane %v1443_v24, %v8690_v20 }
 0x1de   : > { %v1375_v13 = vpack.i.b16 %v7698_v0, %v7698_v0 }
 0x1e0   : > { %803 = vrot.lane.b32.xlu0 %v7644_v14, %s8557_s30  ;;  %801 = vrot.lane.b32.xlu1 %v7643_v15, %s8557_s30  ;;  %v7709_v14 = vcombine.low %v1495_v10, %v1495_v10  ;;  %v1314_v15 = vrot.slane %v1309_v5, %v8702_v32  ;;  %v1380_v22 = vrot.slane %v1375_v13, %v8690_v20 }
 0x1e2   : > { %v1502_v19 = vpack.i.b16 %v7709_v14, %v7709_v14 }
 0x1e4   : > { %854 = vrot.lane.b32.xlu0 %v7648_v52, %s8556_s29  ;;  %852 = vrot.lane.b32.xlu1 %v7647_v17, %s8556_s29  ;;  %v1373_v52 = vrot.slane %v1368_v6, %v8690_v20  ;;  %v1435_v17 = vpack.i.b16 %v1434_v7, %v1434_v7  ;;  %v1507_v26 = vrot.slane %v1502_v19, %v8628_v12 }
 0x1e6   : > { %v1440_v23 = vrot.slane %v1435_v17, %v8690_v20 }
 0x1e8   : > { %877 = vperm.xlu1 %8333, %v7650_v34   ;;  %1013 = vrot.lane.b32.xlu0 %v1003_v36, %s8556_s29  ;;  %v7630_v36 = vcombine.low %v625_v31, %v625_v31 }
 0x1ea   : > { %v632_v43 = vpack.i.b16 %v7630_v36, %v7630_v36 }
 0x1ec   : > { %1015 = vrot.lane.b32.xlu1 %v1010_v39, %s8556_s29  ;;  %1081 = vrot.lane.b32.xlu0 %v1070_v42, %s8557_s30  ;;  %v637_v55 = vrot.slane %v632_v43, %v8702_v32 }
 0x1f0   : > { %1083 = vrot.lane.b32.xlu1 %v1078_v48, %s8557_s30  ;;  %1147 = vrot.lane.b32.xlu0 %v1137_v49, %s8559_s17 }
 0x1f4   : > { %1149 = vrot.lane.b32.xlu1 %v1144_v56, %s8559_s17  ;;  %1215 = vrot.lane.b32.xlu0 %v1204_v57, %s8560_s20  ;;  %v644_v56 = vrot.slane %v639_v44, %v8702_v32 }
 0x1f6   : > { %v646_v0 = vmul.bf16 %v644_v56, %v8730_v54 }
 0x1f8   : > { %1217 = vrot.lane.b32.xlu1 %v1212_v63, %s8560_s20  ;;  %1317 = vrot.lane.b32.xlu0 %v1306_v2, %s8563_s23  ;;  %v645_v63 = vmul.bf16 %v637_v55, %v8732_v16 }
 0x1fc   : > { %1319 = vrot.lane.b32.xlu1 %v1314_v15, %s8563_s23  ;;  %1383 = vrot.lane.b32.xlu0 %v1373_v52, %s8561_s21  ;;  %v7632_v52 = vcombine.low %v645_v63, %v646_v0 }
 0x200   : > { %1385 = vrot.lane.b32.xlu1 %v1380_v22, %s8561_s21  ;;  %1451 = vrot.lane.b32.xlu0 %v1440_v23, %s8562_s22 }
 0x204   : > { %1453 = vrot.lane.b32.xlu1 %v1448_v25, %s8562_s22  ;;  %1517 = vrot.lane.b32.xlu0 %v1507_v26, %s8564_s24 }
 0x208   : > { %1519 = vrot.lane.b32.xlu1 %v1514_v28, %s8564_s24 }
 0x23a   : > { %v453_v29 = vpop.permute.xlu0 %452  ;;  %v451_v30 = vpop.permute.xlu1 %450 }
 0x23b   : > { %v454_v33 = vrot.slane %v451_v30, 4  ;;  %v455_v34 = vrot.slane %v453_v29, 4 }
 0x23d   : > { %v457_v11 = vsel %vm456_vm11, %v454_v33, %v455_v34 }
 0x23e   : > { %v509_v35 = vpop.permute.xlu0 %508  ;;  %v507_v38 = vpop.permute.xlu1 %506  ;;  %v459_v46 = vsel %vm458_vm10, %v451_v30, %v457_v11 }
 0x23f   : > { %v511_v39 = vrot.slane %v509_v35, 4  ;;  %v510_v40 = vrot.slane %v507_v38, 4 }
 0x241   : > { %v512_v42 = vsel %vm456_vm11, %v510_v40, %v511_v39 }
 0x242   : > { %v562_v41 = vpop.permute.xlu0 %561  ;;  %v560_v45 = vpop.permute.xlu1 %559  ;;  %v514_v47 = vsel %vm513_vm9, %v507_v38, %v512_v42 }
 0x243   : > { %v563_v48 = vrot.slane %v560_v45, 4  ;;  %v564_v49 = vrot.slane %v562_v41, 4  ;;  %v7652_v50 = vcombine.high %v459_v46, %v514_v47  ;;  %v7651_v51 = vcombine.low %v459_v46, %v514_v47  ;;  %v7649_v41 = vld [vmem:[%s10976_s2 + $0x8] sm:$0xf] }
 0x245   : > { %936 = vmatprep.subr.bf16.mxu1 %v7652_v50  ;;  %v565_v59 = vsel %vm456_vm11, %v563_v48, %v564_v49 }
 0x246   : > { %v617_v53 = vpop.permute.xlu0 %616  ;;  %v615_v57 = vpop.permute.xlu1 %614  ;;  %937 = vmatpush1.bf16.msra.mxu1 %v7651_v51  ;;  %v567_v5 = vsel %vm566_vm8, %v560_v45, %v565_v59 }
 0x247   : > { %v619_v58 = vrot.slane %v617_v53, 4  ;;  %v618_v60 = vrot.slane %v615_v57, 4 }
 0x249   : > { %v620_v61 = vsel %vm456_vm11, %v618_v60, %v619_v58 }
 0x24a   : > { %v700_v62 = vpop.permute.xlu0 %699  ;;  %v698_v1 = vpop.permute.xlu1 %697  ;;  %v622_v6 = vsel %vm621_vm7, %v615_v57, %v620_v61 }
 0x24b   : > { %v702_v2 = vrot.slane %v700_v62, 4  ;;  %v701_v7 = vrot.slane %v698_v1, 4  ;;  %v7654_v10 = vcombine.high %v567_v5, %v622_v6  ;;  %v7653_v13 = vcombine.low %v567_v5, %v622_v6 }
 0x24d   : > { %v703_v14 = vsel %vm456_vm11, %v701_v7, %v702_v2  ;;  %938 = vmatprep.subr.bf16.mxu1 %v7654_v10 }
 0x24e   : > { %v751_v15 = vpop.permute.xlu0 %750  ;;  %v749_v17 = vpop.permute.xlu1 %748  ;;  %939 = vmatpush1.bf16.msra.mxu1 %v7653_v13  ;;  %v704_v16 = vsel %vm598_vm6, %v698_v1, %v703_v14 }
 0x24f   : > { %v752_v18 = vrot.slane %v749_v17, 4  ;;  %v753_v54 = vrot.slane %v751_v15, 4  ;;  %v7656_v19 = vcombine.high %v7632_v52, %v704_v16  ;;  %v8307_v21 = vcombine.low %v645_v63, %v704_v16 }
 0x251   : > { %940 = vmatprep.subr.bf16.mxu1 %v7656_v19  ;;  %v754_v25 = vsel %vm456_vm11, %v752_v18, %v753_v54 }
 0x252   : > { %v804_v22 = vpop.permute.xlu0 %803  ;;  %v802_v23 = vpop.permute.xlu1 %801  ;;  %941 = vmatpush1.bf16.msra.mxu1 %v8307_v21  ;;  %v755_v31 = vsel %vm543_vm5, %v749_v17, %v754_v25 }
 0x253   : > { %v806_v24 = vrot.slane %v804_v22, 4  ;;  %v805_v26 = vrot.slane %v802_v23, 4 }
 0x255   : > { %v807_v27 = vsel %vm456_vm11, %v805_v26, %v806_v24 }
 0x256   : > { %v855_v28 = vpop.permute.xlu0 %854  ;;  %v853_v29 = vpop.permute.xlu1 %852  ;;  %v808_v33 = vsel %vm490_vm4, %v802_v23, %v807_v27 }
 0x257   : > { %v857_v30 = vrot.slane %v855_v28, 4  ;;  %v856_v34 = vrot.slane %v853_v29, 4  ;;  %v7658_v35 = vcombine.high %v755_v31, %v808_v33  ;;  %v7657_v36 = vcombine.low %v755_v31, %v808_v33 }
 0x259   : > { %v858_v37 = vsel %vm456_vm11, %v856_v34, %v857_v30  ;;  %942 = vmatprep.subr.bf16.mxu1 %v7658_v35 }
 0x25a   : > { %943 = vmatpush1.bf16.msra.mxu1 %v7657_v36  ;;  %v859_v38 = vsel %vm434_vm3, %v853_v29, %v858_v37  ;;  %v1014_v1 = vpop.permute.xlu0 %1013 }
 0x25b   : > { %v7660_v39 = vcombine.high %v859_v38, %v859_v38  ;;  %v7659_v40 = vcombine.low %v859_v38, %v859_v38 }
 0x25d   : > { %7661 = vmatprep.subr.msk.bf16.mxu1 %vm456_vm11, %v7660_v39  ;;  %v931_v11 = vsel %vm456_vm11, %v7659_v40, 0 }
 0x25e   : > { %945 = vmatpush1.bf16.msra.mxu1 %v931_v11  ;;  %v1082_v14 = vpop.permute.xlu0 %1081 }
 0x261   : > { %7662 = vmatmul.mubr.msk.bf16.vlgmr.msra.gmra.mrb[0].mxu1 %vm925_vm12, %v7649_v41 }
 0x262   : > { %v1148_v23 = vpop.permute.xlu0 %1147 }
 0x266   : > { %v1216_v33 = vpop.permute.xlu0 %1215 }
 0x267   : > { %v878_v42 = vpop.permute.xlu1 %877 }
 0x26a   : > { %v1318_v11 = vpop.permute.xlu0 %1317 }
 0x26b   : > { %v1016_v43 = vpop.permute.xlu1 %1015 }
 0x26c   : > { %v1017_v2 = vsel %vm434_vm3, %v1014_v1, %v1016_v43 }
 0x26f   : > { %v1084_v44 = vpop.permute.xlu1 %1083 }
 0x270   : > { %v1085_v17 = vsel %vm490_vm4, %v1082_v14, %v1084_v44 }
 0x273   : > { %v1150_v53 = vpop.permute.xlu1 %1149 }
 0x274   : > { %v1151_v25 = vsel %vm543_vm5, %v1148_v23, %v1150_v53 }
 0x277   : > { %v8870_v60 = vpop.permute.xlu1 %1217 }
 0x278   : > { %v1219_v35 = vsel %vm598_vm6, %v1216_v33, %v8870_v60 }
 0x27b   : > { %v1320_v62 = vpop.permute.xlu1 %1319 }
 0x27f   : > { %v1386_v13 = vpop.permute.xlu1 %1385 }
 0x334   : > { %v970_v45 = vpop.f32.mrb[0].mxu1 }
 0x335   : > { %v971_v46 = vadd.f32 %v970_v45, %v878_v42  ;;  %v972_v47 = vpop.f32.mrb[1].mxu1 }
 0x336   : > { %v973_v48 = vadd.f32 %v972_v47, %v878_v42  ;;  %v974_v49 = vpop.f32.mrb[2].mxu1  ;;  %v1321_v42 = vsel %vm621_vm7, %v1318_v11, %v1320_v62 }
 0x337   : > { %v977_v50 = vmax.f32 %v971_v46, 0.0  ;;  %v975_v51 = vpop.f32.mrb[3].mxu1  ;;  %v1384_v49 = vpop.permute.xlu0 %1383 }
 0x338   : > { %v978_v55 = vmax.f32 %v973_v48, 0.0  ;;  %v1387_v51 = vsel %vm566_vm8, %v1384_v49, %v1386_v13 }
 0x339   : > { %v979_v56 = vpack.c.bf16 %v977_v50, %v977_v50 }
 0x33a   : > { %v980_v57 = vpack.c.bf16 %v978_v55, %v978_v55 }
 0x33b   : > { %v983_v58 = vrot.slane %v979_v56, 4 }
 0x33c   : > { %v984_v59 = vrot.slane %v980_v57, 4 }
 0x33d   : > { %987 = vst [vmem:[#allocation3] sm:$0xf0] %v983_v58 }
 0x33e   : > { %988 = vst [vmem:[#allocation3 + $0x8] sm:$0xf0] %v984_v59  ;;  %v1454_v59 = vpop.permute.xlu1 %1453 }
 0x344   : > { %v8872_v61 = vld [vmem:[#allocation3] sm:$0xff] }
 0x345   : > { %v8874_v63 = vld [vmem:[#allocation3 + $0x8] sm:$0xff]  ;;  %v1327_v0 = vmul.bf16 %v1320_v62, %v8872_v61  ;;  %v1022_v7 = vmul.bf16 %v1017_v2, %v8872_v61  ;;  %v8882_v15 = vmul.bf16 %v1386_v13, %v8872_v61  ;;  %v1090_v54 = vmul.bf16 %v1085_v17, %v8872_v61  ;;  %v1739_v17 = vld [vmem:[%s10975_s1] sm:$0x11] }
 0x346   : > { %v1021_v6 = vmul.bf16 %v1014_v1, %v8874_v63  ;;  %v1089_v18 = vmul.bf16 %v1082_v14, %v8874_v63  ;;  %v1023_v21 = vmul.bf16 %v1016_v43, %v8874_v63  ;;  %v1155_v27 = vmul.bf16 %v1148_v23, %v8874_v63 }
 0x347   : > { %v7694_v5 = vcombine.low %v1327_v0, %v1327_v0  ;;  %v7696_v52 = vcombine.high %v1327_v0, %v1327_v0  ;;  %v7700_v19 = vcombine.low %v8882_v15, %v8882_v15  ;;  %v1156_v28 = vmul.bf16 %v1151_v25, %v8872_v61 }
 0x348   : > { %v7665_v10 = vcombine.low %v1021_v6, %v1022_v7  ;;  %v7667_v16 = vcombine.high %v1021_v6, %v1022_v7  ;;  %v7671_v22 = vcombine.low %v1089_v18, %v1090_v54  ;;  %v7666_v24 = vcombine.low %v1023_v21, %v1023_v21 }
 0x349   : > { %1343 = vrot.lane.b32.xlu1 %v7694_v5, %s8560_s20  ;;  %v7673_v26 = vcombine.high %v1089_v18, %v1090_v54  ;;  %v7668_v29 = vcombine.high %v1023_v21, %v1023_v21  ;;  %v1091_v30 = vmul.bf16 %v1084_v44, %v8874_v63  ;;  %v7677_v31 = vcombine.low %v1155_v27, %v1156_v28 }
 0x34a   : > { %1037 = vrot.lane.b32.xlu0 %v7665_v10, %s8564_s24  ;;  %v1224_v36 = vmul.bf16 %v1219_v35, %v8872_v61  ;;  %v7679_v37 = vcombine.high %v1155_v27, %v1156_v28  ;;  %v1223_v38 = vmul.bf16 %v1216_v33, %v8874_v63  ;;  %v1157_v40 = vmul.bf16 %v1150_v53, %v8874_v63  ;;  %v1520_v10 = vpop.permute.xlu1 %1519 }
 0x34b   : > { %v7672_v34 = vcombine.low %v1091_v30, %v1091_v30  ;;  %v7674_v39 = vcombine.high %v1091_v30, %v1091_v30  ;;  %v1325_v44 = vmul.bf16 %v1318_v11, %v8872_v61  ;;  %v1326_v45 = vmul.bf16 %v1321_v42, %v8874_v63  ;;  %v2002_v30 = vld [vmem:[%s10975_s1] sm:$0x22] }
 0x34c   : > { %v7683_v41 = vcombine.low %v1223_v38, %v1224_v36  ;;  %v7678_v43 = vcombine.low %v1157_v40, %v1157_v40  ;;  %v7685_v46 = vcombine.high %v1223_v38, %v1224_v36  ;;  %v7680_v47 = vcombine.high %v1157_v40, %v1157_v40 }
 0x34d   : > { %1347 = vrot.lane.b32.xlu1 %v7696_v52, %s8560_s20  ;;  %v1225_v48 = vmul.bf16 %v8870_v60, %v8874_v63  ;;  %v7693_v50 = vcombine.low %v1325_v44, %v1326_v45  ;;  %v1391_v55 = vmul.bf16 %v1384_v49, %v8872_v61  ;;  %v1392_v56 = vmul.bf16 %v1387_v51, %v8874_v63  ;;  %v1452_v60 = vpop.permute.xlu0 %1451 }
 0x34e   : > { %1041 = vrot.lane.b32.xlu0 %v7667_v16, %s8564_s24  ;;  %v7695_v57 = vcombine.high %v1325_v44, %v1326_v45  ;;  %v1455_v0 = vsel %vm513_vm9, %v1452_v60, %v1454_v59  ;;  %v1461_v1 = vmul.bf16 %v1454_v59, %v8872_v61  ;;  %v7702_v2 = vcombine.high %v8882_v15, %v8882_v15  ;;  %v1826_v16 = vld [vmem:[%s10975_s1] sm:$0x11]  ;;  %v7716_v44 = vld [vmem:[%s10977_s3 + $0x10] sm:$0xff]  ;;  %v2310_v59 = vld [vmem:[%s10975_s1] sm:$0x88] }
 0x34f   : > { %v7684_v53 = vcombine.low %v1225_v48, %v1225_v48  ;;  %v7686_v58 = vcombine.high %v1225_v48, %v1225_v48  ;;  %v7699_v62 = vcombine.low %v1391_v55, %v1392_v56  ;;  %v1459_v5 = vmul.bf16 %v1452_v60, %v8872_v61 }
 0x350   : > { %v1460_v6 = vmul.bf16 %v1455_v0, %v8874_v63  ;;  %v7701_v7 = vcombine.high %v1391_v55, %v1392_v56  ;;  %v7706_v14 = vcombine.low %v1461_v1, %v1461_v1  ;;  %v1527_v18 = vmul.bf16 %v1520_v10, %v8872_v61 }
 0x351   : > { %1409 = vrot.lane.b32.xlu1 %v7700_v19, %s8559_s17  ;;  %v1518_v13 = vpop.permute.xlu0 %1517  ;;  %v7708_v54 = vcombine.high %v1461_v1, %v1461_v1  ;;  %v7738_v19 = vcombine.low %v1739_v17, %v1739_v17  ;;  %v7747_v35 = vcombine.high %v1826_v16, %v1826_v16  ;;  %v7762_v11 = vcombine.low %v2002_v30, %v2002_v30 }
 0x352   : > { %1105 = vrot.lane.b32.xlu0 %v7671_v22, %s8562_s22  ;;  %v7705_v52 = vcombine.low %v1459_v5, %v1460_v6  ;;  %v1521_v15 = vsel %vm458_vm10, %v1518_v13, %v1520_v10  ;;  %v1525_v21 = vmul.bf16 %v1518_v13, %v8872_v61  ;;  %v7707_v23 = vcombine.high %v1459_v5, %v1460_v6 }
 0x353   : > { %v1526_v22 = vmul.bf16 %v1521_v15, %v8874_v63  ;;  %v7712_v25 = vcombine.low %v1527_v18, %v1527_v18  ;;  %v7714_v33 = vcombine.high %v1527_v18, %v1527_v18 }
 0x355   : > { %1039 = vrot.lane.b32.xlu1 %v7666_v24, %s8564_s24  ;;  %v7746_v24 = vcombine.low %v1826_v16, %v1826_v16  ;;  %v7711_v27 = vcombine.low %v1525_v21, %v1526_v22  ;;  %v2399_v16 = vld [vmem:[%s10975_s1 + $0x8] sm:$0x11] }
 0x356   : > { %1109 = vrot.lane.b32.xlu0 %v7673_v26, %s8562_s22  ;;  %v1746_v26 = vpack.i.b16 %v7738_v19, %v7738_v19 }
 0x357   : > { %v1833_v28 = vshrl.u32 %v7746_v24, 16  ;;  %v7799_v24 = vcombine.low %v2399_v16, %v2399_v16 }
 0x359   : > { %1043 = vrot.lane.b32.xlu1 %v7668_v29, %s8564_s24  ;;  %v1915_v29 = vld [vmem:[%s10975_s1] sm:$0x22]  ;;  %v1834_v40 = vpack.i.b16 %v1833_v28, %v1833_v28 }
 0x35a   : > { %1171 = vrot.lane.b32.xlu0 %v7677_v31, %s8561_s21  ;;  %v8960_v31 = vld [vmem:[%s10976_s2 + $0x10] sm:$0xff]  ;;  %v7754_v38 = vcombine.low %v1915_v29, %v1915_v29  ;;  %v7755_v51 = vcombine.high %v1915_v29, %v1915_v29  ;;  %v2406_v29 = vpack.i.b16 %v7799_v24, %v7799_v24 }
 0x35b   : > { %v7718_v36 = vcombine.high %v8960_v31, %v8960_v31  ;;  %v1839_v45 = vrot.slane %v1834_v40, %v8628_v12 }
 0x35d   : > { %1107 = vrot.lane.b32.xlu1 %v7672_v34, %s8562_s22  ;;  %v7739_v34 = vcombine.high %v1739_v17, %v1739_v17  ;;  %7737 = vmatprep.mubr.msk.bf16.mxu1 %vm513_vm9, %v7718_v36 }
 0x35e   : > { %1175 = vrot.lane.b32.xlu0 %v7679_v37, %s8561_s21  ;;  %v1751_v37 = vrot.slane %v1746_v26, %v8628_v12 }
 0x35f   : > { %v1753_v42 = vpack.i.b16 %v7739_v34, %v7739_v34  ;;  %v7800_v34 = vcombine.high %v2399_v16, %v2399_v16 }
 0x361   : > { %1111 = vrot.lane.b32.xlu1 %v7674_v39, %s8562_s22  ;;  %v7713_v39 = vcombine.high %v1525_v21, %v1526_v22  ;;  %v1758_v49 = vrot.slane %v1753_v42, %v8628_v12  ;;  %v7792_v21 = vcombine.high %v2310_v59, %v2310_v59 }
 0x362   : > { %1239 = vrot.lane.b32.xlu0 %v7683_v41, %s8563_s23  ;;  %v2134_v41 = vld [vmem:[%s10975_s1] sm:$0x44] }
 0x363   : > { %v7775_v48 = vcombine.low %v2134_v41, %v2134_v41  ;;  %v7776_v1 = vcombine.high %v2134_v41, %v2134_v41 }
 0x365   : > { %1173 = vrot.lane.b32.xlu1 %v7678_v43, %s8561_s21  ;;  %v1841_v43 = vshrl.u32 %v7747_v35, 16  ;;  %v2411_v35 = vrot.slane %v2406_v29, %v8628_v12 }
 0x366   : > { %1243 = vrot.lane.b32.xlu0 %v7685_v46, %s8563_s23  ;;  %v1922_v46 = vpack.i.b16 %v7754_v38, %v7754_v38 }
 0x368   : > { %v1927_v55 = vrot.slane %v1922_v46, %v8676_v3 }
 0x369   : > { %1177 = vrot.lane.b32.xlu1 %v7680_v47, %s8561_s21  ;;  %v2009_v47 = vshrl.u32 %v7762_v11, 16 }
 0x36a   : > { %1341 = vrot.lane.b32.xlu0 %v7693_v50, %s8560_s20  ;;  %v1842_v50 = vpack.i.b16 %v1841_v43, %v1841_v43 }
 0x36b   : > { %v2010_v56 = vpack.i.b16 %v2009_v47, %v2009_v47 }
 0x36c   : > { %v1847_v60 = vrot.slane %v1842_v50, %v8628_v12 }
 0x36d   : > { %1241 = vrot.lane.b32.xlu1 %v7684_v53, %s8563_s23  ;;  %v7763_v53 = vcombine.high %v2002_v30, %v2002_v30 }
 0x36e   : > { %1345 = vrot.lane.b32.xlu0 %v7695_v57, %s8560_s20  ;;  %v2141_v57 = vshrl.u32 %v7775_v48, 16 }
 0x36f   : > { %v2017_v0 = vshrl.u32 %v7763_v53, 16 }
 0x370   : > { %v2142_v5 = vpack.i.b16 %v2141_v57, %v2141_v57 }
 0x371   : > { %1245 = vrot.lane.b32.xlu1 %v7686_v58, %s8563_s23  ;;  %v2223_v58 = vld [vmem:[%s10975_s1] sm:$0x88]  ;;  %v2018_v13 = vpack.i.b16 %v2017_v0, %v2017_v0 }
 0x372   : > { %1407 = vrot.lane.b32.xlu0 %v7699_v62, %s8559_s17  ;;  %v1929_v62 = vpack.i.b16 %v7755_v51, %v7755_v51  ;;  %v7783_v6 = vcombine.low %v2223_v58, %v2223_v58  ;;  %v7784_v19 = vcombine.high %v2223_v58, %v2223_v58 }
 0x373   : > { %v2023_v18 = vrot.slane %v2018_v13, %v8676_v3 }
 0x374   : > { %v1934_v10 = vrot.slane %v1929_v62, %v8676_v3  ;;  %v2230_v17 = vpack.i.b16 %v7783_v6, %v7783_v6  ;;  %v2237_v26 = vpack.i.b16 %v7784_v19, %v7784_v19 }
 0x375   : > { %1413 = vrot.lane.b32.xlu1 %v7702_v2, %s8559_s17  ;;  %v2015_v2 = vrot.slane %v2010_v56, %v8676_v3 }
 0x376   : > { %1411 = vrot.lane.b32.xlu0 %v7701_v7, %s8559_s17  ;;  %v7791_v7 = vcombine.low %v2310_v59, %v2310_v59  ;;  %v2235_v22 = vrot.slane %v2230_v17, %v8690_v20  ;;  %v2242_v30 = vrot.slane %v2237_v26, %v8690_v20 }
 0x378   : > { %v2317_v15 = vshrl.u32 %v7791_v7, 16 }
 0x379   : > { %1477 = vrot.lane.b32.xlu1 %v7706_v14, %s8557_s30  ;;  %v2149_v14 = vshrl.u32 %v7776_v1, 16 }
 0x37a   : > { %1475 = vrot.lane.b32.xlu0 %v7705_v52, %s8557_s30  ;;  %v2147_v52 = vrot.slane %v2142_v5, %v8702_v32 }
 0x37d   : > { %1481 = vrot.lane.b32.xlu1 %v7708_v54, %s8557_s30  ;;  %v2150_v54 = vpack.i.b16 %v2149_v14, %v2149_v14 }
 0x37e   : > { %1479 = vrot.lane.b32.xlu0 %v7707_v23, %s8557_s30  ;;  %v2318_v23 = vpack.i.b16 %v2317_v15, %v2317_v15 }
 0x380   : > { %v2323_v28 = vrot.slane %v2318_v23, %v8690_v20 }
 0x381   : > { %1543 = vrot.lane.b32.xlu1 %v7712_v25, %s8556_s29  ;;  %v2155_v25 = vrot.slane %v2150_v54, %v8702_v32 }
 0x382   : > { %1541 = vrot.lane.b32.xlu0 %v7711_v27, %s8556_s29  ;;  %v2325_v27 = vshrl.u32 %v7792_v21, 16 }
 0x385   : > { %1547 = vrot.lane.b32.xlu1 %v7714_v33, %s8556_s29  ;;  %v2326_v33 = vpack.i.b16 %v2325_v27, %v2325_v27 }
 0x386   : > { %1545 = vrot.lane.b32.xlu0 %v7713_v39, %s8556_s29 }
 0x387   : > { %v2331_v36 = vrot.slane %v2326_v33, %v8690_v20 }
 0x389   : > { %1761 = vrot.lane.b32.xlu1 %v1751_v37, %s8556_s29  ;;  %v2413_v37 = vpack.i.b16 %v7800_v34, %v7800_v34 }
 0x38a   : > { %1585 = vperm.xlu0 %8332, %v7716_v44  }
 0x38b   : > { %v2418_v38 = vrot.slane %v2413_v37, %v8628_v12 }
 0x38d   : > { %1850 = vrot.lane.b32.xlu1 %v1839_v45, %s8557_s30 }
 0x38e   : > { %1763 = vrot.lane.b32.xlu0 %v1758_v49, %s8556_s29 }
 0x391   : > { %1937 = vrot.lane.b32.xlu1 %v1927_v55, %s8559_s17 }
 0x392   : > { %1852 = vrot.lane.b32.xlu0 %v1847_v60, %s8557_s30 }
 0x395   : > { %2026 = vrot.lane.b32.xlu1 %v2015_v2, %s8560_s20 }
 0x396   : > { %1939 = vrot.lane.b32.xlu0 %v1934_v10, %s8559_s17 }
 0x399   : > { %2158 = vrot.lane.b32.xlu1 %v2147_v52, %s8563_s23 }
 0x39a   : > { %2028 = vrot.lane.b32.xlu0 %v2023_v18, %s8560_s20 }
 0x39d   : > { %2245 = vrot.lane.b32.xlu1 %v2235_v22, %s8561_s21  ;;  %v1259_v22 = vld [vmem:[%s10975_s1] sm:$0x44] }
 0x39e   : > { %2160 = vrot.lane.b32.xlu0 %v2155_v25, %s8563_s23 }
 0x3a1   : > { %2334 = vrot.lane.b32.xlu1 %v2323_v28, %s8562_s22  ;;  %v7688_v28 = vcombine.high %v1259_v22, %v1259_v22 }
 0x3a2   : > { %2247 = vrot.lane.b32.xlu0 %v2242_v30, %s8561_s21 }
 0x3a5   : > { %2421 = vrot.lane.b32.xlu1 %v2411_v35, %s8564_s24 }
 0x3a6   : > { %2336 = vrot.lane.b32.xlu0 %v2331_v36, %s8562_s22 }
 0x3aa   : > { %2423 = vrot.lane.b32.xlu0 %v2418_v38, %s8564_s24  ;;  %v7687_v38 = vcombine.low %v1259_v22, %v1259_v22 }
 0x3bb   : > { %v9015_v39 = vpop.permute.xlu1 %1343 }
 0x3bc   : > { %v1038_v40 = vpop.permute.xlu0 %1037 }
 0x3bd   : > { %v1045_v47 = vrot.slane %v1038_v40, 4 }
 0x3bf   : > { %v9017_v11 = vpop.permute.xlu1 %1347 }
 0x3c0   : > { %v1042_v41 = vpop.permute.xlu0 %1041 }
 0x3c1   : > { %v1047_v49 = vrot.slane %v1042_v41, 4 }
 0x3c3   : > { %v9019_v42 = vpop.permute.xlu1 %1409 }
 0x3c4   : > { %v1106_v43 = vpop.permute.xlu0 %1105 }
 0x3c5   : > { %v1113_v1 = vrot.slane %v1106_v43, 4 }
 0x3c7   : > { %v1040_v44 = vpop.permute.xlu1 %1039 }
 0x3c8   : > { %v1046_v45 = vrot.slane %v1040_v44, 4  ;;  %v1110_v46 = vpop.permute.xlu0 %1109 }
 0x3c9   : > { %v1115_v5 = vrot.slane %v1110_v46, 4 }
 0x3ca   : > { %v1049_v50 = vsel %vm456_vm11, %v1045_v47, %v1046_v45 }
 0x3cb   : > { %v1044_v48 = vpop.permute.xlu1 %1043  ;;  %v1050_v57 = vsel %vm458_vm10, %v1038_v40, %v1049_v50  ;;  %v1352_v50 = vrot.slane %v9017_v11, 4 }
 0x3cc   : > { %v1048_v51 = vrot.slane %v1044_v48, 4  ;;  %v1172_v53 = vpop.permute.xlu0 %1171 }
 0x3cd   : > { %v1179_v19 = vrot.slane %v1172_v53, 4 }
 0x3ce   : > { %v1051_v55 = vsel %vm456_vm11, %v1047_v49, %v1048_v51  ;;  %v1266_v49 = vpack.i.b16 %v7687_v38, %v7687_v38 }
 0x3cf   : > { %v1108_v56 = vpop.permute.xlu1 %1107  ;;  %v1052_v58 = vsel %vm458_vm10, %v1042_v41, %v1051_v55  ;;  %v1273_v41 = vpack.i.b16 %v7688_v28, %v7688_v28 }
 0x3d0   : > { %v1114_v59 = vrot.slane %v1108_v56, 4  ;;  %v7719_v60 = vcombine.low %v1050_v57, %v1052_v58  ;;  %v7720_v62 = vcombine.high %v1050_v57, %v1052_v58  ;;  %v1176_v0 = vpop.permute.xlu0 %1175  ;;  %v1350_v56 = vrot.slane %v9015_v39, 4 }
 0x3d1   : > { %v1181_v23 = vrot.slane %v1176_v0, 4  ;;  %v1278_v55 = vrot.slane %v1273_v41, %v8702_v32  ;;  %v1271_v11 = vrot.slane %v1266_v49, %v8702_v32 }
 0x3d2   : > { %1688 = vmatprep.subr.bf16.mxu1 %v7720_v62  ;;  %v1117_v6 = vsel %vm456_vm11, %v1113_v1, %v1114_v59 }
 0x3d3   : > { %v1112_v2 = vpop.permute.xlu1 %1111  ;;  %1689 = vmatpush1.bf16.msra.mxu1 %v7719_v60  ;;  %v1118_v52 = vsel %vm513_vm9, %v1106_v43, %v1117_v6  ;;  %v1280_v39 = vmul.bf16 %v1278_v55, %v8874_v63 }
 0x3d4   : > { %v1116_v7 = vrot.slane %v1112_v2, 4  ;;  %v1240_v10 = vpop.permute.xlu0 %1239 }
 0x3d5   : > { %v1247_v40 = vrot.slane %v1240_v10, 4 }
 0x3d6   : > { %v1119_v13 = vsel %vm456_vm11, %v1115_v5, %v1116_v7 }
 0x3d7   : > { %v1174_v14 = vpop.permute.xlu1 %1173  ;;  %v1120_v17 = vsel %vm513_vm9, %v1110_v46, %v1119_v13 }
 0x3d8   : > { %v1180_v15 = vrot.slane %v1174_v14, 4  ;;  %v7721_v16 = vcombine.low %v1118_v52, %v1120_v17  ;;  %v7722_v18 = vcombine.high %v1118_v52, %v1120_v17  ;;  %v1244_v54 = vpop.permute.xlu0 %1243  ;;  %v1416_v14 = vrot.slane %v9019_v42, 4 }
 0x3d9   : > { %v1249_v44 = vrot.slane %v1244_v54, 4 }
 0x3da   : > { %1690 = vmatprep.subr.bf16.mxu1 %v7722_v18  ;;  %v1183_v24 = vsel %vm456_vm11, %v1179_v19, %v1180_v15 }
 0x3db   : > { %v1178_v21 = vpop.permute.xlu1 %1177  ;;  %1691 = vmatpush1.bf16.msra.mxu1 %v7721_v16  ;;  %v1184_v30 = vsel %vm566_vm8, %v1172_v53, %v1183_v24  ;;  %v1279_v16 = vmul.bf16 %v1271_v11, %v8872_v61 }
 0x3dc   : > { %v1182_v25 = vrot.slane %v1178_v21, 4  ;;  %v1342_v26 = vpop.permute.xlu0 %1341 }
 0x3dd   : > { %v1349_v51 = vrot.slane %v1342_v26, 4 }
 0x3de   : > { %v1185_v27 = vsel %vm456_vm11, %v1181_v23, %v1182_v25 }
 0x3df   : > { %v1242_v29 = vpop.permute.xlu1 %1241  ;;  %v1186_v33 = vsel %vm566_vm8, %v1176_v0, %v1185_v27  ;;  %v1353_v5 = vsel %vm456_vm11, %v1349_v51, %v1350_v56  ;;  %v7717_v56 = vcombine.low %v8960_v31, %v8960_v31 }
 0x3e0   : > { %v1248_v34 = vrot.slane %v1242_v29, 4  ;;  %v7723_v35 = vcombine.low %v1184_v30, %v1186_v33  ;;  %v7724_v36 = vcombine.high %v1184_v30, %v1186_v33  ;;  %v1346_v37 = vpop.permute.xlu0 %1345  ;;  %v1354_v17 = vsel %vm598_vm6, %v1342_v26, %v1353_v5 }
 0x3e1   : > { %v1351_v46 = vrot.slane %v1346_v37, 4 }
 0x3e2   : > { %1692 = vmatprep.subr.bf16.mxu1 %v7724_v36  ;;  %v1251_v45 = vsel %vm456_vm11, %v1247_v40, %v1248_v34 }
 0x3e3   : > { %v1246_v43 = vpop.permute.xlu1 %1245  ;;  %1693 = vmatpush1.bf16.msra.mxu1 %v7723_v35  ;;  %v1252_v58 = vsel %vm621_vm7, %v1240_v10, %v1251_v45  ;;  %v1355_v60 = vsel %vm456_vm11, %v1351_v46, %v1352_v50 }
 0x3e4   : > { %v1250_v47 = vrot.slane %v1246_v43, 4  ;;  %v1408_v48 = vpop.permute.xlu0 %1407  ;;  %v1356_v13 = vsel %vm598_vm6, %v1346_v37, %v1355_v60 }
 0x3e5   : > { %v1415_v6 = vrot.slane %v1408_v48, 4  ;;  %v7730_v21 = vcombine.high %v1354_v17, %v1356_v13  ;;  %v7729_v42 = vcombine.low %v1354_v17, %v1356_v13 }
 0x3e6   : > { %v1253_v53 = vsel %vm456_vm11, %v1249_v44, %v1250_v47 }
 0x3e7   : > { %v1414_v57 = vpop.permute.xlu1 %1413  ;;  %v1254_v59 = vsel %vm621_vm7, %v1244_v54, %v1253_v53  ;;  %v1419_v18 = vsel %vm456_vm11, %v1415_v6, %v1416_v14 }
 0x3e8   : > { %v1418_v62 = vrot.slane %v1414_v57, 4  ;;  %v7725_v0 = vcombine.low %v1252_v58, %v1254_v59  ;;  %v7726_v1 = vcombine.high %v1252_v58, %v1254_v59  ;;  %v1412_v2 = vpop.permute.xlu0 %1411  ;;  %v1420_v25 = vsel %vm543_vm5, %v1408_v48, %v1419_v18 }
 0x3e9   : > { %v1417_v7 = vrot.slane %v1412_v2, 4 }
 0x3ea   : > { %1694 = vmatprep.subr.bf16.mxu1 %v7726_v1 }
 0x3eb   : > { %v1478_v10 = vpop.permute.xlu1 %1477  ;;  %1695 = vmatpush1.bf16.msra.mxu1 %v7725_v0  ;;  %v1421_v52 = vsel %vm456_vm11, %v1417_v7, %v1418_v62 }
 0x3ec   : > { %1696 = vmatprep.subr.bf16.mxu1 %v1280_v39  ;;  %v1476_v15 = vpop.permute.xlu0 %1475  ;;  %v1484_v54 = vrot.slane %v1478_v10, 4  ;;  %v1422_v22 = vsel %vm543_vm5, %v1412_v2, %v1421_v52 }
 0x3ed   : > { %v1483_v19 = vrot.slane %v1476_v15, 4  ;;  %v7732_v29 = vcombine.high %v1420_v25, %v1422_v22  ;;  %v7731_v34 = vcombine.low %v1420_v25, %v1422_v22 }
 0x3ef   : > { %v1482_v23 = vpop.permute.xlu1 %1481  ;;  %1697 = vmatpush1.bf16.msra.mxu1 %v1279_v16  ;;  %v1487_v26 = vsel %vm456_vm11, %v1483_v19, %v1484_v54 }
 0x3f0   : > { %v1486_v24 = vrot.slane %v1482_v23, 4  ;;  %1698 = vmatprep.subr.bf16.mxu1 %v7730_v21  ;;  %v1480_v27 = vpop.permute.xlu0 %1479  ;;  %v1488_v35 = vsel %vm490_vm4, %v1476_v15, %v1487_v26 }
 0x3f1   : > { %v1485_v28 = vrot.slane %v1480_v27, 4 }
 0x3f3   : > { %v1544_v30 = vpop.permute.xlu1 %1543  ;;  %1699 = vmatpush1.bf16.msra.mxu1 %v7729_v42  ;;  %v1489_v33 = vsel %vm456_vm11, %v1485_v28, %v1486_v24 }
 0x3f4   : > { %1700 = vmatprep.subr.bf16.mxu1 %v7732_v29  ;;  %v1490_v36 = vsel %vm490_vm4, %v1480_v27, %v1489_v33  ;;  %v1542_v37 = vpop.permute.xlu0 %1541  ;;  %v1550_v38 = vrot.slane %v1544_v30, 4 }
 0x3f5   : > { %v1549_v40 = vrot.slane %v1542_v37, 4  ;;  %v7734_v41 = vcombine.high %v1488_v35, %v1490_v36  ;;  %v7733_v45 = vcombine.low %v1488_v35, %v1490_v36 }
 0x3f7   : > { %v1548_v43 = vpop.permute.xlu1 %1547  ;;  %1701 = vmatpush1.bf16.msra.mxu1 %v7731_v34  ;;  %v1553_v47 = vsel %vm456_vm11, %v1549_v40, %v1550_v38 }
 0x3f8   : > { %v1552_v44 = vrot.slane %v1548_v43, 4  ;;  %1702 = vmatprep.subr.bf16.mxu1 %v7734_v41  ;;  %v1546_v46 = vpop.permute.xlu0 %1545  ;;  %v1554_v50 = vsel %vm434_vm3, %v1542_v37, %v1553_v47 }
 0x3f9   : > { %v1551_v48 = vrot.slane %v1546_v46, 4 }
 0x3fb   : > { %1703 = vmatpush1.bf16.msra.mxu1 %v7733_v45  ;;  %v1555_v49 = vsel %vm456_vm11, %v1551_v48, %v1552_v44  ;;  %v9066_v57 = vpop.permute.xlu1 %1761 }
 0x3fc   : > { %v1556_v51 = vsel %vm434_vm3, %v1546_v46, %v1555_v49  ;;  %v1769_v0 = vmul.bf16 %v9066_v57, %v8874_v63 }
 0x3fd   : > { %v7735_v53 = vcombine.low %v1554_v50, %v1556_v51  ;;  %v7736_v55 = vcombine.high %v1554_v50, %v1556_v51 }
 0x3ff   : > { %1704 = vmatprep.subr.bf16.mxu1 %v7736_v55  ;;  %v9070_v58 = vpop.permute.xlu1 %1850 }
 0x400   : > { %1705 = vmatpush1.bf16.msra.mxu1 %v7735_v53  ;;  %v1858_v10 = vmul.bf16 %v9070_v58, %v8874_v63 }
 0x401   : > { %2743 = vmatprep.subr.bf16.mxu1 %v8874_v63 }
 0x403   : > { %1721 = vmatmul.mubr.bf16.vlgmr.msra.gmra.mrb[4].mxu1 %v7717_v56  ;;  %v9076_v62 = vpop.permute.xlu1 %1937 }
 0x404   : > { %2744 = vmatpush1.bf16.msra.mxu1 %v8872_v61  ;;  %2775 = vmatprep.mubr.bf16.mxu1 %v8555_v4  ;;  %v1945_v21 = vmul.bf16 %v9076_v62, %v8874_v63 }
 0x407   : > { %v9095_v6 = vpop.permute.xlu1 %2026 }
 0x408   : > { %v2034_v36 = vmul.bf16 %v9095_v6, %v8874_v63 }
 0x409   : > { %v9072_v59 = vpop.permute.xlu0 %1585 }
 0x40b   : > { %v9106_v17 = vpop.permute.xlu1 %2158 }
 0x40c   : > { %v2166_v46 = vmul.bf16 %v9106_v17, %v8872_v61 }
 0x40d   : > { %v9074_v60 = vpop.permute.xlu0 %1763 }
 0x40e   : > { %v9081_v31 = vsel %vm434_vm3, %v9066_v57, %v9074_v60  ;;  %v1771_v29 = vmul.bf16 %v9074_v60, %v8874_v63 }
 0x40f   : > { %v1770_v1 = vmul.bf16 %v9081_v31, %v8872_v61  ;;  %v9123_v22 = vpop.permute.xlu1 %2245 }
 0x410   : > { %v9140_v26 = vmul.bf16 %v9123_v22, %v8872_v61  ;;  %v7741_v37 = vcombine.low %v1771_v29, %v1771_v29  ;;  %v7743_v43 = vcombine.high %v1771_v29, %v1771_v29 }
 0x411   : > { %v9087_v2 = vpop.permute.xlu0 %1852  ;;  %v7740_v11 = vcombine.low %v1769_v0, %v1770_v1  ;;  %v7742_v13 = vcombine.high %v1769_v0, %v1770_v1 }
 0x412   : > { %v9092_v5 = vsel %vm490_vm4, %v9070_v58, %v9087_v2  ;;  %v1860_v41 = vmul.bf16 %v9087_v2, %v8874_v63 }
 0x413   : > { %1796 = vrot.lane.b32.xlu1 %v7740_v11, %s8564_s24  ;;  %v1859_v7 = vmul.bf16 %v9092_v5, %v8872_v61 }
 0x414   : > { %v7749_v47 = vcombine.low %v1860_v41, %v1860_v41  ;;  %v7751_v50 = vcombine.high %v1860_v41, %v1860_v41 }
 0x415   : > { %v9099_v39 = vpop.permute.xlu0 %1939  ;;  %v7748_v52 = vcombine.low %v1858_v10, %v1859_v7  ;;  %v7750_v54 = vcombine.high %v1858_v10, %v1859_v7 }
 0x416   : > { %v9111_v15 = vsel %vm543_vm5, %v9076_v62, %v9099_v39  ;;  %v1947_v49 = vmul.bf16 %v9099_v39, %v8874_v63 }
 0x417   : > { %1800 = vrot.lane.b32.xlu1 %v7742_v13, %s8564_s24  ;;  %v1946_v16 = vmul.bf16 %v9111_v15, %v8872_v61  ;;  %v9189_v13 = vpop.permute.xlu1 %2334 }
 0x418   : > { %v7757_v53 = vcombine.low %v1947_v49, %v1947_v49  ;;  %v7759_v0 = vcombine.high %v1947_v49, %v1947_v49 }
 0x419   : > { %v9104_v14 = vpop.permute.xlu0 %2028  ;;  %v7756_v42 = vcombine.low %v1945_v21, %v1946_v16  ;;  %v7758_v34 = vcombine.high %v1945_v21, %v1946_v16 }
 0x41a   : > { %v9130_v25 = vsel %vm598_vm6, %v9095_v6, %v9104_v14  ;;  %v2036_v56 = vmul.bf16 %v9104_v14, %v8874_v63 }
 0x41b   : > { %1885 = vrot.lane.b32.xlu1 %v7748_v52, %s8562_s22  ;;  %v2035_v33 = vmul.bf16 %v9130_v25, %v8872_v61  ;;  %v9193_v52 = vpop.permute.xlu1 %2421 }
 0x41c   : > { %v7765_v1 = vcombine.low %v2036_v56, %v2036_v56  ;;  %v7767_v11 = vcombine.high %v2036_v56, %v2036_v56 }
 0x41d   : > { %v9116_v18 = vpop.permute.xlu0 %2160  ;;  %v7764_v38 = vcombine.low %v2034_v36, %v2035_v33  ;;  %v7766_v45 = vcombine.high %v2034_v36, %v2035_v33 }
 0x41e   : > { %v2168_v19 = vmul.bf16 %v9116_v18, %v8872_v61  ;;  %v9160_v40 = vsel %vm621_vm7, %v9106_v17, %v9116_v18 }
 0x41f   : > { %1889 = vrot.lane.b32.xlu1 %v7750_v54, %s8562_s22  ;;  %v2167_v44 = vmul.bf16 %v9160_v40, %v8874_v63 }
 0x420   : > { %v7778_v23 = vcombine.low %v2168_v19, %v2168_v19  ;;  %v7780_v30 = vcombine.high %v2168_v19, %v2168_v19 }
 0x421   : > { %v9125_v24 = vpop.permute.xlu0 %2247  ;;  %v7777_v48 = vcombine.low %v2166_v46, %v2167_v44  ;;  %v7779_v51 = vcombine.high %v2166_v46, %v2167_v44 }
 0x422   : > { %v9135_v27 = vsel %vm566_vm8, %v9123_v22, %v9125_v24  ;;  %2195 = vrot.lane.b32.xlu0 %v7778_v23, %s8560_s20 }
 0x423   : > { %v9144_v28 = vmul.bf16 %v9135_v27, %v8874_v63  ;;  %1972 = vrot.lane.b32.xlu1 %v7756_v42, %s8561_s21 }
 0x425   : > { %v7787_v35 = vcombine.high %v9140_v26, %v9144_v28  ;;  %v7785_v55 = vcombine.low %v9140_v26, %v9144_v28  ;;  %v9187_v7 = vpop.permute.xlu0 %2336 }
 0x426   : > { %2199 = vrot.lane.b32.xlu0 %v7780_v30, %s8560_s20 }
 0x427   : > { %1976 = vrot.lane.b32.xlu1 %v7758_v34, %s8561_s21 }
 0x429   : > { %v9191_v10 = vpop.permute.xlu0 %2423 }
 0x42a   : > { %1798 = vrot.lane.b32.xlu0 %v7741_v37, %s8564_s24 }
 0x42b   : > { %2061 = vrot.lane.b32.xlu1 %v7764_v38, %s8563_s23 }
 0x42e   : > { %1802 = vrot.lane.b32.xlu0 %v7743_v43, %s8564_s24 }
 0x42f   : > { %2065 = vrot.lane.b32.xlu1 %v7766_v45, %s8563_s23 }
 0x432   : > { %1887 = vrot.lane.b32.xlu0 %v7749_v47, %s8562_s22 }
 0x433   : > { %2193 = vrot.lane.b32.xlu1 %v7777_v48, %s8560_s20 }
 0x436   : > { %1891 = vrot.lane.b32.xlu0 %v7751_v50, %s8562_s22 }
 0x437   : > { %2197 = vrot.lane.b32.xlu1 %v7779_v51, %s8560_s20 }
 0x43a   : > { %1974 = vrot.lane.b32.xlu0 %v7757_v53, %s8561_s21 }
 0x43b   : > { %2280 = vrot.lane.b32.xlu1 %v7785_v55, %s8559_s17 }
 0x43e   : > { %1978 = vrot.lane.b32.xlu0 %v7759_v0, %s8561_s21 }
 0x442   : > { %2063 = vrot.lane.b32.xlu0 %v7765_v1, %s8563_s23 }
 0x446   : > { %2067 = vrot.lane.b32.xlu0 %v7767_v11, %s8563_s23 }
 0x485   : > { %v1797_v54 = vpop.permute.xlu1 %1796 }
 0x486   : > { %v1808_v29 = vrot.slane %v1797_v54, 4 }
 0x489   : > { %v1801_v42 = vpop.permute.xlu1 %1800 }
 0x48a   : > { %v1810_v33 = vrot.slane %v1801_v42, 4 }
 0x494   : > { %v9195_v16 = vpop.permute.xlu0 %2195 }
 0x498   : > { %v9197_v19 = vpop.permute.xlu0 %2199 }
 0x49c   : > { %v1799_v21 = vpop.permute.xlu0 %1798 }
 0x49d   : > { %v1809_v23 = vrot.slane %v1799_v21, 4 }
 0x49f   : > { %v1814_v34 = vsel %vm456_vm11, %v1808_v29, %v1809_v23 }
 0x4a0   : > { %v1803_v30 = vpop.permute.xlu0 %1802  ;;  %v1815_v38 = vsel %vm458_vm10, %v1797_v54, %v1814_v34 }
 0x4a1   : > { %v1811_v36 = vrot.slane %v1803_v30, 4 }
 0x4a3   : > { %v1816_v37 = vsel %vm456_vm11, %v1810_v33, %v1811_v36 }
 0x4a4   : > { %v1817_v41 = vsel %vm458_vm10, %v1801_v42, %v1816_v37 }
 0x4a5   : > { %v7811_v43 = vcombine.low %v1815_v38, %v1817_v41  ;;  %v7812_v44 = vcombine.high %v1815_v38, %v1817_v41 }
 0x4a7   : > { %2673 = vmatprep.subr.bf16.mxu0 %v7812_v44 }
 0x4a8   : > { %2674 = vmatpush1.bf16.msra.mxu0 %v7811_v43 }
 0x4d6   : > { %v1722_v45 = vpop.f32.mrb[4].mxu1 }
 0x4d7   : > { %v1723_v46 = vadd.f32 %v1722_v45, %v9072_v59  ;;  %v1724_v47 = vpop.f32.mrb[5].mxu1 }
 0x4d8   : > { %v1725_v48 = vadd.f32 %v1724_v47, %v9072_v59  ;;  %v1726_v49 = vpop.f32.mrb[6].mxu1  ;;  %v2344_v47 = vmul.bf16 %v9187_v7, %v8872_v61 }
 0x4d9   : > { %v1729_v50 = vmax.f32 %v1723_v46, 0.0  ;;  %v1727_v51 = vpop.f32.mrb[7].mxu1  ;;  %v2425_v46 = vsel %vm458_vm10, %v9193_v52, %v9191_v10 }
 0x4da   : > { %v1730_v53 = vmax.f32 %v1725_v48, 0.0 }
 0x4db   : > { %v1731_v55 = vpack.c.bf16 %v1729_v50, %v1729_v50 }
 0x4dc   : > { %v1732_v56 = vpack.c.bf16 %v1730_v53, %v1730_v53 }
 0x4dd   : > { %1733 = vst [vmem:[#allocation3 + $0x10] sm:$0xf] %v1731_v55 }
 0x4de   : > { %1734 = vst [vmem:[#allocation3 + $0x18] sm:$0xf] %v1732_v56 }
 0x4e4   : > { %v9205_v0 = vld [vmem:[#allocation3 + $0x10] sm:$0xf] }
 0x4e5   : > { %v9207_v1 = vld [vmem:[#allocation3 + $0x18] sm:$0xf]  ;;  %v2171_v11 = vmul.bf16 %v9116_v18, %v9205_v0  ;;  %v1773_v54 = vmul.bf16 %v9081_v31, %v9205_v0  ;;  %v1862_v30 = vmul.bf16 %v9092_v5, %v9205_v0  ;;  %v1949_v33 = vmul.bf16 %v9111_v15, %v9205_v0 }
 0x4e6   : > { %v1772_v59 = vmul.bf16 %v9066_v57, %v9207_v1  ;;  %v1774_v23 = vmul.bf16 %v9074_v60, %v9207_v1  ;;  %v1861_v29 = vmul.bf16 %v9070_v58, %v9207_v1  ;;  %v1863_v31 = vmul.bf16 %v9087_v2, %v9207_v1 }
 0x4e7   : > { %v7782_v21 = vcombine.low %v2171_v11, %v2171_v11  ;;  %v2255_v60 = vmul.bf16 %v9125_v24, %v8872_v61  ;;  %v1948_v5 = vmul.bf16 %v9076_v62, %v9207_v1  ;;  %v1950_v34 = vmul.bf16 %v9099_v39, %v9207_v1 }
 0x4e8   : > { %v7744_v42 = vcombine.low %v1772_v59, %v1773_v54  ;;  %v7745_v18 = vcombine.low %v1774_v23, %v1774_v23  ;;  %v7752_v57 = vcombine.low %v1861_v29, %v1862_v30  ;;  %v7753_v58 = vcombine.low %v1863_v31, %v1863_v31  ;;  %v9305_v30 = vld [vmem:[%s10976_s2 + $0x18] sm:$0xff] }
 0x4e9   : > { %2203 = vrot.lane.b32.xlu0 %v7782_v21, %s8560_s20  ;;  %v7786_v2 = vcombine.low %v2255_v60, %v2255_v60  ;;  %v7760_v36 = vcombine.low %v1948_v5, %v1949_v33  ;;  %v2037_v37 = vmul.bf16 %v9095_v6, %v9207_v1  ;;  %v2038_v62 = vmul.bf16 %v9130_v25, %v9205_v0  ;;  %v1888_v33 = vpop.permute.xlu0 %1887 }
 0x4ea   : > { %1804 = vrot.lane.b32.xlu1 %v7744_v42, %s8564_s24  ;;  %v2338_v15 = vsel %vm513_vm9, %v9189_v13, %v9187_v7  ;;  %v7761_v26 = vcombine.low %v1950_v34, %v1950_v34  ;;  %v2039_v28 = vmul.bf16 %v9104_v14, %v9207_v1  ;;  %v2342_v6 = vmul.bf16 %v9189_v13, %v8872_v61 }
 0x4eb   : > { %v2343_v39 = vmul.bf16 %v2338_v15, %v8874_v63  ;;  %v7788_v41 = vcombine.high %v2255_v60, %v2255_v60  ;;  %v2258_v14 = vmul.bf16 %v9125_v24, %v9205_v0  ;;  %v2169_v44 = vmul.bf16 %v9106_v17, %v9205_v0  ;;  %v1886_v60 = vpop.permute.xlu1 %1885 }
 0x4ec   : > { %v7769_v25 = vcombine.low %v2039_v28, %v2039_v28  ;;  %v2170_v45 = vmul.bf16 %v9160_v40, %v9207_v1  ;;  %v2430_v24 = vmul.bf16 %v2425_v46, %v8874_v63  ;;  %v2429_v17 = vmul.bf16 %v9193_v52, %v8872_v61 }
 0x4ed   : > { %1806 = vrot.lane.b32.xlu0 %v7745_v18, %s8564_s24  ;;  %v7793_v38 = vcombine.low %v2342_v6, %v2343_v39  ;;  %v7795_v43 = vcombine.high %v2342_v6, %v2343_v39  ;;  %v7790_v48 = vcombine.low %v2258_v14, %v2258_v14  ;;  %v7794_v40 = vcombine.low %v2344_v47, %v2344_v47  ;;  %v1892_v34 = vpop.permute.xlu0 %1891 }
 0x4ee   : > { %1893 = vrot.lane.b32.xlu1 %v7752_v57, %s8562_s22  ;;  %v7781_v49 = vcombine.low %v2169_v44, %v2170_v45  ;;  %v7801_v50 = vcombine.low %v2429_v17, %v2430_v24  ;;  %v2256_v51 = vmul.bf16 %v9123_v22, %v9205_v0  ;;  %v2257_v53 = vmul.bf16 %v9135_v27, %v9207_v1  ;;  %v9289_v22 = vld [vmem:[#allocation3] sm:$0xff] }
 0x4ef   : > { %v7796_v63 = vcombine.high %v2344_v47, %v2344_v47  ;;  %v2347_v55 = vmul.bf16 %v9187_v7, %v9205_v0  ;;  %v2345_v61 = vmul.bf16 %v9189_v13, %v9205_v0  ;;  %v2346_v11 = vmul.bf16 %v2338_v15, %v9207_v1  ;;  %v7842_v57 = vld [vmem:[%s10977_s3 + $0x20] sm:$0xff] }
 0x4f0   : > { %v7789_v56 = vcombine.low %v2256_v51, %v2257_v53  ;;  %v2431_v27 = vmul.bf16 %v9289_v22, %v9191_v10  ;;  %v7803_v21 = vcombine.high %v2429_v17, %v2430_v24  ;;  %v2432_v13 = vmul.bf16 %v9193_v52, %v9205_v0 }
 0x4f1   : > { %1895 = vrot.lane.b32.xlu0 %v7753_v58, %s8562_s22  ;;  %v7798_v54 = vcombine.low %v2347_v55, %v2347_v55  ;;  %v7797_v59 = vcombine.low %v2345_v61, %v2346_v11  ;;  %v2433_v23 = vmul.bf16 %v2425_v46, %v9207_v1  ;;  %v2434_v29 = vmul.bf16 %v9191_v10, %v9205_v0  ;;  %v7808_v10 = vld [vmem:[%s10977_s3 + $0x18] sm:$0xff]  ;;  %v1890_v58 = vpop.permute.xlu1 %1889  ;;  %v2091_v11 = vld [vmem:[%s10975_s1] sm:$0x44] }
 0x4f2   : > { %2284 = vrot.lane.b32.xlu1 %v7787_v35, %s8559_s17  ;;  %v7768_v35 = vcombine.low %v2037_v37, %v2038_v62  ;;  %v7802_v7 = vcombine.low %v2431_v27, %v2431_v27  ;;  %v7804_v42 = vcombine.high %v2431_v27, %v2431_v27  ;;  %v7810_v52 = vcombine.high %v9305_v30, %v9305_v30  ;;  %v1975_v37 = vpop.permute.xlu0 %1974 }
 0x4f3   : > { %v7805_v18 = vcombine.low %v2432_v13, %v2433_v23  ;;  %v7806_v31 = vcombine.low %v2434_v29, %v2434_v29  ;;  %v1897_v14 = vrot.slane %v1886_v60, 4 }
 0x4f4   : > { %7840 = vmatprep.mubr.msk.bf16.mxu0 %vm2663_vm13, %v7810_v52 }
 0x4f5   : > { %2282 = vrot.lane.b32.xlu0 %v7786_v2, %s8559_s17  ;;  %v1973_v5 = vpop.permute.xlu1 %1972 }
 0x4f6   : > { %1980 = vrot.lane.b32.xlu1 %v7760_v36, %s8561_s21  ;;  %v1979_v15 = vpop.permute.xlu0 %1978 }
 0x4f7   : > { %v1987_v44 = vrot.slane %v1979_v15, 4 }
 0x4f9   : > { %1982 = vrot.lane.b32.xlu0 %v7761_v26, %s8561_s21  ;;  %v1977_v2 = vpop.permute.xlu1 %1976 }
 0x4fa   : > { %2069 = vrot.lane.b32.xlu1 %v7768_v35, %s8563_s23  ;;  %v2064_v28 = vpop.permute.xlu0 %2063  ;;  %v1986_v17 = vrot.slane %v1977_v2, 4 }
 0x4fd   : > { %2071 = vrot.lane.b32.xlu0 %v7769_v25, %s8563_s23  ;;  %v9319_v36 = vpop.permute.xlu1 %2061 }
 0x4fe   : > { %2369 = vrot.lane.b32.xlu1 %v7793_v38, %s8557_s30  ;;  %v9327_v35 = vpop.permute.xlu0 %2067  ;;  %v1898_v38 = vrot.slane %v1888_v33, 4  ;;  %v2073_v15 = vrot.slane %v9319_v36, 4 }
 0x500   : > { %v1903_v46 = vsel %vm456_vm11, %v1897_v14, %v1898_v38  ;;  %v2076_v14 = vrot.slane %v9327_v35, 4 }
 0x501   : > { %2286 = vrot.lane.b32.xlu0 %v7788_v41, %s8559_s17  ;;  %v9321_v62 = vpop.permute.xlu1 %2065  ;;  %v1904_v61 = vsel %vm513_vm9, %v1886_v60, %v1903_v46 }
 0x502   : > { %2373 = vrot.lane.b32.xlu1 %v7795_v43, %s8557_s30  ;;  %v1900_v43 = vrot.slane %v1892_v34, 4  ;;  %v2075_v46 = vrot.slane %v9321_v62, 4 }
 0x505   : > { %2290 = vrot.lane.b32.xlu0 %v7790_v48, %s8559_s17  ;;  %v9323_v26 = vpop.permute.xlu1 %2193 }
 0x506   : > { %2201 = vrot.lane.b32.xlu1 %v7781_v49, %s8560_s20  ;;  %v1899_v49 = vrot.slane %v1890_v58, 4 }
 0x508   : > { %v1905_v53 = vsel %vm456_vm11, %v1899_v49, %v1900_v43 }
 0x509   : > { %2371 = vrot.lane.b32.xlu0 %v7794_v40, %s8557_s30  ;;  %v9325_v39 = vpop.permute.xlu1 %2197  ;;  %v1984_v40 = vrot.slane %v1973_v5, 4 }
 0x50a   : > { %2456 = vrot.lane.b32.xlu1 %v7801_v50, %s8556_s29  ;;  %v1985_v50 = vrot.slane %v1975_v37, 4 }
 0x50c   : > { %v1990_v13 = vsel %vm456_vm11, %v1984_v40, %v1985_v50 }
 0x50d   : > { %2375 = vrot.lane.b32.xlu0 %v7796_v63, %s8557_s30  ;;  %v9329_v6 = vpop.permute.xlu1 %2280  ;;  %v1992_v63 = vsel %vm456_vm11, %v1986_v17, %v1987_v44  ;;  %v1991_v37 = vsel %vm566_vm8, %v1973_v5, %v1990_v13 }
 0x50e   : > { %2288 = vrot.lane.b32.xlu1 %v7789_v56, %s8559_s17 }
 0x511   : > { %2379 = vrot.lane.b32.xlu0 %v7798_v54, %s8557_s30 }
 0x512   : > { %2377 = vrot.lane.b32.xlu1 %v7797_v59, %s8557_s30 }
 0x515   : > { %2458 = vrot.lane.b32.xlu0 %v7802_v7, %s8556_s29 }
 0x516   : > { %2460 = vrot.lane.b32.xlu1 %v7803_v21, %s8556_s29 }
 0x519   : > { %2462 = vrot.lane.b32.xlu0 %v7804_v42, %s8556_s29  ;;  %v7770_v42 = vcombine.low %v2091_v11, %v2091_v11 }
 0x51a   : > { %2464 = vrot.lane.b32.xlu1 %v7805_v18, %s8556_s29  ;;  %v1906_v18 = vsel %vm513_vm9, %v1890_v58, %v1905_v53 }
 0x51d   : > { %2466 = vrot.lane.b32.xlu0 %v7806_v31, %s8556_s29  ;;  %v1993_v31 = vsel %vm566_vm8, %v1977_v2, %v1992_v63 }
 0x51e   : > { %2519 = vperm.xlu1 %8333, %v7808_v10   ;;  %v7771_v10 = vcombine.high %v2091_v11, %v2091_v11  ;;  %v7818_v38 = vcombine.high %v1991_v37, %v1993_v31 }
 0x520   : > { %v2105_v43 = vpack.i.b16 %v7771_v10, %v7771_v10 }
 0x521   : > { %2736 = vperm.xlu0 %8332, %v7842_v57   ;;  %v2074_v57 = vrot.slane %v2064_v28, 4 }
 0x522   : > { %v2110_v40 = vrot.slane %v2105_v43, %v8702_v32 }
 0x523   : > { %v2079_v44 = vsel %vm456_vm11, %v2073_v15, %v2074_v57 }
 0x524   : > { %v2080_v17 = vsel %vm621_vm7, %v9319_v36, %v2079_v44 }
 0x55b   : > { %v9331_v25 = vpop.permute.xlu0 %2203 }
 0x55c   : > { %v1805_v41 = vpop.permute.xlu1 %1804 }
 0x55d   : > { %v1812_v47 = vrot.slane %v1805_v41, 4 }
 0x55f   : > { %v1807_v45 = vpop.permute.xlu0 %1806 }
 0x560   : > { %v1813_v48 = vrot.slane %v1807_v45, 4  ;;  %v1894_v24 = vpop.permute.xlu1 %1893 }
 0x561   : > { %v1901_v27 = vrot.slane %v1894_v24, 4 }
 0x562   : > { %v1818_v51 = vsel %vm456_vm11, %v1812_v47, %v1813_v48  ;;  %v7817_v47 = vcombine.low %v1991_v37, %v1993_v31  ;;  %v2210_v37 = vrot.slane %v9331_v25, 4 }
 0x563   : > { %v1896_v55 = vpop.permute.xlu0 %1895  ;;  %v1819_v56 = vsel %vm458_vm10, %v1805_v41, %v1818_v51  ;;  %v2098_v41 = vpack.i.b16 %v7770_v42, %v7770_v42 }
 0x564   : > { %v1902_v54 = vrot.slane %v1896_v55, 4  ;;  %v9342_v59 = vpop.permute.xlu1 %2284  ;;  %v7813_v7 = vcombine.low %v1819_v56, %v1904_v61  ;;  %v7814_v21 = vcombine.high %v1819_v56, %v1904_v61  ;;  %v2205_v56 = vrot.slane %v9323_v26, 4 }
 0x565   : > { %v2103_v48 = vrot.slane %v2098_v41, %v8702_v32  ;;  %v2294_v41 = vrot.slane %v9342_v59, 4 }
 0x566   : > { %v1907_v23 = vsel %vm456_vm11, %v1901_v27, %v1902_v54  ;;  %2675 = vmatprep.subr.bf16.mxu0 %v7814_v21  ;;  %v2114_v27 = vmul.bf16 %v2110_v40, %v9207_v1  ;;  %v2206_v54 = vrot.slane %v9195_v16, 4  ;;  %v2208_v16 = vrot.slane %v9197_v19, 4 }
 0x567   : > { %2676 = vmatpush1.bf16.msra.mxu0 %v7813_v7  ;;  %v9346_v29 = vpop.permute.xlu0 %2282  ;;  %v1908_v52 = vsel %vm513_vm9, %v1894_v24, %v1907_v23  ;;  %v2081_v24 = vsel %vm456_vm11, %v2075_v46, %v2076_v14  ;;  %v2113_v11 = vmul.bf16 %v2103_v48, %v9205_v0  ;;  %v8542_v0 = vld [vmem:[#allocation3 + $0x8] sm:$0xff]  ;;  %v2292_v14 = vrot.slane %v9329_v6, 4 }
 0x568   : > { %v1981_v60 = vpop.permute.xlu1 %1980  ;;  %v7815_v33 = vcombine.low %v1906_v18, %v1908_v52  ;;  %v7816_v34 = vcombine.high %v1906_v18, %v1908_v52  ;;  %v2082_v7 = vsel %vm621_vm7, %v9321_v62, %v2081_v24  ;;  %v2211_v18 = vsel %vm456_vm11, %v2205_v56, %v2206_v54 }
 0x569   : > { %v1988_v2 = vrot.slane %v1981_v60, 4  ;;  %v2207_v52 = vrot.slane %v9325_v39, 4  ;;  %v2112_v1 = vmul.bf16 %v8542_v0, %v2110_v40  ;;  %v7774_v31 = vcombine.low %v2113_v11, %v2114_v27 }
 0x56a   : > { %2677 = vmatprep.subr.bf16.mxu0 %v7816_v34  ;;  %v2212_v62 = vsel %vm598_vm6, %v9323_v26, %v2211_v18  ;;  %v2293_v15 = vrot.slane %v9346_v29, 4 }
 0x56b   : > { %2678 = vmatpush1.bf16.msra.mxu0 %v7815_v33  ;;  %v1983_v58 = vpop.permute.xlu0 %1982  ;;  %v2111_v33 = vmul.bf16 %v9289_v22, %v2103_v48  ;;  %v2213_v34 = vsel %vm456_vm11, %v2207_v52, %v2208_v16  ;;  %v7826_v19 = vcombine.high %v7774_v31, %v2212_v62 }
 0x56c   : > { %v1989_v45 = vrot.slane %v1983_v58, 4  ;;  %v2070_v28 = vpop.permute.xlu1 %2069  ;;  %2679 = vmatprep.subr.bf16.mxu0 %v7818_v38  ;;  %v2214_v43 = vsel %vm598_vm6, %v9325_v39, %v2213_v34  ;;  %v2298_v29 = vsel %vm456_vm11, %v2292_v14, %v2293_v15 }
 0x56d   : > { %v2077_v50 = vrot.slane %v2070_v28, 4  ;;  %v2299_v24 = vsel %vm543_vm5, %v9329_v6, %v2298_v29  ;;  %v2843_v29 = vld [vmem:[%s10975_s1] sm:$0x11] }
 0x56e   : > { %v1994_v5 = vsel %vm456_vm11, %v1988_v2, %v1989_v45  ;;  %v8308_v45 = vcombine.low %v2113_v11, %v2212_v62 }
 0x56f   : > { %2680 = vmatpush1.bf16.msra.mxu0 %v7817_v47  ;;  %v2072_v35 = vpop.permute.xlu0 %2071  ;;  %v1995_v49 = vsel %vm566_vm8, %v1981_v60, %v1994_v5 }
 0x570   : > { %v2078_v51 = vrot.slane %v2072_v35, 4  ;;  %v9363_v53 = vpop.permute.xlu1 %2369  ;;  %v7819_v63 = vcombine.low %v1995_v49, %v2080_v17  ;;  %v7820_v55 = vcombine.high %v1995_v49, %v2080_v17 }
 0x571   : > { %v2381_v46 = vrot.slane %v9363_v53, 4 }
 0x572   : > { %v2083_v61 = vsel %vm456_vm11, %v2077_v50, %v2078_v51  ;;  %2681 = vmatprep.subr.bf16.mxu0 %v7820_v55 }
 0x573   : > { %2682 = vmatpush1.bf16.msra.mxu0 %v7819_v63  ;;  %v2287_v36 = vpop.permute.xlu0 %2286  ;;  %v2084_v21 = vsel %vm621_vm7, %v2070_v28, %v2083_v61 }
 0x574   : > { %v9373_v13 = vpop.permute.xlu1 %2373  ;;  %v7821_v23 = vcombine.low %v2082_v7, %v2084_v21  ;;  %v7822_v42 = vcombine.high %v2082_v7, %v2084_v21  ;;  %v2295_v57 = vrot.slane %v2287_v36, 4 }
 0x575   : > { %v2383_v51 = vrot.slane %v9373_v13, 4 }
 0x576   : > { %2683 = vmatprep.subr.bf16.mxu0 %v7822_v42  ;;  %v2300_v22 = vsel %vm456_vm11, %v2294_v41, %v2295_v57 }
 0x577   : > { %2684 = vmatpush1.bf16.msra.mxu0 %v7821_v23  ;;  %v2291_v10 = vpop.permute.xlu0 %2290  ;;  %v2301_v5 = vsel %vm543_vm5, %v9342_v59, %v2300_v22 }
 0x578   : > { %v2202_v60 = vpop.permute.xlu1 %2201  ;;  %2685 = vmatprep.subr.bf16.mxu0 %v2112_v1  ;;  %v2297_v48 = vrot.slane %v2291_v10, 4  ;;  %v7830_v50 = vcombine.high %v2299_v24, %v2301_v5  ;;  %v7829_v54 = vcombine.low %v2299_v24, %v2301_v5 }
 0x579   : > { %v2209_v38 = vrot.slane %v2202_v60, 4 }
 0x57b   : > { %v2215_v58 = vsel %vm456_vm11, %v2209_v38, %v2210_v37  ;;  %2686 = vmatpush1.bf16.msra.mxu0 %v2111_v33  ;;  %v2372_v26 = vpop.permute.xlu0 %2371 }
 0x57c   : > { %v2216_v44 = vsel %vm598_vm6, %v2202_v60, %v2215_v58  ;;  %v2457_v25 = vpop.permute.xlu1 %2456  ;;  %2687 = vmatprep.subr.bf16.mxu0 %v7826_v19  ;;  %v2382_v2 = vrot.slane %v2372_v26, 4 }
 0x57d   : > { %v7828_v28 = vcombine.high %v2214_v43, %v2216_v44  ;;  %v7827_v35 = vcombine.low %v2214_v43, %v2216_v44  ;;  %v2468_v1 = vrot.slane %v2457_v25, 4  ;;  %v7809_v44 = vcombine.low %v9305_v30, %v9305_v30  ;;  %v2947_v30 = vld [vmem:[%s10975_s1] sm:$0x22] }
 0x57e   : > { %v2387_v49 = vsel %vm456_vm11, %v2381_v46, %v2382_v2  ;;  %v2896_v2 = vld [vmem:[%s10975_s1] sm:$0x22]  ;;  %v7849_v46 = vcombine.high %v2843_v29, %v2843_v29  ;;  %v7856_v24 = vcombine.low %v2947_v30, %v2947_v30 }
 0x57f   : > { %2688 = vmatpush1.bf16.msra.mxu0 %v8308_v45  ;;  %v2376_v47 = vpop.permute.xlu0 %2375  ;;  %v2388_v56 = vsel %vm490_vm4, %v9363_v53, %v2387_v49  ;;  %v7853_v5 = vcombine.high %v2896_v2, %v2896_v2 }
 0x580   : > { %v2289_v39 = vpop.permute.xlu1 %2288  ;;  %2689 = vmatprep.subr.bf16.mxu0 %v7828_v28  ;;  %v2384_v17 = vrot.slane %v2376_v47, 4  ;;  %v7848_v47 = vcombine.low %v2843_v29, %v2843_v29 }
 0x581   : > { %v2296_v40 = vrot.slane %v2289_v39, 4 }
 0x582   : > { %v2389_v6 = vsel %vm456_vm11, %v2383_v51, %v2384_v17  ;;  %v2858_v17 = vshrl.u32 %v7849_v46, 16  ;;  %v3029_v51 = vld [vmem:[%s10975_s1] sm:$0x44] }
 0x583   : > { %v2302_v63 = vsel %vm456_vm11, %v2296_v40, %v2297_v48  ;;  %2690 = vmatpush1.bf16.msra.mxu0 %v7827_v35  ;;  %v2380_v55 = vpop.permute.xlu0 %2379  ;;  %v2390_v23 = vsel %vm490_vm4, %v9373_v13, %v2389_v6  ;;  %v7852_v48 = vcombine.low %v2896_v2, %v2896_v2  ;;  %v2850_v40 = vshrl.u32 %v7848_v47, 16 }
 0x584   : > { %v2303_v59 = vsel %vm543_vm5, %v2289_v39, %v2302_v63  ;;  %v2386_v61 = vrot.slane %v2380_v55, 4  ;;  %v2378_v11 = vpop.permute.xlu1 %2377  ;;  %2691 = vmatprep.subr.bf16.mxu0 %v7830_v50  ;;  %v7857_v39 = vcombine.high %v2947_v30, %v2947_v30  ;;  %v2954_v6 = vshrl.u32 %v7856_v24, 16 }
 0x585   : > { %v2385_v27 = vrot.slane %v2378_v11, 4  ;;  %v7832_v36 = vcombine.high %v2303_v59, %v2388_v56  ;;  %v7831_v53 = vcombine.low %v2303_v59, %v2388_v56  ;;  %v2859_v59 = vpack.i.b16 %v2858_v17, %v2858_v17 }
 0x586   : > { %v2962_v50 = vshrl.u32 %v7857_v39, 16  ;;  %v2851_v56 = vpack.i.b16 %v2850_v40, %v2850_v40 }
 0x587   : > { %v2391_v7 = vsel %vm456_vm11, %v2385_v27, %v2386_v61  ;;  %2692 = vmatpush1.bf16.msra.mxu0 %v7829_v54  ;;  %v2459_v21 = vpop.permute.xlu0 %2458  ;;  %v2910_v61 = vpack.i.b16 %v7853_v5, %v7853_v5  ;;  %v2864_v27 = vrot.slane %v2859_v59, %v8628_v12 }
 0x588   : > { %v2392_v42 = vsel %vm490_vm4, %v2378_v11, %v2391_v7  ;;  %v2469_v18 = vrot.slane %v2459_v21, 4  ;;  %v2461_v52 = vpop.permute.xlu1 %2460  ;;  %2693 = vmatprep.subr.bf16.mxu0 %v7832_v36  ;;  %v2903_v11 = vpack.i.b16 %v7852_v48, %v7852_v48  ;;  %v2856_v54 = vrot.slane %v2851_v56, %v8628_v12 }
 0x589   : > { %v7834_v0 = vcombine.high %v2390_v23, %v2392_v42  ;;  %v2470_v10 = vrot.slane %v2461_v52, 4  ;;  %v7833_v57 = vcombine.low %v2390_v23, %v2392_v42  ;;  %v7864_v36 = vcombine.high %v3029_v51, %v3029_v51 }
 0x58a   : > { %v2474_v16 = vsel %vm456_vm11, %v2468_v1, %v2469_v18  ;;  %v7863_v7 = vcombine.low %v3029_v51, %v3029_v51  ;;  %v2963_v21 = vpack.i.b16 %v2962_v50, %v2962_v50  ;;  %v2955_v23 = vpack.i.b16 %v2954_v6, %v2954_v6  ;;  %v3133_v1 = vld [vmem:[%s10975_s1] sm:$0x88] }
 0x58b   : > { %2694 = vmatpush1.bf16.msra.mxu0 %v7831_v53  ;;  %v2463_v31 = vpop.permute.xlu0 %2462  ;;  %v2475_v34 = vsel %vm434_vm3, %v2457_v25, %v2474_v16  ;;  %v2792_v25 = vld [vmem:[%s10975_s1] sm:$0x11]  ;;  %v2915_v42 = vrot.slane %v2910_v61, %v8676_v3  ;;  %v2908_v18 = vrot.slane %v2903_v11, %v8676_v3 }
 0x58c   : > { %v2471_v62 = vrot.slane %v2463_v31, 4  ;;  %2695 = vmatprep.subr.bf16.mxu0 %v7834_v0  ;;  %v2465_v60 = vpop.permute.xlu1 %2464  ;;  %v7845_v45 = vcombine.high %v2792_v25, %v2792_v25  ;;  %v7844_v28 = vcombine.low %v2792_v25, %v2792_v25  ;;  %v3036_v53 = vshrl.u32 %v7863_v7, 16  ;;  %v3082_v0 = vld [vmem:[%s10975_s1] sm:$0x88] }
 0x58d   : > { %v2472_v15 = vrot.slane %v2465_v60, 4  ;;  %v2968_v31 = vrot.slane %v2963_v21, %v8676_v3  ;;  %v2960_v16 = vrot.slane %v2955_v23, %v8676_v3  ;;  %v7841_v61 = vld [vmem:[%s10976_s2 + $0x20] sm:$0xf] }
 0x58e   : > { %v2476_v33 = vsel %vm456_vm11, %v2470_v10, %v2471_v62  ;;  %v2806_v35 = vpack.i.b16 %v7845_v45, %v7845_v45  ;;  %v2799_v49 = vpack.i.b16 %v7844_v28, %v7844_v28  ;;  %v7868_v10 = vcombine.high %v3082_v0, %v3082_v0 }
 0x58f   : > { %2696 = vmatpush1.bf16.msra.mxu0 %v7833_v57  ;;  %v2467_v13 = vpop.permute.xlu0 %2466  ;;  %v2477_v37 = vsel %vm434_vm3, %v2461_v52, %v2476_v33  ;;  %v3044_v52 = vshrl.u32 %v7864_v36, 16  ;;  %v7867_v62 = vcombine.low %v3082_v0, %v3082_v0  ;;  %v7872_v57 = vcombine.high %v3133_v1, %v3133_v1 }
 0x590   : > { %v2473_v38 = vrot.slane %v2467_v13, 4  ;;  %v7835_v41 = vcombine.low %v2475_v34, %v2477_v37  ;;  %v7836_v19 = vcombine.high %v2475_v34, %v2477_v37  ;;  %v2811_v63 = vrot.slane %v2806_v35, %v8628_v12 }
 0x591   : > { %v2804_v55 = vrot.slane %v2799_v49, %v8628_v12  ;;  %v3037_v33 = vpack.i.b16 %v3036_v53, %v3036_v53  ;;  %v7871_v13 = vcombine.low %v3133_v1, %v3133_v1  ;;  %v3096_v34 = vpack.i.b16 %v7868_v10, %v7868_v10 }
 0x592   : > { %v2478_v14 = vsel %vm456_vm11, %v2472_v15, %v2473_v38  ;;  %2697 = vmatprep.subr.bf16.mxu0 %v7836_v19  ;;  %2816 = vrot.lane.b32.xlu0 %v2811_v63, %s8556_s29  ;;  %v3089_v37 = vpack.i.b16 %v7867_v62, %v7867_v62 }
 0x593   : > { %2698 = vmatpush1.bf16.msra.mxu0 %v7835_v41  ;;  %v2479_v58 = vsel %vm434_vm3, %v2465_v60, %v2478_v14  ;;  %2814 = vrot.lane.b32.xlu1 %v2804_v55, %s8556_s29  ;;  %v3045_v60 = vpack.i.b16 %v3044_v52, %v3044_v52  ;;  %v3042_v38 = vrot.slane %v3037_v33, %v8702_v32  ;;  %v3148_v41 = vshrl.u32 %v7872_v57, 16  ;;  %v3186_v14 = vld [vmem:[%s10975_s1 + $0x8] sm:$0x11] }
 0x594   : > { %v7838_v26 = vcombine.high %v2479_v58, %v2479_v58  ;;  %v7837_v43 = vcombine.low %v2479_v58, %v2479_v58  ;;  %v3140_v19 = vshrl.u32 %v7871_v13, 16  ;;  %v3101_v58 = vrot.slane %v3096_v34, %v8690_v20 }
 0x595   : > { %v3050_v15 = vrot.slane %v3045_v60, %v8702_v32 }
 0x596   : > { %7839 = vmatprep.subr.msk.bf16.mxu0 %vm456_vm11, %v7838_v26  ;;  %v2668_v22 = vsel %vm456_vm11, %v7837_v43, 0  ;;  %2869 = vrot.lane.b32.xlu0 %v2864_v27, %s8557_s30  ;;  %v7876_v26 = vcombine.high %v3186_v14, %v3186_v14  ;;  %v7875_v43 = vcombine.low %v3186_v14, %v3186_v14  ;;  %v3141_v25 = vpack.i.b16 %v3140_v19, %v3140_v19 }
 0x597   : > { %2700 = vmatpush1.bf16.msra.mxu0 %v2668_v22  ;;  %2867 = vrot.lane.b32.xlu1 %v2856_v54, %s8557_s30  ;;  %v3094_v22 = vrot.slane %v3089_v37, %v8690_v20 }
 0x598   : > { %v3200_v29 = vpack.i.b16 %v7876_v26, %v7876_v26  ;;  %v3146_v45 = vrot.slane %v3141_v25, %v8690_v20  ;;  %v3193_v28 = vpack.i.b16 %v7875_v43, %v7875_v43 }
 0x59a   : > { %2706 = vmatmul.mubr.bf16.vlgmr.msra.gmra.mrb[4].mxu0 %v7809_v44  ;;  %2920 = vrot.lane.b32.xlu0 %v2915_v42, %s8559_s17  ;;  %v3149_v44 = vpack.i.b16 %v3148_v41, %v3148_v41  ;;  %v3205_v46 = vrot.slane %v3200_v29, %v8628_v12  ;;  %v3198_v47 = vrot.slane %v3193_v28, %v8628_v12 }
 0x59b   : > { %2918 = vrot.lane.b32.xlu1 %v2908_v18, %s8559_s17 }
 0x59c   : > { %v3154_v2 = vrot.slane %v3149_v44, %v8690_v20 }
 0x59d   : > { %v2520_v30 = vpop.permute.xlu1 %2519 }
 0x59e   : > { %2973 = vrot.lane.b32.xlu0 %v2968_v31, %s8560_s20 }
 0x59f   : > { %2971 = vrot.lane.b32.xlu1 %v2960_v16, %s8560_s20 }
 0x5a0   : > { %v2737_v11 = vpop.permute.xlu0 %2736 }
 0x5a2   : > { %3055 = vrot.lane.b32.xlu0 %v3050_v15, %s8563_s23 }
 0x5a3   : > { %3053 = vrot.lane.b32.xlu1 %v3042_v38, %s8563_s23 }
 0x5a6   : > { %3106 = vrot.lane.b32.xlu0 %v3101_v58, %s8561_s21 }
 0x5a7   : > { %3104 = vrot.lane.b32.xlu1 %v3094_v22, %s8561_s21 }
 0x5aa   : > { %3159 = vrot.lane.b32.xlu0 %v3154_v2, %s8562_s22 }
 0x5ab   : > { %3157 = vrot.lane.b32.xlu1 %v3146_v45, %s8562_s22 }
 0x5ae   : > { %3210 = vrot.lane.b32.xlu0 %v3205_v46, %s8564_s24 }
 0x5af   : > { %3208 = vrot.lane.b32.xlu1 %v3198_v47, %s8564_s24 }
 0x604   : > { %v2817_v6 = vpop.permute.xlu0 %2816 }
 0x605   : > { %v2815_v54 = vpop.permute.xlu1 %2814 }
 0x606   : > { %v2818_v34 = vsel %vm434_vm3, %v2815_v54, %v2817_v6 }
 0x608   : > { %v2870_v27 = vpop.permute.xlu0 %2869 }
 0x609   : > { %v2868_v52 = vpop.permute.xlu1 %2867 }
 0x60a   : > { %v2871_v38 = vsel %vm490_vm4, %v2868_v52, %v2870_v27 }
 0x60c   : > { %v2921_v23 = vpop.permute.xlu0 %2920 }
 0x60d   : > { %v2919_v62 = vpop.permute.xlu1 %2918 }
 0x60e   : > { %v2922_v44 = vsel %vm543_vm5, %v2919_v62, %v2921_v23 }
 0x610   : > { %v2974_v10 = vpop.permute.xlu0 %2973 }
 0x611   : > { %v2972_v33 = vpop.permute.xlu1 %2971 }
 0x614   : > { %v3056_v60 = vpop.permute.xlu0 %3055 }
 0x615   : > { %v3054_v19 = vpop.permute.xlu1 %3053 }
 0x618   : > { %v3107_v47 = vpop.permute.xlu0 %3106 }
 0x619   : > { %v3105_v46 = vpop.permute.xlu1 %3104 }
 0x66d   : > { %v2707_v5 = vpop.f32.mrb[4].mxu0 }
 0x66e   : > { %v2708_v48 = vadd.f32 %v2707_v5, %v2520_v30  ;;  %v2709_v39 = vpop.f32.mrb[5].mxu0 }
 0x66f   : > { %v2710_v24 = vadd.f32 %v2709_v39, %v2520_v30  ;;  %v2711_v35 = vpop.f32.mrb[6].mxu0  ;;  %v2975_v30 = vsel %vm598_vm6, %v2972_v33, %v2974_v10 }
 0x670   : > { %v2714_v49 = vmax.f32 %v2708_v48, 0.0  ;;  %v2712_v17 = vpop.f32.mrb[7].mxu0 }
 0x671   : > { %v2715_v40 = vmax.f32 %v2710_v24, 0.0  ;;  %v3057_v24 = vsel %vm621_vm7, %v3054_v19, %v3056_v60 }
 0x672   : > { %v2716_v50 = vpack.c.bf16 %v2714_v49, %v2714_v49 }
 0x673   : > { %v2717_v51 = vpack.c.bf16 %v2715_v40, %v2715_v40 }
 0x674   : > { %v2720_v63 = vrot.slane %v2716_v50, 4  ;;  %v3158_v50 = vpop.permute.xlu1 %3157 }
 0x675   : > { %v2721_v55 = vrot.slane %v2717_v51, 4  ;;  %v3160_v51 = vpop.permute.xlu0 %3159 }
 0x676   : > { %2724 = vst [vmem:[#allocation3 + $0x10] sm:$0xf0] %v2720_v63 }
 0x677   : > { %2725 = vst [vmem:[#allocation3 + $0x18] sm:$0xf0] %v2721_v55  ;;  %v3108_v55 = vsel %vm566_vm8, %v3105_v46, %v3107_v47 }
 0x67d   : > { %v2728_v56 = vld [vmem:[#allocation3 + $0x10] sm:$0xff] }
 0x67e   : > { %v2729_v59 = vld [vmem:[#allocation3 + $0x18] sm:$0xff] }
 0x67f   : > { %2745 = vmatprep.subr.bf16.mxu1 %v2729_v59 }
 0x680   : > { %2746 = vmatpush1.bf16.msra.mxu1 %v2728_v56 }
 0x683   : > { %7843 = vmatmul.mubr.msk.bf16.vlgmr.msra.gmra.mrb[8].mxu1 %vm2739_vm14, %v7841_v61 }
 0x684   : > { %3341 = vmatprep.mubr.bf16.mxu1 %v8555_v4 }
 0x756   : > { %v2777_v36 = vpop.f32.mrb[8].mxu1 }
 0x757   : > { %v2778_v7 = vadd.f32 %v2777_v36, %v2737_v11  ;;  %v2779_v21 = vpop.f32.mrb[9].mxu1 }
 0x758   : > { %v2780_v42 = vadd.f32 %v2779_v21, %v2737_v11  ;;  %v2781_v18 = vpop.f32.mrb[10].mxu1  ;;  %v3211_v21 = vpop.permute.xlu0 %3210 }
 0x759   : > { %v9480_v53 = vadd.f32 %v2778_v7, %v8722_v8  ;;  %v2782_v0 = vpop.f32.mrb[11].mxu1  ;;  %v3209_v7 = vpop.permute.xlu1 %3208 }
 0x75a   : > { %v9483_v1 = vadd.f32 %v2780_v42, %v8724_v9  ;;  %v3212_v0 = vsel %vm458_vm10, %v3209_v7, %v3211_v21 }
 0x75b   : > { %v2786_v31 = vpack.c.bf16 %v9480_v53, %v9480_v53 }
 0x75c   : > { %v2787_v16 = vpack.c.bf16 %v9483_v1, %v9483_v1 }
 0x75d   : > { %2788 = vst [vmem:[#allocation3] sm:$0xf] %v2786_v31 }
 0x75e   : > { %2789 = vst [vmem:[#allocation3 + $0x8] sm:$0xf] %v2787_v16 }
 0x764   : > { %v9489_v57 = vld [vmem:[#allocation3] sm:$0xf] }
 0x765   : > { %v3063_v8 = vmul.bf16 %v3056_v60, %v9489_v57  ;;  %v9492_v13 = vld [vmem:[#allocation3 + $0x8] sm:$0xf]  ;;  %v2823_v15 = vmul.bf16 %v2818_v34, %v9489_v57  ;;  %v2876_v26 = vmul.bf16 %v2871_v38, %v9489_v57  ;;  %v2927_v2 = vmul.bf16 %v2922_v44, %v9489_v57  ;;  %v3430_v34 = vld [vmem:[%s10975_s1] sm:$0x11] }
 0x766   : > { %v2822_v37 = vmul.bf16 %v2815_v54, %v9492_v13  ;;  %v2824_v41 = vmul.bf16 %v2817_v6, %v9492_v13  ;;  %v2875_v58 = vmul.bf16 %v2868_v52, %v9492_v13  ;;  %v2877_v22 = vmul.bf16 %v2870_v27, %v9492_v13 }
 0x767   : > { %v7866_v9 = vcombine.low %v3063_v8, %v3063_v8  ;;  %v2926_v29 = vmul.bf16 %v2919_v62, %v9492_v13  ;;  %v2928_v28 = vmul.bf16 %v2921_v23, %v9492_v13  ;;  %v2979_v48 = vmul.bf16 %v2972_v33, %v9492_v13  ;;  %v7880_v8 = vld [vmem:[%s10977_s3 + $0x28] sm:$0xff] }
 0x768   : > { %v7846_v14 = vcombine.low %v2822_v37, %v2823_v15  ;;  %v7847_v43 = vcombine.low %v2824_v41, %v2824_v41  ;;  %v7850_v25 = vcombine.low %v2875_v58, %v2876_v26  ;;  %v7851_v45 = vcombine.low %v2877_v22, %v2877_v22  ;;  %v3498_v37 = vld [vmem:[%s10975_s1] sm:$0x22] }
 0x769   : > { %3074 = vrot.lane.b32.xlu0 %v7866_v9, %s8560_s20  ;;  %v7854_v5 = vcombine.low %v2926_v29, %v2927_v2  ;;  %v2980_v39 = vmul.bf16 %v2975_v30, %v9489_v57  ;;  %v7855_v35 = vcombine.low %v2928_v28, %v2928_v28  ;;  %v2981_v49 = vmul.bf16 %v2974_v10, %v9492_v13  ;;  %v3364_v9 = vld [vmem:[%s10975_s1] sm:$0x11]  ;;  %v3666_v28 = vld [vmem:[%s10975_s1] sm:$0x44] }
 0x76a   : > { %2833 = vrot.lane.b32.xlu1 %v7846_v14, %s8564_s24  ;;  %v3061_v17 = vmul.bf16 %v3054_v19, %v9489_v57  ;;  %v3062_v40 = vmul.bf16 %v3057_v24, %v9492_v13  ;;  %v3114_v59 = vmul.bf16 %v3107_v47, %v9489_v57  ;;  %v3112_v11 = vmul.bf16 %v3105_v46, %v9489_v57  ;;  %v3564_v14 = vld [vmem:[%s10975_s1] sm:$0x22] }
 0x76b   : > { %v7858_v63 = vcombine.low %v2979_v48, %v2980_v39  ;;  %v7859_v56 = vcombine.low %v2981_v49, %v2981_v49  ;;  %v3113_v6 = vmul.bf16 %v3108_v55, %v9492_v13  ;;  %v3161_v54 = vsel %vm513_vm9, %v3158_v50, %v3160_v51 }
 0x76c   : > { %v7865_v61 = vcombine.low %v3061_v17, %v3062_v40  ;;  %v7870_v27 = vcombine.low %v3114_v59, %v3114_v59  ;;  %v3167_v36 = vmul.bf16 %v3160_v51, %v9489_v57  ;;  %v3165_v42 = vmul.bf16 %v3158_v50, %v9489_v57 }
 0x76d   : > { %2835 = vrot.lane.b32.xlu0 %v7847_v43, %s8564_s24  ;;  %v7869_v23 = vcombine.low %v3112_v11, %v3113_v6  ;;  %v3166_v18 = vmul.bf16 %v3161_v54, %v9492_v13  ;;  %v3218_v31 = vmul.bf16 %v3211_v21, %v9489_v57  ;;  %v3216_v10 = vmul.bf16 %v3209_v7, %v9489_v57  ;;  %v3800_v11 = vld [vmem:[%s10975_s1] sm:$0x88] }
 0x76e   : > { %2886 = vrot.lane.b32.xlu1 %v7850_v25, %s8562_s22  ;;  %v7874_v52 = vcombine.low %v3167_v36, %v3167_v36  ;;  %v3217_v62 = vmul.bf16 %v3212_v0, %v9492_v13  ;;  %v7893_v15 = vcombine.low %v3364_v9, %v3364_v9  ;;  %v7894_v38 = vcombine.high %v3364_v9, %v3364_v9 }
 0x76f   : > { %v7873_v16 = vcombine.low %v3165_v42, %v3166_v18  ;;  %v7878_v60 = vcombine.low %v3218_v31, %v3218_v31  ;;  %v7899_v41 = vcombine.low %v3430_v34, %v3430_v34  ;;  %v7900_v19 = vcombine.high %v3430_v34, %v3430_v34 }
 0x770   : > { %v7877_v33 = vcombine.low %v3216_v10, %v3217_v62  ;;  %v7905_v58 = vcombine.low %v3498_v37, %v3498_v37  ;;  %v7906_v26 = vcombine.high %v3498_v37, %v3498_v37  ;;  %v7911_v43 = vcombine.low %v3564_v14, %v3564_v14  ;;  %v3868_v62 = vld [vmem:[%s10975_s1 + $0x8] sm:$0x11] }
 0x771   : > { %2888 = vrot.lane.b32.xlu0 %v7851_v45, %s8562_s22  ;;  %v7912_v22 = vcombine.high %v3564_v14, %v3564_v14  ;;  %v3371_v44 = vpack.i.b16 %v7893_v15, %v7893_v15  ;;  %v3378_v25 = vpack.i.b16 %v7894_v38, %v7894_v38  ;;  %v3437_v29 = vshrl.u32 %v7899_v41, 16 }
 0x772   : > { %2937 = vrot.lane.b32.xlu1 %v7854_v5, %s8561_s21  ;;  %v3445_v2 = vshrl.u32 %v7900_v19, 16  ;;  %v3571_v45 = vshrl.u32 %v7911_v43, 16  ;;  %v3505_v48 = vpack.i.b16 %v7905_v58, %v7905_v58  ;;  %v3512_v39 = vpack.i.b16 %v7906_v26, %v7906_v26 }
 0x773   : > { %v3376_v46 = vrot.slane %v3371_v44, %v8628_v12  ;;  %v3383_v47 = vrot.slane %v3378_v25, %v8628_v12  ;;  %v3438_v30 = vpack.i.b16 %v3437_v29, %v3437_v29  ;;  %v3579_v24 = vshrl.u32 %v7912_v22, 16  ;;  %v3000_v22 = vld [vmem:[%s10975_s1] sm:$0x44] }
 0x774   : > { %v3446_v5 = vpack.i.b16 %v3445_v2, %v3445_v2  ;;  %v7921_v17 = vcombine.low %v3666_v28, %v3666_v28  ;;  %v7922_v40 = vcombine.high %v3666_v28, %v3666_v28  ;;  %v3572_v50 = vpack.i.b16 %v3571_v45, %v3571_v45 }
 0x775   : > { %2939 = vrot.lane.b32.xlu0 %v7855_v35, %s8561_s21  ;;  %v3443_v35 = vrot.slane %v3438_v30, %v8628_v12  ;;  %v3580_v51 = vpack.i.b16 %v3579_v24, %v3579_v24  ;;  %v3517_v55 = vrot.slane %v3512_v39, %v8676_v3  ;;  %v7933_v7 = vcombine.low %v3800_v11, %v3800_v11 }
 0x776   : > { %2990 = vrot.lane.b32.xlu1 %v7858_v63, %s8563_s23  ;;  %v3451_v49 = vrot.slane %v3446_v5, %v8628_v12  ;;  %v3510_v63 = vrot.slane %v3505_v48, %v8676_v3  ;;  %v3673_v59 = vshrl.u32 %v7921_v17, 16  ;;  %v3577_v6 = vrot.slane %v3572_v50, %v8676_v3 }
 0x777   : > { %v7934_v42 = vcombine.high %v3800_v11, %v3800_v11  ;;  %v7860_v29 = vcombine.low %v3000_v22, %v3000_v22  ;;  %v7861_v2 = vcombine.high %v3000_v22, %v3000_v22 }
 0x778   : > { %v3674_v21 = vpack.i.b16 %v3673_v59, %v3673_v59 }
 0x779   : > { %2992 = vrot.lane.b32.xlu0 %v7859_v56, %s8563_s23  ;;  %v3681_v56 = vshrl.u32 %v7922_v40, 16  ;;  %v3815_v10 = vshrl.u32 %v7934_v42, 16  ;;  %v3007_v48 = vpack.i.b16 %v7860_v29, %v7860_v29  ;;  %v3014_v39 = vpack.i.b16 %v7861_v2, %v7861_v2 }
 0x77a   : > { %3072 = vrot.lane.b32.xlu1 %v7865_v61, %s8560_s20  ;;  %v3734_v61 = vld [vmem:[%s10975_s1] sm:$0x88]  ;;  %v3679_v0 = vrot.slane %v3674_v21, %v8702_v32 }
 0x77b   : > { %v7927_v54 = vcombine.low %v3734_v61, %v3734_v61  ;;  %v7928_v36 = vcombine.high %v3734_v61, %v3734_v61  ;;  %v3816_v37 = vpack.i.b16 %v3815_v10, %v3815_v10  ;;  %v3019_v59 = vrot.slane %v3014_v39, %v8702_v32 }
 0x77d   : > { %3125 = vrot.lane.b32.xlu0 %v7870_v27, %s8559_s17  ;;  %v3585_v27 = vrot.slane %v3580_v51, %v8676_v3  ;;  %v3741_v18 = vpack.i.b16 %v7927_v54, %v7927_v54  ;;  %v3821_v41 = vrot.slane %v3816_v37, %v8690_v20 }
 0x77e   : > { %3123 = vrot.lane.b32.xlu1 %v7869_v23, %s8559_s17  ;;  %v3682_v23 = vpack.i.b16 %v3681_v56, %v3681_v56 }
 0x780   : > { %v3687_v31 = vrot.slane %v3682_v23, %v8702_v32 }
 0x781   : > { %3178 = vrot.lane.b32.xlu0 %v7874_v52, %s8557_s30  ;;  %v3748_v52 = vpack.i.b16 %v7928_v36, %v7928_v36 }
 0x782   : > { %3176 = vrot.lane.b32.xlu1 %v7873_v16, %s8557_s30  ;;  %v3807_v16 = vshrl.u32 %v7933_v7, 16  ;;  %v3021_v7 = vmul.bf16 %v3019_v59, %v9492_v13 }
 0x783   : > { %v3753_v9 = vrot.slane %v3748_v52, %v8690_v20 }
 0x784   : > { %v3808_v34 = vpack.i.b16 %v3807_v16, %v3807_v16 }
 0x785   : > { %3229 = vrot.lane.b32.xlu0 %v7878_v60, %s8556_s29  ;;  %v3746_v60 = vrot.slane %v3741_v18, %v8690_v20 }
 0x786   : > { %3227 = vrot.lane.b32.xlu1 %v7877_v33, %s8556_s29  ;;  %v7939_v33 = vcombine.low %v3868_v62, %v3868_v62  ;;  %v3813_v38 = vrot.slane %v3808_v34, %v8690_v20 }
 0x788   : > { %v3875_v15 = vpack.i.b16 %v7939_v33, %v7939_v33 }
 0x789   : > { %3386 = vrot.lane.b32.xlu0 %v3376_v46, %s8556_s29 }
 0x78a   : > { %3252 = vperm.xlu1 %8333, %v7880_v8   ;;  %v7940_v8 = vcombine.high %v3868_v62, %v3868_v62  ;;  %v3880_v14 = vrot.slane %v3875_v15, %v8628_v12 }
 0x78c   : > { %v3882_v19 = vpack.i.b16 %v7940_v8, %v7940_v8 }
 0x78d   : > { %3454 = vrot.lane.b32.xlu0 %v3443_v35, %s8557_s30 }
 0x78e   : > { %3388 = vrot.lane.b32.xlu1 %v3383_v47, %s8556_s29  ;;  %v3887_v58 = vrot.slane %v3882_v19, %v8628_v12 }
 0x791   : > { %3520 = vrot.lane.b32.xlu0 %v3510_v63, %s8559_s17 }
 0x792   : > { %3456 = vrot.lane.b32.xlu1 %v3451_v49, %s8557_s30 }
 0x795   : > { %3588 = vrot.lane.b32.xlu0 %v3577_v6, %s8560_s20 }
 0x796   : > { %3522 = vrot.lane.b32.xlu1 %v3517_v55, %s8559_s17  ;;  %v3012_v55 = vrot.slane %v3007_v48, %v8702_v32 }
 0x798   : > { %v3020_v36 = vmul.bf16 %v3012_v55, %v9489_v57 }
 0x799   : > { %3690 = vrot.lane.b32.xlu0 %v3679_v0, %s8563_s23 }
 0x79a   : > { %3590 = vrot.lane.b32.xlu1 %v3585_v27, %s8560_s20 }
 0x79d   : > { %3756 = vrot.lane.b32.xlu0 %v3746_v60, %s8561_s21  ;;  %v7862_v60 = vcombine.low %v3020_v36, %v3021_v7 }
 0x79e   : > { %3692 = vrot.lane.b32.xlu1 %v3687_v31, %s8563_s23 }
 0x7a1   : > { %3824 = vrot.lane.b32.xlu0 %v3813_v38, %s8562_s22 }
 0x7a2   : > { %3758 = vrot.lane.b32.xlu1 %v3753_v9, %s8561_s21 }
 0x7a5   : > { %3890 = vrot.lane.b32.xlu0 %v3880_v14, %s8564_s24 }
 0x7a6   : > { %3826 = vrot.lane.b32.xlu1 %v3821_v41, %s8562_s22 }
 0x7aa   : > { %3892 = vrot.lane.b32.xlu1 %v3887_v58, %s8564_s24 }
 0x7db   : > { %v3075_v26 = vpop.permute.xlu0 %3074 }
 0x7dc   : > { %v2834_v43 = vpop.permute.xlu1 %2833  ;;  %v3077_v42 = vrot.slane %v3075_v26, 4 }
 0x7dd   : > { %v2837_v45 = vrot.slane %v2834_v43, 4 }
 0x7df   : > { %v2836_v44 = vpop.permute.xlu0 %2835 }
 0x7e0   : > { %v2838_v25 = vrot.slane %v2836_v44, 4  ;;  %v2887_v28 = vpop.permute.xlu1 %2886 }
 0x7e1   : > { %v2890_v30 = vrot.slane %v2887_v28, 4 }
 0x7e2   : > { %v2839_v47 = vsel %vm456_vm11, %v2837_v45, %v2838_v25 }
 0x7e3   : > { %v2889_v46 = vpop.permute.xlu0 %2888  ;;  %v2840_v17 = vsel %vm458_vm10, %v2834_v43, %v2839_v47 }
 0x7e4   : > { %v2891_v5 = vrot.slane %v2889_v46, 4  ;;  %v2938_v35 = vpop.permute.xlu1 %2937 }
 0x7e5   : > { %v2941_v56 = vrot.slane %v2938_v35, 4 }
 0x7e6   : > { %v2892_v24 = vsel %vm456_vm11, %v2890_v30, %v2891_v5  ;;  %v7879_v5 = vld [vmem:[%s10976_s2 + $0x28] sm:$0xf] }
 0x7e7   : > { %v2940_v49 = vpop.permute.xlu0 %2939  ;;  %v2893_v40 = vsel %vm513_vm9, %v2887_v28, %v2892_v24 }
 0x7e8   : > { %v2942_v50 = vrot.slane %v2940_v49, 4  ;;  %v7881_v51 = vcombine.low %v2840_v17, %v2893_v40  ;;  %v7882_v63 = vcombine.high %v2840_v17, %v2893_v40  ;;  %v2991_v61 = vpop.permute.xlu1 %2990 }
 0x7e9   : > { %v2994_v27 = vrot.slane %v2991_v61, 4 }
 0x7ea   : > { %3309 = vmatprep.subr.bf16.mxu1 %v7882_v63  ;;  %v2943_v6 = vsel %vm456_vm11, %v2941_v56, %v2942_v50 }
 0x7eb   : > { %3310 = vmatpush1.bf16.msra.mxu1 %v7881_v51  ;;  %v2993_v11 = vpop.permute.xlu0 %2992  ;;  %v2944_v0 = vsel %vm566_vm8, %v2938_v35, %v2943_v6 }
 0x7ec   : > { %v2995_v54 = vrot.slane %v2993_v11, 4  ;;  %v3073_v23 = vpop.permute.xlu1 %3072 }
 0x7ed   : > { %v3076_v18 = vrot.slane %v3073_v23, 4 }
 0x7ee   : > { %v2996_v21 = vsel %vm456_vm11, %v2994_v27, %v2995_v54 }
 0x7ef   : > { %v3126_v52 = vpop.permute.xlu0 %3125  ;;  %v2997_v31 = vsel %vm621_vm7, %v2991_v61, %v2996_v21  ;;  %v3078_v62 = vsel %vm456_vm11, %v3076_v18, %v3077_v42 }
 0x7f0   : > { %v7883_v16 = vcombine.low %v2944_v0, %v2997_v31  ;;  %v7884_v10 = vcombine.high %v2944_v0, %v2997_v31  ;;  %v3079_v33 = vsel %vm598_vm6, %v3073_v23, %v3078_v62  ;;  %v3124_v57 = vpop.permute.xlu1 %3123  ;;  %v3128_v13 = vrot.slane %v3126_v52, 4 }
 0x7f1   : > { %v3127_v8 = vrot.slane %v3124_v57, 4  ;;  %v7886_v34 = vcombine.high %v7862_v60, %v3079_v33  ;;  %v8309_v37 = vcombine.low %v3020_v36, %v3079_v33 }
 0x7f2   : > { %3311 = vmatprep.subr.bf16.mxu1 %v7884_v10 }
 0x7f3   : > { %3312 = vmatpush1.bf16.msra.mxu1 %v7883_v16  ;;  %v3179_v9 = vpop.permute.xlu0 %3178  ;;  %v3129_v41 = vsel %vm456_vm11, %v3127_v8, %v3128_v13 }
 0x7f4   : > { %v3181_v15 = vrot.slane %v3179_v9, 4  ;;  %3313 = vmatprep.subr.bf16.mxu1 %v7886_v34  ;;  %v3177_v38 = vpop.permute.xlu1 %3176  ;;  %v3130_v43 = vsel %vm543_vm5, %v3124_v57, %v3129_v41 }
 0x7f5   : > { %v3180_v19 = vrot.slane %v3177_v38, 4 }
 0x7f7   : > { %3314 = vmatpush1.bf16.msra.mxu1 %v8309_v37  ;;  %v3230_v14 = vpop.permute.xlu0 %3229  ;;  %v3182_v58 = vsel %vm456_vm11, %v3180_v19, %v3181_v15 }
 0x7f8   : > { %v3232_v26 = vrot.slane %v3230_v14, 4  ;;  %v3183_v22 = vsel %vm490_vm4, %v3177_v38, %v3182_v58  ;;  %v3228_v44 = vpop.permute.xlu1 %3227 }
 0x7f9   : > { %v7887_v25 = vcombine.low %v3130_v43, %v3183_v22  ;;  %v3231_v29 = vrot.slane %v3228_v44, 4  ;;  %v7888_v2 = vcombine.high %v3130_v43, %v3183_v22 }
 0x7fb   : > { %v3233_v45 = vsel %vm456_vm11, %v3231_v29, %v3232_v26  ;;  %3315 = vmatprep.subr.bf16.mxu1 %v7888_v2  ;;  %v3387_v42 = vpop.permute.xlu0 %3386 }
 0x7fc   : > { %v3234_v28 = vsel %vm434_vm3, %v3228_v44, %v3233_v45  ;;  %3316 = vmatpush1.bf16.msra.mxu1 %v7887_v25 }
 0x7fd   : > { %v7889_v46 = vcombine.low %v3234_v28, %v3234_v28  ;;  %v7890_v47 = vcombine.high %v3234_v28, %v3234_v28 }
 0x7ff   : > { %7891 = vmatprep.subr.msk.bf16.mxu1 %vm456_vm11, %v7890_v47  ;;  %v3304_v30 = vsel %vm456_vm11, %v7889_v46, 0  ;;  %v3455_v60 = vpop.permute.xlu0 %3454 }
 0x800   : > { %3318 = vmatpush1.bf16.msra.mxu1 %v3304_v30 }
 0x803   : > { %7892 = vmatmul.mubr.msk.bf16.vlgmr.msra.gmra.mrb[12].mxu1 %vm925_vm12, %v7879_v5  ;;  %v3521_v38 = vpop.permute.xlu0 %3520 }
 0x807   : > { %v3589_v25 = vpop.permute.xlu0 %3588 }
 0x809   : > { %v3253_v48 = vpop.permute.xlu1 %3252 }
 0x80b   : > { %v3691_v5 = vpop.permute.xlu0 %3690 }
 0x80d   : > { %v3389_v39 = vpop.permute.xlu1 %3388 }
 0x80e   : > { %v3390_v18 = vsel %vm434_vm3, %v3387_v42, %v3389_v39 }
 0x811   : > { %v3457_v24 = vpop.permute.xlu1 %3456 }
 0x812   : > { %v3458_v13 = vsel %vm490_vm4, %v3455_v60, %v3457_v24 }
 0x815   : > { %v3523_v55 = vpop.permute.xlu1 %3522 }
 0x816   : > { %v3524_v14 = vsel %vm543_vm5, %v3521_v38, %v3523_v55 }
 0x819   : > { %v3591_v27 = vpop.permute.xlu1 %3590 }
 0x81a   : > { %v3592_v45 = vsel %vm598_vm6, %v3589_v25, %v3591_v27 }
 0x81d   : > { %v3693_v36 = vpop.permute.xlu1 %3692 }
 0x821   : > { %v3759_v52 = vpop.permute.xlu1 %3758 }
 0x8d6   : > { %v3343_v35 = vpop.f32.mrb[12].mxu1 }
 0x8d7   : > { %v3344_v49 = vadd.f32 %v3343_v35, %v3253_v48  ;;  %v3345_v17 = vpop.f32.mrb[13].mxu1 }
 0x8d8   : > { %v3346_v40 = vadd.f32 %v3345_v17, %v3253_v48  ;;  %v3347_v50 = vpop.f32.mrb[14].mxu1 }
 0x8d9   : > { %v3350_v51 = vmax.f32 %v3344_v49, 0.0  ;;  %v3348_v63 = vpop.f32.mrb[15].mxu1 }
 0x8da   : > { %v3351_v59 = vmax.f32 %v3346_v40, 0.0  ;;  %v3757_v63 = vpop.permute.xlu0 %3756 }
 0x8db   : > { %v3352_v56 = vpack.c.bf16 %v3350_v51, %v3350_v51 }
 0x8dc   : > { %v3353_v61 = vpack.c.bf16 %v3351_v59, %v3351_v59 }
 0x8dd   : > { %v3356_v11 = vrot.slane %v3352_v56, 4 }
 0x8de   : > { %v3357_v6 = vrot.slane %v3353_v61, 4 }
 0x8df   : > { %3360 = vst [vmem:[#allocation3] sm:$0xf0] %v3356_v11 }
 0x8e0   : > { %3361 = vst [vmem:[#allocation3 + $0x8] sm:$0xf0] %v3357_v6  ;;  %v3827_v6 = vpop.permute.xlu1 %3826 }
 0x8e6   : > { %v9629_v54 = vld [vmem:[#allocation3] sm:$0xff] }
 0x8e7   : > { %v3700_v7 = vmul.bf16 %v3693_v36, %v9629_v54  ;;  %v9632_v21 = vld [vmem:[#allocation3 + $0x8] sm:$0xff]  ;;  %v9638_v16 = vmul.bf16 %v3759_v52, %v9629_v54  ;;  %v3395_v10 = vmul.bf16 %v3390_v18, %v9629_v54  ;;  %v3463_v34 = vmul.bf16 %v3458_v13, %v9629_v54 }
 0x8e8   : > { %v3394_v0 = vmul.bf16 %v3387_v42, %v9632_v21  ;;  %v3396_v57 = vmul.bf16 %v3389_v39, %v9632_v21  ;;  %v3462_v9 = vmul.bf16 %v3455_v60, %v9632_v21  ;;  %v3464_v19 = vmul.bf16 %v3457_v24, %v9632_v21 }
 0x8e9   : > { %v7924_v23 = vcombine.low %v3700_v7, %v3700_v7  ;;  %v7926_v31 = vcombine.high %v3700_v7, %v3700_v7  ;;  %v7930_v33 = vcombine.low %v9638_v16, %v9638_v16  ;;  %v3528_v26 = vmul.bf16 %v3521_v38, %v9632_v21 }
 0x8ea   : > { %v7895_v62 = vcombine.low %v3394_v0, %v3395_v10  ;;  %v7897_v8 = vcombine.high %v3394_v0, %v3395_v10  ;;  %v7896_v37 = vcombine.low %v3396_v57, %v3396_v57  ;;  %v7901_v15 = vcombine.low %v3462_v9, %v3463_v34 }
 0x8eb   : > { %3716 = vrot.lane.b32.xlu1 %v7924_v23, %s8560_s20  ;;  %v7898_v41 = vcombine.high %v3396_v57, %v3396_v57  ;;  %v7903_v58 = vcombine.high %v3462_v9, %v3463_v34  ;;  %v3529_v43 = vmul.bf16 %v3524_v14, %v9629_v54  ;;  %v7902_v22 = vcombine.low %v3464_v19, %v3464_v19  ;;  %v3825_v23 = vpop.permute.xlu0 %3824 }
 0x8ec   : > { %3410 = vrot.lane.b32.xlu0 %v7895_v62, %s8564_s24  ;;  %v7904_v29 = vcombine.high %v3464_v19, %v3464_v19  ;;  %v3530_v2 = vmul.bf16 %v3523_v55, %v9632_v21  ;;  %v3597_v28 = vmul.bf16 %v3592_v45, %v9629_v54  ;;  %v3596_v47 = vmul.bf16 %v3589_v25, %v9632_v21  ;;  %v4198_v62 = vld [vmem:[%s10975_s1] sm:$0x11]  ;;  %v4506_v45 = vld [vmem:[%s10975_s1] sm:$0x44] }
 0x8ed   : > { %v7907_v44 = vcombine.low %v3528_v26, %v3529_v43  ;;  %v7909_v46 = vcombine.high %v3528_v26, %v3529_v43  ;;  %v3694_v39 = vsel %vm621_vm7, %v3691_v5, %v3693_v36  ;;  %v3598_v35 = vmul.bf16 %v3591_v27, %v9632_v21  ;;  %v4374_v26 = vld [vmem:[%s10975_s1] sm:$0x22] }
 0x8ee   : > { %v7908_v30 = vcombine.low %v3530_v2, %v3530_v2  ;;  %v7913_v48 = vcombine.low %v3596_v47, %v3597_v28  ;;  %v7910_v24 = vcombine.high %v3530_v2, %v3530_v2  ;;  %v3698_v49 = vmul.bf16 %v3691_v5, %v9629_v54 }
 0x8ef   : > { %3720 = vrot.lane.b32.xlu1 %v7926_v31, %s8560_s20  ;;  %v3699_v17 = vmul.bf16 %v3694_v39, %v9632_v21  ;;  %v7915_v40 = vcombine.high %v3596_v47, %v3597_v28  ;;  %v7914_v50 = vcombine.low %v3598_v35, %v3598_v35  ;;  %v3760_v55 = vsel %vm566_vm8, %v3757_v63, %v3759_v52  ;;  %v3893_v52 = vpop.permute.xlu1 %3892  ;;  %v3891_v57 = vpop.permute.xlu0 %3890  ;;  %v9720_v28 = vld [vmem:[%s10976_s2 + $0x30] sm:$0xff] }
 0x8f0   : > { %3414 = vrot.lane.b32.xlu0 %v7897_v8, %s8564_s24  ;;  %v7916_v59 = vcombine.high %v3598_v35, %v3598_v35  ;;  %v3764_v61 = vmul.bf16 %v3757_v63, %v9629_v54  ;;  %v3765_v11 = vmul.bf16 %v3760_v55, %v9632_v21  ;;  %v7932_v27 = vcombine.high %v9638_v16, %v9638_v16  ;;  %v4111_v16 = vld [vmem:[%s10975_s1] sm:$0x11]  ;;  %v4595_v55 = vld [vmem:[%s10975_s1] sm:$0x88] }
 0x8f1   : > { %v7923_v51 = vcombine.low %v3698_v49, %v3699_v17  ;;  %v7925_v56 = vcombine.high %v3698_v49, %v3699_v17  ;;  %v3834_v36 = vmul.bf16 %v3827_v6, %v9629_v54  ;;  %v3828_v42 = vsel %vm513_vm9, %v3825_v23, %v3827_v6 }
 0x8f2   : > { %v7929_v7 = vcombine.low %v3764_v61, %v3765_v11  ;;  %v7931_v0 = vcombine.high %v3764_v61, %v3765_v11  ;;  %v3832_v31 = vmul.bf16 %v3825_v23, %v9629_v54  ;;  %v3833_v10 = vmul.bf16 %v3828_v42, %v9632_v21 }
 0x8f3   : > { %3782 = vrot.lane.b32.xlu1 %v7930_v33, %s8559_s17  ;;  %v7936_v18 = vcombine.low %v3834_v36, %v3834_v36  ;;  %v7938_v60 = vcombine.high %v3834_v36, %v3834_v36  ;;  %v3900_v33 = vmul.bf16 %v3893_v52, %v9629_v54  ;;  %v7968_v13 = vcombine.low %v4111_v16, %v4111_v16 }
 0x8f4   : > { %3478 = vrot.lane.b32.xlu0 %v7901_v15, %s8562_s22  ;;  %v7935_v8 = vcombine.low %v3832_v31, %v3833_v10  ;;  %v7976_v9 = vcombine.low %v4198_v62, %v4198_v62  ;;  %v3894_v34 = vsel %vm458_vm10, %v3891_v57, %v3893_v52  ;;  %v7937_v38 = vcombine.high %v3832_v31, %v3833_v10 }
 0x8f5   : > { %v4118_v15 = vpack.i.b16 %v7968_v13, %v7968_v13  ;;  %v3899_v19 = vmul.bf16 %v3894_v34, %v9632_v21  ;;  %v7944_v43 = vcombine.high %v3900_v33, %v3900_v33  ;;  %v7992_v2 = vcombine.low %v4374_v26, %v4374_v26 }
 0x8f6   : > { %v4205_v14 = vshrl.u32 %v7976_v9, 16  ;;  %v7977_v47 = vcombine.high %v4198_v62, %v4198_v62  ;;  %v8005_v35 = vcombine.low %v4506_v45, %v4506_v45  ;;  %v7993_v6 = vcombine.high %v4374_v26, %v4374_v26  ;;  %v4771_v62 = vld [vmem:[%s10975_s1 + $0x8] sm:$0x11] }
 0x8f7   : > { %3412 = vrot.lane.b32.xlu1 %v7896_v37, %s8564_s24  ;;  %v7942_v37 = vcombine.low %v3900_v33, %v3900_v33  ;;  %v4123_v25 = vrot.slane %v4118_v15, %v8628_v12  ;;  %v8029_v9 = vcombine.low %v4771_v62, %v4771_v62  ;;  %v8014_v15 = vcombine.high %v4595_v55, %v4595_v55 }
 0x8f8   : > { %3482 = vrot.lane.b32.xlu0 %v7903_v58, %s8562_s22  ;;  %v4287_v58 = vld [vmem:[%s10975_s1] sm:$0x22]  ;;  %v4213_v17 = vshrl.u32 %v7977_v47, 16  ;;  %v4513_v63 = vshrl.u32 %v8005_v35, 16  ;;  %v4389_v52 = vshrl.u32 %v7993_v6, 16 }
 0x8f9   : > { %v7985_v11 = vcombine.high %v4287_v58, %v4287_v58 }
 0x8fa   : > { %v4214_v61 = vpack.i.b16 %v4213_v17, %v4213_v17  ;;  %v4514_v36 = vpack.i.b16 %v4513_v63, %v4513_v63  ;;  %v4390_v33 = vpack.i.b16 %v4389_v52, %v4389_v52 }
 0x8fb   : > { %3416 = vrot.lane.b32.xlu1 %v7898_v41, %s8564_s24  ;;  %v3898_v41 = vmul.bf16 %v3891_v57, %v9629_v54 }
 0x8fc   : > { %3544 = vrot.lane.b32.xlu0 %v7907_v44, %s8561_s21  ;;  %v4219_v42 = vrot.slane %v4214_v61, %v8628_v12  ;;  %v4519_v31 = vrot.slane %v4514_v36, %v8702_v32  ;;  %v4395_v34 = vrot.slane %v4390_v33, %v8676_v3 }
 0x8fd   : > { %v7941_v44 = vcombine.low %v3898_v41, %v3899_v19 }
 0x8ff   : > { %3480 = vrot.lane.b32.xlu1 %v7902_v22, %s8562_s22  ;;  %v7984_v22 = vcombine.low %v4287_v58, %v4287_v58  ;;  %v4609_v58 = vpack.i.b16 %v8014_v15, %v8014_v15 }
 0x900   : > { %3548 = vrot.lane.b32.xlu0 %v7909_v46, %s8561_s21  ;;  %v7969_v46 = vcombine.high %v4111_v16, %v4111_v16 }
 0x901   : > { %v4294_v5 = vpack.i.b16 %v7984_v22, %v7984_v22  ;;  %v4614_v22 = vrot.slane %v4609_v58, %v8690_v20 }
 0x902   : > { %v4125_v49 = vpack.i.b16 %v7969_v46, %v7969_v46 }
 0x903   : > { %3484 = vrot.lane.b32.xlu1 %v7904_v29, %s8562_s22  ;;  %v4206_v29 = vpack.i.b16 %v4205_v14, %v4205_v14 }
 0x904   : > { %3612 = vrot.lane.b32.xlu0 %v7913_v48, %s8563_s23  ;;  %v7943_v48 = vcombine.high %v3898_v41, %v3899_v19  ;;  %v4778_v19 = vpack.i.b16 %v8029_v9, %v8029_v9  ;;  %v3632_v9 = vld [vmem:[%s10975_s1] sm:$0x44] }
 0x905   : > { %v4211_v39 = vrot.slane %v4206_v29, %v8628_v12 }
 0x907   : > { %3546 = vrot.lane.b32.xlu1 %v7908_v30, %s8561_s21  ;;  %v7948_v30 = vcombine.high %v9720_v28, %v9720_v28 }
 0x908   : > { %3616 = vrot.lane.b32.xlu0 %v7915_v40, %s8563_s23  ;;  %v7946_v40 = vld [vmem:[%s10977_s3 + $0x30] sm:$0xff] }
 0x909   : > { %7967 = vmatprep.mubr.msk.bf16.mxu1 %vm513_vm9, %v7948_v30 }
 0x90b   : > { %3550 = vrot.lane.b32.xlu1 %v7910_v24, %s8561_s21  ;;  %v4381_v24 = vshrl.u32 %v7992_v2, 16 }
 0x90c   : > { %3714 = vrot.lane.b32.xlu0 %v7923_v51, %s8560_s20 }
 0x90d   : > { %v4382_v51 = vpack.i.b16 %v4381_v24, %v4381_v24 }
 0x90f   : > { %3614 = vrot.lane.b32.xlu1 %v7914_v50, %s8563_s23  ;;  %v4299_v50 = vrot.slane %v4294_v5, %v8676_v3 }
 0x910   : > { %3718 = vrot.lane.b32.xlu0 %v7925_v56, %s8560_s20  ;;  %v4130_v56 = vrot.slane %v4125_v49, %v8628_v12 }
 0x913   : > { %3618 = vrot.lane.b32.xlu1 %v7916_v59, %s8563_s23  ;;  %v4682_v59 = vld [vmem:[%s10975_s1] sm:$0x88] }
 0x914   : > { %3780 = vrot.lane.b32.xlu0 %v7929_v7, %s8559_s17  ;;  %v8013_v7 = vcombine.low %v4595_v55, %v4595_v55  ;;  %v8021_v23 = vcombine.low %v4682_v59, %v4682_v59 }
 0x916   : > { %v4602_v10 = vpack.i.b16 %v8013_v7, %v8013_v7  ;;  %v4689_v16 = vshrl.u32 %v8021_v23, 16 }
 0x917   : > { %3786 = vrot.lane.b32.xlu1 %v7932_v27, %s8559_s17  ;;  %v4387_v27 = vrot.slane %v4382_v51, %v8676_v3 }
 0x918   : > { %3784 = vrot.lane.b32.xlu0 %v7931_v0, %s8559_s17  ;;  %v8006_v0 = vcombine.high %v4506_v45, %v4506_v45  ;;  %v4607_v13 = vrot.slane %v4602_v10, %v8690_v20 }
 0x91a   : > { %v4521_v57 = vshrl.u32 %v8006_v0, 16 }
 0x91b   : > { %3850 = vrot.lane.b32.xlu1 %v7936_v18, %s8557_s30  ;;  %v4301_v18 = vpack.i.b16 %v7985_v11, %v7985_v11 }
 0x91c   : > { %3848 = vrot.lane.b32.xlu0 %v7935_v8, %s8557_s30  ;;  %v4690_v8 = vpack.i.b16 %v4689_v16, %v4689_v16 }
 0x91e   : > { %v4695_v41 = vrot.slane %v4690_v8, %v8690_v20 }
 0x91f   : > { %3854 = vrot.lane.b32.xlu1 %v7938_v60, %s8557_s30  ;;  %v4306_v60 = vrot.slane %v4301_v18, %v8676_v3 }
 0x920   : > { %3852 = vrot.lane.b32.xlu0 %v7937_v38, %s8557_s30  ;;  %v8022_v38 = vcombine.high %v4682_v59, %v4682_v59 }
 0x922   : > { %v4697_v26 = vshrl.u32 %v8022_v38, 16 }
 0x923   : > { %3916 = vrot.lane.b32.xlu1 %v7942_v37, %s8556_s29  ;;  %v4522_v37 = vpack.i.b16 %v4521_v57, %v4521_v57 }
 0x924   : > { %3914 = vrot.lane.b32.xlu0 %v7941_v44, %s8556_s29  ;;  %v4698_v44 = vpack.i.b16 %v4697_v26, %v4697_v26 }
 0x925   : > { %v4527_v14 = vrot.slane %v4522_v37, %v8702_v32 }
 0x926   : > { %v4703_v29 = vrot.slane %v4698_v44, %v8690_v20 }
 0x927   : > { %3920 = vrot.lane.b32.xlu1 %v7944_v43, %s8556_s29  ;;  %v4783_v43 = vrot.slane %v4778_v19, %v8628_v12  ;;  %v7918_v19 = vcombine.high %v3632_v9, %v3632_v9 }
 0x928   : > { %3918 = vrot.lane.b32.xlu0 %v7943_v48, %s8556_s29 }
 0x92b   : > { %4133 = vrot.lane.b32.xlu1 %v4123_v25, %s8556_s29  ;;  %v8030_v25 = vcombine.high %v4771_v62, %v4771_v62 }
 0x92c   : > { %3958 = vperm.xlu0 %8332, %v7946_v40  }
 0x92d   : > { %v4785_v2 = vpack.i.b16 %v8030_v25, %v8030_v25 }
 0x92f   : > { %4222 = vrot.lane.b32.xlu1 %v4211_v39, %s8557_s30  ;;  %v4790_v45 = vrot.slane %v4785_v2, %v8628_v12  ;;  %v7917_v2 = vcombine.low %v3632_v9, %v3632_v9 }
 0x930   : > { %4135 = vrot.lane.b32.xlu0 %v4130_v56, %s8556_s29 }
 0x933   : > { %4309 = vrot.lane.b32.xlu1 %v4299_v50, %s8559_s17 }
 0x934   : > { %4224 = vrot.lane.b32.xlu0 %v4219_v42, %s8557_s30 }
 0x937   : > { %4398 = vrot.lane.b32.xlu1 %v4387_v27, %s8560_s20 }
 0x938   : > { %4311 = vrot.lane.b32.xlu0 %v4306_v60, %s8559_s17 }
 0x93b   : > { %4530 = vrot.lane.b32.xlu1 %v4519_v31, %s8563_s23 }
 0x93c   : > { %4400 = vrot.lane.b32.xlu0 %v4395_v34, %s8560_s20 }
 0x93f   : > { %4617 = vrot.lane.b32.xlu1 %v4607_v13, %s8561_s21 }
 0x940   : > { %4532 = vrot.lane.b32.xlu0 %v4527_v14, %s8563_s23 }
 0x943   : > { %4706 = vrot.lane.b32.xlu1 %v4695_v41, %s8562_s22 }
 0x944   : > { %4619 = vrot.lane.b32.xlu0 %v4614_v22, %s8561_s21 }
 0x947   : > { %4793 = vrot.lane.b32.xlu1 %v4783_v43, %s8564_s24 }
 0x948   : > { %4708 = vrot.lane.b32.xlu0 %v4703_v29, %s8562_s22 }
 0x94c   : > { %4795 = vrot.lane.b32.xlu0 %v4790_v45, %s8564_s24  ;;  %v3646_v45 = vpack.i.b16 %v7918_v19, %v7918_v19 }
 0x95d   : > { %v9770_v46 = vpop.permute.xlu1 %3716 }
 0x95e   : > { %v3411_v30 = vpop.permute.xlu0 %3410 }
 0x95f   : > { %v3418_v49 = vrot.slane %v3411_v30, 4 }
 0x961   : > { %v9772_v47 = vpop.permute.xlu1 %3720 }
 0x962   : > { %v3415_v48 = vpop.permute.xlu0 %3414 }
 0x963   : > { %v3420_v40 = vrot.slane %v3415_v48, 4 }
 0x965   : > { %v9774_v5 = vpop.permute.xlu1 %3782 }
 0x966   : > { %v3479_v35 = vpop.permute.xlu0 %3478 }
 0x967   : > { %v3486_v7 = vrot.slane %v3479_v35, 4 }
 0x969   : > { %v3413_v39 = vpop.permute.xlu1 %3412 }
 0x96a   : > { %v3419_v24 = vrot.slane %v3413_v39, 4  ;;  %v3483_v63 = vpop.permute.xlu0 %3482 }
 0x96b   : > { %v3488_v42 = vrot.slane %v3483_v63, 4 }
 0x96c   : > { %v3422_v50 = vsel %vm456_vm11, %v3418_v49, %v3419_v24 }
 0x96d   : > { %v3417_v17 = vpop.permute.xlu1 %3416  ;;  %v3423_v56 = vsel %vm458_vm10, %v3411_v30, %v3422_v50  ;;  %v3725_v50 = vrot.slane %v9772_v47, 4 }
 0x96e   : > { %v3421_v51 = vrot.slane %v3417_v17, 4  ;;  %v3545_v36 = vpop.permute.xlu0 %3544  ;;  %v3639_v17 = vpack.i.b16 %v7917_v2, %v7917_v2 }
 0x96f   : > { %v3552_v8 = vrot.slane %v3545_v36, 4 }
 0x970   : > { %v3424_v55 = vsel %vm456_vm11, %v3420_v40, %v3421_v51  ;;  %v3651_v40 = vrot.slane %v3646_v45, %v8702_v32 }
 0x971   : > { %v3481_v59 = vpop.permute.xlu1 %3480  ;;  %v3425_v61 = vsel %vm458_vm10, %v3415_v48, %v3424_v55 }
 0x972   : > { %v3487_v11 = vrot.slane %v3481_v59, 4  ;;  %v7949_v6 = vcombine.low %v3423_v56, %v3425_v61  ;;  %v7950_v27 = vcombine.high %v3423_v56, %v3425_v61  ;;  %v3549_v0 = vpop.permute.xlu0 %3548 }
 0x973   : > { %v3554_v37 = vrot.slane %v3549_v0, 4 }
 0x974   : > { %4060 = vmatprep.subr.bf16.mxu1 %v7950_v27  ;;  %v3490_v18 = vsel %vm456_vm11, %v3486_v7, %v3487_v11  ;;  %v3723_v11 = vrot.slane %v9770_v46, 4 }
 0x975   : > { %v3485_v23 = vpop.permute.xlu1 %3484  ;;  %4061 = vmatpush1.bf16.msra.mxu1 %v7949_v6  ;;  %v3491_v16 = vsel %vm513_vm9, %v3479_v35, %v3490_v18  ;;  %v3653_v18 = vmul.bf16 %v3651_v40, %v9632_v21 }
 0x976   : > { %v3489_v52 = vrot.slane %v3485_v23, 4  ;;  %v3613_v13 = vpop.permute.xlu0 %3612  ;;  %v3644_v23 = vrot.slane %v3639_v17, %v8702_v32 }
 0x977   : > { %v3620_v30 = vrot.slane %v3613_v13, 4 }
 0x978   : > { %v3492_v31 = vsel %vm456_vm11, %v3488_v42, %v3489_v52 }
 0x979   : > { %v3547_v10 = vpop.permute.xlu1 %3546  ;;  %v3493_v62 = vsel %vm513_vm9, %v3483_v63, %v3492_v31  ;;  %v3789_v31 = vrot.slane %v9774_v5, 4 }
 0x97a   : > { %v3553_v60 = vrot.slane %v3547_v10, 4  ;;  %v7951_v33 = vcombine.low %v3491_v16, %v3493_v62  ;;  %v7952_v57 = vcombine.high %v3491_v16, %v3493_v62  ;;  %v3617_v41 = vpop.permute.xlu0 %3616  ;;  %v3652_v62 = vmul.bf16 %v3644_v23, %v9629_v54 }
 0x97b   : > { %v3622_v39 = vrot.slane %v3617_v41, 4 }
 0x97c   : > { %4062 = vmatprep.subr.bf16.mxu1 %v7952_v57  ;;  %v3556_v15 = vsel %vm456_vm11, %v3552_v8, %v3553_v60 }
 0x97d   : > { %v3551_v34 = vpop.permute.xlu1 %3550  ;;  %4063 = vmatpush1.bf16.msra.mxu1 %v7951_v33  ;;  %v3557_v26 = vsel %vm566_vm8, %v3545_v36, %v3556_v15 }
 0x97e   : > { %v3555_v38 = vrot.slane %v3551_v34, 4  ;;  %v3715_v29 = vpop.permute.xlu0 %3714 }
 0x97f   : > { %v3722_v51 = vrot.slane %v3715_v29, 4 }
 0x980   : > { %v3558_v14 = vsel %vm456_vm11, %v3554_v37, %v3555_v38 }
 0x981   : > { %v3615_v58 = vpop.permute.xlu1 %3614  ;;  %v3559_v43 = vsel %vm566_vm8, %v3549_v0, %v3558_v14  ;;  %v3726_v47 = vsel %vm456_vm11, %v3722_v51, %v3723_v11 }
 0x982   : > { %v3621_v22 = vrot.slane %v3615_v58, 4  ;;  %v7953_v44 = vcombine.low %v3557_v26, %v3559_v43  ;;  %v7954_v25 = vcombine.high %v3557_v26, %v3559_v43  ;;  %v3719_v49 = vpop.permute.xlu0 %3718  ;;  %v3727_v10 = vsel %vm598_vm6, %v3715_v29, %v3726_v47 }
 0x983   : > { %v3724_v63 = vrot.slane %v3719_v49, 4 }
 0x984   : > { %4064 = vmatprep.subr.bf16.mxu1 %v7954_v25  ;;  %v3624_v24 = vsel %vm456_vm11, %v3620_v30, %v3621_v22 }
 0x985   : > { %v3619_v48 = vpop.permute.xlu1 %3618  ;;  %4065 = vmatpush1.bf16.msra.mxu1 %v7953_v44  ;;  %v3625_v56 = vsel %vm621_vm7, %v3613_v13, %v3624_v24  ;;  %v3728_v6 = vsel %vm456_vm11, %v3724_v63, %v3725_v50 }
 0x986   : > { %v3623_v35 = vrot.slane %v3619_v48, 4  ;;  %v3781_v7 = vpop.permute.xlu0 %3780  ;;  %v3729_v52 = vsel %vm598_vm6, %v3719_v49, %v3728_v6 }
 0x987   : > { %v3788_v42 = vrot.slane %v3781_v7, 4  ;;  %v7960_v57 = vcombine.high %v3727_v10, %v3729_v52  ;;  %v7959_v9 = vcombine.low %v3727_v10, %v3729_v52 }
 0x988   : > { %v3626_v55 = vsel %vm456_vm11, %v3622_v39, %v3623_v35 }
 0x989   : > { %v3787_v59 = vpop.permute.xlu1 %3786  ;;  %v3627_v61 = vsel %vm621_vm7, %v3617_v41, %v3626_v55  ;;  %v3792_v60 = vsel %vm456_vm11, %v3788_v42, %v3789_v31 }
 0x98a   : > { %v7955_v27 = vcombine.low %v3625_v56, %v3627_v61  ;;  %v7956_v36 = vcombine.high %v3625_v56, %v3627_v61  ;;  %v3791_v46 = vrot.slane %v3787_v59, 4  ;;  %v3785_v16 = vpop.permute.xlu0 %3784  ;;  %v3793_v34 = vsel %vm543_vm5, %v3781_v7, %v3792_v60 }
 0x98b   : > { %v3790_v33 = vrot.slane %v3785_v16, 4  ;;  %v7947_v56 = vcombine.low %v9720_v28, %v9720_v28 }
 0x98c   : > { %4066 = vmatprep.subr.bf16.mxu1 %v7956_v36 }
 0x98d   : > { %v3851_v0 = vpop.permute.xlu1 %3850  ;;  %4067 = vmatpush1.bf16.msra.mxu1 %v7955_v27  ;;  %v3794_v8 = vsel %vm456_vm11, %v3790_v33, %v3791_v46 }
 0x98e   : > { %4068 = vmatprep.subr.bf16.mxu1 %v3653_v18  ;;  %v3795_v5 = vsel %vm543_vm5, %v3785_v16, %v3794_v8  ;;  %v3849_v37 = vpop.permute.xlu0 %3848  ;;  %v3857_v15 = vrot.slane %v3851_v0, 4 }
 0x98f   : > { %v3856_v38 = vrot.slane %v3849_v37, 4  ;;  %v7962_v41 = vcombine.high %v3793_v34, %v3795_v5  ;;  %v7961_v58 = vcombine.low %v3793_v34, %v3795_v5 }
 0x991   : > { %v3855_v13 = vpop.permute.xlu1 %3854  ;;  %4069 = vmatpush1.bf16.msra.mxu1 %v3652_v62  ;;  %v3860_v43 = vsel %vm456_vm11, %v3856_v38, %v3857_v15 }
 0x992   : > { %4070 = vmatprep.subr.bf16.mxu1 %v7960_v57  ;;  %v3859_v14 = vrot.slane %v3855_v13, 4  ;;  %v3853_v26 = vpop.permute.xlu0 %3852  ;;  %v3861_v25 = vsel %vm490_vm4, %v3849_v37, %v3860_v43 }
 0x993   : > { %v3858_v22 = vrot.slane %v3853_v26, 4 }
 0x995   : > { %v3917_v19 = vpop.permute.xlu1 %3916  ;;  %4071 = vmatpush1.bf16.msra.mxu1 %v7959_v9  ;;  %v3862_v44 = vsel %vm456_vm11, %v3858_v22, %v3859_v14 }
 0x996   : > { %4072 = vmatprep.subr.bf16.mxu1 %v7962_v41  ;;  %v3863_v29 = vsel %vm490_vm4, %v3853_v26, %v3862_v44  ;;  %v3915_v2 = vpop.permute.xlu0 %3914  ;;  %v3923_v30 = vrot.slane %v3917_v19, 4 }
 0x997   : > { %v3922_v48 = vrot.slane %v3915_v2, 4  ;;  %v7964_v39 = vcombine.high %v3861_v25, %v3863_v29  ;;  %v7963_v24 = vcombine.low %v3861_v25, %v3863_v29 }
 0x999   : > { %4073 = vmatpush1.bf16.msra.mxu1 %v7961_v58  ;;  %v3921_v45 = vpop.permute.xlu1 %3920  ;;  %v3926_v17 = vsel %vm456_vm11, %v3922_v48, %v3923_v30 }
 0x99a   : > { %v3925_v35 = vrot.slane %v3921_v45, 4  ;;  %4074 = vmatprep.subr.bf16.mxu1 %v7964_v39  ;;  %v3919_v49 = vpop.permute.xlu0 %3918  ;;  %v3927_v51 = vsel %vm434_vm3, %v3915_v2, %v3926_v17 }
 0x99b   : > { %v3924_v40 = vrot.slane %v3919_v49, 4 }
 0x99d   : > { %4075 = vmatpush1.bf16.msra.mxu1 %v7963_v24  ;;  %v3928_v50 = vsel %vm456_vm11, %v3924_v40, %v3925_v35  ;;  %v9821_v61 = vpop.permute.xlu1 %4133 }
 0x99e   : > { %v3929_v63 = vsel %vm434_vm3, %v3919_v49, %v3928_v50  ;;  %v4141_v7 = vmul.bf16 %v9821_v61, %v9632_v21 }
 0x99f   : > { %v7965_v55 = vcombine.low %v3927_v51, %v3929_v63  ;;  %v7966_v59 = vcombine.high %v3927_v51, %v3929_v63 }
 0x9a1   : > { %4076 = vmatprep.subr.bf16.mxu1 %v7966_v59  ;;  %v9825_v11 = vpop.permute.xlu1 %4222 }
 0x9a2   : > { %4077 = vmatpush1.bf16.msra.mxu1 %v7965_v55  ;;  %v4230_v10 = vmul.bf16 %v9825_v11, %v9632_v21 }
 0x9a3   : > { %5113 = vmatprep.subr.bf16.mxu1 %v9632_v21 }
 0x9a5   : > { %4093 = vmatmul.mubr.bf16.vlgmr.msra.gmra.mrb[16].mxu1 %v7947_v56  ;;  %v9831_v36 = vpop.permute.xlu1 %4309 }
 0x9a6   : > { %5114 = vmatpush1.bf16.msra.mxu1 %v9629_v54  ;;  %5145 = vmatprep.mubr.bf16.mxu1 %v8555_v4  ;;  %v4317_v34 = vmul.bf16 %v9831_v36, %v9632_v21 }
 0x9a9   : > { %v9850_v52 = vpop.permute.xlu1 %4398 }
 0x9aa   : > { %v4406_v29 = vmul.bf16 %v9850_v52, %v9632_v21 }
 0x9ab   : > { %v9827_v6 = vpop.permute.xlu0 %3958 }
 0x9ad   : > { %v9861_v60 = vpop.permute.xlu1 %4530 }
 0x9ae   : > { %v4538_v49 = vmul.bf16 %v9861_v60, %v9629_v54 }
 0x9af   : > { %v9829_v27 = vpop.permute.xlu0 %4135 }
 0x9b0   : > { %v9836_v28 = vsel %vm434_vm3, %v9821_v61, %v9829_v27  ;;  %v4143_v26 = vmul.bf16 %v9829_v27, %v9632_v21 }
 0x9b1   : > { %v4142_v23 = vmul.bf16 %v9836_v28, %v9629_v54  ;;  %v9878_v5 = vpop.permute.xlu1 %4617 }
 0x9b2   : > { %v9895_v14 = vmul.bf16 %v9878_v5, %v9629_v54  ;;  %v7971_v2 = vcombine.low %v4143_v26, %v4143_v26  ;;  %v7973_v39 = vcombine.high %v4143_v26, %v4143_v26 }
 0x9b3   : > { %v9842_v47 = vpop.permute.xlu0 %4224  ;;  %v7970_v42 = vcombine.low %v4141_v7, %v4142_v23  ;;  %v7972_v46 = vcombine.high %v4141_v7, %v4142_v23 }
 0x9b4   : > { %v9847_v18 = vsel %vm490_vm4, %v9825_v11, %v9842_v47  ;;  %v4232_v48 = vmul.bf16 %v9842_v47, %v9632_v21 }
 0x9b5   : > { %4168 = vrot.lane.b32.xlu1 %v7970_v42, %s8564_s24  ;;  %v4231_v0 = vmul.bf16 %v9847_v18, %v9629_v54 }
 0x9b6   : > { %v7979_v17 = vcombine.low %v4232_v48, %v4232_v48  ;;  %v7981_v51 = vcombine.high %v4232_v48, %v4232_v48 }
 0x9b7   : > { %v9854_v31 = vpop.permute.xlu0 %4311  ;;  %v7978_v62 = vcombine.low %v4230_v10, %v4231_v0  ;;  %v7980_v8 = vcombine.high %v4230_v10, %v4231_v0 }
 0x9b8   : > { %v9866_v33 = vsel %vm543_vm5, %v9831_v36, %v9854_v31  ;;  %v4319_v50 = vmul.bf16 %v9854_v31, %v9632_v21 }
 0x9b9   : > { %4172 = vrot.lane.b32.xlu1 %v7972_v46, %s8564_s24  ;;  %v4318_v57 = vmul.bf16 %v9866_v33, %v9629_v54  ;;  %v9944_v46 = vpop.permute.xlu1 %4706 }
 0x9ba   : > { %v7987_v55 = vcombine.low %v4319_v50, %v4319_v50  ;;  %v7989_v7 = vcombine.high %v4319_v50, %v4319_v50 }
 0x9bb   : > { %v9859_v16 = vpop.permute.xlu0 %4400  ;;  %v7986_v38 = vcombine.low %v4317_v34, %v4318_v57  ;;  %v7988_v44 = vcombine.high %v4317_v34, %v4318_v57 }
 0x9bc   : > { %v9885_v41 = vsel %vm598_vm6, %v9850_v52, %v9859_v16  ;;  %v4408_v56 = vmul.bf16 %v9859_v16, %v9632_v21 }
 0x9bd   : > { %4257 = vrot.lane.b32.xlu1 %v7978_v62, %s8562_s22  ;;  %v4407_v22 = vmul.bf16 %v9885_v41, %v9629_v54  ;;  %v9948_v62 = vpop.permute.xlu1 %4793 }
 0x9be   : > { %v7995_v23 = vcombine.low %v4408_v56, %v4408_v56  ;;  %v7997_v42 = vcombine.high %v4408_v56, %v4408_v56 }
 0x9bf   : > { %v9871_v13 = vpop.permute.xlu0 %4532  ;;  %v7994_v45 = vcombine.low %v4406_v29, %v4407_v22  ;;  %v7996_v35 = vcombine.high %v4406_v29, %v4407_v22 }
 0x9c0   : > { %v4540_v9 = vmul.bf16 %v9871_v13, %v9629_v54  ;;  %v9915_v30 = vsel %vm621_vm7, %v9861_v60, %v9871_v13 }
 0x9c1   : > { %4261 = vrot.lane.b32.xlu1 %v7980_v8, %s8562_s22  ;;  %v4539_v24 = vmul.bf16 %v9915_v30, %v9632_v21 }
 0x9c2   : > { %v8008_v37 = vcombine.low %v4540_v9, %v4540_v9  ;;  %v8010_v43 = vcombine.high %v4540_v9, %v4540_v9 }
 0x9c3   : > { %v9880_v15 = vpop.permute.xlu0 %4619  ;;  %v8007_v40 = vcombine.low %v4538_v49, %v4539_v24  ;;  %v8009_v63 = vcombine.high %v4538_v49, %v4539_v24 }
 0x9c4   : > { %v9890_v19 = vsel %vm566_vm8, %v9878_v5, %v9880_v15  ;;  %4567 = vrot.lane.b32.xlu0 %v8008_v37, %s8560_s20 }
 0x9c5   : > { %v9899_v58 = vmul.bf16 %v9890_v19, %v9632_v21  ;;  %4344 = vrot.lane.b32.xlu1 %v7986_v38, %s8561_s21 }
 0x9c7   : > { %v8017_v25 = vcombine.high %v9895_v14, %v9899_v58  ;;  %v8015_v59 = vcombine.low %v9895_v14, %v9899_v58  ;;  %v9942_v0 = vpop.permute.xlu0 %4708 }
 0x9c8   : > { %4571 = vrot.lane.b32.xlu0 %v8010_v43, %s8560_s20 }
 0x9c9   : > { %4348 = vrot.lane.b32.xlu1 %v7988_v44, %s8561_s21 }
 0x9cb   : > { %v9946_v10 = vpop.permute.xlu0 %4795 }
 0x9cc   : > { %4170 = vrot.lane.b32.xlu0 %v7971_v2, %s8564_s24 }
 0x9cd   : > { %4433 = vrot.lane.b32.xlu1 %v7994_v45, %s8563_s23 }
 0x9d0   : > { %4174 = vrot.lane.b32.xlu0 %v7973_v39, %s8564_s24 }
 0x9d1   : > { %4437 = vrot.lane.b32.xlu1 %v7996_v35, %s8563_s23 }
 0x9d4   : > { %4259 = vrot.lane.b32.xlu0 %v7979_v17, %s8562_s22 }
 0x9d5   : > { %4565 = vrot.lane.b32.xlu1 %v8007_v40, %s8560_s20 }
 0x9d8   : > { %4263 = vrot.lane.b32.xlu0 %v7981_v51, %s8562_s22 }
 0x9d9   : > { %4569 = vrot.lane.b32.xlu1 %v8009_v63, %s8560_s20 }
 0x9dc   : > { %4346 = vrot.lane.b32.xlu0 %v7987_v55, %s8561_s21 }
 0x9dd   : > { %4652 = vrot.lane.b32.xlu1 %v8015_v59, %s8559_s17 }
 0x9e0   : > { %4350 = vrot.lane.b32.xlu0 %v7989_v7, %s8561_s21 }
 0x9e4   : > { %4435 = vrot.lane.b32.xlu0 %v7995_v23, %s8563_s23 }
 0x9e8   : > { %4439 = vrot.lane.b32.xlu0 %v7997_v42, %s8563_s23 }
 0xa27   : > { %v4169_v8 = vpop.permute.xlu1 %4168 }
 0xa28   : > { %v4180_v26 = vrot.slane %v4169_v8, 4 }
 0xa2b   : > { %v4173_v38 = vpop.permute.xlu1 %4172 }
 0xa2c   : > { %v4182_v22 = vrot.slane %v4173_v38, 4 }
 0xa36   : > { %v9950_v57 = vpop.permute.xlu0 %4567 }
 0xa3a   : > { %v9952_v9 = vpop.permute.xlu0 %4571 }
 0xa3e   : > { %v4171_v34 = vpop.permute.xlu0 %4170 }
 0xa3f   : > { %v4181_v37 = vrot.slane %v4171_v34, 4 }
 0xa41   : > { %v4186_v44 = vsel %vm456_vm11, %v4180_v26, %v4181_v37 }
 0xa42   : > { %v4175_v43 = vpop.permute.xlu0 %4174  ;;  %v4187_v45 = vsel %vm458_vm10, %v4169_v8, %v4186_v44 }
 0xa43   : > { %v4183_v29 = vrot.slane %v4175_v43, 4 }
 0xa45   : > { %v4188_v2 = vsel %vm456_vm11, %v4182_v22, %v4183_v29 }
 0xa46   : > { %v4189_v48 = vsel %vm458_vm10, %v4173_v38, %v4188_v2 }
 0xa47   : > { %v8041_v39 = vcombine.low %v4187_v45, %v4189_v48  ;;  %v8042_v24 = vcombine.high %v4187_v45, %v4189_v48 }
 0xa49   : > { %5044 = vmatprep.subr.bf16.mxu0 %v8042_v24 }
 0xa4a   : > { %5045 = vmatpush1.bf16.msra.mxu0 %v8041_v39 }
 0xa78   : > { %v4094_v35 = vpop.f32.mrb[16].mxu1 }
 0xa79   : > { %v4095_v49 = vadd.f32 %v4094_v35, %v9827_v6  ;;  %v4096_v17 = vpop.f32.mrb[17].mxu1 }
 0xa7a   : > { %v4097_v40 = vadd.f32 %v4096_v17, %v9827_v6  ;;  %v4098_v50 = vpop.f32.mrb[18].mxu1  ;;  %v4716_v17 = vmul.bf16 %v9942_v0, %v9629_v54 }
 0xa7b   : > { %v4101_v51 = vmax.f32 %v4095_v49, 0.0  ;;  %v4099_v63 = vpop.f32.mrb[19].mxu1  ;;  %v4797_v49 = vsel %vm458_vm10, %v9948_v62, %v9946_v10 }
 0xa7c   : > { %v4102_v55 = vmax.f32 %v4097_v40, 0.0 }
 0xa7d   : > { %v4103_v59 = vpack.c.bf16 %v4101_v51, %v4101_v51 }
 0xa7e   : > { %v4104_v56 = vpack.c.bf16 %v4102_v55, %v4102_v55 }
 0xa7f   : > { %4105 = vst [vmem:[#allocation3 + $0x10] sm:$0xf] %v4103_v59 }
 0xa80   : > { %4106 = vst [vmem:[#allocation3 + $0x18] sm:$0xf] %v4104_v56 }
 0xa86   : > { %v9960_v7 = vld [vmem:[#allocation3 + $0x10] sm:$0xf] }
 0xa87   : > { %v9962_v23 = vld [vmem:[#allocation3 + $0x18] sm:$0xf]  ;;  %v4543_v42 = vmul.bf16 %v9871_v13, %v9960_v7  ;;  %v4145_v8 = vmul.bf16 %v9836_v28, %v9960_v7  ;;  %v4234_v43 = vmul.bf16 %v9847_v18, %v9960_v7  ;;  %v4321_v22 = vmul.bf16 %v9866_v33, %v9960_v7 }
 0xa88   : > { %v4144_v6 = vmul.bf16 %v9821_v61, %v9962_v23  ;;  %v4146_v37 = vmul.bf16 %v9829_v27, %v9962_v23  ;;  %v4233_v26 = vmul.bf16 %v9825_v11, %v9962_v23  ;;  %v4235_v28 = vmul.bf16 %v9842_v47, %v9962_v23 }
 0xa89   : > { %v8012_v34 = vcombine.low %v4543_v42, %v4543_v42  ;;  %v4627_v27 = vmul.bf16 %v9880_v15, %v9629_v54  ;;  %v4320_v18 = vmul.bf16 %v9831_v36, %v9962_v23  ;;  %v4322_v44 = vmul.bf16 %v9854_v31, %v9962_v23 }
 0xa8a   : > { %v7974_v38 = vcombine.low %v4144_v6, %v4145_v8  ;;  %v7975_v13 = vcombine.low %v4146_v37, %v4146_v37  ;;  %v7982_v61 = vcombine.low %v4233_v26, %v4234_v43  ;;  %v7983_v11 = vcombine.low %v4235_v28, %v4235_v28  ;;  %v10060_v43 = vld [vmem:[%s10976_s2 + $0x38] sm:$0xff] }
 0xa8b   : > { %4575 = vrot.lane.b32.xlu0 %v8012_v34, %s8560_s20  ;;  %v8016_v47 = vcombine.low %v4627_v27, %v4627_v27  ;;  %v7990_v29 = vcombine.low %v4320_v18, %v4321_v22  ;;  %v4409_v2 = vmul.bf16 %v9850_v52, %v9962_v23  ;;  %v4410_v36 = vmul.bf16 %v9885_v41, %v9960_v7  ;;  %v4260_v22 = vpop.permute.xlu0 %4259 }
 0xa8c   : > { %4176 = vrot.lane.b32.xlu1 %v7974_v38, %s8564_s24  ;;  %v4710_v33 = vsel %vm513_vm9, %v9944_v46, %v9942_v0  ;;  %v7991_v14 = vcombine.low %v4322_v44, %v4322_v44  ;;  %v4411_v58 = vmul.bf16 %v9859_v16, %v9962_v23  ;;  %v4714_v52 = vmul.bf16 %v9944_v46, %v9629_v54 }
 0xa8d   : > { %v4715_v31 = vmul.bf16 %v4710_v33, %v9632_v21  ;;  %v8018_v48 = vcombine.high %v4627_v27, %v4627_v27  ;;  %v4630_v16 = vmul.bf16 %v9880_v15, %v9960_v7  ;;  %v4541_v24 = vmul.bf16 %v9861_v60, %v9960_v7  ;;  %v4258_v27 = vpop.permute.xlu1 %4257 }
 0xa8e   : > { %v7999_v41 = vcombine.low %v4411_v58, %v4411_v58  ;;  %v4542_v35 = vmul.bf16 %v9915_v30, %v9962_v23  ;;  %v4802_v15 = vmul.bf16 %v4797_v49, %v9632_v21  ;;  %v4801_v60 = vmul.bf16 %v9948_v62, %v9629_v54 }
 0xa8f   : > { %4178 = vrot.lane.b32.xlu0 %v7975_v13, %s8564_s24  ;;  %v8023_v45 = vcombine.low %v4714_v52, %v4715_v31  ;;  %v8025_v39 = vcombine.high %v4714_v52, %v4715_v31  ;;  %v8020_v40 = vcombine.low %v4630_v16, %v4630_v16  ;;  %v8024_v30 = vcombine.low %v4716_v17, %v4716_v17  ;;  %v4264_v44 = vpop.permute.xlu0 %4263 }
 0xa90   : > { %4265 = vrot.lane.b32.xlu1 %v7982_v61, %s8562_s22  ;;  %v8011_v50 = vcombine.low %v4541_v24, %v4542_v35  ;;  %v8031_v51 = vcombine.low %v4801_v60, %v4802_v15  ;;  %v4628_v63 = vmul.bf16 %v9878_v5, %v9960_v7  ;;  %v4629_v55 = vmul.bf16 %v9890_v19, %v9962_v23  ;;  %v10044_v5 = vld [vmem:[#allocation3] sm:$0xff] }
 0xa91   : > { %v8026_v21 = vcombine.high %v4716_v17, %v4716_v17  ;;  %v4719_v59 = vmul.bf16 %v9942_v0, %v9960_v7  ;;  %v4717_v54 = vmul.bf16 %v9944_v46, %v9960_v7  ;;  %v4718_v42 = vmul.bf16 %v4710_v33, %v9962_v23  ;;  %v8072_v61 = vld [vmem:[%s10977_s3 + $0x40] sm:$0xff] }
 0xa92   : > { %v8019_v56 = vcombine.low %v4628_v63, %v4629_v55  ;;  %v4803_v19 = vmul.bf16 %v10044_v5, %v9946_v10  ;;  %v8033_v34 = vcombine.high %v4801_v60, %v4802_v15  ;;  %v4804_v46 = vmul.bf16 %v9948_v62, %v9960_v7 }
 0xa93   : > { %4267 = vrot.lane.b32.xlu0 %v7983_v11, %s8562_s22  ;;  %v8028_v8 = vcombine.low %v4719_v59, %v4719_v59  ;;  %v8027_v6 = vcombine.low %v4717_v54, %v4718_v42  ;;  %v4805_v37 = vmul.bf16 %v4797_v49, %v9962_v23  ;;  %v4806_v26 = vmul.bf16 %v9946_v10, %v9960_v7  ;;  %v8038_v10 = vld [vmem:[%s10977_s3 + $0x38] sm:$0xff]  ;;  %v4262_v11 = vpop.permute.xlu1 %4261  ;;  %v4463_v42 = vld [vmem:[%s10975_s1] sm:$0x44] }
 0xa94   : > { %4656 = vrot.lane.b32.xlu1 %v8017_v25, %s8559_s17  ;;  %v7998_v25 = vcombine.low %v4409_v2, %v4410_v36  ;;  %v8032_v0 = vcombine.low %v4803_v19, %v4803_v19  ;;  %v8034_v38 = vcombine.high %v4803_v19, %v4803_v19  ;;  %v8040_v28 = vcombine.high %v10060_v43, %v10060_v43  ;;  %v4347_v2 = vpop.permute.xlu0 %4346 }
 0xa95   : > { %v8035_v13 = vcombine.low %v4804_v46, %v4805_v37  ;;  %v8036_v62 = vcombine.low %v4806_v26, %v4806_v26  ;;  %v4269_v16 = vrot.slane %v4258_v27, 4 }
 0xa96   : > { %8070 = vmatprep.mubr.msk.bf16.mxu0 %vm2663_vm13, %v8040_v28 }
 0xa97   : > { %4654 = vrot.lane.b32.xlu0 %v8016_v47, %s8559_s17  ;;  %v4345_v18 = vpop.permute.xlu1 %4344 }
 0xa98   : > { %4352 = vrot.lane.b32.xlu1 %v7990_v29, %s8561_s21  ;;  %v4351_v33 = vpop.permute.xlu0 %4350 }
 0xa99   : > { %v4359_v24 = vrot.slane %v4351_v33, 4 }
 0xa9b   : > { %4354 = vrot.lane.b32.xlu0 %v7991_v14, %s8561_s21  ;;  %v4349_v47 = vpop.permute.xlu1 %4348 }
 0xa9c   : > { %4441 = vrot.lane.b32.xlu1 %v7998_v25, %s8563_s23  ;;  %v4436_v58 = vpop.permute.xlu0 %4435  ;;  %v4358_v60 = vrot.slane %v4349_v47, 4 }
 0xa9f   : > { %4443 = vrot.lane.b32.xlu0 %v7999_v41, %s8563_s23  ;;  %v10074_v29 = vpop.permute.xlu1 %4433 }
 0xaa0   : > { %4741 = vrot.lane.b32.xlu1 %v8023_v45, %s8557_s30  ;;  %v10082_v25 = vpop.permute.xlu0 %4439  ;;  %v4270_v45 = vrot.slane %v4260_v22, 4  ;;  %v4445_v33 = vrot.slane %v10074_v29, 4 }
 0xaa2   : > { %v4275_v49 = vsel %vm456_vm11, %v4269_v16, %v4270_v45  ;;  %v4448_v16 = vrot.slane %v10082_v25, 4 }
 0xaa3   : > { %4658 = vrot.lane.b32.xlu0 %v8018_v48, %s8559_s17  ;;  %v10076_v36 = vpop.permute.xlu1 %4437  ;;  %v4276_v54 = vsel %vm513_vm9, %v4258_v27, %v4275_v49 }
 0xaa4   : > { %4745 = vrot.lane.b32.xlu1 %v8025_v39, %s8557_s30  ;;  %v4272_v39 = vrot.slane %v4264_v44, 4  ;;  %v4447_v49 = vrot.slane %v10076_v36, 4 }
 0xaa7   : > { %4662 = vrot.lane.b32.xlu0 %v8020_v40, %s8559_s17  ;;  %v10078_v14 = vpop.permute.xlu1 %4565 }
 0xaa8   : > { %4573 = vrot.lane.b32.xlu1 %v8011_v50, %s8560_s20  ;;  %v4271_v50 = vrot.slane %v4262_v11, 4 }
 0xaaa   : > { %v4277_v55 = vsel %vm456_vm11, %v4271_v50, %v4272_v39 }
 0xaab   : > { %4743 = vrot.lane.b32.xlu0 %v8024_v30, %s8557_s30  ;;  %v10080_v31 = vpop.permute.xlu1 %4569  ;;  %v4356_v30 = vrot.slane %v4345_v18, 4 }
 0xaac   : > { %4828 = vrot.lane.b32.xlu1 %v8031_v51, %s8556_s29  ;;  %v4357_v51 = vrot.slane %v4347_v2, 4 }
 0xaae   : > { %v4362_v46 = vsel %vm456_vm11, %v4356_v30, %v4357_v51 }
 0xaaf   : > { %4747 = vrot.lane.b32.xlu0 %v8026_v21, %s8557_s30  ;;  %v10084_v52 = vpop.permute.xlu1 %4652  ;;  %v4364_v21 = vsel %vm456_vm11, %v4358_v60, %v4359_v24  ;;  %v4363_v2 = vsel %vm566_vm8, %v4345_v18, %v4362_v46 }
 0xab0   : > { %4660 = vrot.lane.b32.xlu1 %v8019_v56, %s8559_s17 }
 0xab3   : > { %4751 = vrot.lane.b32.xlu0 %v8028_v8, %s8557_s30 }
 0xab4   : > { %4749 = vrot.lane.b32.xlu1 %v8027_v6, %s8557_s30 }
 0xab7   : > { %4830 = vrot.lane.b32.xlu0 %v8032_v0, %s8556_s29 }
 0xab8   : > { %4832 = vrot.lane.b32.xlu1 %v8033_v34, %s8556_s29 }
 0xabb   : > { %4834 = vrot.lane.b32.xlu0 %v8034_v38, %s8556_s29  ;;  %v8000_v38 = vcombine.low %v4463_v42, %v4463_v42 }
 0xabc   : > { %4836 = vrot.lane.b32.xlu1 %v8035_v13, %s8556_s29  ;;  %v4278_v13 = vsel %vm513_vm9, %v4262_v11, %v4277_v55 }
 0xabf   : > { %4838 = vrot.lane.b32.xlu0 %v8036_v62, %s8556_s29  ;;  %v4365_v62 = vsel %vm566_vm8, %v4349_v47, %v4364_v21 }
 0xac0   : > { %4891 = vperm.xlu1 %8333, %v8038_v10   ;;  %v8001_v10 = vcombine.high %v4463_v42, %v4463_v42  ;;  %v8048_v45 = vcombine.high %v4363_v2, %v4365_v62 }
 0xac2   : > { %v4477_v39 = vpack.i.b16 %v8001_v10, %v8001_v10 }
 0xac3   : > { %5107 = vperm.xlu0 %8332, %v8072_v61   ;;  %v4446_v61 = vrot.slane %v4436_v58, 4 }
 0xac4   : > { %v4482_v30 = vrot.slane %v4477_v39, %v8702_v32 }
 0xac5   : > { %v4451_v24 = vsel %vm456_vm11, %v4445_v33, %v4446_v61 }
 0xac6   : > { %v4452_v60 = vsel %vm621_vm7, %v10074_v29, %v4451_v24 }
 0xafd   : > { %v10086_v41 = vpop.permute.xlu0 %4575 }
 0xafe   : > { %v4177_v48 = vpop.permute.xlu1 %4176 }
 0xaff   : > { %v4184_v17 = vrot.slane %v4177_v48, 4 }
 0xb01   : > { %v4179_v35 = vpop.permute.xlu0 %4178 }
 0xb02   : > { %v4185_v40 = vrot.slane %v4179_v35, 4  ;;  %v4266_v15 = vpop.permute.xlu1 %4265 }
 0xb03   : > { %v4273_v19 = vrot.slane %v4266_v15, 4 }
 0xb04   : > { %v4190_v63 = vsel %vm456_vm11, %v4184_v17, %v4185_v40  ;;  %v8047_v17 = vcombine.low %v4363_v2, %v4365_v62  ;;  %v4582_v2 = vrot.slane %v10086_v41, 4 }
 0xb05   : > { %v4268_v59 = vpop.permute.xlu0 %4267  ;;  %v4191_v56 = vsel %vm458_vm10, %v4177_v48, %v4190_v63  ;;  %v4470_v48 = vpack.i.b16 %v8000_v38, %v8000_v38 }
 0xb06   : > { %v4274_v8 = vrot.slane %v4268_v59, 4  ;;  %v10097_v6 = vpop.permute.xlu1 %4656  ;;  %v8043_v0 = vcombine.low %v4191_v56, %v4276_v54  ;;  %v8044_v34 = vcombine.high %v4191_v56, %v4276_v54  ;;  %v4577_v56 = vrot.slane %v10078_v14, 4 }
 0xb07   : > { %v4475_v40 = vrot.slane %v4470_v48, %v8702_v32  ;;  %v4666_v48 = vrot.slane %v10097_v6, 4 }
 0xb08   : > { %v4279_v37 = vsel %vm456_vm11, %v4273_v19, %v4274_v8  ;;  %5046 = vmatprep.subr.bf16.mxu0 %v8044_v34  ;;  %v4486_v19 = vmul.bf16 %v4482_v30, %v9962_v23  ;;  %v4578_v8 = vrot.slane %v9950_v57, 4  ;;  %v4580_v57 = vrot.slane %v9952_v9, 4 }
 0xb09   : > { %5047 = vmatpush1.bf16.msra.mxu0 %v8043_v0  ;;  %v10101_v26 = vpop.permute.xlu0 %4654  ;;  %v4280_v28 = vsel %vm513_vm9, %v4266_v15, %v4279_v37  ;;  %v4453_v15 = vsel %vm456_vm11, %v4447_v49, %v4448_v16  ;;  %v4485_v42 = vmul.bf16 %v4475_v40, %v9960_v7  ;;  %v8544_v7 = vld [vmem:[#allocation3 + $0x8] sm:$0xff]  ;;  %v4664_v16 = vrot.slane %v10084_v52, 4 }
 0xb0a   : > { %v4353_v27 = vpop.permute.xlu1 %4352  ;;  %v8045_v22 = vcombine.low %v4278_v13, %v4280_v28  ;;  %v8046_v44 = vcombine.high %v4278_v13, %v4280_v28  ;;  %v4454_v0 = vsel %vm621_vm7, %v10076_v36, %v4453_v15  ;;  %v4583_v13 = vsel %vm456_vm11, %v4577_v56, %v4578_v8 }
 0xb0b   : > { %v4360_v47 = vrot.slane %v4353_v27, 4  ;;  %v4579_v28 = vrot.slane %v10080_v31, 4  ;;  %v4484_v23 = vmul.bf16 %v8544_v7, %v4482_v30  ;;  %v8004_v62 = vcombine.low %v4485_v42, %v4486_v19 }
 0xb0c   : > { %5048 = vmatprep.subr.bf16.mxu0 %v8046_v44  ;;  %v4584_v36 = vsel %vm598_vm6, %v10078_v14, %v4583_v13  ;;  %v4665_v33 = vrot.slane %v10101_v26, 4 }
 0xb0d   : > { %5049 = vmatpush1.bf16.msra.mxu0 %v8045_v22  ;;  %v4355_v11 = vpop.permute.xlu0 %4354  ;;  %v4483_v22 = vmul.bf16 %v10044_v5, %v4475_v40  ;;  %v4585_v44 = vsel %vm456_vm11, %v4579_v28, %v4580_v57  ;;  %v8056_v9 = vcombine.high %v8004_v62, %v4584_v36 }
 0xb0e   : > { %v4361_v35 = vrot.slane %v4355_v11, 4  ;;  %v4442_v58 = vpop.permute.xlu1 %4441  ;;  %5050 = vmatprep.subr.bf16.mxu0 %v8048_v45  ;;  %v4586_v39 = vsel %vm598_vm6, %v10080_v31, %v4585_v44  ;;  %v4670_v26 = vsel %vm456_vm11, %v4664_v16, %v4665_v33 }
 0xb0f   : > { %v4449_v51 = vrot.slane %v4442_v58, 4  ;;  %v4671_v15 = vsel %vm543_vm5, %v10084_v52, %v4670_v26  ;;  %v5213_v26 = vld [vmem:[%s10975_s1] sm:$0x11] }
 0xb10   : > { %v4366_v18 = vsel %vm456_vm11, %v4360_v47, %v4361_v35  ;;  %v8310_v35 = vcombine.low %v4485_v42, %v4584_v36 }
 0xb11   : > { %5051 = vmatpush1.bf16.msra.mxu0 %v8047_v17  ;;  %v4444_v25 = vpop.permute.xlu0 %4443  ;;  %v4367_v50 = vsel %vm566_vm8, %v4353_v27, %v4366_v18 }
 0xb12   : > { %v4450_v63 = vrot.slane %v4444_v25, 4  ;;  %v10118_v55 = vpop.permute.xlu1 %4741  ;;  %v8049_v21 = vcombine.low %v4367_v50, %v4452_v60  ;;  %v8050_v59 = vcombine.high %v4367_v50, %v4452_v60 }
 0xb13   : > { %v4753_v49 = vrot.slane %v10118_v55, 4 }
 0xb14   : > { %v4455_v54 = vsel %vm456_vm11, %v4449_v51, %v4450_v63  ;;  %5052 = vmatprep.subr.bf16.mxu0 %v8050_v59 }
 0xb15   : > { %5053 = vmatpush1.bf16.msra.mxu0 %v8049_v21  ;;  %v4659_v29 = vpop.permute.xlu0 %4658  ;;  %v4456_v34 = vsel %vm621_vm7, %v4442_v58, %v4455_v54 }
 0xb16   : > { %v10128_v46 = vpop.permute.xlu1 %4745  ;;  %v8051_v37 = vcombine.low %v4454_v0, %v4456_v34  ;;  %v8052_v38 = vcombine.high %v4454_v0, %v4456_v34  ;;  %v4667_v61 = vrot.slane %v4659_v29, 4 }
 0xb17   : > { %v4755_v63 = vrot.slane %v10128_v46, 4 }
 0xb18   : > { %5054 = vmatprep.subr.bf16.mxu0 %v8052_v38  ;;  %v4672_v5 = vsel %vm456_vm11, %v4666_v48, %v4667_v61 }
 0xb19   : > { %5055 = vmatpush1.bf16.msra.mxu0 %v8051_v37  ;;  %v4663_v10 = vpop.permute.xlu0 %4662  ;;  %v4673_v18 = vsel %vm543_vm5, %v10097_v6, %v4672_v5 }
 0xb1a   : > { %v4574_v27 = vpop.permute.xlu1 %4573  ;;  %5056 = vmatprep.subr.bf16.mxu0 %v4484_v23  ;;  %v4669_v40 = vrot.slane %v4663_v10, 4  ;;  %v8060_v51 = vcombine.high %v4671_v15, %v4673_v18  ;;  %v8059_v8 = vcombine.low %v4671_v15, %v4673_v18 }
 0xb1b   : > { %v4581_v45 = vrot.slane %v4574_v27, 4 }
 0xb1d   : > { %v4587_v11 = vsel %vm456_vm11, %v4581_v45, %v4582_v2  ;;  %5057 = vmatpush1.bf16.msra.mxu0 %v4483_v22  ;;  %v4744_v14 = vpop.permute.xlu0 %4743 }
 0xb1e   : > { %v4588_v24 = vsel %vm598_vm6, %v4574_v27, %v4587_v11  ;;  %v4829_v41 = vpop.permute.xlu1 %4828  ;;  %5058 = vmatprep.subr.bf16.mxu0 %v8056_v9  ;;  %v4754_v47 = vrot.slane %v4744_v14, 4 }
 0xb1f   : > { %v8058_v58 = vcombine.high %v4586_v39, %v4588_v24  ;;  %v8057_v25 = vcombine.low %v4586_v39, %v4588_v24  ;;  %v4840_v23 = vrot.slane %v4829_v41, 4  ;;  %v8039_v24 = vcombine.low %v10060_v43, %v10060_v43  ;;  %v5317_v43 = vld [vmem:[%s10975_s1] sm:$0x22] }
 0xb20   : > { %v4759_v50 = vsel %vm456_vm11, %v4753_v49, %v4754_v47  ;;  %v5266_v47 = vld [vmem:[%s10975_s1] sm:$0x22]  ;;  %v8079_v49 = vcombine.high %v5213_v26, %v5213_v26  ;;  %v8086_v15 = vcombine.low %v5317_v43, %v5317_v43 }
 0xb21   : > { %5059 = vmatpush1.bf16.msra.mxu0 %v8310_v35  ;;  %v4748_v17 = vpop.permute.xlu0 %4747  ;;  %v4760_v56 = vsel %vm490_vm4, %v10118_v55, %v4759_v50  ;;  %v8083_v18 = vcombine.high %v5266_v47, %v5266_v47 }
 0xb22   : > { %v4661_v31 = vpop.permute.xlu1 %4660  ;;  %5060 = vmatprep.subr.bf16.mxu0 %v8058_v58  ;;  %v4756_v60 = vrot.slane %v4748_v17, 4  ;;  %v8078_v17 = vcombine.low %v5213_v26, %v5213_v26 }
 0xb23   : > { %v4668_v30 = vrot.slane %v4661_v31, 4 }
 0xb24   : > { %v4761_v52 = vsel %vm456_vm11, %v4755_v63, %v4756_v60  ;;  %v5228_v60 = vshrl.u32 %v8079_v49, 16  ;;  %v5399_v63 = vld [vmem:[%s10975_s1] sm:$0x44] }
 0xb25   : > { %v4674_v21 = vsel %vm456_vm11, %v4668_v30, %v4669_v40  ;;  %5061 = vmatpush1.bf16.msra.mxu0 %v8057_v25  ;;  %v4752_v59 = vpop.permute.xlu0 %4751  ;;  %v4762_v37 = vsel %vm490_vm4, %v10128_v46, %v4761_v52  ;;  %v8082_v40 = vcombine.low %v5266_v47, %v5266_v47  ;;  %v5220_v30 = vshrl.u32 %v8078_v17, 16 }
 0xb26   : > { %v4675_v6 = vsel %vm543_vm5, %v4661_v31, %v4674_v21  ;;  %v4758_v54 = vrot.slane %v4752_v59, 4  ;;  %v4750_v42 = vpop.permute.xlu1 %4749  ;;  %5062 = vmatprep.subr.bf16.mxu0 %v8060_v51  ;;  %v8087_v31 = vcombine.high %v5317_v43, %v5317_v43  ;;  %v5324_v52 = vshrl.u32 %v8086_v15, 16 }
 0xb27   : > { %v4757_v19 = vrot.slane %v4750_v42, 4  ;;  %v8062_v29 = vcombine.high %v4675_v6, %v4760_v56  ;;  %v8061_v55 = vcombine.low %v4675_v6, %v4760_v56  ;;  %v5229_v6 = vpack.i.b16 %v5228_v60, %v5228_v60 }
 0xb28   : > { %v5332_v51 = vshrl.u32 %v8087_v31, 16  ;;  %v5221_v56 = vpack.i.b16 %v5220_v30, %v5220_v30 }
 0xb29   : > { %v4763_v0 = vsel %vm456_vm11, %v4757_v19, %v4758_v54  ;;  %5063 = vmatpush1.bf16.msra.mxu0 %v8059_v8  ;;  %v4831_v34 = vpop.permute.xlu0 %4830  ;;  %v5280_v54 = vpack.i.b16 %v8083_v18, %v8083_v18  ;;  %v5234_v19 = vrot.slane %v5229_v6, %v8628_v12 }
 0xb2a   : > { %v4764_v38 = vsel %vm490_vm4, %v4750_v42, %v4763_v0  ;;  %v4841_v13 = vrot.slane %v4831_v34, 4  ;;  %v4833_v28 = vpop.permute.xlu1 %4832  ;;  %5064 = vmatprep.subr.bf16.mxu0 %v8062_v29  ;;  %v5273_v42 = vpack.i.b16 %v8082_v40, %v8082_v40  ;;  %v5226_v8 = vrot.slane %v5221_v56, %v8628_v12 }
 0xb2b   : > { %v8064_v7 = vcombine.high %v4762_v37, %v4764_v38  ;;  %v4842_v10 = vrot.slane %v4833_v28, 4  ;;  %v8063_v61 = vcombine.low %v4762_v37, %v4764_v38  ;;  %v8094_v29 = vcombine.high %v5399_v63, %v5399_v63 }
 0xb2c   : > { %v4846_v57 = vsel %vm456_vm11, %v4840_v23, %v4841_v13  ;;  %v8093_v0 = vcombine.low %v5399_v63, %v5399_v63  ;;  %v5333_v34 = vpack.i.b16 %v5332_v51, %v5332_v51  ;;  %v5325_v37 = vpack.i.b16 %v5324_v52, %v5324_v52  ;;  %v5503_v23 = vld [vmem:[%s10975_s1] sm:$0x88] }
 0xb2d   : > { %5065 = vmatpush1.bf16.msra.mxu0 %v8061_v55  ;;  %v4835_v62 = vpop.permute.xlu0 %4834  ;;  %v4847_v44 = vsel %vm434_vm3, %v4829_v41, %v4846_v57  ;;  %v5162_v41 = vld [vmem:[%s10975_s1] sm:$0x11]  ;;  %v5285_v38 = vrot.slane %v5280_v54, %v8676_v3  ;;  %v5278_v13 = vrot.slane %v5273_v42, %v8676_v3 }
 0xb2e   : > { %v4843_v36 = vrot.slane %v4835_v62, 4  ;;  %5066 = vmatprep.subr.bf16.mxu0 %v8064_v7  ;;  %v4837_v27 = vpop.permute.xlu1 %4836  ;;  %v8075_v35 = vcombine.high %v5162_v41, %v5162_v41  ;;  %v8074_v58 = vcombine.low %v5162_v41, %v5162_v41  ;;  %v5406_v55 = vshrl.u32 %v8093_v0, 16  ;;  %v5452_v7 = vld [vmem:[%s10975_s1] sm:$0x88] }
 0xb2f   : > { %v4844_v33 = vrot.slane %v4837_v27, 4  ;;  %v5338_v62 = vrot.slane %v5333_v34, %v8676_v3  ;;  %v5330_v57 = vrot.slane %v5325_v37, %v8676_v3  ;;  %v8071_v54 = vld [vmem:[%s10976_s2 + $0x40] sm:$0xf] }
 0xb30   : > { %v4848_v22 = vsel %vm456_vm11, %v4842_v10, %v4843_v36  ;;  %v5176_v25 = vpack.i.b16 %v8075_v35, %v8075_v35  ;;  %v5169_v50 = vpack.i.b16 %v8074_v58, %v8074_v58  ;;  %v8098_v10 = vcombine.high %v5452_v7, %v5452_v7 }
 0xb31   : > { %5067 = vmatpush1.bf16.msra.mxu0 %v8063_v61  ;;  %v4839_v46 = vpop.permute.xlu0 %4838  ;;  %v4849_v2 = vsel %vm434_vm3, %v4833_v28, %v4848_v22  ;;  %v5414_v28 = vshrl.u32 %v8094_v29, 16  ;;  %v8097_v36 = vcombine.low %v5452_v7, %v5452_v7  ;;  %v8102_v61 = vcombine.high %v5503_v23, %v5503_v23 }
 0xb32   : > { %v4845_v45 = vrot.slane %v4839_v46, 4  ;;  %v8065_v48 = vcombine.low %v4847_v44, %v4849_v2  ;;  %v8066_v9 = vcombine.high %v4847_v44, %v4849_v2  ;;  %v5181_v21 = vrot.slane %v5176_v25, %v8628_v12 }
 0xb33   : > { %v5174_v59 = vrot.slane %v5169_v50, %v8628_v12  ;;  %v5407_v22 = vpack.i.b16 %v5406_v55, %v5406_v55  ;;  %v8101_v46 = vcombine.low %v5503_v23, %v5503_v23  ;;  %v5466_v44 = vpack.i.b16 %v8098_v10, %v8098_v10 }
 0xb34   : > { %v4850_v16 = vsel %vm456_vm11, %v4844_v33, %v4845_v45  ;;  %5068 = vmatprep.subr.bf16.mxu0 %v8066_v9  ;;  %5186 = vrot.lane.b32.xlu0 %v5181_v21, %s8556_s29  ;;  %v5459_v2 = vpack.i.b16 %v8097_v36, %v8097_v36 }
 0xb35   : > { %5069 = vmatpush1.bf16.msra.mxu0 %v8065_v48  ;;  %v4851_v11 = vsel %vm434_vm3, %v4837_v27, %v4850_v16  ;;  %5184 = vrot.lane.b32.xlu1 %v5174_v59, %s8556_s29  ;;  %v5415_v27 = vpack.i.b16 %v5414_v28, %v5414_v28  ;;  %v5412_v45 = vrot.slane %v5407_v22, %v8702_v32  ;;  %v5518_v48 = vshrl.u32 %v8102_v61, 16  ;;  %v5556_v16 = vld [vmem:[%s10975_s1 + $0x8] sm:$0x11]  ;;  %v5370_v61 = vld [vmem:[%s10975_s1] sm:$0x44] }
 0xb36   : > { %v8068_v14 = vcombine.high %v4851_v11, %v4851_v11  ;;  %v8067_v39 = vcombine.low %v4851_v11, %v4851_v11  ;;  %v5510_v9 = vshrl.u32 %v8101_v46, 16  ;;  %v5471_v11 = vrot.slane %v5466_v44, %v8690_v20 }
 0xb37   : > { %v5420_v33 = vrot.slane %v5415_v27, %v8702_v32  ;;  %v8091_v27 = vcombine.high %v5370_v61, %v5370_v61 }
 0xb38   : > { %8069 = vmatprep.subr.msk.bf16.mxu0 %vm456_vm11, %v8068_v14  ;;  %v5039_v5 = vsel %vm456_vm11, %v8067_v39, 0  ;;  %5239 = vrot.lane.b32.xlu0 %v5234_v19, %s8557_s30  ;;  %v8106_v14 = vcombine.high %v5556_v16, %v5556_v16  ;;  %v8105_v39 = vcombine.low %v5556_v16, %v5556_v16  ;;  %v5511_v41 = vpack.i.b16 %v5510_v9, %v5510_v9 }
 0xb39   : > { %5071 = vmatpush1.bf16.msra.mxu0 %v5039_v5  ;;  %5237 = vrot.lane.b32.xlu1 %v5226_v8, %s8557_s30  ;;  %v5464_v5 = vrot.slane %v5459_v2, %v8690_v20 }
 0xb3a   : > { %v5570_v26 = vpack.i.b16 %v8106_v14, %v8106_v14  ;;  %v5516_v35 = vrot.slane %v5511_v41, %v8690_v20  ;;  %v5563_v58 = vpack.i.b16 %v8105_v39, %v8105_v39 }
 0xb3c   : > { %5077 = vmatmul.mubr.bf16.vlgmr.msra.gmra.mrb[8].mxu0 %v8039_v24  ;;  %5290 = vrot.lane.b32.xlu0 %v5285_v38, %s8559_s17  ;;  %v5519_v24 = vpack.i.b16 %v5518_v48, %v5518_v48  ;;  %v5575_v49 = vrot.slane %v5570_v26, %v8628_v12  ;;  %v5568_v17 = vrot.slane %v5563_v58, %v8628_v12 }
 0xb3d   : > { %5288 = vrot.lane.b32.xlu1 %v5278_v13, %s8559_s17 }
 0xb3e   : > { %v5524_v47 = vrot.slane %v5519_v24, %v8690_v20 }
 0xb3f   : > { %v4892_v43 = vpop.permute.xlu1 %4891 }
 0xb40   : > { %5343 = vrot.lane.b32.xlu0 %v5338_v62, %s8560_s20 }
 0xb41   : > { %5341 = vrot.lane.b32.xlu1 %v5330_v57, %s8560_s20 }
 0xb42   : > { %v5108_v42 = vpop.permute.xlu0 %5107 }
 0xb44   : > { %5425 = vrot.lane.b32.xlu0 %v5420_v33, %s8563_s23 }
 0xb45   : > { %5423 = vrot.lane.b32.xlu1 %v5412_v45, %s8563_s23  ;;  %v5384_v45 = vpack.i.b16 %v8091_v27, %v8091_v27 }
 0xb47   : > { %v5389_v24 = vrot.slane %v5384_v45, %v8702_v32 }
 0xb48   : > { %5476 = vrot.lane.b32.xlu0 %v5471_v11, %s8561_s21 }
 0xb49   : > { %5474 = vrot.lane.b32.xlu1 %v5464_v5, %s8561_s21 }
 0xb4c   : > { %5529 = vrot.lane.b32.xlu0 %v5524_v47, %s8562_s22 }
 0xb4d   : > { %5527 = vrot.lane.b32.xlu1 %v5516_v35, %s8562_s22 }
 0xb50   : > { %5580 = vrot.lane.b32.xlu0 %v5575_v49, %s8564_s24 }
 0xb51   : > { %5578 = vrot.lane.b32.xlu1 %v5568_v17, %s8564_s24 }
 0xba6   : > { %v5187_v52 = vpop.permute.xlu0 %5186 }
 0xba7   : > { %v5185_v8 = vpop.permute.xlu1 %5184 }
 0xba8   : > { %v5188_v9 = vsel %vm434_vm3, %v5185_v8, %v5187_v52 }
 0xbaa   : > { %v5240_v19 = vpop.permute.xlu0 %5239 }
 0xbab   : > { %v5238_v28 = vpop.permute.xlu1 %5237 }
 0xbac   : > { %v5241_v14 = vsel %vm490_vm4, %v5238_v28, %v5240_v19 }
 0xbae   : > { %v5291_v37 = vpop.permute.xlu0 %5290 }
 0xbaf   : > { %v5289_v36 = vpop.permute.xlu1 %5288 }
 0xbb0   : > { %v5292_v17 = vsel %vm543_vm5, %v5289_v36, %v5291_v37 }
 0xbb2   : > { %v5344_v10 = vpop.permute.xlu0 %5343 }
 0xbb3   : > { %v5342_v46 = vpop.permute.xlu1 %5341 }
 0xbb7   : > { %v5424_v41 = vpop.permute.xlu1 %5423 }
 0xc0f   : > { %v5078_v18 = vpop.f32.mrb[8].mxu0 }
 0xc10   : > { %v5079_v40 = vadd.f32 %v5078_v18, %v4892_v43  ;;  %v5080_v31 = vpop.f32.mrb[9].mxu0 }
 0xc11   : > { %v5081_v15 = vadd.f32 %v5080_v31, %v4892_v43  ;;  %v5082_v25 = vpop.f32.mrb[10].mxu0 }
 0xc12   : > { %v5085_v50 = vmax.f32 %v5079_v40, 0.0  ;;  %v5083_v60 = vpop.f32.mrb[11].mxu0 }
 0xc13   : > { %v5086_v30 = vmax.f32 %v5081_v15, 0.0 }
 0xc14   : > { %v5087_v51 = vpack.c.bf16 %v5085_v50, %v5085_v50 }
 0xc15   : > { %v5088_v63 = vpack.c.bf16 %v5086_v30, %v5086_v30  ;;  %v5475_v30 = vpop.permute.xlu1 %5474 }
 0xc16   : > { %v5091_v21 = vrot.slane %v5087_v51, 4 }
 0xc17   : > { %v5092_v59 = vrot.slane %v5088_v63, 4  ;;  %v5345_v63 = vsel %vm598_vm6, %v5342_v46, %v5344_v10 }
 0xc18   : > { %5095 = vst [vmem:[#allocation3 + $0x10] sm:$0xf0] %v5091_v21 }
 0xc19   : > { %5096 = vst [vmem:[#allocation3 + $0x18] sm:$0xf0] %v5092_v59 }
 0xc1f   : > { %v5099_v56 = vld [vmem:[#allocation3 + $0x10] sm:$0xff] }
 0xc20   : > { %v5100_v6 = vld [vmem:[#allocation3 + $0x18] sm:$0xff] }
 0xc21   : > { %5115 = vmatprep.subr.bf16.mxu1 %v5100_v6 }
 0xc22   : > { %5116 = vmatpush1.bf16.msra.mxu1 %v5099_v56 }
 0xc25   : > { %8073 = vmatmul.mubr.msk.bf16.vlgmr.msra.gmra.mrb[20].mxu1 %vm2739_vm14, %v8071_v54 }
 0xc26   : > { %5711 = vmatprep.mubr.bf16.mxu1 %v8555_v4 }
 0xcf8   : > { %v5147_v29 = vpop.f32.mrb[20].mxu1 }
 0xcf9   : > { %v5148_v0 = vadd.f32 %v5147_v29, %v5108_v42  ;;  %v5149_v34 = vpop.f32.mrb[21].mxu1 }
 0xcfa   : > { %v5150_v38 = vadd.f32 %v5149_v34, %v5108_v42  ;;  %v5151_v13 = vpop.f32.mrb[22].mxu1 }
 0xcfb   : > { %v10235_v55 = vadd.f32 %v5148_v0, %v9480_v53  ;;  %v5152_v7 = vpop.f32.mrb[23].mxu1  ;;  %v8090_v53 = vcombine.low %v5370_v61, %v5370_v61 }
 0xcfc   : > { %v10238_v23 = vadd.f32 %v5150_v38, %v9483_v1  ;;  %v5426_v1 = vpop.permute.xlu0 %5425 }
 0xcfd   : > { %v5156_v62 = vpack.c.bf16 %v10235_v55, %v10235_v55  ;;  %v5377_v33 = vpack.i.b16 %v8090_v53, %v8090_v53  ;;  %v5427_v56 = vsel %vm621_vm7, %v5424_v41, %v5426_v1 }
 0xcfe   : > { %v5157_v57 = vpack.c.bf16 %v10238_v23, %v10238_v23 }
 0xcff   : > { %5158 = vst [vmem:[#allocation3] sm:$0xf] %v5156_v62  ;;  %v5382_v5 = vrot.slane %v5377_v33, %v8702_v32 }
 0xd00   : > { %5159 = vst [vmem:[#allocation3 + $0x8] sm:$0xf] %v5157_v57  ;;  %v5477_v51 = vpop.permute.xlu0 %5476 }
 0xd01   : > { %v5478_v34 = vsel %vm566_vm8, %v5475_v30, %v5477_v51 }
 0xd04   : > { %v5530_v29 = vpop.permute.xlu0 %5529 }
 0xd06   : > { %v10247_v22 = vld [vmem:[#allocation3] sm:$0xf] }
 0xd07   : > { %v5433_v44 = vmul.bf16 %v5426_v1, %v10247_v22  ;;  %v10250_v2 = vld [vmem:[#allocation3 + $0x8] sm:$0xf]  ;;  %v5193_v11 = vmul.bf16 %v5188_v9, %v10247_v22  ;;  %v5246_v35 = vmul.bf16 %v5241_v14, %v10247_v22  ;;  %v10267_v43 = vmul.bf16 %v5382_v5, %v10247_v22 }
 0xd08   : > { %v5192_v16 = vmul.bf16 %v5185_v8, %v10250_v2  ;;  %v5194_v39 = vmul.bf16 %v5187_v52, %v10250_v2  ;;  %v5245_v47 = vmul.bf16 %v5238_v28, %v10250_v2  ;;  %v5247_v49 = vmul.bf16 %v5240_v19, %v10250_v2  ;;  %v5528_v8 = vpop.permute.xlu1 %5527  ;;  %v5581_v61 = vpop.permute.xlu0 %5580  ;;  %v8110_v14 = vld [vmem:[%s10977_s3 + $0x48] sm:$0xff] }
 0xd09   : > { %v8096_v48 = vcombine.low %v5433_v44, %v5433_v44  ;;  %v5391_v18 = vmul.bf16 %v5389_v24, %v10250_v2  ;;  %v5296_v31 = vmul.bf16 %v5289_v36, %v10250_v2  ;;  %v5297_v15 = vmul.bf16 %v5292_v17, %v10247_v22 }
 0xd0a   : > { %v8076_v26 = vcombine.low %v5192_v16, %v5193_v11  ;;  %v8077_v58 = vcombine.low %v5194_v39, %v5194_v39  ;;  %v8080_v40 = vcombine.low %v5245_v47, %v5246_v35  ;;  %v8081_v25 = vcombine.low %v5247_v49, %v5247_v49  ;;  %v5734_v39 = vld [vmem:[%s10975_s1] sm:$0x11]  ;;  %v5934_v47 = vld [vmem:[%s10975_s1] sm:$0x22] }
 0xd0b   : > { %5444 = vrot.lane.b32.xlu0 %v8096_v48, %s8560_s20  ;;  %v5298_v50 = vmul.bf16 %v5291_v37, %v10250_v2  ;;  %v10274_v60 = vcombine.low %v10267_v43, %v5391_v18  ;;  %v8084_v21 = vcombine.low %v5296_v31, %v5297_v15  ;;  %v5349_v59 = vmul.bf16 %v5342_v46, %v10250_v2 }
 0xd0c   : > { %5203 = vrot.lane.b32.xlu1 %v8076_v26, %s8564_s24  ;;  %v5350_v6 = vmul.bf16 %v5345_v63, %v10247_v22  ;;  %v5351_v42 = vmul.bf16 %v5344_v10, %v10250_v2  ;;  %v5431_v52 = vmul.bf16 %v5424_v41, %v10247_v22  ;;  %v5432_v19 = vmul.bf16 %v5427_v56, %v10250_v2  ;;  %v5579_v36 = vpop.permute.xlu1 %5578 }
 0xd0d   : > { %v8085_v54 = vcombine.low %v5298_v50, %v5298_v50  ;;  %v5484_v37 = vmul.bf16 %v5477_v51, %v10247_v22  ;;  %v5482_v28 = vmul.bf16 %v5475_v30, %v10247_v22  ;;  %v5483_v7 = vmul.bf16 %v5478_v34, %v10250_v2  ;;  %v6036_v50 = vld [vmem:[%s10975_s1] sm:$0x44] }
 0xd0e   : > { %v8088_v0 = vcombine.low %v5349_v59, %v5350_v6  ;;  %v8089_v38 = vcombine.low %v5351_v42, %v5351_v42  ;;  %v8095_v13 = vcombine.low %v5431_v52, %v5432_v19  ;;  %v5531_v57 = vsel %vm513_vm9, %v5528_v8, %v5530_v29 }
 0xd0f   : > { %5205 = vrot.lane.b32.xlu0 %v8077_v58, %s8564_s24  ;;  %v8100_v62 = vcombine.low %v5484_v37, %v5484_v37  ;;  %v5537_v10 = vmul.bf16 %v5530_v29, %v10247_v22  ;;  %v8099_v53 = vcombine.low %v5482_v28, %v5483_v7  ;;  %v5535_v27 = vmul.bf16 %v5528_v8, %v10247_v22  ;;  %v6170_v28 = vld [vmem:[%s10975_s1] sm:$0x88] }
 0xd10   : > { %5256 = vrot.lane.b32.xlu1 %v8080_v40, %s8562_s22  ;;  %v5536_v1 = vmul.bf16 %v5531_v57, %v10250_v2  ;;  %v5582_v44 = vsel %vm458_vm10, %v5579_v36, %v5581_v61  ;;  %v5588_v33 = vmul.bf16 %v5581_v61, %v10247_v22  ;;  %v5586_v48 = vmul.bf16 %v5579_v36, %v10247_v22  ;;  %v5800_v22 = vld [vmem:[%s10975_s1] sm:$0x11] }
 0xd11   : > { %v8104_v46 = vcombine.low %v5537_v10, %v5537_v10  ;;  %v5587_v9 = vmul.bf16 %v5582_v44, %v10250_v2  ;;  %v5868_v2 = vld [vmem:[%s10975_s1] sm:$0x22]  ;;  %v8123_v5 = vcombine.low %v5734_v39, %v5734_v39  ;;  %v8124_v24 = vcombine.high %v5734_v39, %v5734_v39 }
 0xd12   : > { %v8103_v45 = vcombine.low %v5535_v27, %v5536_v1  ;;  %v8108_v16 = vcombine.low %v5588_v33, %v5588_v33  ;;  %v8129_v41 = vcombine.low %v5800_v22, %v5800_v22  ;;  %v8130_v26 = vcombine.high %v5800_v22, %v5800_v22 }
 0xd13   : > { %5258 = vrot.lane.b32.xlu0 %v8081_v25, %s8562_s22  ;;  %v8107_v11 = vcombine.low %v5586_v48, %v5587_v9  ;;  %v8135_v35 = vcombine.low %v5868_v2, %v5868_v2  ;;  %v8136_v58 = vcombine.high %v5868_v2, %v5868_v2  ;;  %v8141_v49 = vcombine.low %v5934_v47, %v5934_v47  ;;  %v6238_v9 = vld [vmem:[%s10975_s1 + $0x8] sm:$0x11] }
 0xd14   : > { %5307 = vrot.lane.b32.xlu1 %v8084_v21, %s8561_s21  ;;  %v8142_v17 = vcombine.high %v5934_v47, %v5934_v47  ;;  %v5741_v18 = vpack.i.b16 %v8123_v5, %v8123_v5  ;;  %v5748_v40 = vpack.i.b16 %v8124_v24, %v8124_v24  ;;  %v5807_v31 = vshrl.u32 %v8129_v41, 16 }
 0xd15   : > { %v5815_v15 = vshrl.u32 %v8130_v26, 16  ;;  %v5941_v25 = vshrl.u32 %v8141_v49, 16  ;;  %v5875_v59 = vpack.i.b16 %v8135_v35, %v8135_v35  ;;  %v5882_v6 = vpack.i.b16 %v8136_v58, %v8136_v58 }
 0xd16   : > { %v5746_v30 = vrot.slane %v5741_v18, %v8628_v12  ;;  %v5753_v51 = vrot.slane %v5748_v40, %v8628_v12  ;;  %v5808_v63 = vpack.i.b16 %v5807_v31, %v5807_v31  ;;  %v5949_v56 = vshrl.u32 %v8142_v17, 16 }
 0xd17   : > { %5309 = vrot.lane.b32.xlu0 %v8085_v54, %s8561_s21  ;;  %v5816_v21 = vpack.i.b16 %v5815_v15, %v5815_v15  ;;  %v8151_v52 = vcombine.low %v6036_v50, %v6036_v50  ;;  %v8152_v19 = vcombine.high %v6036_v50, %v6036_v50  ;;  %v5942_v8 = vpack.i.b16 %v5941_v25, %v5941_v25 }
 0xd18   : > { %5360 = vrot.lane.b32.xlu1 %v8088_v0, %s8563_s23  ;;  %v5813_v54 = vrot.slane %v5808_v63, %v8628_v12  ;;  %v5950_v29 = vpack.i.b16 %v5949_v56, %v5949_v56  ;;  %v5880_v0 = vrot.slane %v5875_v59, %v8676_v3  ;;  %v5887_v34 = vrot.slane %v5882_v6, %v8676_v3 }
 0xd19   : > { %v5821_v42 = vrot.slane %v5816_v21, %v8628_v12  ;;  %v6043_v37 = vshrl.u32 %v8151_v52, 16  ;;  %v5947_v7 = vrot.slane %v5942_v8, %v8676_v3  ;;  %v8163_v36 = vcombine.low %v6170_v28, %v6170_v28 }
 0xd1a   : > { %v8164_v27 = vcombine.high %v6170_v28, %v6170_v28 }
 0xd1b   : > { %5362 = vrot.lane.b32.xlu0 %v8089_v38, %s8563_s23  ;;  %v6051_v38 = vshrl.u32 %v8152_v19, 16  ;;  %v6044_v61 = vpack.i.b16 %v6043_v37, %v6043_v37 }
 0xd1c   : > { %5442 = vrot.lane.b32.xlu1 %v8095_v13, %s8560_s20  ;;  %v6104_v13 = vld [vmem:[%s10975_s1] sm:$0x88]  ;;  %v6185_v48 = vshrl.u32 %v8164_v27, 16 }
 0xd1d   : > { %v8157_v57 = vcombine.low %v6104_v13, %v6104_v13  ;;  %v8158_v10 = vcombine.high %v6104_v13, %v6104_v13  ;;  %v6049_v44 = vrot.slane %v6044_v61, %v8702_v32 }
 0xd1e   : > { %v6186_v2 = vpack.i.b16 %v6185_v48, %v6185_v48 }
 0xd1f   : > { %5495 = vrot.lane.b32.xlu0 %v8100_v62, %s8559_s17  ;;  %v5955_v62 = vrot.slane %v5950_v29, %v8676_v3  ;;  %v6111_v1 = vpack.i.b16 %v8157_v57, %v8157_v57 }
 0xd20   : > { %5493 = vrot.lane.b32.xlu1 %v8099_v53, %s8559_s17  ;;  %v6052_v53 = vpack.i.b16 %v6051_v38, %v6051_v38  ;;  %v6191_v41 = vrot.slane %v6186_v2, %v8690_v20 }
 0xd22   : > { %v6057_v33 = vrot.slane %v6052_v53, %v8702_v32 }
 0xd23   : > { %5548 = vrot.lane.b32.xlu0 %v8104_v46, %s8557_s30  ;;  %v6118_v46 = vpack.i.b16 %v8158_v10, %v8158_v10 }
 0xd24   : > { %5546 = vrot.lane.b32.xlu1 %v8103_v45, %s8557_s30  ;;  %v6177_v45 = vshrl.u32 %v8163_v36, 16 }
 0xd25   : > { %v6123_v39 = vrot.slane %v6118_v46, %v8690_v20 }
 0xd26   : > { %v6178_v22 = vpack.i.b16 %v6177_v45, %v6177_v45 }
 0xd27   : > { %5599 = vrot.lane.b32.xlu0 %v8108_v16, %s8556_s29  ;;  %v6116_v16 = vrot.slane %v6111_v1, %v8690_v20 }
 0xd28   : > { %5597 = vrot.lane.b32.xlu1 %v8107_v11, %s8556_s29  ;;  %v8169_v11 = vcombine.low %v6238_v9, %v6238_v9  ;;  %v6183_v24 = vrot.slane %v6178_v22, %v8690_v20 }
 0xd2a   : > { %v6245_v5 = vpack.i.b16 %v8169_v11, %v8169_v11 }
 0xd2b   : > { %5756 = vrot.lane.b32.xlu0 %v5746_v30, %s8556_s29 }
 0xd2c   : > { %5622 = vperm.xlu1 %8333, %v8110_v14   ;;  %v8170_v14 = vcombine.high %v6238_v9, %v6238_v9  ;;  %v6250_v47 = vrot.slane %v6245_v5, %v8628_v12 }
 0xd2e   : > { %v6252_v26 = vpack.i.b16 %v8170_v14, %v8170_v14 }
 0xd2f   : > { %5824 = vrot.lane.b32.xlu0 %v5813_v54, %s8557_s30 }
 0xd30   : > { %5758 = vrot.lane.b32.xlu1 %v5753_v51, %s8556_s29  ;;  %v6257_v35 = vrot.slane %v6252_v26, %v8628_v12 }
 0xd33   : > { %5890 = vrot.lane.b32.xlu0 %v5880_v0, %s8559_s17 }
 0xd34   : > { %5826 = vrot.lane.b32.xlu1 %v5821_v42, %s8557_s30 }
 0xd37   : > { %5958 = vrot.lane.b32.xlu0 %v5947_v7, %s8560_s20 }
 0xd38   : > { %5892 = vrot.lane.b32.xlu1 %v5887_v34, %s8559_s17 }
 0xd3b   : > { %6060 = vrot.lane.b32.xlu0 %v6049_v44, %s8563_s23 }
 0xd3c   : > { %5960 = vrot.lane.b32.xlu1 %v5955_v62, %s8560_s20 }
 0xd3f   : > { %6126 = vrot.lane.b32.xlu0 %v6116_v16, %s8561_s21 }
 0xd40   : > { %6062 = vrot.lane.b32.xlu1 %v6057_v33, %s8563_s23 }
 0xd43   : > { %6194 = vrot.lane.b32.xlu0 %v6183_v24, %s8562_s22 }
 0xd44   : > { %6128 = vrot.lane.b32.xlu1 %v6123_v39, %s8561_s21 }
 0xd47   : > { %6260 = vrot.lane.b32.xlu0 %v6250_v47, %s8564_s24 }
 0xd48   : > { %6196 = vrot.lane.b32.xlu1 %v6191_v41, %s8562_s22 }
 0xd4c   : > { %6262 = vrot.lane.b32.xlu1 %v6257_v35, %s8564_s24 }
 0xd7d   : > { %v5445_v58 = vpop.permute.xlu0 %5444 }
 0xd7e   : > { %v5204_v49 = vpop.permute.xlu1 %5203  ;;  %v5447_v13 = vrot.slane %v5445_v58, 4 }
 0xd7f   : > { %v5207_v40 = vrot.slane %v5204_v49, 4 }
 0xd81   : > { %v5206_v17 = vpop.permute.xlu0 %5205 }
 0xd82   : > { %v5208_v18 = vrot.slane %v5206_v17, 4  ;;  %v5257_v31 = vpop.permute.xlu1 %5256  ;;  %v8109_v17 = vld [vmem:[%s10976_s2 + $0x48] sm:$0xf] }
 0xd83   : > { %v5260_v50 = vrot.slane %v5257_v31, 4 }
 0xd84   : > { %v5209_v25 = vsel %vm456_vm11, %v5207_v40, %v5208_v18 }
 0xd85   : > { %v5259_v15 = vpop.permute.xlu0 %5258  ;;  %v5210_v59 = vsel %vm458_vm10, %v5204_v49, %v5209_v25 }
 0xd86   : > { %v5261_v30 = vrot.slane %v5259_v15, 4  ;;  %v5308_v63 = vpop.permute.xlu1 %5307 }
 0xd87   : > { %v5311_v52 = vrot.slane %v5308_v63, 4 }
 0xd88   : > { %v5262_v51 = vsel %vm456_vm11, %v5260_v50, %v5261_v30 }
 0xd89   : > { %v5310_v21 = vpop.permute.xlu0 %5309  ;;  %v5263_v6 = vsel %vm513_vm9, %v5257_v31, %v5262_v51 }
 0xd8a   : > { %v5312_v56 = vrot.slane %v5310_v21, 4  ;;  %v8111_v54 = vcombine.low %v5210_v59, %v5263_v6  ;;  %v8112_v42 = vcombine.high %v5210_v59, %v5263_v6  ;;  %v5361_v19 = vpop.permute.xlu1 %5360 }
 0xd8b   : > { %v5364_v0 = vrot.slane %v5361_v19, 4 }
 0xd8c   : > { %5679 = vmatprep.subr.bf16.mxu1 %v8112_v42  ;;  %v5313_v29 = vsel %vm456_vm11, %v5311_v52, %v5312_v56 }
 0xd8d   : > { %5680 = vmatpush1.bf16.msra.mxu1 %v8111_v54  ;;  %v5363_v8 = vpop.permute.xlu0 %5362  ;;  %v5314_v62 = vsel %vm566_vm8, %v5308_v63, %v5313_v29 }
 0xd8e   : > { %v5365_v34 = vrot.slane %v5363_v8, 4  ;;  %v5443_v38 = vpop.permute.xlu1 %5442 }
 0xd8f   : > { %v5446_v28 = vrot.slane %v5443_v38, 4 }
 0xd90   : > { %v5366_v37 = vsel %vm456_vm11, %v5364_v0, %v5365_v34 }
 0xd91   : > { %v5496_v7 = vpop.permute.xlu0 %5495  ;;  %v5367_v57 = vsel %vm621_vm7, %v5361_v19, %v5366_v37  ;;  %v5448_v61 = vsel %vm456_vm11, %v5446_v28, %v5447_v13 }
 0xd92   : > { %v8113_v10 = vcombine.low %v5314_v62, %v5367_v57  ;;  %v8114_v36 = vcombine.high %v5314_v62, %v5367_v57  ;;  %v5449_v53 = vsel %vm598_vm6, %v5443_v38, %v5448_v61  ;;  %v5494_v27 = vpop.permute.xlu1 %5493  ;;  %v5498_v1 = vrot.slane %v5496_v7, 4 }
 0xd93   : > { %v5497_v46 = vrot.slane %v5494_v27, 4  ;;  %v8116_v33 = vcombine.high %v10274_v60, %v5449_v53  ;;  %v8311_v45 = vcombine.low %v10267_v43, %v5449_v53 }
 0xd94   : > { %5681 = vmatprep.subr.bf16.mxu1 %v8114_v36 }
 0xd95   : > { %5682 = vmatpush1.bf16.msra.mxu1 %v8113_v10  ;;  %v5549_v44 = vpop.permute.xlu0 %5548  ;;  %v5499_v16 = vsel %vm456_vm11, %v5497_v46, %v5498_v1 }
 0xd96   : > { %v5551_v48 = vrot.slane %v5549_v44, 4  ;;  %5683 = vmatprep.subr.bf16.mxu1 %v8116_v33  ;;  %v5547_v9 = vpop.permute.xlu1 %5546  ;;  %v5500_v2 = vsel %vm543_vm5, %v5494_v27, %v5499_v16 }
 0xd97   : > { %v5550_v11 = vrot.slane %v5547_v9, 4 }
 0xd99   : > { %5684 = vmatpush1.bf16.msra.mxu1 %v8311_v45  ;;  %v5600_v14 = vpop.permute.xlu0 %5599  ;;  %v5552_v39 = vsel %vm456_vm11, %v5550_v11, %v5551_v48 }
 0xd9a   : > { %v5602_v22 = vrot.slane %v5600_v14, 4  ;;  %v5553_v5 = vsel %vm490_vm4, %v5547_v9, %v5552_v39  ;;  %v5598_v24 = vpop.permute.xlu1 %5597 }
 0xd9b   : > { %v8117_v41 = vcombine.low %v5500_v2, %v5553_v5  ;;  %v5601_v60 = vrot.slane %v5598_v24, 4  ;;  %v8118_v26 = vcombine.high %v5500_v2, %v5553_v5 }
 0xd9d   : > { %v5603_v43 = vsel %vm456_vm11, %v5601_v60, %v5602_v22  ;;  %5685 = vmatprep.subr.bf16.mxu1 %v8118_v26  ;;  %v5757_v38 = vpop.permute.xlu0 %5756 }
 0xd9e   : > { %v5604_v47 = vsel %vm434_vm3, %v5598_v24, %v5603_v43  ;;  %5686 = vmatpush1.bf16.msra.mxu1 %v8117_v41 }
 0xd9f   : > { %v8119_v35 = vcombine.low %v5604_v47, %v5604_v47  ;;  %v8120_v58 = vcombine.high %v5604_v47, %v5604_v47 }
 0xda1   : > { %8121 = vmatprep.subr.msk.bf16.mxu1 %vm456_vm11, %v8120_v58  ;;  %v5674_v49 = vsel %vm456_vm11, %v8119_v35, 0  ;;  %v5825_v61 = vpop.permute.xlu0 %5824 }
 0xda2   : > { %5688 = vmatpush1.bf16.msra.mxu1 %v5674_v49 }
 0xda5   : > { %8122 = vmatmul.mubr.msk.bf16.vlgmr.msra.gmra.mrb[24].mxu1 %vm925_vm12, %v8109_v17  ;;  %v5891_v9 = vpop.permute.xlu0 %5890 }
 0xda9   : > { %v5959_v41 = vpop.permute.xlu0 %5958 }
 0xdab   : > { %v5623_v18 = vpop.permute.xlu1 %5622 }
 0xdad   : > { %v6061_v17 = vpop.permute.xlu0 %6060 }
 0xdaf   : > { %v5759_v40 = vpop.permute.xlu1 %5758 }
 0xdb0   : > { %v5760_v13 = vsel %vm434_vm3, %v5757_v38, %v5759_v40 }
 0xdb3   : > { %v5827_v31 = vpop.permute.xlu1 %5826 }
 0xdb4   : > { %v5828_v1 = vsel %vm490_vm4, %v5825_v61, %v5827_v31 }
 0xdb7   : > { %v5893_v59 = vpop.permute.xlu1 %5892 }
 0xdb8   : > { %v5894_v14 = vsel %vm543_vm5, %v5891_v9, %v5893_v59 }
 0xdbb   : > { %v5961_v19 = vpop.permute.xlu1 %5960 }
 0xdbc   : > { %v5962_v43 = vsel %vm598_vm6, %v5959_v41, %v5961_v19 }
 0xdbf   : > { %v6063_v29 = vpop.permute.xlu1 %6062 }
 0xdc3   : > { %v6129_v28 = vpop.permute.xlu1 %6128 }
 0xe78   : > { %v5713_v15 = vpop.f32.mrb[24].mxu1 }
 0xe79   : > { %v5714_v25 = vadd.f32 %v5713_v15, %v5623_v18  ;;  %v5715_v50 = vpop.f32.mrb[25].mxu1 }
 0xe7a   : > { %v5716_v30 = vadd.f32 %v5715_v50, %v5623_v18  ;;  %v5717_v51 = vpop.f32.mrb[26].mxu1 }
 0xe7b   : > { %v5720_v63 = vmax.f32 %v5714_v25, 0.0  ;;  %v5718_v21 = vpop.f32.mrb[27].mxu1 }
 0xe7c   : > { %v5721_v6 = vmax.f32 %v5716_v30, 0.0  ;;  %v6127_v21 = vpop.permute.xlu0 %6126 }
 0xe7d   : > { %v5722_v56 = vpack.c.bf16 %v5720_v63, %v5720_v63 }
 0xe7e   : > { %v5723_v54 = vpack.c.bf16 %v5721_v6, %v5721_v6 }
 0xe7f   : > { %v5726_v42 = vrot.slane %v5722_v56, 4 }
 0xe80   : > { %v5727_v52 = vrot.slane %v5723_v54, 4 }
 0xe81   : > { %5730 = vst [vmem:[#allocation3] sm:$0xf0] %v5726_v42 }
 0xe82   : > { %5731 = vst [vmem:[#allocation3 + $0x8] sm:$0xf0] %v5727_v52  ;;  %v6197_v52 = vpop.permute.xlu1 %6196 }
 0xe88   : > { %v10391_v8 = vld [vmem:[#allocation3] sm:$0xff] }
 0xe89   : > { %v6070_v0 = vmul.bf16 %v6063_v29, %v10391_v8  ;;  %v10394_v37 = vld [vmem:[#allocation3 + $0x8] sm:$0xff]  ;;  %v10400_v57 = vmul.bf16 %v6129_v28, %v10391_v8  ;;  %v5765_v10 = vmul.bf16 %v5760_v13, %v10391_v8  ;;  %v5833_v33 = vmul.bf16 %v5828_v1, %v10391_v8 }
 0xe8a   : > { %v5764_v7 = vmul.bf16 %v5757_v38, %v10394_v37  ;;  %v5766_v27 = vmul.bf16 %v5759_v40, %v10394_v37  ;;  %v5832_v44 = vmul.bf16 %v5825_v61, %v10394_v37  ;;  %v5834_v11 = vmul.bf16 %v5827_v31, %v10394_v37 }
 0xe8b   : > { %v8154_v34 = vcombine.low %v6070_v0, %v6070_v0  ;;  %v8156_v62 = vcombine.high %v6070_v0, %v6070_v0  ;;  %v8160_v53 = vcombine.low %v10400_v57, %v10400_v57  ;;  %v5898_v22 = vmul.bf16 %v5891_v9, %v10394_v37 }
 0xe8c   : > { %v8125_v36 = vcombine.low %v5764_v7, %v5765_v10  ;;  %v8127_v46 = vcombine.high %v5764_v7, %v5765_v10  ;;  %v8126_v45 = vcombine.low %v5766_v27, %v5766_v27  ;;  %v8131_v48 = vcombine.low %v5832_v44, %v5833_v33 }
 0xe8d   : > { %6086 = vrot.lane.b32.xlu1 %v8154_v34, %s8560_s20  ;;  %v8128_v16 = vcombine.high %v5766_v27, %v5766_v27  ;;  %v8133_v39 = vcombine.high %v5832_v44, %v5833_v33  ;;  %v5899_v2 = vmul.bf16 %v5894_v14, %v10391_v8  ;;  %v8132_v5 = vcombine.low %v5834_v11, %v5834_v11  ;;  %v6195_v34 = vpop.permute.xlu0 %6194 }
 0xe8e   : > { %5780 = vrot.lane.b32.xlu0 %v8125_v36, %s8564_s24  ;;  %v8134_v60 = vcombine.high %v5834_v11, %v5834_v11  ;;  %v5900_v26 = vmul.bf16 %v5893_v59, %v10394_v37  ;;  %v5967_v47 = vmul.bf16 %v5962_v43, %v10391_v8  ;;  %v5966_v58 = vmul.bf16 %v5959_v41, %v10394_v37  ;;  %v6568_v36 = vld [vmem:[%s10975_s1] sm:$0x11]  ;;  %v6876_v43 = vld [vmem:[%s10975_s1] sm:$0x44] }
 0xe8f   : > { %v8137_v24 = vcombine.low %v5898_v22, %v5899_v2  ;;  %v8139_v35 = vcombine.high %v5898_v22, %v5899_v2  ;;  %v6064_v40 = vsel %vm621_vm7, %v6061_v17, %v6063_v29  ;;  %v5968_v15 = vmul.bf16 %v5961_v19, %v10394_v37  ;;  %v6744_v22 = vld [vmem:[%s10975_s1] sm:$0x22] }
 0xe90   : > { %v8138_v49 = vcombine.low %v5900_v26, %v5900_v26  ;;  %v8143_v18 = vcombine.low %v5966_v58, %v5967_v47  ;;  %v8140_v31 = vcombine.high %v5900_v26, %v5900_v26  ;;  %v6068_v25 = vmul.bf16 %v6061_v17, %v10391_v8 }
 0xe91   : > { %6090 = vrot.lane.b32.xlu1 %v8156_v62, %s8560_s20  ;;  %v6069_v50 = vmul.bf16 %v6064_v40, %v10394_v37  ;;  %v8145_v30 = vcombine.high %v5966_v58, %v5967_v47  ;;  %v8144_v51 = vcombine.low %v5968_v15, %v5968_v15  ;;  %v6130_v59 = vsel %vm566_vm8, %v6127_v21, %v6129_v28  ;;  %v6263_v28 = vpop.permute.xlu1 %6262  ;;  %v6261_v27 = vpop.permute.xlu0 %6260  ;;  %v10482_v47 = vld [vmem:[%s10976_s2 + $0x50] sm:$0xff] }
 0xe92   : > { %5784 = vrot.lane.b32.xlu0 %v8127_v46, %s8564_s24  ;;  %v8146_v6 = vcombine.high %v5968_v15, %v5968_v15  ;;  %v6134_v54 = vmul.bf16 %v6127_v21, %v10391_v8  ;;  %v6135_v42 = vmul.bf16 %v6130_v59, %v10394_v37  ;;  %v8162_v19 = vcombine.high %v10400_v57, %v10400_v57  ;;  %v6481_v57 = vld [vmem:[%s10975_s1] sm:$0x11]  ;;  %v6965_v59 = vld [vmem:[%s10975_s1] sm:$0x88] }
 0xe93   : > { %v8153_v63 = vcombine.low %v6068_v25, %v6069_v50  ;;  %v8155_v56 = vcombine.high %v6068_v25, %v6069_v50  ;;  %v6204_v29 = vmul.bf16 %v6197_v52, %v10391_v8  ;;  %v6198_v38 = vsel %vm513_vm9, %v6195_v34, %v6197_v52 }
 0xe94   : > { %v8159_v0 = vcombine.low %v6134_v54, %v6135_v42  ;;  %v8161_v7 = vcombine.high %v6134_v54, %v6135_v42  ;;  %v6202_v62 = vmul.bf16 %v6195_v34, %v10391_v8  ;;  %v6203_v10 = vmul.bf16 %v6198_v38, %v10394_v37 }
 0xe95   : > { %6152 = vrot.lane.b32.xlu1 %v8160_v53, %s8559_s17  ;;  %v8166_v13 = vcombine.low %v6204_v29, %v6204_v29  ;;  %v8168_v61 = vcombine.high %v6204_v29, %v6204_v29  ;;  %v6270_v53 = vmul.bf16 %v6263_v28, %v10391_v8  ;;  %v8198_v1 = vcombine.low %v6481_v57, %v6481_v57 }
 0xe96   : > { %5848 = vrot.lane.b32.xlu0 %v8131_v48, %s8562_s22  ;;  %v8165_v46 = vcombine.low %v6202_v62, %v6203_v10  ;;  %v8206_v44 = vcombine.low %v6568_v36, %v6568_v36  ;;  %v6264_v33 = vsel %vm458_vm10, %v6261_v27, %v6263_v28  ;;  %v8167_v9 = vcombine.high %v6202_v62, %v6203_v10 }
 0xe97   : > { %v6488_v48 = vpack.i.b16 %v8198_v1, %v8198_v1  ;;  %v6269_v11 = vmul.bf16 %v6264_v33, %v10394_v37  ;;  %v8174_v2 = vcombine.high %v6270_v53, %v6270_v53  ;;  %v8222_v26 = vcombine.low %v6744_v22, %v6744_v22 }
 0xe98   : > { %v6575_v14 = vshrl.u32 %v8206_v44, 16  ;;  %v8207_v58 = vcombine.high %v6568_v36, %v6568_v36  ;;  %v8235_v15 = vcombine.low %v6876_v43, %v6876_v43  ;;  %v8223_v52 = vcombine.high %v6744_v22, %v6744_v22  ;;  %v7141_v36 = vld [vmem:[%s10975_s1 + $0x8] sm:$0x11] }
 0xe99   : > { %5782 = vrot.lane.b32.xlu1 %v8126_v45, %s8564_s24  ;;  %v8172_v45 = vcombine.low %v6270_v53, %v6270_v53  ;;  %v6493_v41 = vrot.slane %v6488_v48, %v8628_v12  ;;  %v8259_v44 = vcombine.low %v7141_v36, %v7141_v36  ;;  %v8244_v48 = vcombine.high %v6965_v59, %v6965_v59 }
 0xe9a   : > { %5852 = vrot.lane.b32.xlu0 %v8133_v39, %s8562_s22  ;;  %v6657_v39 = vld [vmem:[%s10975_s1] sm:$0x22]  ;;  %v6583_v50 = vshrl.u32 %v8207_v58, 16  ;;  %v6883_v21 = vshrl.u32 %v8235_v15, 16  ;;  %v6759_v28 = vshrl.u32 %v8223_v52, 16 }
 0xe9b   : > { %v8215_v42 = vcombine.high %v6657_v39, %v6657_v39 }
 0xe9c   : > { %v6584_v54 = vpack.i.b16 %v6583_v50, %v6583_v50  ;;  %v6884_v29 = vpack.i.b16 %v6883_v21, %v6883_v21  ;;  %v6760_v53 = vpack.i.b16 %v6759_v28, %v6759_v28 }
 0xe9d   : > { %5786 = vrot.lane.b32.xlu1 %v8128_v16, %s8564_s24  ;;  %v6268_v16 = vmul.bf16 %v6261_v27, %v10391_v8 }
 0xe9e   : > { %5914 = vrot.lane.b32.xlu0 %v8137_v24, %s8561_s21  ;;  %v6589_v38 = vrot.slane %v6584_v54, %v8628_v12  ;;  %v6889_v62 = vrot.slane %v6884_v29, %v8702_v32  ;;  %v6765_v33 = vrot.slane %v6760_v53, %v8676_v3 }
 0xe9f   : > { %v8171_v24 = vcombine.low %v6268_v16, %v6269_v11 }
 0xea1   : > { %5850 = vrot.lane.b32.xlu1 %v8132_v5, %s8562_s22  ;;  %v8214_v5 = vcombine.low %v6657_v39, %v6657_v39  ;;  %v6979_v39 = vpack.i.b16 %v8244_v48, %v8244_v48 }
 0xea2   : > { %5918 = vrot.lane.b32.xlu0 %v8139_v35, %s8561_s21  ;;  %v8199_v35 = vcombine.high %v6481_v57, %v6481_v57 }
 0xea3   : > { %v6664_v17 = vpack.i.b16 %v8214_v5, %v8214_v5 }
 0xea4   : > { %v6495_v25 = vpack.i.b16 %v8199_v35, %v8199_v35 }
 0xea5   : > { %5854 = vrot.lane.b32.xlu1 %v8134_v60, %s8562_s22  ;;  %v6576_v60 = vpack.i.b16 %v6575_v14, %v6575_v14 }
 0xea6   : > { %5982 = vrot.lane.b32.xlu0 %v8143_v18, %s8563_s23  ;;  %v8173_v18 = vcombine.high %v6268_v16, %v6269_v11  ;;  %v7148_v11 = vpack.i.b16 %v8259_v44, %v8259_v44 }
 0xea7   : > { %v6581_v40 = vrot.slane %v6576_v60, %v8628_v12 }
 0xea9   : > { %5916 = vrot.lane.b32.xlu1 %v8138_v49, %s8561_s21  ;;  %v8178_v49 = vcombine.high %v10482_v47, %v10482_v47 }
 0xeaa   : > { %5986 = vrot.lane.b32.xlu0 %v8145_v30, %s8563_s23  ;;  %v8176_v30 = vld [vmem:[%s10977_s3 + $0x50] sm:$0xff] }
 0xeab   : > { %8197 = vmatprep.mubr.msk.bf16.mxu1 %vm513_vm9, %v8178_v49 }
 0xead   : > { %5920 = vrot.lane.b32.xlu1 %v8140_v31, %s8561_s21  ;;  %v6751_v31 = vshrl.u32 %v8222_v26, 16 }
 0xeae   : > { %6084 = vrot.lane.b32.xlu0 %v8153_v63, %s8560_s20 }
 0xeaf   : > { %v6752_v63 = vpack.i.b16 %v6751_v31, %v6751_v31 }
 0xeb1   : > { %5984 = vrot.lane.b32.xlu1 %v8144_v51, %s8563_s23  ;;  %v6669_v51 = vrot.slane %v6664_v17, %v8676_v3 }
 0xeb2   : > { %6088 = vrot.lane.b32.xlu0 %v8155_v56, %s8560_s20  ;;  %v6500_v56 = vrot.slane %v6495_v25, %v8628_v12 }
 0xeb5   : > { %5988 = vrot.lane.b32.xlu1 %v8146_v6, %s8563_s23  ;;  %v7052_v6 = vld [vmem:[%s10975_s1] sm:$0x88] }
 0xeb6   : > { %6150 = vrot.lane.b32.xlu0 %v8159_v0, %s8559_s17  ;;  %v8243_v0 = vcombine.low %v6965_v59, %v6965_v59  ;;  %v8251_v34 = vcombine.low %v7052_v6, %v7052_v6 }
 0xeb8   : > { %v6972_v10 = vpack.i.b16 %v8243_v0, %v8243_v0  ;;  %v7059_v57 = vshrl.u32 %v8251_v34, 16 }
 0xeb9   : > { %6156 = vrot.lane.b32.xlu1 %v8162_v19, %s8559_s17  ;;  %v6757_v19 = vrot.slane %v6752_v63, %v8676_v3 }
 0xeba   : > { %6154 = vrot.lane.b32.xlu0 %v8161_v7, %s8559_s17  ;;  %v8236_v7 = vcombine.high %v6876_v43, %v6876_v43  ;;  %v6977_v1 = vrot.slane %v6972_v10, %v8690_v20 }
 0xebc   : > { %v6891_v27 = vshrl.u32 %v8236_v7, 16 }
 0xebd   : > { %6220 = vrot.lane.b32.xlu1 %v8166_v13, %s8557_s30  ;;  %v6671_v13 = vpack.i.b16 %v8215_v42, %v8215_v42 }
 0xebe   : > { %6218 = vrot.lane.b32.xlu0 %v8165_v46, %s8557_s30  ;;  %v7060_v46 = vpack.i.b16 %v7059_v57, %v7059_v57 }
 0xec0   : > { %v7065_v16 = vrot.slane %v7060_v46, %v8690_v20 }
 0xec1   : > { %6224 = vrot.lane.b32.xlu1 %v8168_v61, %s8557_s30  ;;  %v6676_v61 = vrot.slane %v6671_v13, %v8676_v3  ;;  %v6984_v3 = vrot.slane %v6979_v39, %v8690_v20 }
 0xec2   : > { %6222 = vrot.lane.b32.xlu0 %v8167_v9, %s8557_s30  ;;  %v8252_v9 = vcombine.high %v7052_v6, %v7052_v6 }
 0xec4   : > { %v7067_v22 = vshrl.u32 %v8252_v9, 16 }
 0xec5   : > { %6286 = vrot.lane.b32.xlu1 %v8172_v45, %s8556_s29  ;;  %v6892_v45 = vpack.i.b16 %v6891_v27, %v6891_v27  ;;  %v6002_v27 = vld [vmem:[%s10975_s1] sm:$0x44] }
 0xec6   : > { %6284 = vrot.lane.b32.xlu0 %v8171_v24, %s8556_s29  ;;  %v7068_v5 = vpack.i.b16 %v7067_v22, %v7067_v22  ;;  %v8260_v24 = vcombine.high %v7141_v36, %v7141_v36  ;;  %v8148_v48 = vcombine.high %v6002_v27, %v6002_v27 }
 0xec7   : > { %v6897_v14 = vrot.slane %v6892_v45, %v8702_v32 }
 0xec8   : > { %v7155_v60 = vpack.i.b16 %v8260_v24, %v8260_v24  ;;  %v6016_v24 = vpack.i.b16 %v8148_v48, %v8148_v48 }
 0xec9   : > { %6290 = vrot.lane.b32.xlu1 %v8174_v2, %s8556_s29  ;;  %v7153_v2 = vrot.slane %v7148_v11, %v8628_v12 }
 0xeca   : > { %6288 = vrot.lane.b32.xlu0 %v8173_v18, %s8556_s29  ;;  %v7160_v26 = vrot.slane %v7155_v60, %v8628_v12 }
 0xecd   : > { %6503 = vrot.lane.b32.xlu1 %v6493_v41, %s8556_s29  ;;  %v7073_v41 = vrot.slane %v7068_v5, %v8690_v20  ;;  %v8147_v5 = vcombine.low %v6002_v27, %v6002_v27 }
 0xece   : > { %6328 = vperm.xlu0 %8332, %v8176_v30  }
 0xed1   : > { %6592 = vrot.lane.b32.xlu1 %v6581_v40, %s8557_s30 }
 0xed2   : > { %6505 = vrot.lane.b32.xlu0 %v6500_v56, %s8556_s29 }
 0xed5   : > { %6679 = vrot.lane.b32.xlu1 %v6669_v51, %s8559_s17 }
 0xed6   : > { %6594 = vrot.lane.b32.xlu0 %v6589_v38, %s8557_s30 }
 0xed9   : > { %6768 = vrot.lane.b32.xlu1 %v6757_v19, %s8560_s20 }
 0xeda   : > { %6681 = vrot.lane.b32.xlu0 %v6676_v61, %s8559_s17 }
 0xedd   : > { %6900 = vrot.lane.b32.xlu1 %v6889_v62, %s8563_s23 }
 0xede   : > { %6770 = vrot.lane.b32.xlu0 %v6765_v33, %s8560_s20 }
 0xee1   : > { %6987 = vrot.lane.b32.xlu1 %v6977_v1, %s8561_s21 }
 0xee2   : > { %6902 = vrot.lane.b32.xlu0 %v6897_v14, %s8563_s23 }
 0xee5   : > { %7076 = vrot.lane.b32.xlu1 %v7065_v16, %s8562_s22 }
 0xee6   : > { %6989 = vrot.lane.b32.xlu0 %v6984_v3, %s8561_s21 }
 0xee9   : > { %7163 = vrot.lane.b32.xlu1 %v7153_v2, %s8564_s24 }
 0xeea   : > { %7078 = vrot.lane.b32.xlu0 %v7073_v41, %s8562_s22 }
 0xeee   : > { %7165 = vrot.lane.b32.xlu0 %v7160_v26, %s8564_s24 }
 0xeff   : > { %v10532_v43 = vpop.permute.xlu1 %6086 }
 0xf00   : > { %v5781_v58 = vpop.permute.xlu0 %5780 }
 0xf01   : > { %v5788_v15 = vrot.slane %v5781_v58, 4 }
 0xf03   : > { %v10534_v35 = vpop.permute.xlu1 %6090 }
 0xf04   : > { %v5785_v17 = vpop.permute.xlu0 %5784 }
 0xf05   : > { %v5790_v25 = vrot.slane %v5785_v17, 4 }
 0xf07   : > { %v10536_v49 = vpop.permute.xlu1 %6152 }
 0xf08   : > { %v5849_v31 = vpop.permute.xlu0 %5848 }
 0xf09   : > { %v5856_v52 = vrot.slane %v5849_v31, 4 }
 0xf0b   : > { %v5783_v18 = vpop.permute.xlu1 %5782 }
 0xf0c   : > { %v5789_v40 = vrot.slane %v5783_v18, 4  ;;  %v5853_v12 = vpop.permute.xlu0 %5852 }
 0xf0d   : > { %v5858_v29 = vrot.slane %v5853_v12, 4 }
 0xf0e   : > { %v5792_v50 = vsel %vm456_vm11, %v5788_v15, %v5789_v40  ;;  %v6009_v40 = vpack.i.b16 %v8147_v5, %v8147_v5  ;;  %v6095_v15 = vrot.slane %v10534_v35, 4 }
 0xf0f   : > { %v5787_v20 = vpop.permute.xlu1 %5786  ;;  %v5793_v21 = vsel %vm458_vm10, %v5781_v58, %v5792_v50 }
 0xf10   : > { %v5791_v30 = vrot.slane %v5787_v20, 4  ;;  %v5915_v42 = vpop.permute.xlu0 %5914 }
 0xf11   : > { %v5922_v53 = vrot.slane %v5915_v42, 4 }
 0xf12   : > { %v5794_v51 = vsel %vm456_vm11, %v5790_v25, %v5791_v30 }
 0xf13   : > { %v5851_v63 = vpop.permute.xlu1 %5850  ;;  %v5795_v59 = vsel %vm458_vm10, %v5785_v17, %v5794_v51 }
 0xf14   : > { %v5857_v6 = vrot.slane %v5851_v63, 4  ;;  %v8179_v56 = vcombine.low %v5793_v21, %v5795_v59  ;;  %v8180_v54 = vcombine.high %v5793_v21, %v5795_v59  ;;  %v5919_v38 = vpop.permute.xlu0 %5918  ;;  %v6093_v63 = vrot.slane %v10532_v43, 4 }
 0xf15   : > { %v5924_v46 = vrot.slane %v5919_v38, 4 }
 0xf16   : > { %6430 = vmatprep.subr.bf16.mxu1 %v8180_v54  ;;  %v5860_v0 = vsel %vm456_vm11, %v5856_v52, %v5857_v6  ;;  %v6014_v54 = vrot.slane %v6009_v40, %v8702_v32 }
 0xf17   : > { %v5855_v19 = vpop.permute.xlu1 %5854  ;;  %6431 = vmatpush1.bf16.msra.mxu1 %v8179_v56  ;;  %v5861_v7 = vsel %vm513_vm9, %v5849_v31, %v5860_v0  ;;  %v6021_v31 = vrot.slane %v6016_v24, %v8702_v32  ;;  %v6159_v0 = vrot.slane %v10536_v49, 4 }
 0xf18   : > { %v5859_v34 = vrot.slane %v5855_v19, 4  ;;  %v5983_v61 = vpop.permute.xlu0 %5982 }
 0xf19   : > { %v5990_v41 = vrot.slane %v5983_v61, 4  ;;  %v6023_v52 = vmul.bf16 %v6021_v31, %v10394_v37 }
 0xf1a   : > { %v5862_v13 = vsel %vm456_vm11, %v5858_v29, %v5859_v34 }
 0xf1b   : > { %v5917_v28 = vpop.permute.xlu1 %5916  ;;  %v5863_v62 = vsel %vm513_vm9, %v5853_v12, %v5862_v13  ;;  %v6022_v13 = vmul.bf16 %v6014_v54, %v10391_v8 }
 0xf1c   : > { %v5923_v10 = vrot.slane %v5917_v28, 4  ;;  %v8181_v57 = vcombine.low %v5861_v7, %v5863_v62  ;;  %v8182_v36 = vcombine.high %v5861_v7, %v5863_v62  ;;  %v5987_v45 = vpop.permute.xlu0 %5986 }
 0xf1d   : > { %v5992_v26 = vrot.slane %v5987_v45, 4 }
 0xf1e   : > { %6432 = vmatprep.subr.bf16.mxu1 %v8182_v36  ;;  %v5926_v44 = vsel %vm456_vm11, %v5922_v53, %v5923_v10 }
 0xf1f   : > { %v5921_v1 = vpop.permute.xlu1 %5920  ;;  %6433 = vmatpush1.bf16.msra.mxu1 %v8181_v57  ;;  %v5927_v11 = vsel %vm566_vm8, %v5915_v42, %v5926_v44 }
 0xf20   : > { %v5925_v33 = vrot.slane %v5921_v1, 4  ;;  %v6085_v3 = vpop.permute.xlu0 %6084 }
 0xf21   : > { %v6092_v20 = vrot.slane %v6085_v3, 4 }
 0xf22   : > { %v5928_v9 = vsel %vm456_vm11, %v5924_v46, %v5925_v33 }
 0xf23   : > { %v5985_v16 = vpop.permute.xlu1 %5984  ;;  %v5929_v14 = vsel %vm566_vm8, %v5919_v38, %v5928_v9  ;;  %v6096_v35 = vsel %vm456_vm11, %v6092_v20, %v6093_v63 }
 0xf24   : > { %v5991_v39 = vrot.slane %v5985_v16, 4  ;;  %v8183_v22 = vcombine.low %v5927_v11, %v5929_v14  ;;  %v8184_v2 = vcombine.high %v5927_v11, %v5929_v14  ;;  %v6089_v18 = vpop.permute.xlu0 %6088  ;;  %v6097_v34 = vsel %vm598_vm6, %v6085_v3, %v6096_v35 }
 0xf25   : > { %v6094_v25 = vrot.slane %v6089_v18, 4 }
 0xf26   : > { %6434 = vmatprep.subr.bf16.mxu1 %v8184_v2  ;;  %v5994_v58 = vsel %vm456_vm11, %v5990_v41, %v5991_v39 }
 0xf27   : > { %v5989_v60 = vpop.permute.xlu1 %5988  ;;  %6435 = vmatpush1.bf16.msra.mxu1 %v8183_v22  ;;  %v5995_v12 = vsel %vm621_vm7, %v5983_v61, %v5994_v58  ;;  %v6098_v21 = vsel %vm456_vm11, %v6094_v25, %v6095_v15  ;;  %v8177_v25 = vcombine.low %v10482_v47, %v10482_v47 }
 0xf28   : > { %v5993_v17 = vrot.slane %v5989_v60, 4  ;;  %v6151_v56 = vpop.permute.xlu0 %6150  ;;  %v6099_v19 = vsel %vm598_vm6, %v6089_v18, %v6098_v21 }
 0xf29   : > { %v6158_v42 = vrot.slane %v6151_v56, 4  ;;  %v8190_v28 = vcombine.high %v6097_v34, %v6099_v19  ;;  %v8189_v36 = vcombine.low %v6097_v34, %v6099_v19 }
 0xf2a   : > { %v5996_v50 = vsel %vm456_vm11, %v5992_v26, %v5993_v17 }
 0xf2b   : > { %v6157_v30 = vpop.permute.xlu1 %6156  ;;  %v5997_v51 = vsel %vm621_vm7, %v5987_v45, %v5996_v50  ;;  %v6162_v7 = vsel %vm456_vm11, %v6158_v42, %v6159_v0 }
 0xf2c   : > { %v8185_v59 = vcombine.low %v5995_v12, %v5997_v51  ;;  %v8186_v6 = vcombine.high %v5995_v12, %v5997_v51  ;;  %v6161_v43 = vrot.slane %v6157_v30, 4  ;;  %v6155_v38 = vpop.permute.xlu0 %6154  ;;  %v6163_v61 = vsel %vm543_vm5, %v6151_v56, %v6162_v7 }
 0xf2d   : > { %v6160_v62 = vrot.slane %v6155_v38, 4 }
 0xf2e   : > { %6436 = vmatprep.subr.bf16.mxu1 %v8186_v6 }
 0xf2f   : > { %v6221_v29 = vpop.permute.xlu1 %6220  ;;  %6437 = vmatpush1.bf16.msra.mxu1 %v8185_v59  ;;  %v6164_v57 = vsel %vm456_vm11, %v6160_v62, %v6161_v43 }
 0xf30   : > { %6438 = vmatprep.subr.bf16.mxu1 %v6023_v52  ;;  %v6165_v49 = vsel %vm543_vm5, %v6155_v38, %v6164_v57  ;;  %v6219_v53 = vpop.permute.xlu0 %6218  ;;  %v6227_v1 = vrot.slane %v6221_v29, 4 }
 0xf31   : > { %v8192_v27 = vcombine.high %v6163_v61, %v6165_v49  ;;  %v6226_v46 = vrot.slane %v6219_v53, 4  ;;  %v8191_v45 = vcombine.low %v6163_v61, %v6165_v49 }
 0xf33   : > { %v6225_v10 = vpop.permute.xlu1 %6224  ;;  %6439 = vmatpush1.bf16.msra.mxu1 %v6022_v13  ;;  %v6230_v9 = vsel %vm456_vm11, %v6226_v46, %v6227_v1 }
 0xf34   : > { %6440 = vmatprep.subr.bf16.mxu1 %v8190_v28  ;;  %v6229_v33 = vrot.slane %v6225_v10, 4  ;;  %v6223_v48 = vpop.permute.xlu0 %6222  ;;  %v6231_v14 = vsel %vm490_vm4, %v6219_v53, %v6230_v9 }
 0xf35   : > { %v6228_v16 = vrot.slane %v6223_v48, 4 }
 0xf37   : > { %v6287_v44 = vpop.permute.xlu1 %6286  ;;  %6441 = vmatpush1.bf16.msra.mxu1 %v8189_v36  ;;  %v6232_v11 = vsel %vm456_vm11, %v6228_v16, %v6229_v33 }
 0xf38   : > { %6442 = vmatprep.subr.bf16.mxu1 %v8192_v27  ;;  %v6233_v39 = vsel %vm490_vm4, %v6223_v48, %v6232_v11  ;;  %v6285_v22 = vpop.permute.xlu0 %6284  ;;  %v6293_v5 = vrot.slane %v6287_v44, 4 }
 0xf39   : > { %v8194_v3 = vcombine.high %v6231_v14, %v6233_v39  ;;  %v6292_v24 = vrot.slane %v6285_v22, 4  ;;  %v8193_v41 = vcombine.low %v6231_v14, %v6233_v39 }
 0xf3b   : > { %6443 = vmatpush1.bf16.msra.mxu1 %v8191_v45  ;;  %v6291_v2 = vpop.permute.xlu1 %6290  ;;  %v6296_v58 = vsel %vm456_vm11, %v6292_v24, %v6293_v5 }
 0xf3c   : > { %v6295_v60 = vrot.slane %v6291_v2, 4  ;;  %6444 = vmatprep.subr.bf16.mxu1 %v8194_v3  ;;  %v6289_v26 = vpop.permute.xlu0 %6288  ;;  %v6297_v40 = vsel %vm434_vm3, %v6285_v22, %v6296_v58 }
 0xf3d   : > { %v6294_v17 = vrot.slane %v6289_v26, 4 }
 0xf3f   : > { %6445 = vmatpush1.bf16.msra.mxu1 %v8193_v41  ;;  %v6298_v18 = vsel %vm456_vm11, %v6294_v17, %v6295_v60  ;;  %v10583_v50 = vpop.permute.xlu1 %6503 }
 0xf40   : > { %v6299_v31 = vsel %vm434_vm3, %v6289_v26, %v6298_v18  ;;  %v6511_v21 = vmul.bf16 %v10583_v50, %v10394_v37 }
 0xf41   : > { %v8195_v15 = vcombine.low %v6297_v40, %v6299_v31  ;;  %v8196_v20 = vcombine.high %v6297_v40, %v6299_v31 }
 0xf43   : > { %6446 = vmatprep.subr.bf16.mxu1 %v8196_v20  ;;  %v10587_v30 = vpop.permute.xlu1 %6592 }
 0xf44   : > { %6447 = vmatpush1.bf16.msra.mxu1 %v8195_v15  ;;  %v6600_v19 = vmul.bf16 %v10587_v30, %v10394_v37 }
 0xf45   : > { %7483 = vmatprep.subr.bf16.mxu1 %v10394_v37 }
 0xf47   : > { %6463 = vmatmul.mubr.bf16.vlgmr.msra.gmra.mrb[28].mxu1 %v8177_v25  ;;  %v10593_v63 = vpop.permute.xlu1 %6679 }
 0xf48   : > { %7484 = vmatpush1.bf16.msra.mxu1 %v10391_v8  ;;  %7515 = vmatprep.mubr.bf16.mxu1 %v8555_v4  ;;  %v6687_v62 = vmul.bf16 %v10593_v63, %v10394_v37 }
 0xf4b   : > { %v10612_v54 = vpop.permute.xlu1 %6768 }
 0xf4c   : > { %v6776_v9 = vmul.bf16 %v10612_v54, %v10394_v37 }
 0xf4d   : > { %v10589_v12 = vpop.permute.xlu0 %6328 }
 0xf4f   : > { %v10623_v43 = vpop.permute.xlu1 %6900 }
 0xf50   : > { %v6908_v5 = vmul.bf16 %v10623_v43, %v10391_v8 }
 0xf51   : > { %v10591_v51 = vpop.permute.xlu0 %6505 }
 0xf52   : > { %v10598_v47 = vsel %vm434_vm3, %v10583_v50, %v10591_v51  ;;  %v6513_v46 = vmul.bf16 %v10591_v51, %v10394_v37 }
 0xf53   : > { %v6512_v59 = vmul.bf16 %v10598_v47, %v10391_v8  ;;  %v10640_v10 = vpop.permute.xlu1 %6987 }
 0xf54   : > { %v10657_v27 = vmul.bf16 %v10640_v10, %v10391_v8  ;;  %v8201_v16 = vcombine.low %v6513_v46, %v6513_v46  ;;  %v8203_v39 = vcombine.high %v6513_v46, %v6513_v46 }
 0xf55   : > { %v8200_v4 = vcombine.low %v6511_v21, %v6512_v59  ;;  %v10604_v6 = vpop.permute.xlu0 %6594  ;;  %v8202_v35 = vcombine.high %v6511_v21, %v6512_v59 }
 0xf56   : > { %v10609_v56 = vsel %vm490_vm4, %v10587_v30, %v10604_v6  ;;  %v6602_v22 = vmul.bf16 %v10604_v6, %v10394_v37 }
 0xf57   : > { %6538 = vrot.lane.b32.xlu1 %v8200_v4, %s8564_s24  ;;  %v6601_v42 = vmul.bf16 %v10609_v56, %v10391_v8  ;;  %v10706_v21 = vpop.permute.xlu1 %7076 }
 0xf58   : > { %v8209_v24 = vcombine.low %v6602_v22, %v6602_v22  ;;  %v8211_v60 = vcombine.high %v6602_v22, %v6602_v22 }
 0xf59   : > { %v10616_v52 = vpop.permute.xlu0 %6681  ;;  %v8208_v29 = vcombine.low %v6600_v19, %v6601_v42  ;;  %v8210_v38 = vcombine.high %v6600_v19, %v6601_v42 }
 0xf5a   : > { %v10628_v34 = vsel %vm543_vm5, %v10593_v63, %v10616_v52  ;;  %v6689_v26 = vmul.bf16 %v10616_v52, %v10394_v37 }
 0xf5b   : > { %6542 = vrot.lane.b32.xlu1 %v8202_v35, %s8564_s24  ;;  %v6688_v13 = vmul.bf16 %v10628_v34, %v10391_v8  ;;  %v10710_v4 = vpop.permute.xlu1 %7163 }
 0xf5c   : > { %v8217_v17 = vcombine.low %v6689_v26, %v6689_v26  ;;  %v8219_v40 = vcombine.high %v6689_v26, %v6689_v26 }
 0xf5d   : > { %v10621_v0 = vpop.permute.xlu0 %6770  ;;  %v8216_v36 = vcombine.low %v6687_v62, %v6688_v13  ;;  %v8218_v33 = vcombine.high %v6687_v62, %v6688_v13 }
 0xf5e   : > { %v10647_v49 = vsel %vm598_vm6, %v10612_v54, %v10621_v0  ;;  %v6778_v31 = vmul.bf16 %v10621_v0, %v10394_v37 }
 0xf5f   : > { %6627 = vrot.lane.b32.xlu1 %v8208_v29, %s8562_s22  ;;  %v6777_v45 = vmul.bf16 %v10647_v49, %v10391_v8 }
 0xf60   : > { %v8225_v15 = vcombine.low %v6778_v31, %v6778_v31  ;;  %v8227_v20 = vcombine.high %v6778_v31, %v6778_v31 }
 0xf61   : > { %v10633_v28 = vpop.permute.xlu0 %6902  ;;  %v8224_v11 = vcombine.low %v6776_v9, %v6777_v45  ;;  %v8226_v2 = vcombine.high %v6776_v9, %v6777_v45 }
 0xf62   : > { %v6910_v7 = vmul.bf16 %v10633_v28, %v10391_v8  ;;  %v10677_v14 = vsel %vm621_vm7, %v10623_v43, %v10633_v28 }
 0xf63   : > { %6631 = vrot.lane.b32.xlu1 %v8210_v38, %s8562_s22  ;;  %v6909_v3 = vmul.bf16 %v10677_v14, %v10394_v37 }
 0xf64   : > { %v8238_v57 = vcombine.low %v6910_v7, %v6910_v7  ;;  %v8240_v44 = vcombine.high %v6910_v7, %v6910_v7 }
 0xf65   : > { %v10642_v61 = vpop.permute.xlu0 %6989  ;;  %v8237_v41 = vcombine.low %v6908_v5, %v6909_v3  ;;  %v8239_v58 = vcombine.high %v6908_v5, %v6909_v3 }
 0xf66   : > { %v10652_v53 = vsel %vm566_vm8, %v10640_v10, %v10642_v61  ;;  %6937 = vrot.lane.b32.xlu0 %v8238_v57, %s8560_s20 }
 0xf67   : > { %v10661_v1 = vmul.bf16 %v10652_v53, %v10394_v37  ;;  %6714 = vrot.lane.b32.xlu1 %v8216_v36, %s8561_s21 }
 0xf69   : > { %v8247_v48 = vcombine.high %v10657_v27, %v10661_v1  ;;  %v8245_v18 = vcombine.low %v10657_v27, %v10661_v1  ;;  %v10704_v25 = vpop.permute.xlu0 %7078 }
 0xf6a   : > { %6941 = vrot.lane.b32.xlu0 %v8240_v44, %s8560_s20 }
 0xf6b   : > { %6718 = vrot.lane.b32.xlu1 %v8218_v33, %s8561_s21 }
 0xf6d   : > { %v10708_v59 = vpop.permute.xlu0 %7165 }
 0xf6e   : > { %6540 = vrot.lane.b32.xlu0 %v8201_v16, %s8564_s24 }
 0xf6f   : > { %6803 = vrot.lane.b32.xlu1 %v8224_v11, %s8563_s23 }
 0xf72   : > { %6544 = vrot.lane.b32.xlu0 %v8203_v39, %s8564_s24 }
 0xf73   : > { %6807 = vrot.lane.b32.xlu1 %v8226_v2, %s8563_s23 }
 0xf76   : > { %6629 = vrot.lane.b32.xlu0 %v8209_v24, %s8562_s22 }
 0xf77   : > { %6935 = vrot.lane.b32.xlu1 %v8237_v41, %s8560_s20 }
 0xf7a   : > { %6633 = vrot.lane.b32.xlu0 %v8211_v60, %s8562_s22 }
 0xf7b   : > { %6939 = vrot.lane.b32.xlu1 %v8239_v58, %s8560_s20 }
 0xf7e   : > { %6716 = vrot.lane.b32.xlu0 %v8217_v17, %s8561_s21 }
 0xf7f   : > { %7022 = vrot.lane.b32.xlu1 %v8245_v18, %s8559_s17 }
 0xf82   : > { %6720 = vrot.lane.b32.xlu0 %v8219_v40, %s8561_s21 }
 0xf86   : > { %6805 = vrot.lane.b32.xlu0 %v8225_v15, %s8563_s23 }
 0xf8a   : > { %6809 = vrot.lane.b32.xlu0 %v8227_v20, %s8563_s23  ;;  %v6833_v20 = vld [vmem:[%s10975_s1] sm:$0x44] }
 0xfc9   : > { %v6539_v42 = vpop.permute.xlu1 %6538 }
 0xfca   : > { %v6550_v7 = vrot.slane %v6539_v42, 4 }
 0xfcd   : > { %v6543_v13 = vpop.permute.xlu1 %6542 }
 0xfce   : > { %v6552_v57 = vrot.slane %v6543_v13, 4 }
 0xfd1   : > { %v10718_v11 = vpop.permute.xlu1 %6627 }
 0xfd5   : > { %v10720_v39 = vpop.permute.xlu1 %6631 }
 0xfd8   : > { %v6938_v35 = vpop.permute.xlu0 %6937 }
 0xfd9   : > { %v10722_v22 = vpop.permute.xlu1 %6714 }
 0xfdc   : > { %v10712_v19 = vpop.permute.xlu0 %6941 }
 0xfdd   : > { %v10724_v2 = vpop.permute.xlu1 %6718 }
 0xfe0   : > { %v6541_v29 = vpop.permute.xlu0 %6540 }
 0xfe1   : > { %v6551_v38 = vrot.slane %v6541_v29, 4  ;;  %v10728_v26 = vpop.permute.xlu1 %6803  ;;  %v8231_v29 = vcombine.high %v6833_v20, %v6833_v20 }
 0xfe3   : > { %v6556_v36 = vsel %vm456_vm11, %v6550_v7, %v6551_v38 }
 0xfe4   : > { %v6545_v62 = vpop.permute.xlu0 %6544  ;;  %v6557_v33 = vsel %vm458_vm10, %v6539_v42, %v6556_v36  ;;  %v8230_v42 = vcombine.low %v6833_v20, %v6833_v20 }
 0xfe5   : > { %v6553_v46 = vrot.slane %v6545_v62, 4  ;;  %v10730_v15 = vpop.permute.xlu1 %6807 }
 0xfe7   : > { %v6558_v44 = vsel %vm456_vm11, %v6552_v57, %v6553_v46 }
 0xfe8   : > { %v6559_v45 = vsel %vm458_vm10, %v6543_v13, %v6558_v44  ;;  %v6840_v44 = vpack.i.b16 %v8230_v42, %v8230_v42 }
 0xfe9   : > { %v8271_v9 = vcombine.low %v6557_v33, %v6559_v45  ;;  %v8272_v16 = vcombine.high %v6557_v33, %v6559_v45  ;;  %v6847_v33 = vpack.i.b16 %v8231_v29, %v8231_v29  ;;  %v7080_v29 = vsel %vm513_vm9, %v10706_v21, %v10704_v25 }
 0xfeb   : > { %7414 = vmatprep.subr.bf16.mxu0 %v8272_v16 }
 0xfec   : > { %7415 = vmatpush1.bf16.msra.mxu0 %v8271_v9 }
0x101a   : > { %v6464_v3 = vpop.f32.mrb[28].mxu1 }
0x101b   : > { %v6465_v5 = vadd.f32 %v6464_v3, %v10589_v12  ;;  %v6466_v24 = vpop.f32.mrb[29].mxu1 }
0x101c   : > { %v6467_v41 = vadd.f32 %v6466_v24, %v10589_v12  ;;  %v6468_v60 = vpop.f32.mrb[30].mxu1  ;;  %v6936_v12 = vpop.permute.xlu1 %6935  ;;  %v10757_v24 = vrot.slane %v6847_v33, %v8702_v32 }
0x101d   : > { %v6471_v58 = vmax.f32 %v6465_v5, 0.0  ;;  %v6469_v17 = vpop.f32.mrb[31].mxu1  ;;  %v6947_v45 = vrot.slane %v6936_v12, 4 }
0x101e   : > { %v6472_v18 = vmax.f32 %v6467_v41, 0.0 }
0x101f   : > { %v6473_v40 = vpack.c.bf16 %v6471_v58, %v6471_v58 }
0x1020   : > { %v6474_v31 = vpack.c.bf16 %v6472_v18, %v6472_v18 }
0x1021   : > { %6475 = vst [vmem:[#allocation3 + $0x10] sm:$0xf] %v6473_v40 }
0x1022   : > { %6476 = vst [vmem:[#allocation3 + $0x18] sm:$0xf] %v6474_v31 }
0x1028   : > { %v10735_v38 = vld [vmem:[#allocation3 + $0x10] sm:$0xf] }
0x1029   : > { %v10737_v13 = vld [vmem:[#allocation3 + $0x18] sm:$0xf]  ;;  %v6913_v7 = vmul.bf16 %v10633_v28, %v10735_v38  ;;  %v6515_v62 = vmul.bf16 %v10598_v47, %v10735_v38  ;;  %v6604_v28 = vmul.bf16 %v10609_v56, %v10735_v38  ;;  %v6948_v47 = vrot.slane %v6938_v35, 4 }
0x102a   : > { %v6514_v57 = vmul.bf16 %v10583_v50, %v10737_v13  ;;  %v6516_v46 = vmul.bf16 %v10591_v51, %v10737_v13  ;;  %v6603_v16 = vmul.bf16 %v10587_v30, %v10737_v13  ;;  %v6605_v3 = vmul.bf16 %v10604_v6, %v10737_v13 }
0x102b   : > { %v8242_v36 = vcombine.low %v6913_v7, %v6913_v7  ;;  %v6953_v51 = vsel %vm456_vm11, %v6947_v45, %v6948_v47  ;;  %v10760_v30 = vrot.slane %v6840_v44, %v8702_v32  ;;  %v6856_v6 = vmul.bf16 %v10757_v24, %v10737_v13  ;;  %v10826_v44 = vld [vmem:[#allocation3 + $0x8] sm:$0xff] }
0x102c   : > { %v8204_v9 = vcombine.low %v6514_v57, %v6515_v62  ;;  %v8205_v50 = vcombine.low %v6516_v46, %v6516_v46  ;;  %v8212_v5 = vcombine.low %v6603_v16, %v6604_v28  ;;  %v6997_v35 = vmul.bf16 %v10642_v61, %v10391_v8 }
0x102d   : > { %6945 = vrot.lane.b32.xlu0 %v8242_v36, %s8560_s20  ;;  %v10766_v56 = vmul.bf16 %v10760_v30, %v10735_v38  ;;  %v10773_v41 = vsel %vm598_vm6, %v6936_v12, %v6953_v51  ;;  %v8213_v60 = vcombine.low %v6605_v3, %v6605_v3  ;;  %v6690_v32 = vmul.bf16 %v10593_v63, %v10737_v13  ;;  %v10822_v36 = vld [vmem:[#allocation3] sm:$0xff] }
0x102e   : > { %6546 = vrot.lane.b32.xlu1 %v8204_v9, %s8564_s24  ;;  %v6691_v58 = vmul.bf16 %v10628_v34, %v10735_v38  ;;  %v8246_v63 = vcombine.low %v6997_v35, %v6997_v35  ;;  %v6692_v34 = vmul.bf16 %v10616_v52, %v10737_v13  ;;  %v6779_v20 = vmul.bf16 %v10612_v54, %v10737_v13 }
0x102f   : > { %v10780_v17 = vcombine.low %v10766_v56, %v6856_v6  ;;  %v8312_v18 = vcombine.low %v10766_v56, %v10773_v41  ;;  %v6780_v42 = vmul.bf16 %v10647_v49, %v10735_v38  ;;  %v6781_v1 = vmul.bf16 %v10621_v0, %v10737_v13 }
0x1030   : > { %v8220_v31 = vcombine.low %v6690_v32, %v6691_v58  ;;  %v8221_v27 = vcombine.low %v6692_v34, %v6692_v34  ;;  %v7085_v52 = vmul.bf16 %v7080_v29, %v10394_v37  ;;  %v7084_v54 = vmul.bf16 %v10706_v21, %v10391_v8 }
0x1031   : > { %6548 = vrot.lane.b32.xlu0 %v8205_v50, %s8564_s24  ;;  %v8286_v40 = vcombine.high %v10780_v17, %v10773_v41  ;;  %v8229_v49 = vcombine.low %v6781_v1, %v6781_v1  ;;  %v8248_v7 = vcombine.high %v6997_v35, %v6997_v35  ;;  %v7000_v0 = vmul.bf16 %v10642_v61, %v10735_v38  ;;  %v10874_v1 = vpop.permute.xlu1 %6939 }
0x1032   : > { %6635 = vrot.lane.b32.xlu1 %v8212_v5, %s8562_s22  ;;  %v8253_v12 = vcombine.low %v7084_v54, %v7085_v52  ;;  %v8255_v62 = vcombine.high %v7084_v54, %v7085_v52  ;;  %v6911_v37 = vmul.bf16 %v10623_v43, %v10735_v38  ;;  %v6912_v57 = vmul.bf16 %v10677_v14, %v10737_v13 }
0x1033   : > { %v7167_v8 = vsel %vm458_vm10, %v10710_v4, %v10708_v59  ;;  %v7086_v61 = vmul.bf16 %v10822_v36, %v10704_v25  ;;  %v8250_v46 = vcombine.low %v7000_v0, %v7000_v0  ;;  %v7171_v14 = vmul.bf16 %v10822_v36, %v10710_v4 }
0x1034   : > { %v7172_v43 = vmul.bf16 %v10826_v44, %v7167_v8  ;;  %v8241_v33 = vcombine.low %v6911_v37, %v6912_v57  ;;  %v6998_v16 = vmul.bf16 %v10640_v10, %v10735_v38  ;;  %v6999_v28 = vmul.bf16 %v10652_v53, %v10737_v13 }
0x1035   : > { %6637 = vrot.lane.b32.xlu0 %v8213_v60, %s8562_s22  ;;  %v8254_v45 = vcombine.low %v7086_v61, %v7086_v61  ;;  %v8256_v47 = vcombine.high %v7086_v61, %v7086_v61  ;;  %v7089_v50 = vmul.bf16 %v10704_v25, %v10735_v38  ;;  %v7087_v51 = vmul.bf16 %v10706_v21, %v10735_v38 }
0x1036   : > { %7026 = vrot.lane.b32.xlu1 %v8247_v48, %s8559_s17  ;;  %v8228_v48 = vcombine.low %v6779_v20, %v6780_v42  ;;  %v8261_v9 = vcombine.low %v7171_v14, %v7172_v43  ;;  %v8249_v3 = vcombine.low %v6998_v16, %v6999_v28  ;;  %v7088_v5 = vmul.bf16 %v7080_v29, %v10737_v13 }
0x1037   : > { %v7173_v10 = vmul.bf16 %v10822_v36, %v10708_v59  ;;  %v8258_v53 = vcombine.low %v7089_v50, %v7089_v50  ;;  %v8263_v35 = vcombine.high %v7171_v14, %v7172_v43  ;;  %v7174_v21 = vmul.bf16 %v10710_v4, %v10735_v38 }
0x1038   : > { %v8257_v6 = vcombine.low %v7087_v51, %v7088_v5  ;;  %v7175_v60 = vmul.bf16 %v7167_v8, %v10737_v13  ;;  %v7176_v58 = vmul.bf16 %v10708_v59, %v10735_v38  ;;  %v8268_v59 = vld [vmem:[%s10977_s3 + $0x58] sm:$0xff]  ;;  %v8302_v38 = vld [vmem:[%s10977_s3 + $0x60] sm:$0xff]  ;;  %v6630_v13 = vpop.permute.xlu0 %6629  ;;  %v6641_v43 = vrot.slane %v10720_v39, 4 }
0x1039   : > { %7024 = vrot.lane.b32.xlu0 %v8246_v63, %s8559_s17  ;;  %v8262_v25 = vcombine.low %v7173_v10, %v7173_v10  ;;  %v8264_v32 = vcombine.high %v7173_v10, %v7173_v10  ;;  %v10860_v63 = vld [vmem:[%s10976_s2 + $0x58] sm:$0xff]  ;;  %v6726_v14 = vrot.slane %v10722_v22, 4 }
0x103a   : > { %6722 = vrot.lane.b32.xlu1 %v8220_v31, %s8561_s21  ;;  %v8265_v34 = vcombine.low %v7174_v21, %v7175_v60  ;;  %v8270_v31 = vcombine.high %v10860_v63, %v10860_v63  ;;  %v8266_v4 = vcombine.low %v7176_v58, %v7176_v58 }
0x103c   : > { %8300 = vmatprep.mubr.msk.bf16.mxu0 %vm2663_vm13, %v8270_v31  ;;  %v6634_v20 = vpop.permute.xlu0 %6633 }
0x103d   : > { %6724 = vrot.lane.b32.xlu0 %v8221_v27, %s8561_s21  ;;  %v6642_v0 = vrot.slane %v6634_v20, 4 }
0x103e   : > { %6811 = vrot.lane.b32.xlu1 %v8228_v48, %s8563_s23  ;;  %v10876_v48 = vpop.permute.xlu1 %7022 }
0x103f   : > { %v6647_v16 = vsel %vm456_vm11, %v6641_v43, %v6642_v0 }
0x1040   : > { %v6717_v42 = vpop.permute.xlu0 %6716  ;;  %v6648_v60 = vsel %vm513_vm9, %v10720_v39, %v6647_v16 }
0x1041   : > { %6813 = vrot.lane.b32.xlu0 %v8229_v49, %s8563_s23  ;;  %v6640_v49 = vrot.slane %v6630_v13, 4 }
0x1042   : > { %7111 = vrot.lane.b32.xlu1 %v8253_v12, %s8557_s30 }
0x1044   : > { %v6721_v29 = vpop.permute.xlu0 %6720 }
0x1045   : > { %7028 = vrot.lane.b32.xlu0 %v8248_v7, %s8559_s17  ;;  %v6639_v7 = vrot.slane %v10718_v11, 4 }
0x1046   : > { %7115 = vrot.lane.b32.xlu1 %v8255_v62, %s8557_s30  ;;  %v6729_v62 = vrot.slane %v6721_v29, 4 }
0x1047   : > { %v6645_v57 = vsel %vm456_vm11, %v6639_v7, %v6640_v49 }
0x1048   : > { %v6806_v27 = vpop.permute.xlu0 %6805 }
0x1049   : > { %7032 = vrot.lane.b32.xlu0 %v8250_v46, %s8559_s17  ;;  %v6816_v58 = vrot.slane %v6806_v27, 4 }
0x104a   : > { %6943 = vrot.lane.b32.xlu1 %v8241_v33, %s8560_s20  ;;  %v6728_v33 = vrot.slane %v10724_v2, 4 }
0x104c   : > { %v6810_v52 = vpop.permute.xlu0 %6809  ;;  %v6734_v28 = vsel %vm456_vm11, %v6728_v33, %v6729_v62 }
0x104d   : > { %7113 = vrot.lane.b32.xlu0 %v8254_v45, %s8557_s30  ;;  %v6727_v45 = vrot.slane %v6717_v42, 4  ;;  %v6818_v20 = vrot.slane %v6810_v52, 4 }
0x104e   : > { %7198 = vrot.lane.b32.xlu1 %v8261_v9, %s8556_s29 }
0x1051   : > { %7117 = vrot.lane.b32.xlu0 %v8256_v47, %s8557_s30 }
0x1052   : > { %7030 = vrot.lane.b32.xlu1 %v8249_v3, %s8559_s17  ;;  %v6646_v3 = vsel %vm513_vm9, %v10718_v11, %v6645_v57  ;;  %v6735_v11 = vsel %vm566_vm8, %v10724_v2, %v6734_v28  ;;  %v6817_v2 = vrot.slane %v10730_v15, 4 }
0x1055   : > { %7121 = vrot.lane.b32.xlu0 %v8258_v53, %s8557_s30 }
0x1056   : > { %7119 = vrot.lane.b32.xlu1 %v8257_v6, %s8557_s30 }
0x1059   : > { %7200 = vrot.lane.b32.xlu0 %v8262_v25, %s8556_s29  ;;  %v6732_v25 = vsel %vm456_vm11, %v6726_v14, %v6727_v45 }
0x105a   : > { %7202 = vrot.lane.b32.xlu1 %v8263_v35, %s8556_s29 }
0x105d   : > { %7204 = vrot.lane.b32.xlu0 %v8264_v32, %s8556_s29 }
0x105e   : > { %7206 = vrot.lane.b32.xlu1 %v8265_v34, %s8556_s29 }
0x1061   : > { %7208 = vrot.lane.b32.xlu0 %v8266_v4, %s8556_s29 }
0x1062   : > { %7261 = vperm.xlu1 %8333, %v8268_v59   ;;  %v6733_v59 = vsel %vm566_vm8, %v10722_v22, %v6732_v25  ;;  %v6823_v22 = vsel %vm456_vm11, %v6817_v2, %v6818_v20 }
0x1063   : > { %v8278_v13 = vcombine.high %v6733_v59, %v6735_v11  ;;  %v8277_v27 = vcombine.low %v6733_v59, %v6735_v11  ;;  %v6824_v14 = vsel %vm621_vm7, %v10730_v15, %v6823_v22  ;;  %v6853_v15 = vmul.bf16 %v10822_v36, %v10760_v30 }
0x1065   : > { %7477 = vperm.xlu0 %8332, %v8302_v38   ;;  %v6815_v38 = vrot.slane %v10728_v26, 4 }
0x1067   : > { %v6821_v39 = vsel %vm456_vm11, %v6815_v38, %v6816_v58 }
0x1068   : > { %v6822_v52 = vsel %vm621_vm7, %v10728_v26, %v6821_v39  ;;  %v6949_v26 = vrot.slane %v10874_v1, 4 }
0x109f   : > { %v10878_v54 = vpop.permute.xlu0 %6945 }
0x10a0   : > { %v6547_v12 = vpop.permute.xlu1 %6546 }
0x10a1   : > { %v6554_v8 = vrot.slane %v6547_v12, 4 }
0x10a3   : > { %v6549_v37 = vpop.permute.xlu0 %6548 }
0x10a4   : > { %v6555_v61 = vrot.slane %v6549_v37, 4  ;;  %v6636_v46 = vpop.permute.xlu1 %6635 }
0x10a5   : > { %v6643_v51 = vrot.slane %v6636_v46, 4 }
0x10a6   : > { %v6560_v9 = vsel %vm456_vm11, %v6554_v8, %v6555_v61 }
0x10a7   : > { %v6638_v47 = vpop.permute.xlu0 %6637  ;;  %v6561_v50 = vsel %vm458_vm10, %v6547_v12, %v6560_v9 }
0x10a8   : > { %v6644_v5 = vrot.slane %v6638_v47, 4  ;;  %v10891_v10 = vpop.permute.xlu1 %7026  ;;  %v8273_v53 = vcombine.low %v6561_v50, %v6646_v3  ;;  %v8274_v6 = vcombine.high %v6561_v50, %v6646_v3  ;;  %v6854_v47 = vmul.bf16 %v10826_v44, %v10757_v24 }
0x10a9   : > { %v6950_v50 = vrot.slane %v10712_v19, 4  ;;  %v7034_v24 = vrot.slane %v10876_v48, 4 }
0x10aa   : > { %v6649_v35 = vsel %vm456_vm11, %v6643_v51, %v6644_v5  ;;  %7416 = vmatprep.subr.bf16.mxu0 %v8274_v6  ;;  %v6952_v6 = vrot.slane %v10878_v54, 4 }
0x10ab   : > { %7417 = vmatpush1.bf16.msra.mxu0 %v8273_v53  ;;  %v10895_v21 = vpop.permute.xlu0 %7024  ;;  %v6650_v32 = vsel %vm513_vm9, %v6636_v46, %v6649_v35  ;;  %v6955_v53 = vsel %vm456_vm11, %v6949_v26, %v6950_v50 }
0x10ac   : > { %v6723_v34 = vpop.permute.xlu1 %6722  ;;  %v8275_v31 = vcombine.low %v6648_v60, %v6650_v32  ;;  %v8276_v4 = vcombine.high %v6648_v60, %v6650_v32  ;;  %v7035_v25 = vrot.slane %v10895_v21, 4  ;;  %v7036_v60 = vrot.slane %v10891_v10, 4 }
0x10ad   : > { %v6730_v29 = vrot.slane %v6723_v34, 4  ;;  %v6956_v32 = vsel %vm598_vm6, %v10874_v1, %v6955_v53 }
0x10ae   : > { %7418 = vmatprep.subr.bf16.mxu0 %v8276_v4  ;;  %v7040_v54 = vsel %vm456_vm11, %v7034_v24, %v7035_v25 }
0x10af   : > { %7419 = vmatpush1.bf16.msra.mxu0 %v8275_v31  ;;  %v6725_v42 = vpop.permute.xlu0 %6724  ;;  %v7041_v17 = vsel %vm543_vm5, %v10876_v48, %v7040_v54 }
0x10b0   : > { %v6731_v49 = vrot.slane %v6725_v42, 4  ;;  %v6812_v12 = vpop.permute.xlu1 %6811  ;;  %7420 = vmatprep.subr.bf16.mxu0 %v8278_v13 }
0x10b1   : > { %v6819_v37 = vrot.slane %v6812_v12, 4 }
0x10b2   : > { %v6736_v7 = vsel %vm456_vm11, %v6730_v29, %v6731_v49 }
0x10b3   : > { %7421 = vmatpush1.bf16.msra.mxu0 %v8277_v27  ;;  %v6814_v0 = vpop.permute.xlu0 %6813  ;;  %v6737_v62 = vsel %vm566_vm8, %v6723_v34, %v6736_v7 }
0x10b4   : > { %v6820_v57 = vrot.slane %v6814_v0, 4  ;;  %v7112_v8 = vpop.permute.xlu1 %7111  ;;  %v8279_v61 = vcombine.low %v6737_v62, %v6822_v52  ;;  %v8280_v46 = vcombine.high %v6737_v62, %v6822_v52 }
0x10b5   : > { %v7123_v34 = vrot.slane %v7112_v8, 4 }
0x10b6   : > { %v6825_v43 = vsel %vm456_vm11, %v6819_v37, %v6820_v57  ;;  %7422 = vmatprep.subr.bf16.mxu0 %v8280_v46 }
0x10b7   : > { %7423 = vmatpush1.bf16.msra.mxu0 %v8279_v61  ;;  %v7029_v33 = vpop.permute.xlu0 %7028  ;;  %v6826_v45 = vsel %vm621_vm7, %v6812_v12, %v6825_v43 }
0x10b8   : > { %v7116_v9 = vpop.permute.xlu1 %7115  ;;  %v8281_v16 = vcombine.low %v6824_v14, %v6826_v45  ;;  %v8282_v28 = vcombine.high %v6824_v14, %v6826_v45  ;;  %v7037_v51 = vrot.slane %v7029_v33, 4 }
0x10b9   : > { %v7125_v39 = vrot.slane %v7116_v9, 4 }
0x10ba   : > { %7424 = vmatprep.subr.bf16.mxu0 %v8282_v28  ;;  %v7042_v30 = vsel %vm456_vm11, %v7036_v60, %v7037_v51  ;;  %v8269_v60 = vcombine.low %v10860_v63, %v10860_v63 }
0x10bb   : > { %7425 = vmatpush1.bf16.msra.mxu0 %v8281_v16  ;;  %v7033_v3 = vpop.permute.xlu0 %7032  ;;  %v7043_v1 = vsel %vm543_vm5, %v10891_v10, %v7042_v30 }
0x10bc   : > { %v6944_v5 = vpop.permute.xlu1 %6943  ;;  %7426 = vmatprep.subr.bf16.mxu0 %v6854_v47  ;;  %v7039_v4 = vrot.slane %v7033_v3, 4  ;;  %v8290_v42 = vcombine.high %v7041_v17, %v7043_v1  ;;  %v8289_v27 = vcombine.low %v7041_v17, %v7043_v1 }
0x10bd   : > { %v6951_v35 = vrot.slane %v6944_v5, 4 }
0x10bf   : > { %v6957_v19 = vsel %vm456_vm11, %v6951_v35, %v6952_v6  ;;  %7427 = vmatpush1.bf16.msra.mxu0 %v6853_v15  ;;  %v7114_v44 = vpop.permute.xlu0 %7113 }
0x10c0   : > { %v6958_v36 = vsel %vm598_vm6, %v6944_v5, %v6957_v19  ;;  %v7199_v11 = vpop.permute.xlu1 %7198  ;;  %7428 = vmatprep.subr.bf16.mxu0 %v8286_v40  ;;  %v7124_v58 = vrot.slane %v7114_v44, 4 }
0x10c1   : > { %v8288_v21 = vcombine.high %v6956_v32, %v6958_v36  ;;  %v8287_v40 = vcombine.low %v6956_v32, %v6958_v36  ;;  %v7210_v61 = vrot.slane %v7199_v11, 4 }
0x10c2   : > { %v7129_v38 = vsel %vm456_vm11, %v7123_v34, %v7124_v58 }
0x10c3   : > { %7429 = vmatpush1.bf16.msra.mxu0 %v8312_v18  ;;  %v7118_v31 = vpop.permute.xlu0 %7117  ;;  %v7130_v10 = vsel %vm490_vm4, %v7112_v8, %v7129_v38 }
0x10c4   : > { %v7031_v59 = vpop.permute.xlu1 %7030  ;;  %7430 = vmatprep.subr.bf16.mxu0 %v8288_v21  ;;  %v7126_v13 = vrot.slane %v7118_v31, 4 }
0x10c5   : > { %v7038_v20 = vrot.slane %v7031_v59, 4 }
0x10c6   : > { %v7131_v48 = vsel %vm456_vm11, %v7125_v39, %v7126_v13 }
0x10c7   : > { %v7044_v56 = vsel %vm456_vm11, %v7038_v20, %v7039_v4  ;;  %7431 = vmatpush1.bf16.msra.mxu0 %v8287_v40  ;;  %v7122_v41 = vpop.permute.xlu0 %7121  ;;  %v7132_v0 = vsel %vm490_vm4, %v7116_v9, %v7131_v48 }
0x10c8   : > { %v7045_v18 = vsel %vm543_vm5, %v7031_v59, %v7044_v56  ;;  %v7128_v29 = vrot.slane %v7122_v41, 4  ;;  %v7120_v49 = vpop.permute.xlu1 %7119  ;;  %7432 = vmatprep.subr.bf16.mxu0 %v8290_v42  ;;  %v8301_v59 = vld [vmem:[%s10976_s2 + $0x60] sm:$0xf] }
0x10c9   : > { %v8292_v12 = vcombine.high %v7045_v18, %v7130_v10  ;;  %v7127_v2 = vrot.slane %v7120_v49, 4  ;;  %v8291_v57 = vcombine.low %v7045_v18, %v7130_v10 }
0x10cb   : > { %v7133_v7 = vsel %vm456_vm11, %v7127_v2, %v7128_v29  ;;  %7433 = vmatpush1.bf16.msra.mxu0 %v8289_v27  ;;  %v7201_v22 = vpop.permute.xlu0 %7200 }
0x10cc   : > { %v7134_v62 = vsel %vm490_vm4, %v7120_v49, %v7133_v7  ;;  %v7211_v52 = vrot.slane %v7201_v22, 4  ;;  %v7203_v37 = vpop.permute.xlu1 %7202  ;;  %7434 = vmatprep.subr.bf16.mxu0 %v8292_v12 }
0x10cd   : > { %v8294_v8 = vcombine.high %v7132_v0, %v7134_v62  ;;  %v7212_v33 = vrot.slane %v7203_v37, 4  ;;  %v8293_v45 = vcombine.low %v7132_v0, %v7134_v62 }
0x10ce   : > { %v7216_v43 = vsel %vm456_vm11, %v7210_v61, %v7211_v52 }
0x10cf   : > { %7435 = vmatpush1.bf16.msra.mxu0 %v8291_v57  ;;  %v7205_v46 = vpop.permute.xlu0 %7204  ;;  %v7217_v26 = vsel %vm434_vm3, %v7199_v11, %v7216_v43 }
0x10d0   : > { %v7213_v14 = vrot.slane %v7205_v46, 4  ;;  %7436 = vmatprep.subr.bf16.mxu0 %v8294_v8  ;;  %v7207_v16 = vpop.permute.xlu1 %7206 }
0x10d1   : > { %v7214_v50 = vrot.slane %v7207_v16, 4 }
0x10d2   : > { %v7218_v28 = vsel %vm456_vm11, %v7212_v33, %v7213_v14 }
0x10d3   : > { %7437 = vmatpush1.bf16.msra.mxu0 %v8293_v45  ;;  %v7209_v9 = vpop.permute.xlu0 %7208  ;;  %v7219_v47 = vsel %vm434_vm3, %v7203_v37, %v7218_v28 }
0x10d4   : > { %v7215_v3 = vrot.slane %v7209_v9, 4  ;;  %v8295_v51 = vcombine.low %v7217_v26, %v7219_v47  ;;  %v8296_v5 = vcombine.high %v7217_v26, %v7219_v47 }
0x10d6   : > { %v7220_v15 = vsel %vm456_vm11, %v7214_v50, %v7215_v3  ;;  %7438 = vmatprep.subr.bf16.mxu0 %v8296_v5 }
0x10d7   : > { %v7221_v53 = vsel %vm434_vm3, %v7207_v16, %v7220_v15  ;;  %7439 = vmatpush1.bf16.msra.mxu0 %v8295_v51 }
0x10d8   : > { %v8298_v6 = vcombine.high %v7221_v53, %v7221_v53  ;;  %v8297_v25 = vcombine.low %v7221_v53, %v7221_v53 }
0x10da   : > { %8299 = vmatprep.subr.msk.bf16.mxu0 %vm456_vm11, %v8298_v6  ;;  %v7409_v35 = vsel %vm456_vm11, %v8297_v25, 0 }
0x10db   : > { %7441 = vmatpush1.bf16.msra.mxu0 %v7409_v35 }
0x10de   : > { %7447 = vmatmul.mubr.bf16.vlgmr.msra.gmra.mrb[12].mxu0 %v8269_v60 }
0x10e1   : > { %v7262_v24 = vpop.permute.xlu1 %7261 }
0x10e4   : > { %v7478_v17 = vpop.permute.xlu0 %7477 }
0x11b1   : > { %v7448_v19 = vpop.f32.mrb[12].mxu0 }
0x11b2   : > { %v7449_v44 = vadd.f32 %v7448_v19, %v7262_v24  ;;  %v7450_v32 = vpop.f32.mrb[13].mxu0 }
0x11b3   : > { %v7451_v30 = vadd.f32 %v7450_v32, %v7262_v24  ;;  %v7452_v36 = vpop.f32.mrb[14].mxu0 }
0x11b4   : > { %v7455_v11 = vmax.f32 %v7449_v44, 0.0  ;;  %v7453_v54 = vpop.f32.mrb[15].mxu0 }
0x11b5   : > { %v7456_v21 = vmax.f32 %v7451_v30, 0.0 }
0x11b6   : > { %v7457_v58 = vpack.c.bf16 %v7455_v11, %v7455_v11 }
0x11b7   : > { %v7458_v34 = vpack.c.bf16 %v7456_v21, %v7456_v21 }
0x11b8   : > { %v7461_v31 = vrot.slane %v7457_v58, 4 }
0x11b9   : > { %v7462_v1 = vrot.slane %v7458_v34, 4 }
0x11ba   : > { %7465 = vst [vmem:[#allocation3 + $0x10] sm:$0xf0] %v7461_v31 }
0x11bb   : > { %7466 = vst [vmem:[#allocation3 + $0x18] sm:$0xf0] %v7462_v1 }
0x11c1   : > { %v7469_v63 = vld [vmem:[#allocation3 + $0x10] sm:$0xff] }
0x11c2   : > { %v7470_v4 = vld [vmem:[#allocation3 + $0x18] sm:$0xff] }
0x11c3   : > { %7485 = vmatprep.subr.bf16.mxu1 %v7470_v4 }
0x11c4   : > { %7486 = vmatpush1.bf16.msra.mxu1 %v7469_v63 }
0x11c7   : > { %8303 = vmatmul.mubr.msk.bf16.vlgmr.msra.gmra.mrb[32].mxu1 %vm2739_vm14, %v8301_v59 }
0x129a   : > { %v7517_v40 = vpop.f32.mrb[32].mxu1 }
0x129b   : > { %v7518_v38 = vadd.f32 %v7517_v40, %v7478_v17  ;;  %v7519_v13 = vpop.f32.mrb[33].mxu1 }
0x129c   : > { %v7520_v20 = vadd.f32 %v7519_v13, %v7478_v17  ;;  %v7521_v42 = vpop.f32.mrb[34].mxu1 }
0x129d   : > { %v7524_v39 = vadd.f32 %v7518_v38, %v10235_v55  ;;  %v7522_v56 = vpop.f32.mrb[35].mxu1 }
0x129e   : > { %v7525_v41 = vadd.f32 %v7520_v20, %v10238_v23 }
0x129f   : > { %7526 = vst [vmem:[%s197_s14] sm:$0xff] %v7524_v39 }
0x12a0   : > { %7527 = vst [vmem:[%s197_s14 + $0x8] sm:$0xff] %v7525_v41 }
0x12a1 PF: > { %s14_s15 = sadd.s32 1, %s8553_s15  }
0x12a2   : > { %p11_p4 = scmp.ge.s32.totalorder %s14_s15, 4  }
0x12a4   :  { %13 = sbr.rel (!%p11_p4) target bundleno = 1 (0x1), region = 90 }

</bundles_post_ra>
